<compile_context>
chip_gen: v6e
topology: v6e:2x2x1
jax: 0.10.0
libtpu: 0.0.40
codegen_flags: <defaults>
</compile_context>

<pallas_src>
import functools

import jax
import jax.numpy as jnp
from jax import lax
from jax.experimental import pallas as pl
from jax.experimental.pallas import tpu as pltpu


def _round_up(x, m):
    return (x + m - 1) // m * m


# ----------------------------- Pallas kernel --------------------------------

def _embed_kernel(idx_ref, off_ref, tbl_ref, out_ref, *, use_gather):
    """Embedding lookup for one batch tile.

    idx_ref: (TB, F)    int32 field-local ids            (pipelined VMEM block)
    off_ref: (1, F)     int32 per-field row offsets      (whole-array VMEM, 1 copy)
    tbl_ref: (V, D)     f32   concatenated table         (whole-array VMEM, 1 copy)
    out_ref: (TB, F*D)  f32   lane-dense output block
    """
    v, _ = tbl_ref.shape
    tb, f = idx_ref.shape

    idx = idx_ref[...] + off_ref[...]          # field-local -> global row ids
    # OOB ids clamp into range (torch.nn.Embedding would raise instead).
    idx = jnp.clip(idx, 0, v - 1)
    tbl = tbl_ref[...]                         # (V, D)

    if use_gather:
        # Direct row gather: O(TB*D) memory work, no V-proportional FLOPs and no
        # (TB, V) one-hot blow-up.
        cols = [jnp.take(tbl, idx[:, j], axis=0, mode="promise_in_bounds")
                for j in range(f)]             # each (TB, D)
    else:
        # Small-vocab fallback: one-hot @ table on the MXU as flat 2-D dots with
        # M = TB (>= 256) instead of tiny batched einsums.  (bf16 one-hot would
        # halve vreg pressure on v6e/v7x; kept f32 here for exactness.)
        iota_v = lax.broadcasted_iota(jnp.int32, (tb, v), 1)   # hoisted: no CSE in JAX
        cols = [jnp.dot((iota_v == idx[:, j][:, None]).astype(tbl.dtype), tbl,
                        preferred_element_type=jnp.float32)
                for j in range(f)]             # each (TB, D)

    # Concatenate along lanes -> one full-width (TB, F*D) store (unmasked vst
    # when F*D is a multiple of 128).
    out_ref[...] = jnp.concatenate(cols, axis=-1).astype(out_ref.dtype)


# ------------------------------- wrapper -------------------------------------

_VMEM_HEADROOM = 2 << 20      # allowance for compiler-internal scratch


def _vmem_budget_bytes():
    """Conservative per-core VMEM budget (v7x: 64 MiB physical; v5e/v6e: 128 MiB)."""
    try:
        cap = pltpu.get_tpu_info().vmem_capacity_bytes
    except Exception:
        cap = 64 << 20
    return int(cap * 3 // 4)


@functools.partial(jax.jit, static_argnames=("batch_tile", "impl"))
def embedding_forward(sparse_input, table, field_offsets, *, batch_tile=256,
                      impl="gather"):
    """BaseCTR.forward_embed: [B, F] int32 field-local ids -> [B, F, D] float32."""
    B, F = sparse_input.shape
    V, D = table.shape

    # Pad vocab axis to a sublane multiple and batch to a tile multiple.
    V_pad = _round_up(V, 8)
    if V_pad != V:
        table = jnp.pad(table, ((0, V_pad - V), (0, 0)))
    batch_tile = min(batch_tile, _round_up(B, 8))
    B_pad = _round_up(B, batch_tile)
    ids = sparse_input.astype(jnp.int32)
    if B_pad != B:
        ids = jnp.pad(ids, ((0, B_pad - B), (0, 0)))
    offsets = field_offsets.astype(jnp.int32).reshape(1, F)

    # Explicit VMEM budget: single-buffered table + double-buffered id/out tiles.
    table_bytes = V_pad * D * table.dtype.itemsize
    tile_bytes = 2 * (batch_tile * F * 4 + batch_tile * F * D * 4)
    budget = _vmem_budget_bytes()
    need = table_bytes + tile_bytes + _VMEM_HEADROOM
    if need > budget:
        # TODO(synk): for production-scale vocabularies switch to an HBM-resident
        # table (memory_space=pl.ANY) + manually double-buffered DMA row gather.
        raise ValueError(f"embedding table does not fit the VMEM budget "
                         f"({need} > {budget} bytes)")
    vmem_limit = int(min(max(2 * need, 16 << 20), budget))

    grid = (B_pad // batch_tile,)
    out2d = pl.pallas_call(
        functools.partial(_embed_kernel, use_gather=(impl == "gather")),
        out_shape=jax.ShapeDtypeStruct((B_pad, F * D), jnp.float32),
        grid=grid,
        in_specs=[
            pl.BlockSpec((batch_tile, F), lambda i: (i, 0)),       # ids tile
            pl.BlockSpec(memory_space=pltpu.MemorySpace.VMEM),     # offsets (whole)
            pl.BlockSpec(memory_space=pltpu.MemorySpace.VMEM),     # table (whole)
        ],
        out_specs=pl.BlockSpec((batch_tile, F * D), lambda i: (i, 0)),  # lane-dense
        compiler_params=pltpu.CompilerParams(
            dimension_semantics=("parallel",),   # shards tiles across v7x's 2 TCs
            vmem_limit_bytes=vmem_limit),
    )(ids, offsets, table)

    return out2d[:B].reshape(B, F, D)


def forward_embed(sparse_input, table, field_offsets, *, batch_tile=256):
    """Gather path by default; falls back to the MXU one-hot path if this build's
    Mosaic cannot lower the in-kernel gather."""
    try:
        return jax.block_until_ready(
            embedding_forward(sparse_input, table, field_offsets,
                              batch_tile=batch_tile, impl="gather"))
    except Exception:
        return jax.block_until_ready(
            embedding_forward(sparse_input, table, field_offsets,
                              batch_tile=batch_tile, impl="onehot"))


# ---- plain-JAX glue mirroring the rest of BaseCTR ---------------------------

def l2_loss(params, l2_weight):
    """BaseCTR.L2_Loss: sum of L2 norms (matches torch.norm(p, 2)) * weight."""
    if l2_weight == 0:
        return jnp.float32(0.0)
    return l2_weight * sum(jnp.linalg.norm(p.astype(jnp.float32)) for p in params)


def get_loss(logits, label, params, l2_weight):
    """BaseCTR.get_loss: BCE-with-logits + L2."""
    z = logits.squeeze(-1).astype(jnp.float32)
    y = label.squeeze(-1).astype(jnp.float32)
    bce = jnp.mean(jnp.maximum(z, 0) - z * y + jnp.log1p(jnp.exp(-jnp.abs(z))))
    return bce + l2_loss(params, l2_weight)


# TODO(synk): FeatureInteraction is abstract (raise NotImplementedError) in the
# base class; subclasses define it, so no kernel is emitted for it here.


if __name__ == "__main__":
    key = jax.random.PRNGKey(0)
    k_tbl, k_idx, k_lbl = jax.random.split(key, 3)

    # feature_stastic ~ {'label': None, 'f0': 16, ..., 'f7': 100}
    vocab_sizes = [16, 24, 32, 40, 48, 56, 64, 100]
    num_fields = len(vocab_sizes)            # len(feature_stastic) - 1
    embedding_dim = 16                       # F * D = 128 -> full-lane output rows
    batch = 512                              # 2 parallel tiles of 256
    batch_tile = 256

    total_vocab = sum(vocab_sizes)
    field_offsets = jnp.array(
        [0] + list(jnp.cumsum(jnp.array(vocab_sizes))[:-1]), dtype=jnp.int32)

    # deterministic embedding table init (normal(0, 0.01), typical CTR init)
    table = (0.01 * jax.random.normal(
        k_tbl, (total_vocab, embedding_dim))).astype(jnp.float32)

    # deterministic sparse input: field-local ids within each field's vocab
    sparse_input = jnp.stack(
        [jax.random.randint(jax.random.fold_in(k_idx, f), (batch,), 0,
                            vocab_sizes[f], dtype=jnp.int32)
         for f in range(num_fields)], axis=1)                       # [B, F]

    dense = forward_embed(sparse_input, table, field_offsets,
                          batch_tile=batch_tile)                    # [B, F, D]

    # correctness check against the plain-JAX gather reference
    ref = jnp.take(table, sparse_input + field_offsets[None, :], axis=0)
    assert dense.shape == (batch, num_fields, embedding_dim)
    assert jnp.allclose(dense, ref, atol=1e-5), "embedding kernel mismatch"

    # exercise the (plain-JAX) loss glue with dummy logits
    dummy_logits = jnp.sum(dense, axis=(1, 2))[:, None]
    label = jax.random.bernoulli(k_lbl, 0.5, (batch, 1))
    _ = jax.block_until_ready(get_loss(dummy_logits, label, [table], 1e-5))

    print("KERNEL_OK")
</pallas_src>

<mosaic_0001>
module attributes {stable_mosaic.version = 11 : i64} {
  func.func @_embed_kernel(%arg0: i32, %arg1: memref<256x8xi32, #tpu.memory_space<vmem>>, %arg2: memref<1x8xi32, #tpu.memory_space<vmem>>, %arg3: memref<384x16xf32, #tpu.memory_space<vmem>>, %arg4: memref<256x128xf32, #tpu.memory_space<vmem>>) attributes {dimension_semantics = [#tpu.dimension_semantics<parallel>], iteration_bounds = array<i64: 2>, scalar_prefetch = 0 : i64, scratch_operands = 0 : i64, tpu.core_type = #tpu.core_type<tc>, window_params = [{transform_indices = @transform_0, window_bounds = array<i64: 256, 8>}, {pipeline_mode = #tpu.pipeline_mode<synchronous>, transform_indices = @transform_1, window_bounds = array<i64: 1, 8>}, {pipeline_mode = #tpu.pipeline_mode<synchronous>, transform_indices = @transform_2, window_bounds = array<i64: 384, 16>}, {transform_indices = @transform_3, window_bounds = array<i64: 256, 128>}]} {
    %c0 = arith.constant 0 : index
    %c0_0 = arith.constant 0 : index
    %0 = vector.load %arg1[%c0, %c0_0] : memref<256x8xi32, #tpu.memory_space<vmem>>, vector<256x8xi32>
    %c0_1 = arith.constant 0 : index
    %c0_2 = arith.constant 0 : index
    %1 = vector.load %arg2[%c0_1, %c0_2] : memref<1x8xi32, #tpu.memory_space<vmem>>, vector<1x8xi32>
    %2 = vector.broadcast %1 : vector<1x8xi32> to vector<256x8xi32>
    %3 = arith.addi %0, %2 : vector<256x8xi32>
    %c0_i32 = arith.constant 0 : i32
    %c383_i32 = arith.constant 383 : i32
    %4 = vector.broadcast %c0_i32 : i32 to vector<256x8xi32>
    %5 = arith.maxsi %4, %3 : vector<256x8xi32>
    %6 = vector.broadcast %c383_i32 : i32 to vector<256x8xi32>
    %7 = arith.minsi %6, %5 : vector<256x8xi32>
    %c0_3 = arith.constant 0 : index
    %c0_4 = arith.constant 0 : index
    %8 = vector.load %arg3[%c0_3, %c0_4] : memref<384x16xf32, #tpu.memory_space<vmem>>, vector<384x16xf32>
    %9 = tpu.iota {dimensions = array<i32: 1>} : vector<256x384xi32>
    %10 = vector.extract_strided_slice %7 {offsets = [0, 0], sizes = [256, 1], strides = [1, 1]} : vector<256x8xi32> to vector<256x1xi32>
    %11 = vector.shape_cast %10 : vector<256x1xi32> to vector<256xi32>
    %12 = vector.shape_cast %11 : vector<256xi32> to vector<256x1xi32>
    %13 = vector.broadcast %12 : vector<256x1xi32> to vector<256x384xi32>
    %14 = arith.cmpi eq, %9, %13 : vector<256x384xi32>
    %15 = arith.extui %14 : vector<256x384xi1> to vector<256x384xi32>
    %16 = arith.sitofp %15 : vector<256x384xi32> to vector<256x384xf32>
    %cst = arith.constant dense<0.000000e+00> : vector<256x16xf32>
    %17 = tpu.matmul %16, %8, %cst {dimension_numbers = #tpu.dot_dimension_numbers<[1], [0], [0], [1], [0, 0, 1, 1], [], []>} : vector<256x384xf32>, vector<384x16xf32>, vector<256x16xf32> -> vector<256x16xf32>
    %18 = vector.extract_strided_slice %7 {offsets = [0, 1], sizes = [256, 1], strides = [1, 1]} : vector<256x8xi32> to vector<256x1xi32>
    %19 = vector.shape_cast %18 : vector<256x1xi32> to vector<256xi32>
    %20 = vector.shape_cast %19 : vector<256xi32> to vector<256x1xi32>
    %21 = vector.broadcast %20 : vector<256x1xi32> to vector<256x384xi32>
    %22 = arith.cmpi eq, %9, %21 : vector<256x384xi32>
    %23 = arith.extui %22 : vector<256x384xi1> to vector<256x384xi32>
    %24 = arith.sitofp %23 : vector<256x384xi32> to vector<256x384xf32>
    %cst_5 = arith.constant dense<0.000000e+00> : vector<256x16xf32>
    %25 = tpu.matmul %24, %8, %cst_5 {dimension_numbers = #tpu.dot_dimension_numbers<[1], [0], [0], [1], [0, 0, 1, 1], [], []>} : vector<256x384xf32>, vector<384x16xf32>, vector<256x16xf32> -> vector<256x16xf32>
    %26 = vector.extract_strided_slice %7 {offsets = [0, 2], sizes = [256, 1], strides = [1, 1]} : vector<256x8xi32> to vector<256x1xi32>
    %27 = vector.shape_cast %26 : vector<256x1xi32> to vector<256xi32>
    %28 = vector.shape_cast %27 : vector<256xi32> to vector<256x1xi32>
    %29 = vector.broadcast %28 : vector<256x1xi32> to vector<256x384xi32>
    %30 = arith.cmpi eq, %9, %29 : vector<256x384xi32>
    %31 = arith.extui %30 : vector<256x384xi1> to vector<256x384xi32>
    %32 = arith.sitofp %31 : vector<256x384xi32> to vector<256x384xf32>
    %cst_6 = arith.constant dense<0.000000e+00> : vector<256x16xf32>
    %33 = tpu.matmul %32, %8, %cst_6 {dimension_numbers = #tpu.dot_dimension_numbers<[1], [0], [0], [1], [0, 0, 1, 1], [], []>} : vector<256x384xf32>, vector<384x16xf32>, vector<256x16xf32> -> vector<256x16xf32>
    %34 = vector.extract_strided_slice %7 {offsets = [0, 3], sizes = [256, 1], strides = [1, 1]} : vector<256x8xi32> to vector<256x1xi32>
    %35 = vector.shape_cast %34 : vector<256x1xi32> to vector<256xi32>
    %36 = vector.shape_cast %35 : vector<256xi32> to vector<256x1xi32>
    %37 = vector.broadcast %36 : vector<256x1xi32> to vector<256x384xi32>
    %38 = arith.cmpi eq, %9, %37 : vector<256x384xi32>
    %39 = arith.extui %38 : vector<256x384xi1> to vector<256x384xi32>
    %40 = arith.sitofp %39 : vector<256x384xi32> to vector<256x384xf32>
    %cst_7 = arith.constant dense<0.000000e+00> : vector<256x16xf32>
    %41 = tpu.matmul %40, %8, %cst_7 {dimension_numbers = #tpu.dot_dimension_numbers<[1], [0], [0], [1], [0, 0, 1, 1], [], []>} : vector<256x384xf32>, vector<384x16xf32>, vector<256x16xf32> -> vector<256x16xf32>
    %42 = vector.extract_strided_slice %7 {offsets = [0, 4], sizes = [256, 1], strides = [1, 1]} : vector<256x8xi32> to vector<256x1xi32>
    %43 = vector.shape_cast %42 : vector<256x1xi32> to vector<256xi32>
    %44 = vector.shape_cast %43 : vector<256xi32> to vector<256x1xi32>
    %45 = vector.broadcast %44 : vector<256x1xi32> to vector<256x384xi32>
    %46 = arith.cmpi eq, %9, %45 : vector<256x384xi32>
    %47 = arith.extui %46 : vector<256x384xi1> to vector<256x384xi32>
    %48 = arith.sitofp %47 : vector<256x384xi32> to vector<256x384xf32>
    %cst_8 = arith.constant dense<0.000000e+00> : vector<256x16xf32>
    %49 = tpu.matmul %48, %8, %cst_8 {dimension_numbers = #tpu.dot_dimension_numbers<[1], [0], [0], [1], [0, 0, 1, 1], [], []>} : vector<256x384xf32>, vector<384x16xf32>, vector<256x16xf32> -> vector<256x16xf32>
    %50 = vector.extract_strided_slice %7 {offsets = [0, 5], sizes = [256, 1], strides = [1, 1]} : vector<256x8xi32> to vector<256x1xi32>
    %51 = vector.shape_cast %50 : vector<256x1xi32> to vector<256xi32>
    %52 = vector.shape_cast %51 : vector<256xi32> to vector<256x1xi32>
    %53 = vector.broadcast %52 : vector<256x1xi32> to vector<256x384xi32>
    %54 = arith.cmpi eq, %9, %53 : vector<256x384xi32>
    %55 = arith.extui %54 : vector<256x384xi1> to vector<256x384xi32>
    %56 = arith.sitofp %55 : vector<256x384xi32> to vector<256x384xf32>
    %cst_9 = arith.constant dense<0.000000e+00> : vector<256x16xf32>
    %57 = tpu.matmul %56, %8, %cst_9 {dimension_numbers = #tpu.dot_dimension_numbers<[1], [0], [0], [1], [0, 0, 1, 1], [], []>} : vector<256x384xf32>, vector<384x16xf32>, vector<256x16xf32> -> vector<256x16xf32>
    %58 = vector.extract_strided_slice %7 {offsets = [0, 6], sizes = [256, 1], strides = [1, 1]} : vector<256x8xi32> to vector<256x1xi32>
    %59 = vector.shape_cast %58 : vector<256x1xi32> to vector<256xi32>
    %60 = vector.shape_cast %59 : vector<256xi32> to vector<256x1xi32>
    %61 = vector.broadcast %60 : vector<256x1xi32> to vector<256x384xi32>
    %62 = arith.cmpi eq, %9, %61 : vector<256x384xi32>
    %63 = arith.extui %62 : vector<256x384xi1> to vector<256x384xi32>
    %64 = arith.sitofp %63 : vector<256x384xi32> to vector<256x384xf32>
    %cst_10 = arith.constant dense<0.000000e+00> : vector<256x16xf32>
    %65 = tpu.matmul %64, %8, %cst_10 {dimension_numbers = #tpu.dot_dimension_numbers<[1], [0], [0], [1], [0, 0, 1, 1], [], []>} : vector<256x384xf32>, vector<384x16xf32>, vector<256x16xf32> -> vector<256x16xf32>
    %66 = vector.extract_strided_slice %7 {offsets = [0, 7], sizes = [256, 1], strides = [1, 1]} : vector<256x8xi32> to vector<256x1xi32>
    %67 = vector.shape_cast %66 : vector<256x1xi32> to vector<256xi32>
    %68 = vector.shape_cast %67 : vector<256xi32> to vector<256x1xi32>
    %69 = vector.broadcast %68 : vector<256x1xi32> to vector<256x384xi32>
    %70 = arith.cmpi eq, %9, %69 : vector<256x384xi32>
    %71 = arith.extui %70 : vector<256x384xi1> to vector<256x384xi32>
    %72 = arith.sitofp %71 : vector<256x384xi32> to vector<256x384xf32>
    %cst_11 = arith.constant dense<0.000000e+00> : vector<256x16xf32>
    %73 = tpu.matmul %72, %8, %cst_11 {dimension_numbers = #tpu.dot_dimension_numbers<[1], [0], [0], [1], [0, 0, 1, 1], [], []>} : vector<256x384xf32>, vector<384x16xf32>, vector<256x16xf32> -> vector<256x16xf32>
    %74 = tpu.concatenate %17, %25, %33, %41, %49, %57, %65, %73 in 1 : vector<256x16xf32>, vector<256x16xf32>, vector<256x16xf32>, vector<256x16xf32>, vector<256x16xf32>, vector<256x16xf32>, vector<256x16xf32>, vector<256x16xf32> -> vector<256x128xf32>
    %c0_12 = arith.constant 0 : index
    %c0_13 = arith.constant 0 : index
    %75 = vector.load %arg4[%c0_12, %c0_13] : memref<256x128xf32, #tpu.memory_space<vmem>>, vector<256x128xf32>
    tpu.vector_store %arg4[%c0_12, %c0_13], %74 {strides = array<i32>} : memref<256x128xf32, #tpu.memory_space<vmem>>, vector<256x128xf32>,
    return
  }
  func.func @transform_0(%arg0: i32) -> (i32, i32) {
    %c0_i32 = arith.constant 0 : i32
    %c0_i32_0 = arith.constant 0 : i32
    return %arg0, %c0_i32 : i32, i32
  }
  func.func @transform_1(%arg0: i32) -> (i32, i32) {
    %c0_i32 = arith.constant 0 : i32
    %c0_i32_0 = arith.constant 0 : i32
    %c0_i32_1 = arith.constant 0 : i32
    return %c0_i32, %c0_i32_0 : i32, i32
  }
  func.func @transform_2(%arg0: i32) -> (i32, i32) {
    %c0_i32 = arith.constant 0 : i32
    %c0_i32_0 = arith.constant 0 : i32
    %c0_i32_1 = arith.constant 0 : i32
    return %c0_i32, %c0_i32_0 : i32, i32
  }
  func.func @transform_3(%arg0: i32) -> (i32, i32) {
    %c0_i32 = arith.constant 0 : i32
    %c0_i32_0 = arith.constant 0 : i32
    return %arg0, %c0_i32 : i32, i32
  }
}

</mosaic_0001>

<bundles_post_ra>
// kernel: embedding_forward.1
= control target key start
LH: loop header
LB: loop body
LE: loop exit
PB: predicated region body
PF: predicated region fallthrough
CT: control target
= control target key end

     0   :  { %s11133_s12 = smov 0   ;;  %s18252_s0 = inlined_call_operand.vmem [shape: s32[512,8], index: 0, kind: input, shape index: {}]   ;;  %s18253_s1 = inlined_call_operand.vmem [shape: s32[1,8], index: 1, kind: input, shape index: {}]   ;;  %s18254_s2 = inlined_call_operand.vmem [shape: f32[384,16], index: 2, kind: input, shape index: {}]   ;;  %s18255_s3 = inlined_call_operand.vmem [shape: f32[512,128], index: 3, kind: output, shape index: {}]  }
   0x1 LB: > { %s8310_s13 = sadd.s32 4294967295, %s11094_s12   ;;  %p8314_p0 = scmp.ge.s32.totalorder %s11094_s12, 1  ;;  %s11094_s12 = sphi %s11133_s12, %s13_s12  }
   0x2   : > { %p138_p1 = scmp.lt.s32.totalorder %s11094_s12, 3 }
   0x4   : > { %p139_p2 = pnand %p8314_p0, %p138_p1 }
   0x6   : > { %142 = sbr.rel (%p139_p2) target bundleno = 1397 (0x575), region = 32 }
   0xb   : > { %s8315_s14 = sshll.u32 %s8310_s13, 5  ;;  %v11144_v0 = vld [vmem:[%s18254_s2 + $0x78] sm:$0xff]  ;;  %v11096_v1 = vmov 0   ;;  %v18256_v2 = vmov 0.0   ;;  %v11150_v3 = vld [vmem:[%s18254_s2 + $0x70] sm:$0xff]  ;;  %v11159_v4 = vld [vmem:[%s18254_s2 + $0x68] sm:$0xff] }
   0xc   : > { %10908 = vset.pattern.permute.xlu1 %v11096_v1  ;;  %10907 = vset.pattern.permute.xlu0 %v11096_v1  ;;  %p163_p3 = scmp.lt.s32.totalorder %s8315_s14, 63  ;;  %v11165_v5 = vld [vmem:[%s18253_s1] ss:$0 sm:$0xff]  ;;  %v11184_v7 = vld [vmem:[%s18254_s2 + $0x58] sm:$0xff]  ;;  %v11214_v23 = vld [vmem:[%s18254_s2 + $0x50] sm:$0xff]  ;;  %s11107_s27 = smov 32  }
   0xd   : > { %807 = vmatprep.subr.mxu0 %v18256_v2  ;;  %v11179_v6 = vld [vmem:[%s18254_s2 + $0x60] sm:$0xff]  ;;  %v11189_v8 = vld [vmem:[%s18254_s2 + $0x178] sm:$0xff]  ;;  %v11228_v32 = vld [vmem:[%s18254_s2 + $0x48] sm:$0xff]  ;;  %s11108_s18 = smov 48   ;;  %s11109_s17 = smov 64  }
   0xe   : > { %s19606_s14 = smov (!%p163_p3, %s8315_s14), 63  ;;  %808 = vmatpush1.msra.mxu0 %v11144_v0  ;;  %10242 = vmatprep.subr.mxu1 %v11189_v8  ;;  %v11246_v42 = vld [vmem:[%s18254_s2 + $0x40] sm:$0xff]  ;;  %v11256_v47 = vld [vmem:[%s18254_s2 + $0x38] sm:$0xff]  ;;  %v11270_v52 = vld [vmem:[%s18254_s2 + $0x170] sm:$0xff]  ;;  %s11110_s24 = smov 80  }
   0xf   : > { %809 = vmatprep.subr.mxu0 %v18256_v2  ;;  %s8316_s21 = sshll.u32 %s19606_s14, 3  ;;  %10243 = vmatpush3.msra.mxu1 %v11189_v8  ;;  %v11277_v53 = vld [vmem:[%s18254_s2 + $0x168] sm:$0xff]  ;;  %v11285_v57 = vld [vmem:[%s18254_s2 + $0x30] sm:$0xff]  ;;  %v11294_v59 = vld [vmem:[%s18254_s2 + $0x160] sm:$0xff]  ;;  %s11112_s25 = smov 112  }
  0x10   : > { %810 = vmatpush1.msra.mxu0 %v11150_v3  ;;  %s11173_s26 = scalar_lea.vmem %s18252_s0, %s8316_s21  ;;  %10244 = vmatprep.subr.mxu1 %v11270_v52  ;;  %s18097_s30 = scalar_lea.vmem %s18255_s3, %s8316_s21 }
  0x11   : > { %811 = vmatprep.subr.mxu0 %v18256_v2  ;;  %v176_v9 = vld [vmem:[%s11173_s26 + $0x10] sm:$0xff]  ;;  %v174_v10 = vld [vmem:[%s11173_s26] sm:$0xff]  ;;  %v177_v11 = vld [vmem:[%s11173_s26 + $0x18] sm:$0xff]  ;;  %10245 = vmatpush3.msra.mxu1 %v11270_v52 }
  0x12   : > { %812 = vmatpush1.msra.mxu0 %v11159_v4  ;;  %v213_v12 = vadd.s32 %v11165_v5, %v176_v9  ;;  %v211_v13 = vadd.s32 %v11165_v5, %v174_v10  ;;  %v214_v14 = vadd.s32 %v11165_v5, %v177_v11  ;;  %v175_v15 = vld [vmem:[%s11173_s26 + $0x8] sm:$0xff]  ;;  %v178_v17 = vld [vmem:[%s11173_s26 + $0x20] sm:$0xff]  ;;  %v181_v21 = vld [vmem:[%s11173_s26 + $0x38] sm:$0xff]  ;;  %10246 = vmatprep.subr.mxu1 %v11277_v53 }
  0x13   : > { %v179_v16 = vld [vmem:[%s11173_s26 + $0x28] sm:$0xff]  ;;  %813 = vmatprep.subr.mxu0 %v18256_v2  ;;  %v212_v18 = vadd.s32 %v11165_v5, %v175_v15  ;;  %v215_v20 = vadd.s32 %v11165_v5, %v178_v17  ;;  %v218_v22 = vadd.s32 %v11165_v5, %v181_v21  ;;  %v180_v28 = vld [vmem:[%s11173_s26 + $0x30] sm:$0xff]  ;;  %v182_v38 = vld [vmem:[%s11173_s26 + $0x40] sm:$0xff]  ;;  %10247 = vmatpush3.msra.mxu1 %v11277_v53 }
  0x14   : > { %v216_v19 = vadd.s32 %v11165_v5, %v179_v16  ;;  %814 = vmatpush1.msra.mxu0 %v11179_v6  ;;  %vm247_vm0 = vcmp.gt.s32.totalorder %v213_v12, 0  ;;  %vm243_vm1 = vcmp.gt.s32.totalorder %v211_v13, 0  ;;  %vm249_vm2 = vcmp.gt.s32.totalorder %v214_v14, 0  ;;  %v183_v31 = vld [vmem:[%s11173_s26 + $0x48] sm:$0xff]  ;;  %v185_v39 = vld [vmem:[%s11173_s26 + $0x58] sm:$0xff]  ;;  %v184_v41 = vld [vmem:[%s11173_s26 + $0x50] sm:$0xff]  ;;  %10248 = vmatprep.subr.mxu1 %v11294_v59 }
  0x15   : > { %815 = vmatprep.subr.mxu0 %v18256_v2  ;;  %v248_v24 = vsel %vm247_vm0, %v213_v12, 0  ;;  %v244_v25 = vsel %vm243_vm1, %v211_v13, 0  ;;  %v250_v26 = vsel %vm249_vm2, %v214_v14, 0  ;;  %vm245_vm3 = vcmp.gt.s32.totalorder %v212_v18, 0  ;;  %v187_v51 = vld [vmem:[%s11173_s26 + $0x68] sm:$0xff]  ;;  %v186_v56 = vld [vmem:[%s11173_s26 + $0x60] sm:$0xff]  ;;  %10249 = vmatpush3.msra.mxu1 %v11294_v59 }
  0x16   : > { %816 = vmatpush1.msra.mxu0 %v11184_v7  ;;  %vm311_vm4 = vcmp.lt.s32.totalorder %v248_v24, 383  ;;  %vm307_vm5 = vcmp.lt.s32.totalorder %v244_v25, 383  ;;  %vm313_vm6 = vcmp.lt.s32.totalorder %v250_v26, 383  ;;  %v246_v27 = vsel %vm245_vm3, %v212_v18, 0  ;;  %v189_v62 = vld [vmem:[%s11173_s26 + $0x78] sm:$0xff]  ;;  %v188_v63 = vld [vmem:[%s11173_s26 + $0x70] sm:$0xff] }
  0x17   : > { %817 = vmatprep.subr.mxu0 %v18256_v2  ;;  %v11219_v29 = vsel %vm311_vm4, %v248_v24, 383  ;;  %v11221_v30 = vsel %vm307_vm5, %v244_v25, 383  ;;  %vm309_vm7 = vcmp.lt.s32.totalorder %v246_v27, 383  ;;  %v11232_v33 = vsel %vm313_vm6, %v250_v26, 383  ;;  %v11311_v9 = vld [vmem:[%s18254_s2 + $0x28] sm:$0xff]  ;;  %v11321_v12 = vld [vmem:[%s18254_s2 + $0x158] sm:$0xff] }
  0x18   : > { %18572 = vst [vmem:[#allocation2_spill] sm:$0xff] %v11221_v30  ;;  %818 = vmatpush1.msra.mxu0 %v11214_v23  ;;  %430 = vperm.xlu1 %10908, %v11219_v29   ;;  %18573 = vst [vmem:[#allocation3_spill] sm:$0xff] %v11232_v33  ;;  %vm253_vm8 = vcmp.gt.s32.totalorder %v216_v19, 0  ;;  %vm251_vm9 = vcmp.gt.s32.totalorder %v215_v20, 0  ;;  %vm257_vm10 = vcmp.gt.s32.totalorder %v218_v22, 0  ;;  %v11234_v34 = vsel %vm309_vm7, %v246_v27, 383 }
  0x19   : > { %424 = vperm.xlu0 %10907, %v11221_v30   ;;  %18574 = vst [vmem:[#allocation4_spill] sm:$0xff] %v11234_v34  ;;  %v254_v35 = vsel %vm253_vm8, %v216_v19, 0  ;;  %v252_v36 = vsel %vm251_vm9, %v215_v20, 0  ;;  %v217_v37 = vadd.s32 %v11165_v5, %v180_v28  ;;  %819 = vmatprep.subr.mxu0 %v18256_v2  ;;  %v220_v40 = vadd.s32 %v11165_v5, %v183_v31  ;;  %v11330_v15 = vld [vmem:[%s18254_s2 + $0x20] sm:$0xff]  ;;  %v191_v18 = vld [vmem:[%s11173_s26 + $0x88] sm:$0xff]  ;;  %v11347_v20 = vld [vmem:[%s18254_s2 + $0x150] sm:$0xff] }
  0x1a   : > { %vm317_vm11 = vcmp.lt.s32.totalorder %v254_v35, 383  ;;  %vm315_vm12 = vcmp.lt.s32.totalorder %v252_v36, 383  ;;  %820 = vmatpush1.msra.mxu0 %v11228_v32  ;;  %v258_v43 = vsel %vm257_vm10, %v218_v22, 0  ;;  %v219_v45 = vadd.s32 %v11165_v5, %v182_v38  ;;  %v190_v19 = vld [vmem:[%s11173_s26 + $0x80] sm:$0xff]  ;;  %10250 = vmatprep.subr.mxu1 %v11321_v12  ;;  %18581 = vst [vmem:[#allocation11_spill] sm:$0xff] %v11347_v20  ;;  %v11355_v24 = vld [vmem:[%s18254_s2 + $0x18] sm:$0xff] }
  0x1b   : > { %vm255_vm13 = vcmp.gt.s32.totalorder %v217_v37, 0  ;;  %821 = vmatprep.subr.mxu0 %v18256_v2  ;;  %vm261_vm14 = vcmp.gt.s32.totalorder %v220_v40, 0  ;;  %v222_v46 = vadd.s32 %v11165_v5, %v185_v39  ;;  %v11259_v48 = vsel %vm317_vm11, %v254_v35, 383  ;;  %10251 = vmatpush3.msra.mxu1 %v11321_v12  ;;  %v11365_v27 = vld [vmem:[%s18254_s2 + $0x148] sm:$0xff]  ;;  %v193_v35 = vld [vmem:[%s11173_s26 + $0x98] sm:$0xff] }
  0x1c   : > { %433 = vperm.xlu1 %10908, %v11232_v33   ;;  %v256_v44 = vsel %vm255_vm13, %v217_v37, 0  ;;  %18575 = vst [vmem:[#allocation5_spill] sm:$0xff] %v11259_v48  ;;  %v11262_v49 = vsel %vm315_vm12, %v252_v36, 383  ;;  %v221_v50 = vadd.s32 %v11165_v5, %v184_v41  ;;  %822 = vmatpush1.msra.mxu0 %v11246_v42  ;;  %vm321_vm15 = vcmp.lt.s32.totalorder %v258_v43, 383  ;;  %18582 = vst [vmem:[#allocation12_spill] sm:$0xff] %v11365_v27  ;;  %v192_v36 = vld [vmem:[%s11173_s26 + $0x90] sm:$0xff] }
  0x1d   : > { %427 = vperm.xlu0 %10907, %v11234_v34   ;;  %18576 = vst [vmem:[#allocation6_spill] sm:$0xff] %v11262_v49  ;;  %vm319_vm0 = vcmp.lt.s32.totalorder %v256_v44, 383  ;;  %vm259_vm1 = vcmp.gt.s32.totalorder %v219_v45, 0  ;;  %823 = vmatprep.subr.mxu0 %v18256_v2  ;;  %v262_v54 = vsel %vm261_vm14, %v220_v40, 0  ;;  %vm265_vm2 = vcmp.gt.s32.totalorder %v222_v46, 0  ;;  %v11381_v37 = vld [vmem:[%s18254_s2 + $0x10] sm:$0xff] }
  0x1e   : > { %v260_v55 = vsel %vm259_vm1, %v219_v45, 0  ;;  %824 = vmatpush1.msra.mxu0 %v11256_v47  ;;  %vm263_vm3 = vcmp.gt.s32.totalorder %v221_v50, 0  ;;  %v224_v58 = vadd.s32 %v11165_v5, %v187_v51  ;;  %v11297_v60 = vsel %vm321_vm15, %v258_v43, 383  ;;  %10252 = vmatprep.subr.mxu1 %v11347_v20  ;;  %v411_v40 = vld [vmem:[%s18254_s2 + $0x140] sm:$0xff] }
  0x1f   : > { %18577 = vst [vmem:[#allocation7_spill] sm:$0xff] %v11297_v60  ;;  %v11300_v61 = vsel %vm319_vm0, %v256_v44, 383  ;;  %825 = vmatprep.subr.mxu0 %v18256_v2  ;;  %vm325_vm4 = vcmp.lt.s32.totalorder %v262_v54, 383  ;;  %vm323_vm5 = vcmp.lt.s32.totalorder %v260_v55, 383  ;;  %v223_v1 = vadd.s32 %v11165_v5, %v186_v56  ;;  %10253 = vmatpush3.msra.mxu1 %v11347_v20  ;;  %v11398_v44 = vld [vmem:[%s18254_s2 + $0x8] sm:$0xff]  ;;  %v194_v51 = vld [vmem:[%s11173_s26 + $0xa0] sm:$0xff] }
  0x20   : > { %439 = vperm.xlu1 %10908, %v11259_v48   ;;  %18578 = vst [vmem:[#allocation8_spill] sm:$0xff] %v11300_v61  ;;  %826 = vmatpush1.msra.mxu0 %v11285_v57  ;;  %v266_v10 = vsel %vm265_vm2, %v222_v46, 0  ;;  %v264_v11 = vsel %vm263_vm3, %v221_v50, 0  ;;  %vm269_vm6 = vcmp.gt.s32.totalorder %v224_v58, 0  ;;  %v226_v13 = vadd.s32 %v11165_v5, %v189_v62  ;;  %v195_v50 = vld [vmem:[%s11173_s26 + $0xa8] sm:$0xff] }
  0x21   : > { %436 = vperm.xlu0 %10907, %v11262_v49   ;;  %827 = vmatprep.subr.mxu0 %v18256_v2  ;;  %vm267_vm7 = vcmp.gt.s32.totalorder %v223_v1, 0  ;;  %v225_v14 = vadd.s32 %v11165_v5, %v188_v63  ;;  %v11333_v16 = vsel %vm325_vm4, %v262_v54, 383  ;;  %v11336_v17 = vsel %vm323_vm5, %v260_v55, 383  ;;  %v410_v54 = vld [vmem:[%s18254_s2 + $0x138] sm:$0xff] }
  0x22   : > { %18579 = vst [vmem:[#allocation9_spill] sm:$0xff] %v11333_v16  ;;  %18580 = vst [vmem:[#allocation10_spill] sm:$0xff] %v11336_v17  ;;  %828 = vmatpush1.msra.mxu0 %v11311_v9  ;;  %vm329_vm8 = vcmp.lt.s32.totalorder %v266_v10, 383  ;;  %vm327_vm9 = vcmp.lt.s32.totalorder %v264_v11, 383  ;;  %v270_v21 = vsel %vm269_vm6, %v224_v58, 0  ;;  %v268_v22 = vsel %vm267_vm7, %v223_v1, 0  ;;  %10254 = vmatprep.subr.mxu1 %v11365_v27 }
  0x23   : > { %829 = vmatprep.subr.mxu0 %v18256_v2  ;;  %vm273_vm10 = vcmp.gt.s32.totalorder %v226_v13, 0  ;;  %vm271_vm11 = vcmp.gt.s32.totalorder %v225_v14, 0  ;;  %v228_v25 = vadd.s32 %v11165_v5, %v191_v18  ;;  %v227_v26 = vadd.s32 %v11165_v5, %v190_v19  ;;  %10255 = vmatpush3.msra.mxu1 %v11365_v27  ;;  %v11420_v58 = vld [vmem:[%s18254_s2] sm:$0xff]  ;;  %v409_v1 = vld [vmem:[%s18254_s2 + $0x130] sm:$0xff]  ;;  %v11442_v18 = vld [vmem:[%s18254_s2 + $0xf8] sm:$0xff] }
  0x24   : > { %445 = vperm.xlu1 %10908, %v11297_v60   ;;  %830 = vmatpush1.msra.mxu0 %v11330_v15  ;;  %v11368_v28 = vsel %vm329_vm8, %v266_v10, 383  ;;  %v11371_v31 = vsel %vm327_vm9, %v264_v11, 383  ;;  %vm333_vm12 = vcmp.lt.s32.totalorder %v270_v21, 383  ;;  %vm331_vm13 = vcmp.lt.s32.totalorder %v268_v22, 383  ;;  %v202_v27 = vld [vmem:[%s11173_s26 + $0xe0] sm:$0xff] }
  0x25   : > { %442 = vperm.xlu0 %10907, %v11300_v61   ;;  %18583 = vst [vmem:[#allocation13_spill] sm:$0xff] %v11368_v28  ;;  %18584 = vst [vmem:[#allocation14_spill] sm:$0xff] %v11371_v31  ;;  %831 = vmatprep.subr.mxu0 %v18256_v2  ;;  %v274_v38 = vsel %vm273_vm10, %v226_v13, 0  ;;  %v272_v39 = vsel %vm271_vm11, %v225_v14, 0  ;;  %vm277_vm14 = vcmp.gt.s32.totalorder %v228_v25, 0  ;;  %vm275_vm15 = vcmp.gt.s32.totalorder %v227_v26, 0 }
  0x26   : > { %832 = vmatpush1.msra.mxu0 %v11355_v24  ;;  %v230_v41 = vadd.s32 %v11165_v5, %v193_v35  ;;  %v229_v43 = vadd.s32 %v11165_v5, %v192_v36  ;;  %v11401_v45 = vsel %vm333_vm12, %v270_v21, 383  ;;  %v11404_v46 = vsel %vm331_vm13, %v268_v22, 383  ;;  %10256 = vmatprep.subr.mxu1 %v411_v40  ;;  %v197_v13 = vld [vmem:[%s11173_s26 + $0xb8] sm:$0xff]  ;;  %v196_v14 = vld [vmem:[%s11173_s26 + $0xb0] sm:$0xff]  ;;  %v408_v22 = vld [vmem:[%s18254_s2 + $0x128] sm:$0xff] }
  0x27   : > { %833 = vmatprep.subr.mxu0 %v18256_v2  ;;  %18585 = vst [vmem:[#allocation15_spill] sm:$0xff] %v11404_v46  ;;  %vm337_vm0 = vcmp.lt.s32.totalorder %v274_v38, 383  ;;  %vm335_vm1 = vcmp.lt.s32.totalorder %v272_v39, 383  ;;  %v278_v55 = vsel %vm277_vm14, %v228_v25, 0  ;;  %v276_v56 = vsel %vm275_vm15, %v227_v26, 0  ;;  %10257 = vmatpush3.msra.mxu1 %v411_v40  ;;  %v11457_v35 = vld [vmem:[%s18254_s2 + $0xf0] sm:$0xff] }
  0x28   : > { %451 = vperm.xlu1 %10908, %v11333_v16   ;;  %834 = vmatpush1.msra.mxu0 %v11381_v37  ;;  %vm281_vm2 = vcmp.gt.s32.totalorder %v230_v41, 0  ;;  %vm279_vm3 = vcmp.gt.s32.totalorder %v229_v43, 0  ;;  %v232_v62 = vadd.s32 %v11165_v5, %v195_v50  ;;  %v231_v63 = vadd.s32 %v11165_v5, %v194_v51  ;;  %v198_v40 = vld [vmem:[%s11173_s26 + $0xc0] sm:$0xff]  ;;  %v11478_v51 = vld [vmem:[%s18254_s2 + $0xe8] sm:$0xff] }
  0x29   : > { %448 = vperm.xlu0 %10907, %v11336_v17   ;;  %835 = vmatprep.subr.mxu0 %v18256_v2  ;;  %v11430_v10 = vsel %vm337_vm0, %v274_v38, 383  ;;  %v11433_v11 = vsel %vm335_vm1, %v272_v39, 383  ;;  %vm341_vm4 = vcmp.lt.s32.totalorder %v278_v55, 383  ;;  %vm339_vm5 = vcmp.lt.s32.totalorder %v276_v56, 383  ;;  %v199_v39 = vld [vmem:[%s11173_s26 + $0xc8] sm:$0xff]  ;;  %18587 = vst [vmem:[#allocation17_spill] sm:$0xff] %v11478_v51 }
  0x2a   : > { %836 = vmatpush1.msra.mxu0 %v11398_v44  ;;  %18586 = vst [vmem:[#allocation16_spill] sm:$0xff] %v11433_v11  ;;  %10258 = vmatprep.subr.mxu1 %v410_v54  ;;  %v282_v19 = vsel %vm281_vm2, %v230_v41, 0  ;;  %v280_v21 = vsel %vm279_vm3, %v229_v43, 0  ;;  %vm285_vm6 = vcmp.gt.s32.totalorder %v232_v62, 0  ;;  %vm283_vm7 = vcmp.gt.s32.totalorder %v231_v63, 0  ;;  %v407_v41 = vld [vmem:[%s18254_s2 + $0x120] sm:$0xff] }
  0x2b   : > { %837 = vmatprep.subr.mxu0 %v18256_v2  ;;  %10259 = vmatpush3.msra.mxu1 %v410_v54  ;;  %v234_v25 = vadd.s32 %v11165_v5, %v197_v13  ;;  %v233_v26 = vadd.s32 %v11165_v5, %v196_v14  ;;  %v11460_v36 = vsel %vm341_vm4, %v278_v55, 383  ;;  %v11463_v38 = vsel %vm339_vm5, %v276_v56, 383  ;;  %v406_v56 = vld [vmem:[%s18254_s2 + $0x118] sm:$0xff]  ;;  %v200_v13 = vld [vmem:[%s11173_s26 + $0xd0] sm:$0xff]  ;;  %v11500_v14 = vld [vmem:[%s18254_s2 + $0xe0] sm:$0xff] }
  0x2c   : > { %457 = vperm.xlu1 %10908, %v11368_v28   ;;  %838 = vmatpush1.msra.mxu0 %v11420_v58  ;;  %vm345_vm8 = vcmp.lt.s32.totalorder %v282_v19, 383  ;;  %vm343_vm9 = vcmp.lt.s32.totalorder %v280_v21, 383  ;;  %v286_v43 = vsel %vm285_vm6, %v232_v62, 0  ;;  %v284_v50 = vsel %vm283_vm7, %v231_v63, 0  ;;  %18589 = vst [vmem:[#allocation19_spill] sm:$0xff] %v11500_v14 }
  0x2d   : > { %454 = vperm.xlu0 %10907, %v11371_v31   ;;  %839 = vmatprep.subr.mxu0 %v18256_v2  ;;  %vm289_vm10 = vcmp.gt.s32.totalorder %v234_v25, 0  ;;  %vm287_vm11 = vcmp.gt.s32.totalorder %v233_v26, 0  ;;  %v236_v54 = vadd.s32 %v11165_v5, %v199_v39  ;;  %v235_v55 = vadd.s32 %v11165_v5, %v198_v40 }
  0x2e   : > { %10260 = vmatprep.subr.mxu1 %v409_v1  ;;  %840 = vmatpush2.msra.mxu0 %v11442_v18  ;;  %v11488_v62 = vsel %vm345_vm8, %v282_v19, 383  ;;  %v11491_v63 = vsel %vm343_vm9, %v280_v21, 383  ;;  %vm349_vm12 = vcmp.lt.s32.totalorder %v286_v43, 383  ;;  %vm347_vm13 = vcmp.lt.s32.totalorder %v284_v50, 383 }
  0x2f   : > { %10261 = vmatpush3.msra.mxu1 %v409_v1  ;;  %841 = vmatprep.subr.mxu0 %v18256_v2  ;;  %18588 = vst [vmem:[#allocation18_spill] sm:$0xff] %v11491_v63  ;;  %v201_v1 = vld [vmem:[%s11173_s26 + $0xd8] sm:$0xff]  ;;  %v290_v19 = vsel %vm289_vm10, %v234_v25, 0  ;;  %v288_v21 = vsel %vm287_vm11, %v233_v26, 0  ;;  %vm293_vm14 = vcmp.gt.s32.totalorder %v236_v54, 0  ;;  %vm291_vm15 = vcmp.gt.s32.totalorder %v235_v55, 0 }
  0x30   : > { %463 = vperm.xlu1 %10908, %v11401_v45   ;;  %10262 = vmatprep.subr.mxu1 %v408_v22  ;;  %v238_v39 = vadd.s32 %v11165_v5, %v201_v1  ;;  %v237_v40 = vadd.s32 %v11165_v5, %v200_v13  ;;  %v11515_v25 = vld [vmem:[%s18254_s2 + $0xd8] sm:$0xff]  ;;  %v11518_v26 = vsel %vm349_vm12, %v286_v43, 383  ;;  %vm353_vm0 = vcmp.lt.s32.totalorder %v290_v19, 383  ;;  %v404_v13 = vld [vmem:[%s18254_s2 + $0x108] sm:$0xff] }
  0x31   : > { %460 = vperm.xlu0 %10907, %v11404_v46   ;;  %842 = vmatpush2.msra.mxu0 %v11457_v35  ;;  %18590 = vst [vmem:[#allocation20_spill] sm:$0xff] %v11515_v25  ;;  %vm351_vm1 = vcmp.lt.s32.totalorder %v288_v21, 383  ;;  %v18592_v1 = vmov 0.0   ;;  %v294_v43 = vsel %vm293_vm14, %v236_v54, 0  ;;  %v239_v54 = vadd.s32 %v11165_v5, %v202_v27 }
  0x32   : > { %10263 = vmatpush3.msra.mxu1 %v408_v22  ;;  %843 = vmatprep.subr.mxu0 %v18256_v2  ;;  %v405_v22 = vld [vmem:[%s18254_s2 + $0x110] sm:$0xff]  ;;  %vm297_vm2 = vcmp.gt.s32.totalorder %v238_v39, 0  ;;  %vm295_vm3 = vcmp.gt.s32.totalorder %v237_v40, 0  ;;  %vm357_vm4 = vcmp.lt.s32.totalorder %v294_v43, 383 }
  0x33   : > { %10264 = vmatprep.subr.mxu1 %v407_v41  ;;  %844 = vmatpush2.msra.mxu0 %v11478_v51  ;;  %v204_v51 = vld [vmem:[%s11173_s26 + $0xf0] sm:$0xff]  ;;  %v298_v27 = vsel %vm297_vm2, %v238_v39, 0  ;;  %vm299_vm7 = vcmp.gt.s32.totalorder %v239_v54, 0  ;;  %v11573_v39 = vsel %vm357_vm4, %v294_v43, 383  ;;  %v11585_v43 = vld [vmem:[%s18254_s2 + $0xb8] sm:$0xff] }
  0x34   : > { %469 = vperm.xlu1 %10908, %v11430_v10   ;;  %10265 = vmatpush3.msra.mxu1 %v407_v41  ;;  %v11521_v41 = vsel %vm347_vm13, %v284_v50, 383  ;;  %v292_v50 = vsel %vm291_vm15, %v235_v55, 0  ;;  %v403_v55 = vld [vmem:[%s18254_s2 + $0x100] sm:$0xff]  ;;  %vm361_vm8 = vcmp.lt.s32.totalorder %v298_v27, 383  ;;  %18596 = vst [vmem:[#allocation25_spill] sm:$0xff] %v11585_v43 }
  0x35   : > { %466 = vperm.xlu0 %10907, %v11433_v11   ;;  %845 = vmatprep.subr.mxu0 %v18256_v2  ;;  %18591 = vst [vmem:[#allocation21_spill] sm:$0xff] %v11521_v41  ;;  %v203_v2 = vld [vmem:[%s11173_s26 + $0xe8] sm:$0xff]  ;;  %vm355_vm5 = vcmp.lt.s32.totalorder %v292_v50, 383 }
  0x36   : > { %10266 = vmatprep.subr.mxu1 %v406_v56  ;;  %846 = vmatpush2.msra.mxu0 %v11500_v14  ;;  %v240_v20 = vadd.s32 %v11165_v5, %v203_v2  ;;  %v11549_v14 = vsel %vm351_vm1, %v288_v21, 383  ;;  %v11558_v2 = vld [vmem:[%s18254_s2 + $0xc8] sm:$0xff] }
  0x37   : > { %10267 = vmatpush3.msra.mxu1 %v406_v56  ;;  %847 = vmatprep.subr.mxu0 %v18592_v1  ;;  %v11536_v56 = vld [vmem:[%s18254_s2 + $0xd0] sm:$0xff]  ;;  %18594 = vst [vmem:[#allocation23_spill] sm:$0xff] %v11549_v14 }
  0x38   : > { %475 = vperm.xlu1 %10908, %v11460_v36   ;;  %10268 = vmatprep.subr.mxu1 %v405_v22  ;;  %18593 = vst [vmem:[#allocation22_spill] sm:$0xff] %v11536_v56  ;;  %vm301_vm6 = vcmp.gt.s32.totalorder %v240_v20, 0 }
  0x39   : > { %472 = vperm.xlu0 %10907, %v11463_v38   ;;  %848 = vmatpush2.msra.mxu0 %v11515_v25  ;;  %v11546_v25 = vsel %vm353_vm0, %v290_v19, 383  ;;  %v296_v19 = vsel %vm295_vm3, %v237_v40, 0  ;;  %v11576_v40 = vsel %vm355_vm5, %v292_v50, 383  ;;  %v11589_v50 = vsel %vm361_vm8, %v298_v27, 383  ;;  %v11606_v27 = vld [vmem:[%s18254_s2 + $0xa8] sm:$0xff] }
  0x3a   : > { %10269 = vmatpush3.msra.mxu1 %v405_v22  ;;  %v205_v22 = vld [vmem:[%s11173_s26 + $0xf8] sm:$0xff]  ;;  %849 = vmatprep.subr.mxu0 %v18592_v1  ;;  %18595 = vst [vmem:[#allocation24_spill] sm:$0xff] %v11576_v40  ;;  %vm359_vm9 = vcmp.lt.s32.totalorder %v296_v19, 383  ;;  %18597 = vst [vmem:[#allocation26_spill] sm:$0xff] %v11589_v50  ;;  %s11106_s26 = smov 16  }
  0x3b   : > { %10270 = vmatprep.subr.mxu1 %v404_v13  ;;  %850 = vmatpush2.msra.mxu0 %v11536_v56  ;;  %v242_v21 = vadd.s32 %v11165_v5, %v205_v22  ;;  %v241_v56 = vadd.s32 %v11165_v5, %v204_v51  ;;  %v302_v5 = vsel %vm301_vm6, %v240_v20, 0  ;;  %v300_v51 = vsel %vm299_vm7, %v239_v54, 0  ;;  %v11598_v20 = vld [vmem:[%s18254_s2 + $0xb0] sm:$0xff]  ;;  %18600 = vst [vmem:[#allocation29_spill] sm:$0xff] %v11606_v27 }
  0x3c   : > { %481 = vperm.xlu1 %10908, %v11488_v62   ;;  %10271 = vmatpush3.msra.mxu1 %v404_v13  ;;  %v11570_v13 = vld [vmem:[%s18254_s2 + $0xc0] sm:$0xff]  ;;  %vm365_vm12 = vcmp.lt.s32.totalorder %v302_v5, 383  ;;  %vm363_vm13 = vcmp.lt.s32.totalorder %v300_v51, 383  ;;  %18599 = vst [vmem:[#allocation28_spill] sm:$0xff] %v11598_v20 }
  0x3d   : > { %478 = vperm.xlu0 %10907, %v11491_v63   ;;  %851 = vmatprep.subr.mxu0 %v18592_v1  ;;  %vm305_vm10 = vcmp.gt.s32.totalorder %v242_v21, 0  ;;  %vm303_vm11 = vcmp.gt.s32.totalorder %v241_v56, 0 }
  0x3e   : > { %10272 = vmatprep.subr.mxu1 %v403_v55  ;;  %852 = vmatpush2.msra.mxu0 %v11558_v2  ;;  %v306_v54 = vsel %vm305_vm10, %v242_v21, 0  ;;  %v304_v22 = vsel %vm303_vm11, %v241_v56, 0  ;;  %v11618_v56 = vld [vmem:[%s18254_s2 + $0xa0] sm:$0xff] }
  0x3f   : > { %10273 = vmatpush3.msra.mxu1 %v403_v55  ;;  %853 = vmatprep.subr.mxu0 %v18592_v1  ;;  %v11591_v55 = vsel %vm359_vm9, %v296_v19, 383  ;;  %v11608_v19 = vsel %vm365_vm12, %v302_v5, 383  ;;  %vm369_vm14 = vcmp.lt.s32.totalorder %v306_v54, 383  ;;  %vm367_vm15 = vcmp.lt.s32.totalorder %v304_v22, 383  ;;  %18603 = vst [vmem:[#allocation32_spill] sm:$0xff] %v11618_v56 }
  0x40   : > { %487 = vperm.xlu1 %10908, %v11518_v26   ;;  %1641 = vmatprep.subr.mxu1 %v18592_v1  ;;  %18598 = vst [vmem:[#allocation27_spill] sm:$0xff] %v11591_v55  ;;  %18601 = vst [vmem:[#allocation30_spill] sm:$0xff] %v11608_v19  ;;  %v11622_v21 = vsel %vm369_vm14, %v306_v54, 383  ;;  %v11624_v5 = vsel %vm367_vm15, %v304_v22, 383  ;;  %v11639_v54 = vld [vmem:[%s18254_s2 + $0x90] sm:$0xff]  ;;  %v11098_v22 = vmov 1  }
  0x41   : > { %484 = vperm.xlu0 %10907, %v11521_v41   ;;  %854 = vmatpush2.msra.mxu0 %v11570_v13  ;;  %18604 = vst [vmem:[#allocation33_spill] sm:$0xff] %v11622_v21  ;;  %18605 = vst [vmem:[#allocation34_spill] sm:$0xff] %v11624_v5 }
  0x42   : > { %855 = vmatprep.subr.mxu0 %v18592_v1  ;;  %18607 = vst [vmem:[#allocation36_spill] sm:$0xff] %v11639_v54 }
  0x43   : > { %856 = vmatpush2.msra.mxu0 %v11585_v43  ;;  %v11610_v43 = vsel %vm363_vm13, %v300_v51, 383  ;;  %v11631_v51 = vld [vmem:[%s18254_s2 + $0x98] sm:$0xff] }
  0x44   : > { %493 = vperm.xlu1 %10908, %v11546_v25   ;;  %857 = vmatprep.subr.mxu0 %v18592_v1  ;;  %18602 = vst [vmem:[#allocation31_spill] sm:$0xff] %v11610_v43  ;;  %18606 = vst [vmem:[#allocation35_spill] sm:$0xff] %v11631_v51 }
  0x45   : > { %490 = vperm.xlu0 %10907, %v11549_v14   ;;  %858 = vmatpush2.msra.mxu0 %v11598_v20 }
  0x46   : > { %859 = vmatprep.subr.mxu0 %v18592_v1 }
  0x47   : > { %860 = vmatpush2.msra.mxu0 %v11606_v27 }
  0x48   : > { %499 = vperm.xlu1 %10908, %v11573_v39   ;;  %861 = vmatprep.subr.mxu0 %v18592_v1 }
  0x49   : > { %496 = vperm.xlu0 %10907, %v11576_v40   ;;  %862 = vmatpush2.msra.mxu0 %v11618_v56  ;;  %v11647_v56 = vld [vmem:[%s18254_s2 + $0x88] sm:$0xff] }
  0x4a   : > { %863 = vmatprep.subr.mxu0 %v18592_v1  ;;  %18608 = vst [vmem:[#allocation37_spill] sm:$0xff] %v11647_v56 }
  0x4b   : > { %864 = vmatpush2.msra.mxu0 %v11631_v51 }
  0x4c   : > { %505 = vperm.xlu1 %10908, %v11589_v50   ;;  %865 = vmatprep.subr.mxu0 %v18592_v1 }
  0x4d   : > { %502 = vperm.xlu0 %10907, %v11591_v55   ;;  %866 = vmatpush2.msra.mxu0 %v11639_v54  ;;  %v11656_v54 = vld [vmem:[%s18254_s2 + $0x80] sm:$0xff] }
  0x4e   : > { %867 = vmatprep.subr.mxu0 %v18592_v1  ;;  %18609 = vst [vmem:[#allocation38_spill] sm:$0xff] %v11656_v54 }
  0x4f   : > { %868 = vmatpush2.msra.mxu0 %v11647_v56 }
  0x50   : > { %511 = vperm.xlu1 %10908, %v11608_v19   ;;  %869 = vmatprep.subr.mxu0 %v18592_v1 }
  0x51   : > { %508 = vperm.xlu0 %10907, %v11610_v43   ;;  %870 = vmatpush2.msra.mxu0 %v11656_v54 }
  0x52   : > { %10322 = vmatprep.subr.mxu0 %v11189_v8 }
  0x54   : > { %517 = vperm.xlu1 %10908, %v11622_v21  }
  0x55   : > { %514 = vperm.xlu0 %10907, %v11624_v5  }
  0x58   : > { %10910 = vset.pattern.permute.xlu1 %v11098_v22 }
  0x59   : > { %10909 = vset.pattern.permute.xlu0 %v11098_v22  ;;  %1261 = vperm.xlu1 %10910, %v11234_v34   ;;  %v419_v22 = vlaneseq }
  0x5a   : > { %1258 = vperm.xlu0 %10909, %v11221_v30  }
  0x5b   : > { %v11685_v54 = vand.u32 127, %v419_v22  ;;  %v18377_v22 = vmov 1.0  }
  0x5d   : > { %1264 = vperm.xlu1 %10910, %v11219_v29   ;;  %v11690_v56 = vadd.s32 128, %v11685_v54  ;;  %v11693_v51 = vadd.s32 256, %v11685_v54 }
  0x5e   : > { %1267 = vperm.xlu0 %10909, %v11232_v33  }
  0x5f   : > { %18610 = vst [vmem:[#allocation39_spill] sm:$0xff] %v11693_v51 }
  0x61   : > { %1270 = vperm.xlu1 %10910, %v11262_v49  }
  0x62   : > { %1273 = vperm.xlu0 %10909, %v11259_v48  }
  0x65   : > { %1276 = vperm.xlu1 %10910, %v11300_v61  }
  0x66   : > { %1279 = vperm.xlu0 %10909, %v11297_v60  }
  0x69   : > { %1282 = vperm.xlu1 %10910, %v11336_v17  }
  0x6a   : > { %1285 = vperm.xlu0 %10909, %v11333_v16  }
  0x6d   : > { %1288 = vperm.xlu1 %10910, %v11371_v31  }
  0x6e   : > { %1291 = vperm.xlu0 %10909, %v11368_v28  }
  0x71   : > { %1294 = vperm.xlu1 %10910, %v11404_v46  }
  0x72   : > { %1297 = vperm.xlu0 %10909, %v11401_v45  }
  0x75   : > { %1300 = vperm.xlu1 %10910, %v11433_v11  }
  0x76   : > { %1303 = vperm.xlu0 %10909, %v11430_v10  }
  0x79   : > { %1306 = vperm.xlu1 %10910, %v11463_v38  }
  0x7a   : > { %1309 = vperm.xlu0 %10909, %v11460_v36  }
  0x7d   : > { %1312 = vperm.xlu1 %10910, %v11491_v63  }
  0x7e   : > { %1315 = vperm.xlu0 %10909, %v11488_v62  }
  0x81   : > { %1318 = vperm.xlu1 %10910, %v11521_v41  }
  0x82   : > { %1321 = vperm.xlu0 %10909, %v11518_v26  }
  0x85   : > { %1324 = vperm.xlu1 %10910, %v11549_v14  }
  0x86   : > { %1327 = vperm.xlu0 %10909, %v11546_v25  }
  0x89   : > { %1330 = vperm.xlu1 %10910, %v11576_v40  }
  0x8a   : > { %1333 = vperm.xlu0 %10909, %v11573_v39  }
  0x8d   : > { %1336 = vperm.xlu1 %10910, %v11591_v55  }
  0x8e   : > { %1339 = vperm.xlu0 %10909, %v11589_v50  }
  0x91   : > { %1342 = vperm.xlu1 %10910, %v11610_v43  }
  0x92   : > { %1345 = vperm.xlu0 %10909, %v11608_v19  }
  0x93   : > { %v431_v27 = vpop.permute.xlu1 %430 }
  0x94   : > { %v425_v20 = vpop.permute.xlu0 %424  ;;  %vm527_vm6 = vcmp.eq.s32.totalorder %v11693_v51, %v431_v27  ;;  %vm526_vm7 = vcmp.eq.s32.totalorder %v11690_v56, %v431_v27  ;;  %vm525_vm10 = vcmp.eq.s32.totalorder %v11685_v54, %v431_v27 }
  0x95   : > { %vm520_vm0 = vcmp.eq.s32.totalorder %v11690_v56, %v425_v20  ;;  %vm521_vm1 = vcmp.eq.s32.totalorder %v11693_v51, %v425_v20  ;;  %vm519_vm2 = vcmp.eq.s32.totalorder %v11685_v54, %v425_v20  ;;  %1348 = vperm.xlu1 %10910, %v11624_v5   ;;  %v11100_v20 = vmov 2  }
  0x96   : > { %1351 = vperm.xlu0 %10909, %v11622_v21   ;;  %8416 = vmatprep.mubr.msk.f32.mxu0 %vm520_vm0, %v18377_v22 }
  0x97   : > { %10274 = vmatprep.mubr.msk.f32.mxu1 %vm521_vm1, %v18377_v22  ;;  %8417 = vmatmul.mubr.msk.f32.vlgmr.msra.gmra.mxu0 %vm519_vm2, %v18377_v22  ;;  %v434_v19 = vpop.permute.xlu1 %433 }
  0x98   : > { %v428_v50 = vpop.permute.xlu0 %427  ;;  %10323 = vmatpush3.msra.mxu0 %v11189_v8  ;;  %vm530_vm8 = vcmp.eq.s32.totalorder %v11693_v51, %v434_v19  ;;  %vm529_vm11 = vcmp.eq.s32.totalorder %v11690_v56, %v434_v19  ;;  %vm528_vm14 = vcmp.eq.s32.totalorder %v11685_v54, %v434_v19 }
  0x99   : > { %vm523_vm3 = vcmp.eq.s32.totalorder %v11690_v56, %v428_v50  ;;  %vm524_vm4 = vcmp.eq.s32.totalorder %v11693_v51, %v428_v50  ;;  %10911 = vset.pattern.permute.xlu1 %v11100_v20  ;;  %vm522_vm5 = vcmp.eq.s32.totalorder %v11685_v54, %v428_v50  ;;  %10324 = vmatprep.subr.mxu0 %v11270_v52 }
  0x9a   : > { %10912 = vset.pattern.permute.xlu0 %v11100_v20  ;;  %8418 = vmatprep.mubr.msk.f32.mxu0 %vm523_vm3, %v18377_v22  ;;  %v18613_v20 = vld [vmem:[#allocation20_spill] sm:$0xff] }
  0x9b   : > { %10275 = vmatmul.mubr.msk.f32.vlgmr.msra.gmra.mxu1 %vm524_vm4, %v18377_v22  ;;  %2092 = vperm.xlu1 %10911, %v11221_v30   ;;  %v11714_v21 = vpop.permute.xlu1 %439 }
  0x9c   : > { %1642 = vmatpush1.msra.mxu1 %v11144_v0  ;;  %v437_v5 = vpop.permute.xlu0 %436  ;;  %2095 = vperm.xlu0 %10912, %v11234_v34   ;;  %vm536_vm12 = vcmp.eq.s32.totalorder %v11693_v51, %v11714_v21  ;;  %vm535_vm3 = vcmp.eq.s32.totalorder %v11690_v56, %v11714_v21 }
  0x9d   : > { %8419 = vmatmul.mubr.msk.f32.gmra.mxu0 %vm522_vm5, %v18377_v22  ;;  %10277 = vmatprep.mubr.msk.f32.mxu1 %vm527_vm6, %v18377_v22  ;;  %vm533_vm9 = vcmp.eq.s32.totalorder %v11693_v51, %v437_v5  ;;  %vm532_vm15 = vcmp.eq.s32.totalorder %v11690_v56, %v437_v5  ;;  %vm531_vm2 = vcmp.eq.s32.totalorder %v11685_v54, %v437_v5 }
  0x9e   : > { %1643 = vmatprep.subr.mxu1 %v18592_v1  ;;  %8420 = vmatprep.mubr.msk.f32.mxu0 %vm526_vm7, %v18377_v22  ;;  %vm534_vm6 = vcmp.eq.s32.totalorder %v11685_v54, %v11714_v21  ;;  %v18611_v21 = vld [vmem:[#allocation17_spill] sm:$0xff] }
  0x9f   : > { %1644 = vmatpush1.msra.mxu1 %v11150_v3  ;;  %v11727_v0 = vpop.permute.xlu1 %445  ;;  %2098 = vperm.xlu1 %10911, %v11219_v29  }
  0xa0   : > { %1645 = vmatprep.subr.mxu1 %v18592_v1  ;;  %10278 = vmatmul.mubr.msk.f32.gmra.mxu1 %vm530_vm8, %v18377_v22  ;;  %v11729_v8 = vpop.permute.xlu0 %442  ;;  %vm542_vm0 = vcmp.eq.s32.totalorder %v11693_v51, %v11727_v0 }
  0xa1   : > { %1646 = vmatpush1.msra.mxu1 %v11159_v4  ;;  %2104 = vperm.xlu0 %10912, %v11262_v49   ;;  %vm539_vm13 = vcmp.eq.s32.totalorder %v11693_v51, %v11729_v8  ;;  %vm538_vm7 = vcmp.eq.s32.totalorder %v11690_v56, %v11729_v8 }
  0xa2   : > { %8421 = vmatmul.mubr.msk.f32.gmra.mxu0 %vm525_vm10, %v18377_v22  ;;  %10280 = vmatprep.mubr.msk.f32.mxu1 %vm533_vm9, %v18377_v22  ;;  %vm537_vm10 = vcmp.eq.s32.totalorder %v11685_v54, %v11729_v8 }
  0xa3   : > { %1647 = vmatprep.subr.mxu1 %v18592_v1  ;;  %8422 = vmatprep.mubr.msk.f32.mxu0 %vm529_vm11, %v18377_v22  ;;  %v11743_v3 = vpop.permute.xlu1 %451  ;;  %vm541_vm11 = vcmp.eq.s32.totalorder %v11690_v56, %v11727_v0 }
  0xa4   : > { %1648 = vmatpush1.msra.mxu1 %v11179_v6  ;;  %v11745_v4 = vpop.permute.xlu0 %448  ;;  %2101 = vperm.xlu1 %10911, %v11232_v33   ;;  %vm548_vm4 = vcmp.eq.s32.totalorder %v11693_v51, %v11743_v3 }
  0xa5   : > { %1649 = vmatprep.subr.mxu1 %v18592_v1  ;;  %10281 = vmatmul.mubr.msk.f32.gmra.mxu1 %vm536_vm12, %v18377_v22  ;;  %vm545_vm1 = vcmp.eq.s32.totalorder %v11693_v51, %v11745_v4 }
  0xa6   : > { %1650 = vmatpush1.msra.mxu1 %v11184_v7  ;;  %2110 = vperm.xlu0 %10912, %v11300_v61  }
  0xa7   : > { %8423 = vmatmul.mubr.msk.f32.gmra.mxu0 %vm528_vm14, %v18377_v22  ;;  %10283 = vmatprep.mubr.msk.f32.mxu1 %vm539_vm13, %v18377_v22  ;;  %v11759_v6 = vpop.permute.xlu1 %457  ;;  %vm540_vm14 = vcmp.eq.s32.totalorder %v11685_v54, %v11727_v0  ;;  %v18614_v0 = vld [vmem:[#allocation11_spill] sm:$0xff] }
  0xa8   : > { %1651 = vmatprep.subr.mxu1 %v18592_v1  ;;  %v11761_v50 = vpop.permute.xlu0 %454  ;;  %8424 = vmatprep.mubr.msk.f32.mxu0 %vm532_vm15, %v18377_v22  ;;  %vm554_vm8 = vcmp.eq.s32.totalorder %v11693_v51, %v11759_v6  ;;  %vm544_vm15 = vcmp.eq.s32.totalorder %v11690_v56, %v11745_v4 }
  0xa9   : > { %1652 = vmatpush1.msra.mxu1 %v11214_v23  ;;  %10325 = vmatpush3.msra.mxu0 %v11270_v52  ;;  %vm551_vm5 = vcmp.eq.s32.totalorder %v11693_v51, %v11761_v50 }
  0xaa   : > { %1653 = vmatprep.subr.mxu1 %v18592_v1  ;;  %10284 = vmatmul.mubr.msk.f32.gmra.mxu1 %vm542_vm0, %v18377_v22 }
  0xab   : > { %1654 = vmatpush1.msra.mxu1 %v11228_v32  ;;  %2107 = vperm.xlu1 %10911, %v11259_v48   ;;  %v11776_v7 = vpop.permute.xlu1 %463 }
  0xac   : > { %v11778_v23 = vpop.permute.xlu0 %460  ;;  %2116 = vperm.xlu0 %10912, %v11336_v17   ;;  %8425 = vmatmul.mubr.msk.f32.gmra.mxu0 %vm531_vm2, %v18377_v22  ;;  %vm560_vm12 = vcmp.eq.s32.totalorder %v11693_v51, %v11776_v7  ;;  %vm543_vm2 = vcmp.eq.s32.totalorder %v11685_v54, %v11745_v4  ;;  %v18615_v4 = vld [vmem:[#allocation22_spill] sm:$0xff] }
  0xad   : > { %10286 = vmatprep.mubr.msk.f32.mxu1 %vm545_vm1, %v18377_v22  ;;  %1655 = vmatprep.subr.mxu1 %v18592_v1  ;;  %vm557_vm9 = vcmp.eq.s32.totalorder %v11693_v51, %v11778_v23 }
  0xae   : > { %8426 = vmatprep.mubr.msk.f32.mxu0 %vm535_vm3, %v18377_v22  ;;  %1656 = vmatpush1.msra.mxu1 %v11246_v42  ;;  %vm547_vm3 = vcmp.eq.s32.totalorder %v11690_v56, %v11743_v3 }
  0xaf   : > { %1657 = vmatprep.subr.mxu1 %v18592_v1  ;;  %10287 = vmatmul.mubr.msk.f32.gmra.mxu1 %vm548_vm4, %v18377_v22  ;;  %v11794_v32 = vpop.permute.xlu1 %469 }
  0xb0   : > { %v11796_v52 = vpop.permute.xlu0 %466  ;;  %1658 = vmatpush1.msra.mxu1 %v11256_v47  ;;  %2113 = vperm.xlu1 %10911, %v11297_v60   ;;  %vm566_vm0 = vcmp.eq.s32.totalorder %v11693_v51, %v11794_v32 }
  0xb1   : > { %2122 = vperm.xlu0 %10912, %v11371_v31   ;;  %8427 = vmatmul.mubr.msk.f32.gmra.mxu0 %vm534_vm6, %v18377_v22  ;;  %vm563_vm13 = vcmp.eq.s32.totalorder %v11693_v51, %v11796_v52  ;;  %vm546_vm6 = vcmp.eq.s32.totalorder %v11685_v54, %v11743_v3 }
  0xb2   : > { %10289 = vmatprep.mubr.msk.f32.mxu1 %vm551_vm5, %v18377_v22  ;;  %1659 = vmatprep.subr.mxu1 %v18592_v1 }
  0xb3   : > { %10326 = vmatprep.subr.mxu0 %v11277_v53  ;;  %8428 = vmatprep.mubr.msk.f32.mxu0 %vm538_vm7, %v18377_v22  ;;  %v11810_v42 = vpop.permute.xlu1 %475  ;;  %vm550_vm7 = vcmp.eq.s32.totalorder %v11690_v56, %v11761_v50 }
  0xb4   : > { %v11812_v47 = vpop.permute.xlu0 %472  ;;  %1660 = vmatpush1.msra.mxu1 %v11285_v57  ;;  %10327 = vmatpush3.msra.mxu0 %v11277_v53  ;;  %vm572_vm4 = vcmp.eq.s32.totalorder %v11693_v51, %v11810_v42 }
  0xb5   : > { %1661 = vmatprep.subr.mxu1 %v18592_v1  ;;  %10290 = vmatmul.mubr.msk.f32.gmra.mxu1 %vm554_vm8, %v18377_v22  ;;  %vm569_vm1 = vcmp.eq.s32.totalorder %v11693_v51, %v11812_v47 }
  0xb6   : > { %1662 = vmatpush1.msra.mxu1 %v11311_v9  ;;  %2119 = vperm.xlu1 %10911, %v11333_v16  }
  0xb7   : > { %2128 = vperm.xlu0 %10912, %v11404_v46   ;;  %8429 = vmatmul.mubr.msk.f32.gmra.mxu0 %vm537_vm10, %v18377_v22  ;;  %v11828_v53 = vpop.permute.xlu1 %481  ;;  %vm549_vm10 = vcmp.eq.s32.totalorder %v11685_v54, %v11761_v50 }
  0xb8   : > { %v11830_v57 = vpop.permute.xlu0 %478  ;;  %10292 = vmatprep.mubr.msk.f32.mxu1 %vm557_vm9, %v18377_v22  ;;  %1663 = vmatprep.subr.mxu1 %v18592_v1  ;;  %vm578_vm8 = vcmp.eq.s32.totalorder %v11693_v51, %v11828_v53 }
  0xb9   : > { %8430 = vmatprep.mubr.msk.f32.mxu0 %vm541_vm11, %v18377_v22  ;;  %1664 = vmatpush1.msra.mxu1 %v11330_v15  ;;  %vm575_vm5 = vcmp.eq.s32.totalorder %v11693_v51, %v11830_v57  ;;  %vm553_vm11 = vcmp.eq.s32.totalorder %v11690_v56, %v11759_v6 }
  0xba   : > { %1665 = vmatprep.subr.mxu1 %v18592_v1  ;;  %10293 = vmatmul.mubr.msk.f32.gmra.mxu1 %vm560_vm12, %v18377_v22 }
  0xbb   : > { %1666 = vmatpush1.msra.mxu1 %v11355_v24  ;;  %2125 = vperm.xlu1 %10911, %v11368_v28   ;;  %v11848_v9 = vpop.permute.xlu1 %487 }
  0xbc   : > { %v11850_v15 = vpop.permute.xlu0 %484  ;;  %2134 = vperm.xlu0 %10912, %v11433_v11   ;;  %8431 = vmatmul.mubr.msk.f32.gmra.mxu0 %vm540_vm14, %v18377_v22  ;;  %vm584_vm12 = vcmp.eq.s32.totalorder %v11693_v51, %v11848_v9  ;;  %vm552_vm14 = vcmp.eq.s32.totalorder %v11685_v54, %v11759_v6 }
  0xbd   : > { %10295 = vmatprep.mubr.msk.f32.mxu1 %vm563_vm13, %v18377_v22  ;;  %1667 = vmatprep.subr.mxu1 %v18592_v1  ;;  %vm581_vm9 = vcmp.eq.s32.totalorder %v11693_v51, %v11850_v15 }
  0xbe   : > { %10328 = vmatprep.subr.mxu0 %v11294_v59  ;;  %8432 = vmatprep.mubr.msk.f32.mxu0 %vm544_vm15, %v18377_v22  ;;  %vm556_vm15 = vcmp.eq.s32.totalorder %v11690_v56, %v11778_v23 }
  0xbf   : > { %1668 = vmatpush1.msra.mxu1 %v11381_v37  ;;  %10329 = vmatpush3.msra.mxu0 %v11294_v59  ;;  %v11864_v24 = vpop.permute.xlu1 %493 }
  0xc0   : > { %v11866_v27 = vpop.permute.xlu0 %490  ;;  %1669 = vmatprep.subr.mxu1 %v18592_v1  ;;  %10296 = vmatmul.mubr.msk.f32.gmra.mxu1 %vm566_vm0, %v18377_v22  ;;  %vm590_vm0 = vcmp.eq.s32.totalorder %v11693_v51, %v11864_v24 }
  0xc1   : > { %1670 = vmatpush1.msra.mxu1 %v11398_v44  ;;  %2131 = vperm.xlu1 %10911, %v11401_v45   ;;  %vm587_vm13 = vcmp.eq.s32.totalorder %v11693_v51, %v11866_v27 }
  0xc2   : > { %2140 = vperm.xlu0 %10912, %v11463_v38   ;;  %8433 = vmatmul.mubr.msk.f32.gmra.mxu0 %vm543_vm2, %v18377_v22  ;;  %vm555_vm2 = vcmp.eq.s32.totalorder %v11685_v54, %v11778_v23 }
  0xc3   : > { %10298 = vmatprep.mubr.msk.f32.mxu1 %vm569_vm1, %v18377_v22  ;;  %1671 = vmatprep.subr.mxu1 %v18592_v1  ;;  %v11882_v59 = vpop.permute.xlu1 %499 }
  0xc4   : > { %v11884_v37 = vpop.permute.xlu0 %496  ;;  %8434 = vmatprep.mubr.msk.f32.mxu0 %vm547_vm3, %v18377_v22  ;;  %1672 = vmatpush1.msra.mxu1 %v11420_v58  ;;  %vm559_vm3 = vcmp.eq.s32.totalorder %v11690_v56, %v11776_v7 }
  0xc5   : > { %1673 = vmatprep.subr.mxu1 %v18592_v1  ;;  %10299 = vmatmul.mubr.msk.f32.gmra.mxu1 %vm572_vm4, %v18377_v22  ;;  %vm593_vm1 = vcmp.eq.s32.totalorder %v11693_v51, %v11884_v37  ;;  %vm596_vm4 = vcmp.eq.s32.totalorder %v11693_v51, %v11882_v59 }
  0xc6   : > { %1674 = vmatpush2.msra.mxu1 %v11442_v18  ;;  %2137 = vperm.xlu1 %10911, %v11430_v10  }
  0xc7   : > { %2146 = vperm.xlu0 %10912, %v11491_v63   ;;  %8435 = vmatmul.mubr.msk.f32.gmra.mxu0 %vm546_vm6, %v18377_v22  ;;  %v11900_v44 = vpop.permute.xlu1 %505  ;;  %vm558_vm6 = vcmp.eq.s32.totalorder %v11685_v54, %v11776_v7  ;;  %v18618_v7 = vld [vmem:[#allocation28_spill] sm:$0xff] }
  0xc8   : > { %v11902_v58 = vpop.permute.xlu0 %502  ;;  %10301 = vmatprep.mubr.msk.f32.mxu1 %vm575_vm5, %v18377_v22  ;;  %1675 = vmatprep.subr.mxu1 %v18592_v1 }
  0xc9   : > { %10330 = vmatprep.subr.mxu0 %v11321_v12  ;;  %8436 = vmatprep.mubr.msk.f32.mxu0 %vm550_vm7, %v18377_v22  ;;  %vm599_vm5 = vcmp.eq.s32.totalorder %v11693_v51, %v11902_v58  ;;  %vm562_vm7 = vcmp.eq.s32.totalorder %v11690_v56, %v11796_v52 }
  0xca   : > { %1676 = vmatpush2.msra.mxu1 %v11457_v35  ;;  %10331 = vmatpush3.msra.mxu0 %v11321_v12  ;;  %v18612_v12 = vld [vmem:[#allocation19_spill] sm:$0xff] }
  0xcb   : > { %1677 = vmatprep.subr.mxu1 %v18592_v1  ;;  %10302 = vmatmul.mubr.msk.f32.gmra.mxu1 %vm578_vm8, %v18377_v22  ;;  %v11918_v18 = vpop.permute.xlu1 %511  ;;  %vm602_vm8 = vcmp.eq.s32.totalorder %v11693_v51, %v11900_v44 }
  0xcc   : > { %v11920_v19 = vpop.permute.xlu0 %508  ;;  %1678 = vmatpush2.msra.mxu1 %v18611_v21  ;;  %2143 = vperm.xlu1 %10911, %v11460_v36   ;;  %v18617_v21 = vld [vmem:[#allocation12_spill] sm:$0xff] }
  0xcd   : > { %2152 = vperm.xlu0 %10912, %v11521_v41   ;;  %8437 = vmatmul.mubr.msk.f32.gmra.mxu0 %vm549_vm10, %v18377_v22  ;;  %vm561_vm10 = vcmp.eq.s32.totalorder %v11685_v54, %v11796_v52  ;;  %v18621_v52 = vld [vmem:[#allocation35_spill] sm:$0xff] }
  0xce   : > { %10304 = vmatprep.mubr.msk.f32.mxu1 %vm581_vm9, %v18377_v22  ;;  %1679 = vmatprep.subr.mxu1 %v18592_v1  ;;  %vm605_vm9 = vcmp.eq.s32.totalorder %v11693_v51, %v11920_v19 }
  0xcf   : > { %8438 = vmatprep.mubr.msk.f32.mxu0 %vm553_vm11, %v18377_v22  ;;  %1680 = vmatpush2.msra.mxu1 %v18612_v12  ;;  %v11936_v35 = vpop.permute.xlu1 %517  ;;  %vm565_vm11 = vcmp.eq.s32.totalorder %v11690_v56, %v11794_v32 }
  0xd0   : > { %v11938_v5 = vpop.permute.xlu0 %514  ;;  %1681 = vmatprep.subr.mxu1 %v18592_v1  ;;  %10305 = vmatmul.mubr.msk.f32.gmra.mxu1 %vm584_vm12, %v18377_v22  ;;  %vm608_vm12 = vcmp.eq.s32.totalorder %v11693_v51, %v11918_v18 }
  0xd1   : > { %1682 = vmatpush2.msra.mxu1 %v18613_v20  ;;  %2149 = vperm.xlu1 %10911, %v11488_v62  }
  0xd2   : > { %2158 = vperm.xlu0 %10912, %v11549_v14   ;;  %8439 = vmatmul.mubr.msk.f32.gmra.mxu0 %vm552_vm14, %v18377_v22  ;;  %vm564_vm14 = vcmp.eq.s32.totalorder %v11685_v54, %v11794_v32  ;;  %v18625_v32 = vld [vmem:[#allocation36_spill] sm:$0xff] }
  0xd3   : > { %10307 = vmatprep.mubr.msk.f32.mxu1 %vm587_vm13, %v18377_v22  ;;  %1683 = vmatprep.subr.mxu1 %v18592_v1  ;;  %vm611_vm13 = vcmp.eq.s32.totalorder %v11693_v51, %v11938_v5 }
  0xd4   : > { %10332 = vmatprep.subr.mxu0 %v18614_v0  ;;  %8440 = vmatprep.mubr.msk.f32.mxu0 %vm556_vm15, %v18377_v22  ;;  %v11956_v8 = vpop.permute.xlu1 %1261  ;;  %vm568_vm15 = vcmp.eq.s32.totalorder %v11690_v56, %v11812_v47 }
  0xd5   : > { %v11958_v3 = vpop.permute.xlu0 %1258  ;;  %1684 = vmatpush2.msra.mxu1 %v18615_v4  ;;  %10333 = vmatpush3.msra.mxu0 %v18614_v0  ;;  %v18619_v0 = vld [vmem:[#allocation29_spill] sm:$0xff] }
  0xd6   : > { %1685 = vmatprep.subr.mxu1 %v18592_v1  ;;  %10308 = vmatmul.mubr.msk.f32.gmra.mxu1 %vm590_vm0, %v18377_v22  ;;  %vm614_vm0 = vcmp.eq.s32.totalorder %v11693_v51, %v11936_v35  ;;  %v18629_v51 = vld [vmem:[#allocation33_spill] sm:$0xff] }
  0xd7   : > { %1686 = vmatpush2.msra.mxu1 %v11558_v2  ;;  %2155 = vperm.xlu1 %10911, %v11518_v26   ;;  %v18616_v2 = vld [vmem:[#allocation25_spill] sm:$0xff] }
  0xd8   : > { %2164 = vperm.xlu0 %10912, %v11576_v40   ;;  %8441 = vmatmul.mubr.msk.f32.gmra.mxu0 %vm555_vm2, %v18377_v22  ;;  %v11974_v6 = vpop.permute.xlu1 %1264  ;;  %v18626_v40 = vld [vmem:[#allocation37_spill] sm:$0xff]  ;;  %vm1354_vm2 = vcmp.eq.s32.totalorder %v11690_v56, %v11958_v3 }
  0xd9   : > { %v11976_v50 = vpop.permute.xlu0 %1267  ;;  %10310 = vmatprep.mubr.msk.f32.mxu1 %vm593_vm1, %v18377_v22  ;;  %1687 = vmatprep.subr.mxu1 %v18592_v1  ;;  %vm567_vm1 = vcmp.eq.s32.totalorder %v11685_v54, %v11812_v47 }
  0xda   : > { %8442 = vmatprep.mubr.msk.f32.mxu0 %vm559_vm3, %v18377_v22  ;;  %1688 = vmatpush2.msra.mxu1 %v11570_v13  ;;  %vm1353_vm3 = vcmp.eq.s32.totalorder %v11685_v54, %v11958_v3 }
  0xdb   : > { %1689 = vmatprep.subr.mxu1 %v18592_v1  ;;  %10311 = vmatmul.mubr.msk.f32.gmra.mxu1 %vm596_vm4, %v18377_v22  ;;  %vm571_vm4 = vcmp.eq.s32.totalorder %v11690_v56, %v11810_v42 }
  0xdc   : > { %1690 = vmatpush2.msra.mxu1 %v18616_v2  ;;  %2161 = vperm.xlu1 %10911, %v11546_v25   ;;  %v11994_v23 = vpop.permute.xlu1 %1270 }
  0xdd   : > { %v11996_v13 = vpop.permute.xlu0 %1273  ;;  %2170 = vperm.xlu0 %10912, %v11591_v55   ;;  %8443 = vmatmul.mubr.msk.f32.gmra.mxu0 %vm558_vm6, %v18377_v22  ;;  %vm1357_vm6 = vcmp.eq.s32.totalorder %v11690_v56, %v11956_v8 }
  0xde   : > { %10313 = vmatprep.mubr.msk.f32.mxu1 %vm599_vm5, %v18377_v22  ;;  %1691 = vmatprep.subr.mxu1 %v18592_v1  ;;  %vm570_vm5 = vcmp.eq.s32.totalorder %v11685_v54, %v11810_v42 }
  0xdf   : > { %10334 = vmatprep.subr.mxu0 %v18617_v21  ;;  %8444 = vmatprep.mubr.msk.f32.mxu0 %vm562_vm7, %v18377_v22  ;;  %vm574_vm7 = vcmp.eq.s32.totalorder %v11690_v56, %v11830_v57 }
  0xe0   : > { %1692 = vmatpush2.msra.mxu1 %v18618_v7  ;;  %10335 = vmatpush3.msra.mxu0 %v18617_v21  ;;  %v12010_v12 = vpop.permute.xlu1 %1276  ;;  %v18620_v21 = vld [vmem:[#allocation32_spill] sm:$0xff]  ;;  %v18622_v7 = vld [vmem:[#allocation26_spill] sm:$0xff] }
  0xe1   : > { %v12012_v20 = vpop.permute.xlu0 %1279  ;;  %1693 = vmatprep.subr.mxu1 %v18592_v1  ;;  %10314 = vmatmul.mubr.msk.f32.gmra.mxu1 %vm602_vm8, %v18377_v22  ;;  %vm1356_vm8 = vcmp.eq.s32.totalorder %v11685_v54, %v11956_v8 }
  0xe2   : > { %1694 = vmatpush2.msra.mxu1 %v18619_v0  ;;  %2167 = vperm.xlu1 %10911, %v11573_v39   ;;  %v18623_v0 = vld [vmem:[#allocation34_spill] sm:$0xff] }
  0xe3   : > { %2176 = vperm.xlu0 %10912, %v11610_v43   ;;  %8445 = vmatmul.mubr.msk.f32.gmra.mxu0 %vm561_vm10, %v18377_v22  ;;  %vm1360_vm10 = vcmp.eq.s32.totalorder %v11690_v56, %v11974_v6 }
  0xe4   : > { %10316 = vmatprep.mubr.msk.f32.mxu1 %vm605_vm9, %v18377_v22  ;;  %1695 = vmatprep.subr.mxu1 %v18592_v1  ;;  %v12028_v4 = vpop.permute.xlu1 %1282  ;;  %vm573_vm9 = vcmp.eq.s32.totalorder %v11685_v54, %v11830_v57 }
  0xe5   : > { %v12030_v2 = vpop.permute.xlu0 %1285  ;;  %8446 = vmatprep.mubr.msk.f32.mxu0 %vm565_vm11, %v18377_v22  ;;  %1696 = vmatpush2.msra.mxu1 %v18620_v21  ;;  %vm577_vm11 = vcmp.eq.s32.totalorder %v11690_v56, %v11828_v53 }
  0xe6   : > { %1697 = vmatprep.subr.mxu1 %v18592_v1  ;;  %10317 = vmatmul.mubr.msk.f32.gmra.mxu1 %vm608_vm12, %v18377_v22  ;;  %vm1359_vm12 = vcmp.eq.s32.totalorder %v11685_v54, %v11974_v6 }
  0xe7   : > { %1698 = vmatpush2.msra.mxu1 %v18621_v52  ;;  %2173 = vperm.xlu1 %10911, %v18622_v7   ;;  %v12057_v52 = vld [vmem:[%s18254_s2 + $0x140] sm:$0xff] }
  0xe8   : > { %2182 = vperm.xlu0 %10912, %v18623_v0   ;;  %8447 = vmatmul.mubr.msk.f32.gmra.mxu0 %vm564_vm14, %v18377_v22  ;;  %v12046_v21 = vpop.permute.xlu1 %1288  ;;  %18624 = vst [vmem:[#allocation17_spill] sm:$0xff] %v12057_v52  ;;  %v18627_v7 = vld [vmem:[#allocation30_spill] sm:$0xff]  ;;  %vm1363_vm14 = vcmp.eq.s32.totalorder %v11690_v56, %v11976_v50 }
  0xe9   : > { %v12048_v43 = vpop.permute.xlu0 %1291  ;;  %10319 = vmatprep.mubr.msk.f32.mxu1 %vm611_vm13, %v18377_v22  ;;  %1699 = vmatprep.subr.mxu1 %v18592_v1  ;;  %vm576_vm13 = vcmp.eq.s32.totalorder %v11685_v54, %v11828_v53  ;;  %v12160_v53 = vld [vmem:[%s18254_s2 + $0x130] sm:$0xff] }
  0xea   : > { %10336 = vmatprep.subr.mxu0 %v12057_v52  ;;  %8448 = vmatprep.mubr.msk.f32.mxu0 %vm568_vm15, %v18377_v22  ;;  %18632 = vst [vmem:[#allocation11_spill] sm:$0xff] %v12160_v53  ;;  %vm580_vm15 = vcmp.eq.s32.totalorder %v11690_v56, %v11850_v15 }
  0xeb   : > { %1700 = vmatpush2.msra.mxu1 %v18625_v32  ;;  %10337 = vmatpush3.msra.mxu0 %v12057_v52  ;;  %v11101_v32 = vmov 3  }
  0xec   : > { %1701 = vmatprep.subr.mxu1 %v18592_v1  ;;  %10320 = vmatmul.mubr.msk.f32.gmra.mxu1 %vm614_vm0, %v18377_v22  ;;  %v12067_v0 = vpop.permute.xlu1 %1294  ;;  %vm1362_vm0 = vcmp.eq.s32.totalorder %v11685_v54, %v11976_v50 }
  0xed   : > { %v12069_v55 = vpop.permute.xlu0 %1297  ;;  %1702 = vmatpush2.msra.mxu1 %v18626_v40  ;;  %2179 = vperm.xlu1 %10911, %v18627_v7   ;;  %v18628_v40 = vld [vmem:[#allocation38_spill] sm:$0xff] }
  0xee   : > { %10913 = vset.pattern.permute.xlu0 %v11101_v32  ;;  %8449 = vmatmul.mubr.msk.f32.gmra.mxu0 %vm567_vm1, %v18377_v22  ;;  %vm579_vm1 = vcmp.eq.s32.totalorder %v11685_v54, %v11850_v15 }
  0xef   : > { %1703 = vmatprep.subr.mxu1 %v18592_v1  ;;  %2926 = vperm.xlu0 %10913, %v11221_v30   ;;  %v10924_v30 = vld [vmem:[%s18254_s2 + $0x78] sm:$0xff] }
  0xf0   : > { %8450 = vmatprep.mubr.msk.f32.mxu0 %vm571_vm4, %v18377_v22  ;;  %1704 = vmatpush2.msra.mxu1 %v18628_v40  ;;  %v12086_v47 = vpop.permute.xlu1 %1300  ;;  %v12105_v40 = vld [vmem:[%s18254_s2 + $0x138] sm:$0xff]  ;;  %vm1365_vm4 = vcmp.eq.s32.totalorder %v11685_v54, %v11994_v23 }
  0xf1   : > { %v12088_v52 = vpop.permute.xlu0 %1303  ;;  %8608 = vmatprep.mubr.msk.f32.mxu1 %vm1354_vm2, %v18377_v22  ;;  %2475 = vmatprep.subr.mxu1 %v18592_v1  ;;  %18630 = vst [vmem:[#allocation19_spill] sm:$0xff] %v12105_v40  ;;  %vm1366_vm2 = vcmp.eq.s32.totalorder %v11690_v56, %v11994_v23 }
  0xf2   : > { %8609 = vmatmul.mubr.msk.f32.vlgmr.msra.gmra.mxu1 %vm1353_vm3, %v18377_v22  ;;  %2185 = vperm.xlu1 %10911, %v18629_v51   ;;  %vm583_vm3 = vcmp.eq.s32.totalorder %v11690_v56, %v11848_v9 }
  0xf3   : > { %2476 = vmatpush1.msra.mxu1 %v10924_v30  ;;  %8451 = vmatmul.mubr.msk.f32.gmra.mxu0 %vm570_vm5, %v18377_v22  ;;  %vm582_vm5 = vcmp.eq.s32.totalorder %v11685_v54, %v11848_v9  ;;  %v12211_v9 = vld [vmem:[%s18254_s2 + $0x128] sm:$0xff] }
  0xf4   : > { %10338 = vmatprep.subr.mxu0 %v12105_v40  ;;  %2935 = vperm.xlu0 %10913, %v11232_v33   ;;  %v12113_v30 = vpop.permute.xlu1 %1306  ;;  %v10926_v33 = vld [vmem:[%s18254_s2 + $0x70] sm:$0xff]  ;;  %18634 = vst [vmem:[#allocation25_spill] sm:$0xff] %v12211_v9 }
  0xf5   : > { %v12115_v42 = vpop.permute.xlu0 %1309  ;;  %8452 = vmatprep.mubr.msk.f32.mxu0 %vm574_vm7, %v18377_v22  ;;  %10339 = vmatpush3.msra.mxu0 %v12105_v40  ;;  %vm586_vm7 = vcmp.eq.s32.totalorder %v11690_v56, %v11866_v27 }
  0xf6   : > { %18631 = vst [vmem:[#allocation20_spill] sm:$0xff] %v12115_v42  ;;  %8610 = vmatprep.mubr.msk.f32.mxu1 %vm1357_vm6, %v18377_v22  ;;  %2477 = vmatprep.subr.mxu1 %v18592_v1  ;;  %vm1369_vm6 = vcmp.eq.s32.totalorder %v11690_v56, %v11996_v13 }
  0xf7   : > { %8611 = vmatmul.mubr.msk.f32.gmra.mxu1 %vm1356_vm8, %v18377_v22  ;;  %10914 = vset.pattern.permute.xlu1 %v11101_v32  ;;  %vm1368_vm8 = vcmp.eq.s32.totalorder %v11685_v54, %v11996_v13 }
  0xf8   : > { %2478 = vmatpush1.msra.mxu1 %v10926_v33  ;;  %8453 = vmatmul.mubr.msk.f32.gmra.mxu0 %vm573_vm9, %v18377_v22  ;;  %v12130_v40 = vpop.permute.xlu1 %1312  ;;  %v10927_v33 = vld [vmem:[%s18254_s2 + $0x68] sm:$0xff]  ;;  %vm585_vm9 = vcmp.eq.s32.totalorder %v11685_v54, %v11866_v27 }
  0xf9   : > { %v12132_v42 = vpop.permute.xlu0 %1315  ;;  %8612 = vmatprep.mubr.msk.f32.mxu1 %vm1360_vm10, %v18377_v22  ;;  %2929 = vperm.xlu1 %10914, %v11234_v34   ;;  %vm1372_vm10 = vcmp.eq.s32.totalorder %v11690_v56, %v12010_v12 }
  0xfa   : > { %2941 = vperm.xlu0 %10913, %v11259_v48   ;;  %8454 = vmatprep.mubr.msk.f32.mxu0 %vm577_vm11, %v18377_v22  ;;  %vm589_vm11 = vcmp.eq.s32.totalorder %v11690_v56, %v11864_v24 }
  0xfb   : > { %2479 = vmatprep.subr.mxu1 %v18592_v1  ;;  %8613 = vmatmul.mubr.msk.f32.gmra.mxu1 %vm1359_vm12, %v18377_v22  ;;  %vm1371_vm12 = vcmp.eq.s32.totalorder %v11685_v54, %v12010_v12 }
  0xfc   : > { %2480 = vmatpush1.msra.mxu1 %v10927_v33  ;;  %8455 = vmatmul.mubr.msk.f32.gmra.mxu0 %vm576_vm13, %v18377_v22  ;;  %v12152_v57 = vpop.permute.xlu1 %1318  ;;  %vm588_vm13 = vcmp.eq.s32.totalorder %v11685_v54, %v11864_v24  ;;  %v12268_v24 = vld [vmem:[%s18254_s2 + $0x120] sm:$0xff] }
  0xfd   : > { %v12154_v32 = vpop.permute.xlu0 %1321  ;;  %8614 = vmatprep.mubr.msk.f32.mxu1 %vm1363_vm14, %v18377_v22  ;;  %10340 = vmatprep.subr.mxu0 %v12160_v53  ;;  %vm1375_vm14 = vcmp.eq.s32.totalorder %v11690_v56, %v12012_v20 }
  0xfe   : > { %2932 = vperm.xlu1 %10914, %v11219_v29   ;;  %10341 = vmatpush3.msra.mxu0 %v12160_v53 }
  0xff   : > { %2947 = vperm.xlu0 %10913, %v11297_v60   ;;  %8456 = vmatprep.mubr.msk.f32.mxu0 %vm580_vm15, %v18377_v22  ;;  %v10929_v60 = vld [vmem:[%s18254_s2 + $0x60] sm:$0xff]  ;;  %vm592_vm15 = vcmp.eq.s32.totalorder %v11690_v56, %v11884_v37 }
 0x100   : > { %2481 = vmatprep.subr.mxu1 %v18592_v1  ;;  %8615 = vmatmul.mubr.msk.f32.gmra.mxu1 %vm1362_vm0, %v18377_v22  ;;  %v12175_v33 = vpop.permute.xlu1 %1324  ;;  %vm1374_vm0 = vcmp.eq.s32.totalorder %v11685_v54, %v12012_v20 }
 0x101   : > { %v12177_v53 = vpop.permute.xlu0 %1327  ;;  %2482 = vmatpush1.msra.mxu1 %v10929_v60  ;;  %8457 = vmatmul.mubr.msk.f32.gmra.mxu0 %vm579_vm1, %v18377_v22  ;;  %vm591_vm1 = vcmp.eq.s32.totalorder %v11685_v54, %v11884_v37 }
 0x102   : > { %8616 = vmatprep.mubr.msk.f32.mxu1 %vm1366_vm2, %v18377_v22  ;;  %2938 = vperm.xlu1 %10914, %v11262_v49   ;;  %vm1378_vm2 = vcmp.eq.s32.totalorder %v11690_v56, %v12028_v4 }
 0x103   : > { %2953 = vperm.xlu0 %10913, %v11333_v16   ;;  %8458 = vmatprep.mubr.msk.f32.mxu0 %vm583_vm3, %v18377_v22  ;;  %v10930_v16 = vld [vmem:[%s18254_s2 + $0x58] sm:$0xff]  ;;  %vm595_vm3 = vcmp.eq.s32.totalorder %v11690_v56, %v11882_v59 }
 0x104   : > { %2483 = vmatprep.subr.mxu1 %v18592_v1  ;;  %8617 = vmatmul.mubr.msk.f32.gmra.mxu1 %vm1365_vm4, %v18377_v22  ;;  %v12197_v60 = vpop.permute.xlu1 %1330  ;;  %vm1377_vm4 = vcmp.eq.s32.totalorder %v11685_v54, %v12028_v4 }
 0x105   : > { %v12199_v15 = vpop.permute.xlu0 %1333  ;;  %2484 = vmatpush1.msra.mxu1 %v10930_v16  ;;  %8459 = vmatmul.mubr.msk.f32.gmra.mxu0 %vm582_vm5, %v18377_v22  ;;  %vm594_vm5 = vcmp.eq.s32.totalorder %v11685_v54, %v11882_v59  ;;  %v12325_v59 = vld [vmem:[%s18254_s2 + $0x118] sm:$0xff] }
 0x106   : > { %18633 = vst [vmem:[#allocation22_spill] sm:$0xff] %v12199_v15  ;;  %8618 = vmatprep.mubr.msk.f32.mxu1 %vm1369_vm6, %v18377_v22  ;;  %10342 = vmatprep.subr.mxu0 %v12211_v9  ;;  %vm1381_vm6 = vcmp.eq.s32.totalorder %v11690_v56, %v12030_v2 }
 0x107   : > { %2944 = vperm.xlu1 %10914, %v11300_v61   ;;  %10343 = vmatpush3.msra.mxu0 %v12211_v9  ;;  %v12233_v9 = vld [vmem:[%s18254_s2 + $0x50] sm:$0xff] }
 0x108   : > { %2959 = vperm.xlu0 %10913, %v11368_v28   ;;  %8460 = vmatprep.mubr.msk.f32.mxu0 %vm586_vm7, %v18377_v22  ;;  %v12222_v16 = vpop.permute.xlu1 %1336  ;;  %18636 = vst [vmem:[#allocation28_spill] sm:$0xff] %v12233_v9  ;;  %vm598_vm7 = vcmp.eq.s32.totalorder %v11690_v56, %v11902_v58 }
 0x109   : > { %v12224_v15 = vpop.permute.xlu0 %1339  ;;  %2485 = vmatprep.subr.mxu1 %v18592_v1  ;;  %8619 = vmatmul.mubr.msk.f32.gmra.mxu1 %vm1368_vm8, %v18377_v22  ;;  %vm1380_vm8 = vcmp.eq.s32.totalorder %v11685_v54, %v12030_v2 }
 0x10a   : > { %18635 = vst [vmem:[#allocation12_spill] sm:$0xff] %v12224_v15  ;;  %2486 = vmatpush1.msra.mxu1 %v12233_v9  ;;  %8461 = vmatmul.mubr.msk.f32.gmra.mxu0 %vm585_vm9, %v18377_v22  ;;  %v12258_v15 = vld [vmem:[%s18254_s2 + $0x48] sm:$0xff]  ;;  %vm597_vm9 = vcmp.eq.s32.totalorder %v11685_v54, %v11902_v58 }
 0x10b   : > { %8620 = vmatprep.mubr.msk.f32.mxu1 %vm1372_vm10, %v18377_v22  ;;  %2950 = vperm.xlu1 %10914, %v11336_v17   ;;  %18638 = vst [vmem:[#allocation32_spill] sm:$0xff] %v12258_v15  ;;  %vm1384_vm10 = vcmp.eq.s32.totalorder %v11690_v56, %v12046_v21  ;;  %v12368_v58 = vld [vmem:[%s18254_s2 + $0x28] sm:$0xff] }
 0x10c   : > { %2965 = vperm.xlu0 %10913, %v11401_v45   ;;  %8462 = vmatprep.mubr.msk.f32.mxu0 %vm589_vm11, %v18377_v22  ;;  %v12247_v27 = vpop.permute.xlu1 %1342  ;;  %vm601_vm11 = vcmp.eq.s32.totalorder %v11690_v56, %v11900_v44  ;;  %18647 = vst [vmem:[#allocation44_spill] sm:$0xff] %v12368_v58 }
 0x10d   : > { %2487 = vmatprep.subr.mxu1 %v18592_v1  ;;  %8621 = vmatmul.mubr.msk.f32.gmra.mxu1 %vm1371_vm12, %v18377_v22  ;;  %v12253_v9 = vpop.permute.xlu0 %1345  ;;  %vm1383_vm12 = vcmp.eq.s32.totalorder %v11685_v54, %v12046_v21 }
 0x10e   : > { %18637 = vst [vmem:[#allocation29_spill] sm:$0xff] %v12253_v9  ;;  %2488 = vmatpush1.msra.mxu1 %v12258_v15  ;;  %8463 = vmatmul.mubr.msk.f32.gmra.mxu0 %vm588_vm13, %v18377_v22  ;;  %v12288_v9 = vld [vmem:[%s18254_s2 + $0x40] sm:$0xff]  ;;  %vm600_vm13 = vcmp.eq.s32.totalorder %v11685_v54, %v11900_v44  ;;  %v12380_v44 = vld [vmem:[%s18254_s2 + $0x110] sm:$0xff] }
 0x10f   : > { %8622 = vmatprep.mubr.msk.f32.mxu1 %vm1375_vm14, %v18377_v22  ;;  %10344 = vmatprep.subr.mxu0 %v12268_v24  ;;  %18640 = vst [vmem:[#allocation36_spill] sm:$0xff] %v12288_v9  ;;  %vm1387_vm14 = vcmp.eq.s32.totalorder %v11690_v56, %v12048_v43 }
 0x110   : > { %2956 = vperm.xlu1 %10914, %v11371_v31   ;;  %10345 = vmatpush3.msra.mxu0 %v12268_v24  ;;  %v12275_v15 = vpop.permute.xlu1 %1348 }
 0x111   : > { %18639 = vst [vmem:[#allocation35_spill] sm:$0xff] %v12275_v15  ;;  %2971 = vperm.xlu0 %10913, %v11430_v10   ;;  %8464 = vmatprep.mubr.msk.f32.mxu0 %vm592_vm15, %v18377_v22  ;;  %v12294_v15 = vpop.permute.xlu0 %1351  ;;  %vm604_vm15 = vcmp.eq.s32.totalorder %v11690_v56, %v11920_v19 }
 0x112   : > { %2489 = vmatprep.subr.mxu1 %v18592_v1  ;;  %8623 = vmatmul.mubr.msk.f32.gmra.mxu1 %vm1374_vm0, %v18377_v22  ;;  %18641 = vst [vmem:[#allocation37_spill] sm:$0xff] %v12294_v15  ;;  %vm1386_vm0 = vcmp.eq.s32.totalorder %v11685_v54, %v12048_v43 }
 0x113   : > { %2490 = vmatpush1.msra.mxu1 %v12288_v9  ;;  %8465 = vmatmul.mubr.msk.f32.gmra.mxu0 %vm591_vm1, %v18377_v22  ;;  %v12313_v9 = vld [vmem:[%s18254_s2 + $0x38] sm:$0xff]  ;;  %vm603_vm1 = vcmp.eq.s32.totalorder %v11685_v54, %v11920_v19 }
 0x114   : > { %8624 = vmatprep.mubr.msk.f32.mxu1 %vm1378_vm2, %v18377_v22  ;;  %2962 = vperm.xlu1 %10914, %v11404_v46   ;;  %18643 = vst [vmem:[#allocation40_spill] sm:$0xff] %v12313_v9  ;;  %vm1390_vm2 = vcmp.eq.s32.totalorder %v11690_v56, %v12067_v0 }
 0x115   : > { %2977 = vperm.xlu0 %10913, %v11460_v36   ;;  %8466 = vmatprep.mubr.msk.f32.mxu0 %vm595_vm3, %v18377_v22  ;;  %vm607_vm3 = vcmp.eq.s32.totalorder %v11690_v56, %v11918_v18 }
 0x116   : > { %2491 = vmatprep.subr.mxu1 %v18592_v1  ;;  %8625 = vmatmul.mubr.msk.f32.gmra.mxu1 %vm1377_vm4, %v18377_v22  ;;  %v12308_v37 = vpop.permute.xlu1 %2092  ;;  %vm1389_vm4 = vcmp.eq.s32.totalorder %v11685_v54, %v12067_v0 }
 0x117   : > { %18642 = vst [vmem:[#allocation38_spill] sm:$0xff] %v12308_v37  ;;  %2492 = vmatpush1.msra.mxu1 %v12313_v9  ;;  %8467 = vmatmul.mubr.msk.f32.gmra.mxu0 %vm594_vm5, %v18377_v22  ;;  %v12319_v15 = vpop.permute.xlu0 %2095  ;;  %vm606_vm5 = vcmp.eq.s32.totalorder %v11685_v54, %v11918_v18 }
 0x118   : > { %18644 = vst [vmem:[#allocation41_spill] sm:$0xff] %v12319_v15  ;;  %8626 = vmatprep.mubr.msk.f32.mxu1 %vm1381_vm6, %v18377_v22  ;;  %10346 = vmatprep.subr.mxu0 %v12325_v59  ;;  %v12345_v15 = vld [vmem:[%s18254_s2 + $0x30] sm:$0xff]  ;;  %vm1393_vm6 = vcmp.eq.s32.totalorder %v11690_v56, %v12069_v55 }
 0x119   : > { %2968 = vperm.xlu1 %10914, %v11433_v11   ;;  %10347 = vmatpush3.msra.mxu0 %v12325_v59  ;;  %18645 = vst [vmem:[#allocation42_spill] sm:$0xff] %v12345_v15 }
 0x11a   : > { %2983 = vperm.xlu0 %10913, %v11488_v62   ;;  %8468 = vmatprep.mubr.msk.f32.mxu0 %vm598_vm7, %v18377_v22  ;;  %v12340_v9 = vpop.permute.xlu1 %2098  ;;  %vm610_vm7 = vcmp.eq.s32.totalorder %v11690_v56, %v11938_v5 }
 0x11b   : > { %2493 = vmatprep.subr.mxu1 %v18592_v1  ;;  %8627 = vmatmul.mubr.msk.f32.gmra.mxu1 %vm1380_vm8, %v18377_v22  ;;  %vm1392_vm8 = vcmp.eq.s32.totalorder %v11685_v54, %v12069_v55 }
 0x11c   : > { %2494 = vmatpush1.msra.mxu1 %v12345_v15  ;;  %8469 = vmatmul.mubr.msk.f32.gmra.mxu0 %vm597_vm9, %v18377_v22  ;;  %v12351_v37 = vpop.permute.xlu0 %2104  ;;  %vm609_vm9 = vcmp.eq.s32.totalorder %v11685_v54, %v11938_v5 }
 0x11d   : > { %18646 = vst [vmem:[#allocation43_spill] sm:$0xff] %v12351_v37  ;;  %8628 = vmatprep.mubr.msk.f32.mxu1 %vm1384_vm10, %v18377_v22  ;;  %2974 = vperm.xlu1 %10914, %v11463_v38   ;;  %vm1396_vm10 = vcmp.eq.s32.totalorder %v11690_v56, %v12086_v47 }
 0x11e   : > { %2989 = vperm.xlu0 %10913, %v11518_v26   ;;  %8470 = vmatprep.mubr.msk.f32.mxu0 %vm601_vm11, %v18377_v22  ;;  %vm613_vm11 = vcmp.eq.s32.totalorder %v11690_v56, %v11936_v35 }
 0x11f   : > { %2495 = vmatprep.subr.mxu1 %v18592_v1  ;;  %8629 = vmatmul.mubr.msk.f32.gmra.mxu1 %vm1383_vm12, %v18377_v22  ;;  %v12374_v15 = vpop.permute.xlu1 %2101  ;;  %vm1395_vm12 = vcmp.eq.s32.totalorder %v11685_v54, %v12086_v47 }
 0x120   : > { %2496 = vmatpush1.msra.mxu1 %v12368_v58  ;;  %8471 = vmatmul.mubr.msk.f32.gmra.mxu0 %vm600_vm13, %v18377_v22  ;;  %18648 = vst [vmem:[#allocation45_spill] sm:$0xff] %v12374_v15  ;;  %v12400_v58 = vld [vmem:[%s18254_s2 + $0x20] sm:$0xff]  ;;  %vm612_vm13 = vcmp.eq.s32.totalorder %v11685_v54, %v11936_v35  ;;  %v18667_v15 = vld [vmem:[#allocation31_spill] sm:$0xff] }
 0x121   : > { %8630 = vmatprep.mubr.msk.f32.mxu1 %vm1387_vm14, %v18377_v22  ;;  %10348 = vmatprep.subr.mxu0 %v12380_v44  ;;  %v12383_v37 = vpop.permute.xlu0 %2110  ;;  %18650 = vst [vmem:[#allocation47_spill] sm:$0xff] %v12400_v58  ;;  %vm1399_vm14 = vcmp.eq.s32.totalorder %v11690_v56, %v12088_v52  ;;  %v12492_v35 = vld [vmem:[%s18254_s2 + $0x100] sm:$0xff] }
 0x122   : > { %18649 = vst [vmem:[#allocation46_spill] sm:$0xff] %v12383_v37  ;;  %2980 = vperm.xlu1 %10914, %v11491_v63   ;;  %10349 = vmatpush3.msra.mxu0 %v12380_v44  ;;  %v12425_v37 = vld [vmem:[%s18254_s2 + $0x18] sm:$0xff] }
 0x123   : > { %2995 = vperm.xlu0 %10913, %v11546_v25   ;;  %8472 = vmatprep.mubr.msk.f32.mxu0 %vm604_vm15, %v18377_v22  ;;  %18653 = vst [vmem:[#allocation50_spill] sm:$0xff] %v12425_v37 }
 0x124   : > { %2497 = vmatprep.subr.mxu1 %v18592_v1  ;;  %8631 = vmatmul.mubr.msk.f32.gmra.mxu1 %vm1386_vm0, %v18377_v22  ;;  %vm1398_vm0 = vcmp.eq.s32.totalorder %v11685_v54, %v12088_v52 }
 0x125   : > { %2498 = vmatpush1.msra.mxu1 %v12400_v58  ;;  %8473 = vmatmul.mubr.msk.f32.gmra.mxu0 %vm603_vm1, %v18377_v22  ;;  %vm1402_vm1 = vcmp.eq.s32.totalorder %v11690_v56, %v12113_v30 }
 0x126   : > { %8632 = vmatprep.mubr.msk.f32.mxu1 %vm1390_vm2, %v18377_v22  ;;  %2986 = vperm.xlu1 %10914, %v11521_v41   ;;  %v12410_v19 = vpop.permute.xlu1 %2107 }
 0x127   : > { %18651 = vst [vmem:[#allocation48_spill] sm:$0xff] %v12410_v19  ;;  %3001 = vperm.xlu0 %10913, %v11573_v39   ;;  %8474 = vmatprep.mubr.msk.f32.mxu0 %vm607_vm3, %v18377_v22  ;;  %v12416_v58 = vpop.permute.xlu0 %2116 }
 0x128   : > { %18652 = vst [vmem:[#allocation49_spill] sm:$0xff] %v12416_v58  ;;  %2499 = vmatprep.subr.mxu1 %v18592_v1  ;;  %8633 = vmatmul.mubr.msk.f32.gmra.mxu1 %vm1389_vm4, %v18377_v22  ;;  %v12435_v58 = vld [vmem:[%s18254_s2 + $0x108] sm:$0xff]  ;;  %vm1401_vm4 = vcmp.eq.s32.totalorder %v11685_v54, %v12113_v30 }
 0x129   : > { %2500 = vmatpush1.msra.mxu1 %v12425_v37  ;;  %8475 = vmatmul.mubr.msk.f32.gmra.mxu0 %vm606_vm5, %v18377_v22  ;;  %v18655_v37 = vld [vmem:[#allocation26_spill] sm:$0xff] }
 0x12a   : > { %8634 = vmatprep.mubr.msk.f32.mxu1 %vm1393_vm6, %v18377_v22  ;;  %10350 = vmatprep.subr.mxu0 %v12435_v58 }
 0x12b   : > { %2992 = vperm.xlu1 %10914, %v11549_v14   ;;  %10351 = vmatpush3.msra.mxu0 %v12435_v58  ;;  %v12442_v18 = vpop.permute.xlu1 %2113 }
 0x12c   : > { %18654 = vst [vmem:[#allocation51_spill] sm:$0xff] %v12442_v18  ;;  %3007 = vperm.xlu0 %10913, %v18655_v37   ;;  %8476 = vmatprep.mubr.msk.f32.mxu0 %vm610_vm7, %v18377_v22  ;;  %v12448_v19 = vpop.permute.xlu0 %2122  ;;  %v12457_v18 = vld [vmem:[%s18254_s2 + $0x10] sm:$0xff] }
 0x12d   : > { %18656 = vst [vmem:[#allocation52_spill] sm:$0xff] %v12448_v19  ;;  %2501 = vmatprep.subr.mxu1 %v18592_v1  ;;  %8635 = vmatmul.mubr.msk.f32.gmra.mxu1 %vm1392_vm8, %v18377_v22  ;;  %18657 = vst [vmem:[#allocation53_spill] sm:$0xff] %v12457_v18  ;;  %v18658_v19 = vld [vmem:[#allocation24_spill] sm:$0xff] }
 0x12e   : > { %2502 = vmatpush1.msra.mxu1 %v12457_v18  ;;  %8477 = vmatmul.mubr.msk.f32.gmra.mxu0 %vm609_vm9, %v18377_v22  ;;  %v12480_v18 = vld [vmem:[%s18254_s2 + $0x8] sm:$0xff]  ;;  %vm1408_vm9 = vcmp.eq.s32.totalorder %v11690_v56, %v12130_v40 }
 0x12f   : > { %8636 = vmatprep.mubr.msk.f32.mxu1 %vm1396_vm10, %v18377_v22  ;;  %2998 = vperm.xlu1 %10914, %v18658_v19   ;;  %18660 = vst [vmem:[#allocation54_spill] sm:$0xff] %v12480_v18 }
 0x130   : > { %3013 = vperm.xlu0 %10913, %v18627_v7   ;;  %8478 = vmatprep.mubr.msk.f32.mxu0 %vm613_vm11, %v18377_v22 }
 0x131   : > { %2503 = vmatprep.subr.mxu1 %v18592_v1  ;;  %8637 = vmatmul.mubr.msk.f32.gmra.mxu1 %vm1395_vm12, %v18377_v22  ;;  %v12475_v5 = vpop.permute.xlu1 %2119  ;;  %vm1407_vm12 = vcmp.eq.s32.totalorder %v11685_v54, %v12130_v40 }
 0x132   : > { %18659 = vst [vmem:[#allocation24_spill] sm:$0xff] %v12475_v5  ;;  %2504 = vmatpush1.msra.mxu1 %v12480_v18  ;;  %8479 = vmatmul.mubr.msk.f32.gmra.mxu0 %vm612_vm13, %v18377_v22  ;;  %v12486_v7 = vpop.permute.xlu0 %2128  ;;  %v18662_v5 = vld [vmem:[#allocation27_spill] sm:$0xff]  ;;  %vm1411_vm13 = vcmp.eq.s32.totalorder %v11690_v56, %v12132_v42 }
 0x133   : > { %18661 = vst [vmem:[#allocation55_spill] sm:$0xff] %v12486_v7  ;;  %8638 = vmatprep.mubr.msk.f32.mxu1 %vm1399_vm14, %v18377_v22  ;;  %10352 = vmatprep.subr.mxu0 %v12492_v35  ;;  %v18663_v18 = vld [vmem:[#allocation39_spill] sm:$0xff] }
 0x134   : > { %3004 = vperm.xlu1 %10914, %v18662_v5   ;;  %10353 = vmatpush3.msra.mxu0 %v12492_v35  ;;  %vm1355_vm15 = vcmp.eq.s32.totalorder %v18663_v18, %v11958_v3  ;;  %vm1358_vm2 = vcmp.eq.s32.totalorder %v18663_v18, %v11956_v8  ;;  %v12514_v3 = vld [vmem:[%s18254_s2] sm:$0xff]  ;;  %vm1361_vm3 = vcmp.eq.s32.totalorder %v18663_v18, %v11974_v6  ;;  %v18668_v8 = vld [vmem:[#allocation20_spill] sm:$0xff]  ;;  %v12535_v6 = vld [vmem:[%s18254_s2 + $0x178] sm:$0xff] }
 0x135   : > { %3019 = vperm.xlu0 %10913, %v18629_v51   ;;  %10354 = vmatprep.mubr.msk.f32.mxu0 %vm1355_vm15, %v18377_v22  ;;  %18665 = vst [vmem:[#allocation56_spill] sm:$0xff] %v12514_v3  ;;  %vm1405_vm5 = vcmp.eq.s32.totalorder %v11690_v56, %v18668_v8  ;;  %vm1364_vm6 = vcmp.eq.s32.totalorder %v18663_v18, %v11976_v50  ;;  %v12567_v50 = vld [vmem:[%s18254_s2 + $0x170] sm:$0xff] }
 0x136   : > { %2505 = vmatprep.subr.mxu1 %v18592_v1  ;;  %8639 = vmatmul.mubr.msk.f32.gmra.mxu1 %vm1398_vm0, %v18377_v22  ;;  %v12507_v7 = vpop.permute.xlu1 %2125  ;;  %vm1367_vm7 = vcmp.eq.s32.totalorder %v18663_v18, %v11994_v23  ;;  %vm1404_vm8 = vcmp.eq.s32.totalorder %v11685_v54, %v18668_v8  ;;  %v12573_v23 = vld [vmem:[%s18254_s2 + $0xf0] sm:$0xff]  ;;  %vm1370_vm10 = vcmp.eq.s32.totalorder %v18663_v18, %v11996_v13  ;;  %v12599_v13 = vld [vmem:[%s18254_s2 + $0xe8] sm:$0xff] }
 0x137   : > { %18664 = vst [vmem:[#allocation39_spill] sm:$0xff] %v12507_v7  ;;  %2506 = vmatpush1.msra.mxu1 %v12514_v3  ;;  %8640 = vmatprep.mubr.msk.f32.mxu1 %vm1402_vm1, %v18377_v22  ;;  %v12518_v51 = vpop.permute.xlu0 %2134  ;;  %v11102_v7 = vmov 4   ;;  %v12541_v3 = vld [vmem:[%s18254_s2 + $0xf8] sm:$0xff]  ;;  %18672 = vst [vmem:[#allocation59_spill] sm:$0xff] %v12573_v23  ;;  %vm1373_vm11 = vcmp.eq.s32.totalorder %v18663_v18, %v12010_v12  ;;  %vm1376_vm14 = vcmp.eq.s32.totalorder %v18663_v18, %v12012_v20  ;;  %v12609_v12 = vld [vmem:[%s18254_s2 + $0x168] sm:$0xff] }
 0x138   : > { %18666 = vst [vmem:[#allocation57_spill] sm:$0xff] %v12518_v51  ;;  %10355 = vmatmul.mubr.msk.f32.vlgmr.msra.gmra.mxu0 %vm1358_vm2, %v18377_v22  ;;  %3010 = vperm.xlu1 %10914, %v18667_v15   ;;  %18669 = vst [vmem:[#allocation20_spill] sm:$0xff] %v12541_v3  ;;  %vm1379_vm15 = vcmp.eq.s32.totalorder %v18663_v18, %v12028_v4  ;;  %vm1410_vm0 = vcmp.eq.s32.totalorder %v11685_v54, %v12132_v42  ;;  %v12631_v20 = vld [vmem:[%s18254_s2 + $0xe0] sm:$0xff] }
 0x139   : > { %10916 = vset.pattern.permute.xlu0 %v11102_v7  ;;  %10357 = vmatprep.mubr.msk.f32.mxu0 %vm1361_vm3, %v18377_v22  ;;  %18674 = vst [vmem:[#allocation60_spill] sm:$0xff] %v12599_v13  ;;  %vm1414_vm1 = vcmp.eq.s32.totalorder %v11690_v56, %v12152_v57  ;;  %18676 = vst [vmem:[#allocation62_spill] sm:$0xff] %v12631_v20  ;;  %vm1382_vm2 = vcmp.eq.s32.totalorder %v18663_v18, %v12030_v2  ;;  %v12641_v4 = vld [vmem:[%s18254_s2 + $0x160] sm:$0xff]  ;;  %v18678_v2 = vld [vmem:[#allocation3_spill] sm:$0xff] }
 0x13a   : > { %3763 = vperm.xlu0 %10916, %v11234_v34   ;;  %2507 = vmatprep.subr.mxu1 %v18592_v1  ;;  %v18670_v34 = vld [vmem:[#allocation34_spill] sm:$0xff]  ;;  %vm1385_vm3 = vcmp.eq.s32.totalorder %v18663_v18, %v12046_v21  ;;  %v12663_v21 = vld [vmem:[%s18254_s2 + $0xd8] sm:$0xff] }
 0x13b   : > { %8641 = vmatmul.mubr.msk.f32.gmra.mxu1 %vm1401_vm4, %v18377_v22  ;;  %10402 = vmatprep.subr.mxu0 %v12535_v6  ;;  %vm1413_vm4 = vcmp.eq.s32.totalorder %v11685_v54, %v12152_v57  ;;  %18679 = vst [vmem:[#allocation64_spill] sm:$0xff] %v12663_v21 }
 0x13c   : > { %2508 = vmatpush2.msra.mxu1 %v12541_v3  ;;  %8642 = vmatprep.mubr.msk.f32.mxu1 %vm1405_vm5, %v18377_v22  ;;  %v12547_v51 = vpop.permute.xlu1 %2131  ;;  %vm1417_vm5 = vcmp.eq.s32.totalorder %v11690_v56, %v12154_v32 }
 0x13d   : > { %10358 = vmatmul.mubr.msk.f32.gmra.mxu0 %vm1364_vm6, %v18377_v22  ;;  %3016 = vperm.xlu1 %10914, %v18670_v34   ;;  %v12553_v37 = vpop.permute.xlu0 %2140  ;;  %vm1388_vm6 = vcmp.eq.s32.totalorder %v18663_v18, %v12048_v43 }
 0x13e   : > { %18671 = vst [vmem:[#allocation58_spill] sm:$0xff] %v12553_v37  ;;  %10360 = vmatprep.mubr.msk.f32.mxu0 %vm1367_vm7, %v18377_v22  ;;  %10403 = vmatpush3.msra.mxu0 %v12535_v6  ;;  %vm1391_vm7 = vcmp.eq.s32.totalorder %v18663_v18, %v12067_v0  ;;  %v12695_v0 = vld [vmem:[%s18254_s2 + $0xd0] sm:$0xff] }
 0x13f   : > { %3772 = vperm.xlu0 %10916, %v11262_v49   ;;  %2509 = vmatprep.subr.mxu1 %v18592_v1  ;;  %18682 = vst [vmem:[#allocation67_spill] sm:$0xff] %v12695_v0 }
 0x140   : > { %8643 = vmatmul.mubr.msk.f32.gmra.mxu1 %vm1404_vm8, %v18377_v22  ;;  %10404 = vmatprep.subr.mxu0 %v12567_v50  ;;  %vm1416_vm8 = vcmp.eq.s32.totalorder %v11685_v54, %v12154_v32 }
 0x141   : > { %2510 = vmatpush2.msra.mxu1 %v12573_v23  ;;  %8644 = vmatprep.mubr.msk.f32.mxu1 %vm1408_vm9, %v18377_v22  ;;  %v12579_v3 = vpop.permute.xlu1 %2137  ;;  %v18673_v23 = vld [vmem:[#allocation2_spill] sm:$0xff]  ;;  %vm1420_vm9 = vcmp.eq.s32.totalorder %v11690_v56, %v12175_v33 }
 0x142   : > { %10361 = vmatmul.mubr.msk.f32.gmra.mxu0 %vm1370_vm10, %v18377_v22  ;;  %10915 = vset.pattern.permute.xlu1 %v11102_v7  ;;  %v12584_v37 = vpop.permute.xlu0 %2146  ;;  %vm1394_vm10 = vcmp.eq.s32.totalorder %v18663_v18, %v12069_v55  ;;  %v18686_v55 = vld [vmem:[#allocation7_spill] sm:$0xff] }
 0x143   : > { %10363 = vmatprep.mubr.msk.f32.mxu0 %vm1373_vm11, %v18377_v22  ;;  %10405 = vmatpush3.msra.mxu0 %v12567_v50  ;;  %vm1397_vm11 = vcmp.eq.s32.totalorder %v18663_v18, %v12086_v47 }
 0x144   : > { %3760 = vperm.xlu1 %10915, %v18673_v23   ;;  %2511 = vmatprep.subr.mxu1 %v18592_v1 }
 0x145   : > { %3778 = vperm.xlu0 %10916, %v11300_v61   ;;  %8645 = vmatmul.mubr.msk.f32.gmra.mxu1 %vm1407_vm12, %v18377_v22  ;;  %vm1419_vm12 = vcmp.eq.s32.totalorder %v11685_v54, %v12175_v33 }
 0x146   : > { %2512 = vmatpush2.msra.mxu1 %v12599_v13  ;;  %8646 = vmatprep.mubr.msk.f32.mxu1 %vm1411_vm13, %v18377_v22  ;;  %vm1423_vm13 = vcmp.eq.s32.totalorder %v11690_v56, %v12177_v53 }
 0x147   : > { %10364 = vmatmul.mubr.msk.f32.gmra.mxu0 %vm1376_vm14, %v18377_v22  ;;  %10406 = vmatprep.subr.mxu0 %v12609_v12  ;;  %v12614_v7 = vpop.permute.xlu1 %2143  ;;  %vm1400_vm14 = vcmp.eq.s32.totalorder %v18663_v18, %v12088_v52  ;;  %v18691_v52 = vld [vmem:[#allocation9_spill] sm:$0xff] }
 0x148   : > { %10366 = vmatprep.mubr.msk.f32.mxu0 %vm1379_vm15, %v18377_v22  ;;  %10407 = vmatpush3.msra.mxu0 %v12609_v12  ;;  %v12618_v13 = vpop.permute.xlu0 %2152  ;;  %vm1403_vm15 = vcmp.eq.s32.totalorder %v18663_v18, %v12113_v30 }
 0x149   : > { %18675 = vst [vmem:[#allocation61_spill] sm:$0xff] %v12618_v13  ;;  %3766 = vperm.xlu1 %10915, %v11219_v29   ;;  %2513 = vmatprep.subr.mxu1 %v18592_v1 }
 0x14a   : > { %3784 = vperm.xlu0 %10916, %v11336_v17   ;;  %8647 = vmatmul.mubr.msk.f32.gmra.mxu1 %vm1410_vm0, %v18377_v22  ;;  %vm1422_vm0 = vcmp.eq.s32.totalorder %v11685_v54, %v12177_v53 }
 0x14b   : > { %2514 = vmatpush2.msra.mxu1 %v12631_v20  ;;  %8648 = vmatprep.mubr.msk.f32.mxu1 %vm1414_vm1, %v18377_v22  ;;  %vm1426_vm1 = vcmp.eq.s32.totalorder %v11690_v56, %v12197_v60 }
 0x14c   : > { %10367 = vmatmul.mubr.msk.f32.gmra.mxu0 %vm1382_vm2, %v18377_v22  ;;  %10408 = vmatprep.subr.mxu0 %v12641_v4  ;;  %v12646_v13 = vpop.permute.xlu1 %2149  ;;  %vm1406_vm2 = vcmp.eq.s32.totalorder %v18663_v18, %v18668_v8 }
 0x14d   : > { %10369 = vmatprep.mubr.msk.f32.mxu0 %vm1385_vm3, %v18377_v22  ;;  %10409 = vmatpush3.msra.mxu0 %v12641_v4  ;;  %v12650_v20 = vpop.permute.xlu0 %2158  ;;  %vm1409_vm3 = vcmp.eq.s32.totalorder %v18663_v18, %v12130_v40  ;;  %v18697_v40 = vld [vmem:[#allocation22_spill] sm:$0xff] }
 0x14e   : > { %18677 = vst [vmem:[#allocation63_spill] sm:$0xff] %v12650_v20  ;;  %3769 = vperm.xlu1 %10915, %v18678_v2   ;;  %2515 = vmatprep.subr.mxu1 %v18592_v1  ;;  %v12673_v20 = vld [vmem:[%s18254_s2 + $0x158] sm:$0xff] }
 0x14f   : > { %3790 = vperm.xlu0 %10916, %v11371_v31   ;;  %8649 = vmatmul.mubr.msk.f32.gmra.mxu1 %vm1413_vm4, %v18377_v22  ;;  %vm1425_vm4 = vcmp.eq.s32.totalorder %v11685_v54, %v12197_v60 }
 0x150   : > { %2516 = vmatpush2.msra.mxu1 %v12663_v21  ;;  %8650 = vmatprep.mubr.msk.f32.mxu1 %vm1417_vm5, %v18377_v22  ;;  %vm1429_vm5 = vcmp.eq.s32.totalorder %v11690_v56, %v18697_v40 }
 0x151   : > { %10370 = vmatmul.mubr.msk.f32.gmra.mxu0 %vm1388_vm6, %v18377_v22  ;;  %10410 = vmatprep.subr.mxu0 %v12673_v20  ;;  %vm1412_vm6 = vcmp.eq.s32.totalorder %v18663_v18, %v12132_v42 }
 0x152   : > { %10372 = vmatprep.mubr.msk.f32.mxu0 %vm1391_vm7, %v18377_v22  ;;  %10411 = vmatpush3.msra.mxu0 %v12673_v20  ;;  %v12680_v21 = vpop.permute.xlu1 %2155  ;;  %vm1415_vm7 = vcmp.eq.s32.totalorder %v18663_v18, %v12152_v57  ;;  %v12823_v57 = vld [vmem:[%s18254_s2 + $0xb0] sm:$0xff] }
 0x153   : > { %18680 = vst [vmem:[#allocation65_spill] sm:$0xff] %v12680_v21  ;;  %3775 = vperm.xlu1 %10915, %v11259_v48   ;;  %2517 = vmatprep.subr.mxu1 %v18592_v1  ;;  %v12686_v43 = vpop.permute.xlu0 %2164 }
 0x154   : > { %18681 = vst [vmem:[#allocation66_spill] sm:$0xff] %v12686_v43  ;;  %3796 = vperm.xlu0 %10916, %v11404_v46   ;;  %8651 = vmatmul.mubr.msk.f32.gmra.mxu1 %vm1416_vm8, %v18377_v22  ;;  %v12705_v43 = vld [vmem:[%s18254_s2 + $0x150] sm:$0xff]  ;;  %vm1428_vm8 = vcmp.eq.s32.totalorder %v11685_v54, %v18697_v40 }
 0x155   : > { %2518 = vmatpush2.msra.mxu1 %v12695_v0  ;;  %8652 = vmatprep.mubr.msk.f32.mxu1 %vm1420_vm9, %v18377_v22  ;;  %18683 = vst [vmem:[#allocation68_spill] sm:$0xff] %v12705_v43  ;;  %vm1432_vm9 = vcmp.eq.s32.totalorder %v11690_v56, %v12222_v16 }
 0x156   : > { %10373 = vmatmul.mubr.msk.f32.gmra.mxu0 %vm1394_vm10, %v18377_v22  ;;  %10412 = vmatprep.subr.mxu0 %v12705_v43  ;;  %vm1418_vm10 = vcmp.eq.s32.totalorder %v18663_v18, %v12154_v32 }
 0x157   : > { %10375 = vmatprep.mubr.msk.f32.mxu0 %vm1397_vm11, %v18377_v22  ;;  %10413 = vmatpush3.msra.mxu0 %v12705_v43  ;;  %v12712_v0 = vpop.permute.xlu1 %2161  ;;  %v12714_v21 = vpop.f32.mrf.mxu0  ;;  %vm1421_vm11 = vcmp.eq.s32.totalorder %v18663_v18, %v12175_v33  ;;  %v18707_v33 = vld [vmem:[#allocation12_spill] sm:$0xff] }
 0x158   : > { %18684 = vst [vmem:[#allocation69_spill] sm:$0xff] %v12712_v0  ;;  %18685 = vst [vmem:[#allocation70_spill] sm:$0xff] %v12714_v21  ;;  %3781 = vperm.xlu1 %10915, %v18686_v55   ;;  %2519 = vmatprep.subr.mxu1 %v18592_v1  ;;  %v12720_v46 = vpop.permute.xlu0 %2170  ;;  %v12729_v21 = vld [vmem:[%s18254_s2 + $0xc8] sm:$0xff] }
 0x159   : > { %18687 = vst [vmem:[#allocation71_spill] sm:$0xff] %v12720_v46  ;;  %3802 = vperm.xlu0 %10916, %v11433_v11   ;;  %8653 = vmatmul.mubr.msk.f32.gmra.mxu1 %vm1419_vm12, %v18377_v22  ;;  %v875_v47 = vpop.f32.mrf.mxu0  ;;  %18688 = vst [vmem:[#allocation72_spill] sm:$0xff] %v12729_v21  ;;  %v12739_v0 = vld [vmem:[%s18254_s2 + $0x148] sm:$0xff]  ;;  %vm1431_vm12 = vcmp.eq.s32.totalorder %v11685_v54, %v12222_v16 }
 0x15a   : > { %2520 = vmatpush2.msra.mxu1 %v12729_v21  ;;  %8654 = vmatprep.mubr.msk.f32.mxu1 %vm1423_vm13, %v18377_v22  ;;  %18689 = vst [vmem:[#allocation73_spill] sm:$0xff] %v12739_v0  ;;  %vm1435_vm13 = vcmp.eq.s32.totalorder %v11690_v56, %v18707_v33 }
 0x15b   : > { %v10276_v46 = vpop.f32.mrf.mxu1  ;;  %10376 = vmatmul.mubr.msk.f32.gmra.mxu0 %vm1400_vm14, %v18377_v22  ;;  %10414 = vmatprep.subr.mxu0 %v12739_v0  ;;  %vm1424_vm14 = vcmp.eq.s32.totalorder %v18663_v18, %v12177_v53 }
 0x15c   : > { %10378 = vmatprep.mubr.msk.f32.mxu0 %vm1403_vm15, %v18377_v22  ;;  %10415 = vmatpush3.msra.mxu0 %v12739_v0  ;;  %v12765_v0 = vld [vmem:[%s18254_s2 + $0xc0] sm:$0xff]  ;;  %vm1427_vm15 = vcmp.eq.s32.totalorder %v18663_v18, %v12197_v60 }
 0x15d   : > { %v878_v47 = vpop.f32.mrf.mxu0  ;;  %v12746_v21 = vpop.f32.mrf.mxu1  ;;  %3787 = vperm.xlu1 %10915, %v18691_v52   ;;  %2521 = vmatprep.subr.mxu1 %v18592_v1 }
 0x15e   : > { %18690 = vst [vmem:[#allocation74_spill] sm:$0xff] %v12746_v21  ;;  %v12752_v11 = vpop.permute.xlu1 %2167  ;;  %v12754_v43 = vadd.f32 %v10276_v46, %v878_v47  ;;  %3808 = vperm.xlu0 %10916, %v11463_v38   ;;  %8655 = vmatmul.mubr.msk.f32.gmra.mxu1 %vm1422_vm0, %v18377_v22  ;;  %v12760_v30 = vpop.permute.xlu0 %2176  ;;  %v18694_v47 = vld [vmem:[#allocation17_spill] sm:$0xff]  ;;  %vm1434_vm0 = vcmp.eq.s32.totalorder %v11685_v54, %v18707_v33 }
 0x15f   : > { %18693 = vst [vmem:[#allocation75_spill] sm:$0xff] %v12760_v30  ;;  %v880_v21 = vpop.f32.mrf.mxu0  ;;  %2522 = vmatpush2.msra.mxu1 %v12765_v0  ;;  %8656 = vmatprep.mubr.msk.f32.mxu1 %vm1426_vm1, %v18377_v22  ;;  %vm1438_vm1 = vcmp.eq.s32.totalorder %v11690_v56, %v12247_v27 }
 0x160   : > { %18692 = vst [vmem:[#allocation9_spill] sm:$0xff] %v12754_v43  ;;  %v10279_v46 = vpop.f32.mrf.mxu1  ;;  %10379 = vmatmul.mubr.msk.f32.gmra.mxu0 %vm1406_vm2, %v18377_v22  ;;  %10416 = vmatprep.subr.mxu0 %v18694_v47  ;;  %vm1430_vm2 = vcmp.eq.s32.totalorder %v18663_v18, %v18697_v40 }
 0x161   : > { %10381 = vmatprep.mubr.msk.f32.mxu0 %vm1409_vm3, %v18377_v22  ;;  %10417 = vmatpush3.msra.mxu0 %v18694_v47  ;;  %vm1433_vm3 = vcmp.eq.s32.totalorder %v18663_v18, %v12222_v16  ;;  %v18714_v16 = vld [vmem:[#allocation29_spill] sm:$0xff] }
 0x162   : > { %v12777_v21 = vpop.f32.mrf.mxu0  ;;  %v12779_v43 = vpop.f32.mrf.mxu1  ;;  %3793 = vperm.xlu1 %10915, %v11368_v28   ;;  %2523 = vmatprep.subr.mxu1 %v18592_v1 }
 0x163   : > { %18695 = vst [vmem:[#allocation17_spill] sm:$0xff] %v12777_v21  ;;  %18696 = vst [vmem:[#allocation76_spill] sm:$0xff] %v12779_v43  ;;  %3814 = vperm.xlu0 %10916, %v11491_v63   ;;  %8657 = vmatmul.mubr.msk.f32.gmra.mxu1 %vm1425_vm4, %v18377_v22  ;;  %v12789_v8 = vpop.permute.xlu1 %2173  ;;  %v12794_v43 = vld [vmem:[%s18254_s2 + $0xb8] sm:$0xff]  ;;  %v12800_v21 = vpop.permute.xlu0 %2182  ;;  %v18700_v63 = vld [vmem:[#allocation19_spill] sm:$0xff]  ;;  %vm1437_vm4 = vcmp.eq.s32.totalorder %v11685_v54, %v12247_v27 }
 0x164   : > { %18698 = vst [vmem:[#allocation22_spill] sm:$0xff] %v12789_v8  ;;  %v885_v47 = vpop.f32.mrf.mxu0  ;;  %2524 = vmatpush2.msra.mxu1 %v12794_v43  ;;  %8658 = vmatprep.mubr.msk.f32.mxu1 %vm1429_vm5, %v18377_v22  ;;  %18699 = vst [vmem:[#allocation77_spill] sm:$0xff] %v12800_v21  ;;  %vm1441_vm5 = vcmp.eq.s32.totalorder %v11690_v56, %v18714_v16 }
 0x165   : > { %v10282_v30 = vpop.f32.mrf.mxu1  ;;  %10382 = vmatmul.mubr.msk.f32.gmra.mxu0 %vm1412_vm6, %v18377_v22  ;;  %10418 = vmatprep.subr.mxu0 %v18700_v63  ;;  %vm1436_vm6 = vcmp.eq.s32.totalorder %v18663_v18, %v18707_v33 }
 0x166   : > { %10384 = vmatprep.mubr.msk.f32.mxu0 %vm1415_vm7, %v18377_v22  ;;  %10419 = vmatpush3.msra.mxu0 %v18700_v63  ;;  %vm1439_vm7 = vcmp.eq.s32.totalorder %v18663_v18, %v12247_v27  ;;  %v18719_v27 = vld [vmem:[#allocation35_spill] sm:$0xff] }
 0x167   : > { %v888_v47 = vpop.f32.mrf.mxu0  ;;  %v12808_v8 = vpop.f32.mrf.mxu1  ;;  %3799 = vperm.xlu1 %10915, %v11401_v45   ;;  %2525 = vmatprep.subr.mxu1 %v18592_v1 }
 0x168   : > { %18701 = vst [vmem:[#allocation19_spill] sm:$0xff] %v12808_v8  ;;  %v12814_v42 = vadd.f32 %v10279_v46, %v888_v47  ;;  %3820 = vperm.xlu0 %10916, %v11521_v41   ;;  %8659 = vmatmul.mubr.msk.f32.gmra.mxu1 %vm1428_vm8, %v18377_v22  ;;  %v12829_v46 = vpop.permute.xlu1 %2179  ;;  %v18703_v47 = vld [vmem:[#allocation11_spill] sm:$0xff]  ;;  %vm1440_vm8 = vcmp.eq.s32.totalorder %v11685_v54, %v18714_v16 }
 0x169   : > { %v890_v63 = vpop.f32.mrf.mxu0  ;;  %2526 = vmatpush2.msra.mxu1 %v12823_v57  ;;  %8660 = vmatprep.mubr.msk.f32.mxu1 %vm1432_vm9, %v18377_v22  ;;  %vm1444_vm9 = vcmp.eq.s32.totalorder %v11690_v56, %v18719_v27 }
 0x16a   : > { %18702 = vst [vmem:[#allocation78_spill] sm:$0xff] %v12814_v42  ;;  %10385 = vmatmul.mubr.msk.f32.gmra.mxu0 %vm1418_vm10, %v18377_v22  ;;  %10420 = vmatprep.subr.mxu0 %v18703_v47  ;;  %v12835_v63 = vpop.permute.xlu0 %2926  ;;  %v12837_v42 = vpop.f32.mrf.mxu1  ;;  %vm1442_vm10 = vcmp.eq.s32.totalorder %v18663_v18, %v18714_v16  ;;  %v18724_v16 = vld [vmem:[#allocation37_spill] sm:$0xff] }
 0x16b   : > { %18704 = vst [vmem:[#allocation11_spill] sm:$0xff] %v12835_v63  ;;  %10387 = vmatprep.mubr.msk.f32.mxu0 %vm1421_vm11, %v18377_v22  ;;  %10421 = vmatpush3.msra.mxu0 %v18703_v47  ;;  %v12856_v47 = vld [vmem:[%s18254_s2 + $0xa8] sm:$0xff]  ;;  %vm1445_vm11 = vcmp.eq.s32.totalorder %v18663_v18, %v18719_v27 }
 0x16c   : > { %3805 = vperm.xlu1 %10915, %v11430_v10   ;;  %2527 = vmatprep.subr.mxu1 %v18592_v1  ;;  %v12845_v32 = vpop.f32.mrf.mxu0  ;;  %v12847_v8 = vpop.f32.mrf.mxu1 }
 0x16d   : > { %18705 = vst [vmem:[#allocation79_spill] sm:$0xff] %v12845_v32  ;;  %18706 = vst [vmem:[#allocation80_spill] sm:$0xff] %v12847_v8  ;;  %3826 = vperm.xlu0 %10916, %v11549_v14   ;;  %8661 = vmatmul.mubr.msk.f32.gmra.mxu1 %vm1431_vm12, %v18377_v22  ;;  %v18708_v32 = vld [vmem:[#allocation25_spill] sm:$0xff]  ;;  %v12872_v21 = vpop.permute.xlu1 %2185  ;;  %vm1443_vm12 = vcmp.eq.s32.totalorder %v11685_v54, %v18719_v27 }
 0x16e   : > { %2528 = vmatpush2.msra.mxu1 %v12856_v47  ;;  %8662 = vmatprep.mubr.msk.f32.mxu1 %vm1435_vm13, %v18377_v22  ;;  %v895_v8 = vpop.f32.mrf.mxu0  ;;  %vm1447_vm13 = vcmp.eq.s32.totalorder %v11690_v56, %v18724_v16 }
 0x16f   : > { %10388 = vmatmul.mubr.msk.f32.gmra.mxu0 %vm1424_vm14, %v18377_v22  ;;  %10422 = vmatprep.subr.mxu0 %v18708_v32  ;;  %v12866_v63 = vpop.permute.xlu0 %2935  ;;  %v12868_v14 = vpop.f32.mrf.mxu1  ;;  %vm1448_vm14 = vcmp.eq.s32.totalorder %v18663_v18, %v18724_v16 }
 0x170   : > { %18709 = vst [vmem:[#allocation12_spill] sm:$0xff] %v12866_v63  ;;  %10390 = vmatprep.mubr.msk.f32.mxu0 %vm1427_vm15, %v18377_v22  ;;  %10423 = vmatpush3.msra.mxu0 %v18708_v32  ;;  %v12889_v32 = vld [vmem:[%s18254_s2 + $0xa0] sm:$0xff] }
 0x171   : > { %3811 = vperm.xlu1 %10915, %v11460_v36   ;;  %2529 = vmatprep.subr.mxu1 %v18592_v1  ;;  %v898_v53 = vpop.f32.mrf.mxu0  ;;  %v12878_v8 = vpop.f32.mrf.mxu1 }
 0x172   : > { %18710 = vst [vmem:[#allocation25_spill] sm:$0xff] %v12878_v8  ;;  %3832 = vperm.xlu0 %10916, %v18658_v19   ;;  %8663 = vmatmul.mubr.msk.f32.gmra.mxu1 %vm1434_vm0, %v18377_v22  ;;  %v12884_v60 = vadd.f32 %v10282_v30, %v898_v53 }
 0x173   : > { %2530 = vmatpush2.msra.mxu1 %v12889_v32  ;;  %8664 = vmatprep.mubr.msk.f32.mxu1 %vm1438_vm1, %v18377_v22  ;;  %v900_v8 = vpop.f32.mrf.mxu0  ;;  %vm1446_vm1 = vcmp.eq.s32.totalorder %v11685_v54, %v18724_v16 }
 0x174   : > { %18711 = vst [vmem:[#allocation81_spill] sm:$0xff] %v12884_v60  ;;  %10391 = vmatmul.mubr.msk.f32.gmra.mxu0 %vm1430_vm2, %v18377_v22  ;;  %10424 = vmatprep.subr.mxu0 %v12268_v24  ;;  %v12899_v30 = vpop.permute.xlu1 %2929  ;;  %v12922_v8 = vld [vmem:[%s18254_s2 + $0x98] sm:$0xff] }
 0x175   : > { %18712 = vst [vmem:[#allocation82_spill] sm:$0xff] %v12899_v30  ;;  %10393 = vmatprep.mubr.msk.f32.mxu0 %vm1433_vm3, %v18377_v22  ;;  %10425 = vmatpush3.msra.mxu0 %v12268_v24  ;;  %v12903_v53 = vpop.permute.xlu0 %2941  ;;  %v12905_v60 = vpop.f32.mrf.mxu1  ;;  %vm2195_vm3 = vcmp.eq.s32.totalorder %v18663_v18, %v12340_v9  ;;  %v18765_v30 = vld [vmem:[#allocation36_spill] sm:$0xff] }
 0x176   : > { %18713 = vst [vmem:[#allocation83_spill] sm:$0xff] %v12903_v53  ;;  %3817 = vperm.xlu1 %10915, %v11488_v62   ;;  %2531 = vmatprep.subr.mxu1 %v18592_v1 }
 0x177   : > { %3838 = vperm.xlu0 %10916, %v18662_v5   ;;  %8665 = vmatmul.mubr.msk.f32.gmra.mxu1 %vm1437_vm4, %v18377_v22  ;;  %v12915_v40 = vpop.f32.mrf.mxu0  ;;  %v12917_v24 = vpop.f32.mrf.mxu1 }
 0x178   : > { %18715 = vst [vmem:[#allocation29_spill] sm:$0xff] %v12915_v40  ;;  %18716 = vst [vmem:[#allocation84_spill] sm:$0xff] %v12917_v24  ;;  %2532 = vmatpush2.msra.mxu1 %v12922_v8  ;;  %8666 = vmatprep.mubr.msk.f32.mxu1 %vm1441_vm5, %v18377_v22 }
 0x179   : > { %10394 = vmatmul.mubr.msk.f32.gmra.mxu0 %vm1436_vm6, %v18377_v22  ;;  %10426 = vmatprep.subr.mxu0 %v12325_v59  ;;  %v12932_v24 = vpop.permute.xlu1 %2932  ;;  %v905_v40 = vpop.f32.mrf.mxu0 }
 0x17a   : > { %18717 = vst [vmem:[#allocation85_spill] sm:$0xff] %v12932_v24  ;;  %10396 = vmatprep.mubr.msk.f32.mxu0 %vm1439_vm7, %v18377_v22  ;;  %10427 = vmatpush3.msra.mxu0 %v12325_v59  ;;  %v12936_v53 = vpop.permute.xlu0 %2947  ;;  %v12938_v63 = vpop.f32.mrf.mxu1  ;;  %v12953_v40 = vld [vmem:[%s18254_s2 + $0x90] sm:$0xff] }
 0x17b   : > { %18718 = vst [vmem:[#allocation86_spill] sm:$0xff] %v12936_v53  ;;  %3823 = vperm.xlu1 %10915, %v11518_v26   ;;  %2533 = vmatprep.subr.mxu1 %v18592_v1 }
 0x17c   : > { %3844 = vperm.xlu0 %10916, %v18667_v15   ;;  %8667 = vmatmul.mubr.msk.f32.gmra.mxu1 %vm1440_vm8, %v18377_v22  ;;  %v908_v33 = vpop.f32.mrf.mxu0  ;;  %v12948_v59 = vpop.f32.mrf.mxu1 }
 0x17d   : > { %18720 = vst [vmem:[#allocation35_spill] sm:$0xff] %v12948_v59  ;;  %2534 = vmatpush2.msra.mxu1 %v12953_v40  ;;  %8668 = vmatprep.mubr.msk.f32.mxu1 %vm1444_vm9, %v18377_v22  ;;  %v12959_v53 = vpop.permute.xlu1 %2938  ;;  %v12962_v15 = vadd.f32 %v12837_v42, %v908_v33  ;;  %vm2194_vm9 = vcmp.eq.s32.totalorder %v11690_v56, %v12340_v9 }
 0x17e   : > { %18721 = vst [vmem:[#allocation87_spill] sm:$0xff] %v12959_v53  ;;  %10397 = vmatmul.mubr.msk.f32.gmra.mxu0 %vm1442_vm10, %v18377_v22  ;;  %10428 = vmatprep.subr.mxu0 %v12380_v44  ;;  %v12968_v59 = vpop.permute.xlu0 %2953  ;;  %v910_v24 = vpop.f32.mrf.mxu0  ;;  %v18734_v53 = vmov 1.0  }
 0x17f   : > { %18722 = vst [vmem:[#allocation88_spill] sm:$0xff] %v12962_v15  ;;  %18723 = vst [vmem:[#allocation89_spill] sm:$0xff] %v12968_v59  ;;  %10399 = vmatprep.mubr.msk.f32.mxu0 %vm1445_vm11, %v18377_v22  ;;  %10429 = vmatpush3.msra.mxu0 %v12380_v44  ;;  %v12985_v44 = vld [vmem:[%s18254_s2 + $0x88] sm:$0xff] }
 0x180   : > { %3829 = vperm.xlu1 %10915, %v11546_v25   ;;  %2535 = vmatprep.subr.mxu1 %v18592_v1  ;;  %v12976_v42 = vpop.f32.mrf.mxu1 }
 0x181   : > { %3850 = vperm.xlu0 %10916, %v18670_v34   ;;  %8669 = vmatmul.mubr.msk.f32.gmra.mxu1 %vm1443_vm12, %v18377_v22  ;;  %vm2193_vm12 = vcmp.eq.s32.totalorder %v11685_v54, %v12340_v9 }
 0x182   : > { %2536 = vmatpush2.msra.mxu1 %v12985_v44  ;;  %8670 = vmatprep.mubr.msk.f32.mxu1 %vm1447_vm13, %v18377_v22  ;;  %v12991_v24 = vpop.permute.xlu1 %2944  ;;  %v12993_v27 = vpop.f32.mrf.mxu0 }
 0x183   : > { %18725 = vst [vmem:[#allocation37_spill] sm:$0xff] %v12991_v24  ;;  %18726 = vst [vmem:[#allocation90_spill] sm:$0xff] %v12993_v27  ;;  %10400 = vmatmul.mubr.msk.f32.gmra.mxu0 %vm1448_vm14, %v18377_v22  ;;  %10430 = vmatprep.subr.mxu0 %v12435_v58  ;;  %v12997_v33 = vpop.permute.xlu0 %2959  ;;  %v12999_v15 = vpop.f32.mrf.mxu1  ;;  %v18729_v24 = vld [vmem:[#allocation38_spill] sm:$0xff]  ;;  %v18730_v22 = vld [vmem:[#allocation41_spill] sm:$0xff] }
 0x184   : > { %18727 = vst [vmem:[#allocation91_spill] sm:$0xff] %v12997_v33  ;;  %18728 = vst [vmem:[#allocation92_spill] sm:$0xff] %v12999_v15  ;;  %10431 = vmatpush3.msra.mxu0 %v12435_v58  ;;  %3835 = vperm.xlu1 %10915, %v11573_v39   ;;  %v915_v59 = vpop.f32.mrf.mxu0  ;;  %vm2189_vm15 = vcmp.eq.s32.totalorder %v18663_v18, %v18729_v24  ;;  %vm2192_vm0 = vcmp.eq.s32.totalorder %v18663_v18, %v18730_v22  ;;  %v18380_v33 = vmov 5   ;;  %v13015_v58 = vld [vmem:[%s18254_s2 + $0x80] sm:$0xff] }
 0x185   : > { %2537 = vmatprep.subr.mxu1 %v18592_v1  ;;  %10432 = vmatprep.subr.mxu0 %v12492_v35  ;;  %v13007_v27 = vpop.f32.mrf.mxu1  ;;  %18731 = vst [vmem:[#allocation38_spill] sm:$0xff] %v13015_v58  ;;  %vm2188_vm2 = vcmp.eq.s32.totalorder %v11690_v56, %v18729_v24  ;;  %vm2187_vm4 = vcmp.eq.s32.totalorder %v11685_v54, %v18729_v24  ;;  %v10972_v24 = vld [vmem:[%s18254_s2 + $0x70] sm:$0xff] }
 0x186   : > { %10917 = vset.pattern.permute.xlu0 %v18380_v33  ;;  %2538 = vmatpush2.msra.mxu1 %v13015_v58  ;;  %v13018_v59 = vpop.permute.xlu1 %2950  ;;  %vm2191_vm5 = vcmp.eq.s32.totalorder %v11690_v56, %v18730_v22  ;;  %vm2190_vm8 = vcmp.eq.s32.totalorder %v11685_v54, %v18730_v22  ;;  %v18750_v22 = vld [vmem:[#allocation46_spill] sm:$0xff] }
 0x187   : > { %18732 = vst [vmem:[#allocation41_spill] sm:$0xff] %v13018_v59  ;;  %10433 = vmatpush3.msra.mxu0 %v12492_v35  ;;  %4594 = vperm.xlu0 %10917, %v18673_v23   ;;  %v13028_v33 = vpop.permute.xlu0 %2965  ;;  %v918_v15 = vpop.f32.mrf.mxu0  ;;  %v10971_v59 = vld [vmem:[%s18254_s2 + $0x78] sm:$0xff]  ;;  %vm2207_vm11 = vcmp.eq.s32.totalorder %v18663_v18, %v18750_v22 }
 0x188   : > { %18733 = vst [vmem:[#allocation93_spill] sm:$0xff] %v13028_v33  ;;  %8671 = vmatmul.mubr.msk.f32.gmra.mxu1 %vm1446_vm1, %v18734_v53  ;;  %10434 = vmatprep.mubr.msk.f32.mxu0 %vm2189_vm15, %v18734_v53  ;;  %v13036_v35 = vadd.f32 %v12868_v14, %v918_v15  ;;  %v13038_v16 = vpop.f32.mrf.mxu1  ;;  %v18737_v14 = vld [vmem:[#allocation26_spill] sm:$0xff] }
 0x189   : > { %18736 = vst [vmem:[#allocation95_spill] sm:$0xff] %v13038_v16  ;;  %10435 = vmatmul.mubr.msk.f32.vlgmr.msra.gmra.mxu0 %vm2192_vm0, %v18734_v53  ;;  %3309 = vmatprep.subr.mxu0 %v18592_v1  ;;  %v920_v33 = vpop.f32.mrf.mxu0 }
 0x18a   : > { %18735 = vst [vmem:[#allocation94_spill] sm:$0xff] %v13036_v35  ;;  %8800 = vmatprep.mubr.msk.f32.mxu1 %vm2188_vm2, %v18734_v53  ;;  %10437 = vmatprep.mubr.msk.f32.mxu0 %vm2195_vm3, %v18734_v53 }
 0x18b   : > { %3310 = vmatpush1.msra.mxu0 %v10971_v59  ;;  %3841 = vperm.xlu1 %10915, %v18737_v14   ;;  %v13051_v15 = vpop.permute.xlu1 %2956  ;;  %v13053_v16 = vpop.f32.mrf.mxu1  ;;  %v18740_v59 = vld [vmem:[#allocation43_spill] sm:$0xff] }
 0x18c   : > { %18738 = vst [vmem:[#allocation26_spill] sm:$0xff] %v13051_v15  ;;  %3311 = vmatprep.subr.mxu0 %v18592_v1  ;;  %10482 = vmatprep.subr.mxu1 %v12535_v6  ;;  %v13059_v33 = vpop.permute.xlu0 %2971  ;;  %vm2201_vm6 = vcmp.eq.s32.totalorder %v18663_v18, %v18740_v59  ;;  %vm2200_vm1 = vcmp.eq.s32.totalorder %v11690_v56, %v18740_v59 }
 0x18d   : > { %18739 = vst [vmem:[#allocation96_spill] sm:$0xff] %v13059_v33  ;;  %4603 = vperm.xlu0 %10917, %v18678_v2   ;;  %8801 = vmatmul.mubr.msk.f32.vlgmr.msra.gmra.mxu1 %vm2187_vm4, %v18734_v53  ;;  %v13067_v35 = vpop.f32.mrf.mxu0  ;;  %v13069_v15 = vpop.f32.mrf.mxu1  ;;  %v18743_v33 = vld [vmem:[#allocation45_spill] sm:$0xff]  ;;  %vm2199_vm4 = vcmp.eq.s32.totalorder %v11685_v54, %v18740_v59  ;;  %v18777_v59 = vld [vmem:[#allocation39_spill] sm:$0xff] }
 0x18e   : > { %18741 = vst [vmem:[#allocation43_spill] sm:$0xff] %v13067_v35  ;;  %18742 = vst [vmem:[#allocation97_spill] sm:$0xff] %v13069_v15  ;;  %3312 = vmatpush1.msra.mxu0 %v10972_v24  ;;  %10483 = vmatpush3.msra.mxu1 %v12535_v6  ;;  %vm2198_vm7 = vcmp.eq.s32.totalorder %v18663_v18, %v18743_v33  ;;  %v10973_v6 = vld [vmem:[%s18254_s2 + $0x68] sm:$0xff]  ;;  %v18746_v24 = vld [vmem:[#allocation30_spill] sm:$0xff]  ;;  %vm2197_vm13 = vcmp.eq.s32.totalorder %v11690_v56, %v18743_v33 }
 0x18f   : > { %10438 = vmatmul.mubr.msk.f32.gmra.mxu0 %vm2198_vm7, %v18734_v53  ;;  %3313 = vmatprep.subr.mxu0 %v18592_v1  ;;  %v13079_v2 = vpop.permute.xlu1 %2962  ;;  %v925_v23 = vpop.f32.mrf.mxu0  ;;  %vm2196_vm0 = vcmp.eq.s32.totalorder %v11685_v54, %v18743_v33  ;;  %v18769_v33 = vld [vmem:[#allocation24_spill] sm:$0xff] }
 0x190   : > { %18744 = vst [vmem:[#allocation45_spill] sm:$0xff] %v13079_v2  ;;  %8802 = vmatprep.mubr.msk.f32.mxu1 %vm2191_vm5, %v18734_v53  ;;  %10440 = vmatprep.mubr.msk.f32.mxu0 %vm2201_vm6, %v18734_v53  ;;  %v13083_v15 = vpop.permute.xlu0 %2977  ;;  %v13085_v35 = vpop.f32.mrf.mxu1  ;;  %vm2216_vm2 = vcmp.eq.s32.totalorder %v18663_v18, %v18769_v33  ;;  %vm2222_vm6 = vcmp.eq.s32.totalorder %v18663_v18, %v18777_v59 }
 0x191   : > { %18745 = vst [vmem:[#allocation98_spill] sm:$0xff] %v13083_v15  ;;  %3314 = vmatpush1.msra.mxu0 %v10973_v6  ;;  %3847 = vperm.xlu1 %10915, %v18746_v24   ;;  %v10974_v15 = vld [vmem:[%s18254_s2 + $0x60] sm:$0xff]  ;;  %v18748_v6 = vld [vmem:[#allocation48_spill] sm:$0xff] }
 0x192   : > { %3315 = vmatprep.subr.mxu0 %v18592_v1  ;;  %4609 = vperm.xlu0 %10917, %v11259_v48   ;;  %v928_v23 = vpop.f32.mrf.mxu0  ;;  %v13095_v2 = vpop.f32.mrf.mxu1  ;;  %vm2204_vm10 = vcmp.eq.s32.totalorder %v18663_v18, %v18748_v6  ;;  %vm2203_vm5 = vcmp.eq.s32.totalorder %v11690_v56, %v18748_v6 }
 0x193   : > { %18747 = vst [vmem:[#allocation30_spill] sm:$0xff] %v13095_v2  ;;  %8803 = vmatmul.mubr.msk.f32.gmra.mxu1 %vm2190_vm8, %v18734_v53  ;;  %3316 = vmatpush1.msra.mxu0 %v10974_v15  ;;  %v13106_v48 = vadd.f32 %v12905_v60, %v928_v23  ;;  %v10975_v60 = vld [vmem:[%s18254_s2 + $0x58] sm:$0xff]  ;;  %vm2202_vm8 = vcmp.eq.s32.totalorder %v11685_v54, %v18748_v6 }
 0x194   : > { %8804 = vmatprep.mubr.msk.f32.mxu1 %vm2194_vm9, %v18734_v53  ;;  %10441 = vmatmul.mubr.msk.f32.gmra.mxu0 %vm2204_vm10, %v18734_v53  ;;  %v13112_v2 = vpop.permute.xlu1 %2968  ;;  %v930_v34 = vpop.f32.mrf.mxu0  ;;  %v18753_v23 = vld [vmem:[#allocation33_spill] sm:$0xff]  ;;  %vm2206_vm9 = vcmp.eq.s32.totalorder %v11690_v56, %v18750_v22  ;;  %vm2228_vm10 = vcmp.eq.s32.totalorder %v18663_v18, %v12547_v51 }
 0x195   : > { %18749 = vst [vmem:[#allocation48_spill] sm:$0xff] %v13106_v48  ;;  %18751 = vst [vmem:[#allocation46_spill] sm:$0xff] %v13112_v2  ;;  %3317 = vmatprep.subr.mxu0 %v18592_v1  ;;  %10443 = vmatprep.mubr.msk.f32.mxu0 %vm2207_vm11, %v18734_v53  ;;  %v13116_v15 = vpop.permute.xlu0 %2983  ;;  %v18754_v34 = vld [vmem:[#allocation28_spill] sm:$0xff] }
 0x196   : > { %18752 = vst [vmem:[#allocation99_spill] sm:$0xff] %v13116_v15  ;;  %3318 = vmatpush1.msra.mxu0 %v10975_v60  ;;  %3853 = vperm.xlu1 %10915, %v18753_v23   ;;  %v13122_v48 = vpop.f32.mrf.mxu1  ;;  %v18757_v60 = vld [vmem:[#allocation51_spill] sm:$0xff] }
 0x197   : > { %3319 = vmatprep.subr.mxu0 %v18592_v1  ;;  %10484 = vmatprep.subr.mxu1 %v12567_v50  ;;  %vm2210_vm14 = vcmp.eq.s32.totalorder %v18663_v18, %v18757_v60 }
 0x198   : > { %8805 = vmatmul.mubr.msk.f32.gmra.mxu1 %vm2193_vm12, %v18734_v53  ;;  %3320 = vmatpush1.msra.mxu0 %v18754_v34  ;;  %v13130_v15 = vpop.permute.xlu1 %2974  ;;  %v13132_v2 = vpop.f32.mrf.mxu0  ;;  %v18760_v34 = vld [vmem:[#allocation49_spill] sm:$0xff]  ;;  %vm2205_vm12 = vcmp.eq.s32.totalorder %v11685_v54, %v18750_v22 }
 0x199   : > { %18755 = vst [vmem:[#allocation33_spill] sm:$0xff] %v13130_v15  ;;  %18756 = vst [vmem:[#allocation28_spill] sm:$0xff] %v13132_v2  ;;  %10485 = vmatpush3.msra.mxu1 %v12567_v50  ;;  %4615 = vperm.xlu0 %10917, %v18686_v55   ;;  %v13140_v5 = vpop.permute.xlu0 %2989  ;;  %v13142_v9 = vpop.f32.mrf.mxu1  ;;  %vm2213_vm15 = vcmp.eq.s32.totalorder %v18663_v18, %v18760_v34  ;;  %v18761_v15 = vld [vmem:[#allocation32_spill] sm:$0xff]  ;;  %v18762_v55 = vmov 5  }
 0x19a   : > { %18758 = vst [vmem:[#allocation51_spill] sm:$0xff] %v13140_v5  ;;  %18759 = vst [vmem:[#allocation100_spill] sm:$0xff] %v13142_v9  ;;  %8806 = vmatprep.mubr.msk.f32.mxu1 %vm2197_vm13, %v18734_v53  ;;  %10444 = vmatmul.mubr.msk.f32.gmra.mxu0 %vm2210_vm14, %v18734_v53  ;;  %v935_v50 = vpop.f32.mrf.mxu0  ;;  %v18763_v9 = vld [vmem:[#allocation4_spill] sm:$0xff]  ;;  %vm2209_vm13 = vcmp.eq.s32.totalorder %v11690_v56, %v18757_v60  ;;  %vm2234_vm14 = vcmp.eq.s32.totalorder %v18663_v18, %v12579_v3 }
 0x19b   : > { %3321 = vmatprep.subr.mxu0 %v18592_v1  ;;  %10446 = vmatprep.mubr.msk.f32.mxu0 %vm2213_vm15, %v18734_v53  ;;  %v13150_v2 = vpop.f32.mrf.mxu1 }
 0x19c   : > { %3322 = vmatpush1.msra.mxu0 %v18761_v15  ;;  %10918 = vset.pattern.permute.xlu1 %v18762_v55 }
 0x19d   : > { %3323 = vmatprep.subr.mxu0 %v18592_v1  ;;  %4597 = vperm.xlu1 %10918, %v18763_v9   ;;  %v13158_v5 = vpop.permute.xlu1 %2980  ;;  %v938_v50 = vpop.f32.mrf.mxu0 }
 0x19e   : > { %18764 = vst [vmem:[#allocation49_spill] sm:$0xff] %v13158_v5  ;;  %8807 = vmatmul.mubr.msk.f32.gmra.mxu1 %vm2196_vm0, %v18734_v53  ;;  %3324 = vmatpush1.msra.mxu0 %v18765_v30  ;;  %v13164_v15 = vpop.permute.xlu0 %2995  ;;  %v13167_v55 = vadd.f32 %v12938_v63, %v938_v50  ;;  %v13169_v58 = vpop.f32.mrf.mxu1  ;;  %v18770_v30 = vld [vmem:[#allocation52_spill] sm:$0xff]  ;;  %vm2208_vm0 = vcmp.eq.s32.totalorder %v11685_v54, %v18757_v60 }
 0x19f   : > { %18766 = vst [vmem:[#allocation32_spill] sm:$0xff] %v13164_v15  ;;  %18768 = vst [vmem:[#allocation36_spill] sm:$0xff] %v13169_v58  ;;  %4621 = vperm.xlu0 %10917, %v18691_v52   ;;  %8808 = vmatprep.mubr.msk.f32.mxu1 %vm2200_vm1, %v18734_v53  ;;  %v940_v5 = vpop.f32.mrf.mxu0  ;;  %vm2219_vm3 = vcmp.eq.s32.totalorder %v18663_v18, %v18770_v30  ;;  %v18771_v63 = vld [vmem:[#allocation40_spill] sm:$0xff]  ;;  %v18776_v15 = vld [vmem:[#allocation42_spill] sm:$0xff]  ;;  %vm2212_vm1 = vcmp.eq.s32.totalorder %v11690_v56, %v18760_v34 }
 0x1a0   : > { %18767 = vst [vmem:[#allocation4_spill] sm:$0xff] %v13167_v55  ;;  %10447 = vmatmul.mubr.msk.f32.gmra.mxu0 %vm2216_vm2, %v18734_v53  ;;  %3325 = vmatprep.subr.mxu0 %v18592_v1  ;;  %vm2240_vm2 = vcmp.eq.s32.totalorder %v18663_v18, %v12614_v7 }
 0x1a1   : > { %10449 = vmatprep.mubr.msk.f32.mxu0 %vm2219_vm3, %v18734_v53  ;;  %3326 = vmatpush1.msra.mxu0 %v18771_v63  ;;  %v13181_v50 = vpop.permute.xlu1 %2986  ;;  %v13183_v58 = vpop.f32.mrf.mxu1  ;;  %vm2243_vm3 = vcmp.eq.s32.totalorder %v18663_v18, %v12584_v37 }
 0x1a2   : > { %18772 = vst [vmem:[#allocation24_spill] sm:$0xff] %v13181_v50  ;;  %3327 = vmatprep.subr.mxu0 %v18592_v1  ;;  %10486 = vmatprep.subr.mxu1 %v12609_v12  ;;  %v13189_v5 = vpop.permute.xlu0 %3001 }
 0x1a3   : > { %18773 = vst [vmem:[#allocation52_spill] sm:$0xff] %v13189_v5  ;;  %4600 = vperm.xlu1 %10918, %v11219_v29   ;;  %8809 = vmatmul.mubr.msk.f32.gmra.mxu1 %vm2199_vm4, %v18734_v53  ;;  %v13193_v55 = vpop.f32.mrf.mxu0  ;;  %v13195_v63 = vpop.f32.mrf.mxu1  ;;  %vm2211_vm4 = vcmp.eq.s32.totalorder %v11685_v54, %v18760_v34 }
 0x1a4   : > { %18774 = vst [vmem:[#allocation40_spill] sm:$0xff] %v13193_v55  ;;  %18775 = vst [vmem:[#allocation101_spill] sm:$0xff] %v13195_v63  ;;  %3328 = vmatpush1.msra.mxu0 %v18776_v15  ;;  %10487 = vmatpush3.msra.mxu1 %v12609_v12  ;;  %v18778_v63 = vld [vmem:[#allocation55_spill] sm:$0xff]  ;;  %v18781_v55 = vld [vmem:[#allocation44_spill] sm:$0xff] }
 0x1a5   : > { %4627 = vperm.xlu0 %10917, %v11368_v28   ;;  %8810 = vmatprep.mubr.msk.f32.mxu1 %vm2203_vm5, %v18734_v53  ;;  %v945_v5 = vpop.f32.mrf.mxu0  ;;  %vm2225_vm7 = vcmp.eq.s32.totalorder %v18663_v18, %v18778_v63  ;;  %vm2215_vm5 = vcmp.eq.s32.totalorder %v11690_v56, %v18769_v33 }
 0x1a6   : > { %10450 = vmatmul.mubr.msk.f32.gmra.mxu0 %vm2222_vm6, %v18734_v53  ;;  %3329 = vmatprep.subr.mxu0 %v18592_v1  ;;  %v13209_v15 = vpop.permute.xlu1 %2992  ;;  %v13211_v12 = vpop.f32.mrf.mxu1  ;;  %vm2246_vm6 = vcmp.eq.s32.totalorder %v18663_v18, %v12646_v13 }
 0x1a7   : > { %18779 = vst [vmem:[#allocation42_spill] sm:$0xff] %v13209_v15  ;;  %18780 = vst [vmem:[#allocation39_spill] sm:$0xff] %v13211_v12  ;;  %10452 = vmatprep.mubr.msk.f32.mxu0 %vm2225_vm7, %v18734_v53  ;;  %3330 = vmatpush1.msra.mxu0 %v18781_v55  ;;  %v13215_v50 = vpop.permute.xlu0 %3007  ;;  %v18784_v15 = vld [vmem:[#allocation47_spill] sm:$0xff] }
 0x1a8   : > { %18782 = vst [vmem:[#allocation55_spill] sm:$0xff] %v13215_v50  ;;  %3331 = vmatprep.subr.mxu0 %v18592_v1  ;;  %4606 = vperm.xlu1 %10918, %v11262_v49   ;;  %v948_v5 = vpop.f32.mrf.mxu0  ;;  %v13221_v28 = vpop.f32.mrf.mxu1  ;;  %v18821_v50 = vld [vmem:[#allocation16_spill] sm:$0xff] }
 0x1a9   : > { %18783 = vst [vmem:[#allocation44_spill] sm:$0xff] %v13221_v28  ;;  %8811 = vmatmul.mubr.msk.f32.gmra.mxu1 %vm2202_vm8, %v18734_v53  ;;  %3332 = vmatpush1.msra.mxu0 %v18784_v15  ;;  %v13228_v55 = vadd.f32 %v12976_v42, %v948_v5  ;;  %v18787_v15 = vld [vmem:[#allocation57_spill] sm:$0xff]  ;;  %v18789_v42 = vld [vmem:[#allocation50_spill] sm:$0xff]  ;;  %vm2214_vm8 = vcmp.eq.s32.totalorder %v11685_v54, %v18769_v33 }
 0x1aa   : > { %4633 = vperm.xlu0 %10917, %v11401_v45   ;;  %8812 = vmatprep.mubr.msk.f32.mxu1 %vm2206_vm9, %v18734_v53  ;;  %v13234_v6 = vpop.permute.xlu1 %2998  ;;  %v950_v28 = vpop.f32.mrf.mxu0  ;;  %vm2231_vm11 = vcmp.eq.s32.totalorder %v18663_v18, %v18787_v15  ;;  %vm2218_vm9 = vcmp.eq.s32.totalorder %v11690_v56, %v18770_v30 }
 0x1ab   : > { %18785 = vst [vmem:[#allocation47_spill] sm:$0xff] %v13228_v55  ;;  %18786 = vst [vmem:[#allocation102_spill] sm:$0xff] %v13234_v6  ;;  %10453 = vmatmul.mubr.msk.f32.gmra.mxu0 %vm2228_vm10, %v18734_v53  ;;  %3333 = vmatprep.subr.mxu0 %v18592_v1  ;;  %v13240_v12 = vpop.permute.xlu0 %3013  ;;  %v18824_v6 = vld [vmem:[#allocation67_spill] sm:$0xff] }
 0x1ac   : > { %18788 = vst [vmem:[#allocation57_spill] sm:$0xff] %v13240_v12  ;;  %10455 = vmatprep.mubr.msk.f32.mxu0 %vm2231_vm11, %v18734_v53  ;;  %3334 = vmatpush1.msra.mxu0 %v18789_v42  ;;  %v13244_v5 = vpop.f32.mrf.mxu1  ;;  %v18793_v12 = vld [vmem:[#allocation53_spill] sm:$0xff] }
 0x1ad   : > { %18790 = vst [vmem:[#allocation50_spill] sm:$0xff] %v13244_v5  ;;  %3335 = vmatprep.subr.mxu0 %v18592_v1  ;;  %10488 = vmatprep.subr.mxu1 %v12641_v4 }
 0x1ae   : > { %4612 = vperm.xlu1 %10918, %v11300_v61   ;;  %8813 = vmatmul.mubr.msk.f32.gmra.mxu1 %vm2205_vm12, %v18734_v53  ;;  %v13252_v28 = vpop.f32.mrf.mxu0  ;;  %v13254_v55 = vpop.f32.mrf.mxu1  ;;  %vm2217_vm12 = vcmp.eq.s32.totalorder %v11685_v54, %v18770_v30  ;;  %v18826_v30 = vld [vmem:[#allocation69_spill] sm:$0xff] }
 0x1af   : > { %18791 = vst [vmem:[#allocation103_spill] sm:$0xff] %v13252_v28  ;;  %18792 = vst [vmem:[#allocation104_spill] sm:$0xff] %v13254_v55  ;;  %3336 = vmatpush1.msra.mxu0 %v18793_v12  ;;  %10489 = vmatpush3.msra.mxu1 %v12641_v4  ;;  %v13260_v42 = vpop.permute.xlu1 %3004  ;;  %v18796_v4 = vld [vmem:[#allocation58_spill] sm:$0xff] }
 0x1b0   : > { %18794 = vst [vmem:[#allocation53_spill] sm:$0xff] %v13260_v42  ;;  %4639 = vperm.xlu0 %10917, %v11430_v10   ;;  %8814 = vmatprep.mubr.msk.f32.mxu1 %vm2209_vm13, %v18734_v53  ;;  %v13266_v22 = vpop.permute.xlu0 %3019  ;;  %v955_v28 = vpop.f32.mrf.mxu0  ;;  %vm2237_vm15 = vcmp.eq.s32.totalorder %v18663_v18, %v18796_v4  ;;  %v18797_v12 = vld [vmem:[#allocation54_spill] sm:$0xff]  ;;  %vm2221_vm13 = vcmp.eq.s32.totalorder %v11690_v56, %v18777_v59 }
 0x1b1   : > { %18795 = vst [vmem:[#allocation105_spill] sm:$0xff] %v13266_v22  ;;  %10456 = vmatmul.mubr.msk.f32.gmra.mxu0 %vm2234_vm14, %v18734_v53  ;;  %3337 = vmatprep.subr.mxu0 %v18592_v1  ;;  %v18800_v22 = vld [vmem:[#allocation56_spill] sm:$0xff]  ;;  %vm2258_vm14 = vcmp.eq.s32.totalorder %v18663_v18, %v18826_v30 }
 0x1b2   : > { %10458 = vmatprep.mubr.msk.f32.mxu0 %vm2237_vm15, %v18734_v53  ;;  %3338 = vmatpush1.msra.mxu0 %v18797_v12  ;;  %v13274_v5 = vpop.f32.mrf.mxu1 }
 0x1b3   : > { %18798 = vst [vmem:[#allocation58_spill] sm:$0xff] %v13274_v5  ;;  %3339 = vmatprep.subr.mxu0 %v18592_v1  ;;  %4618 = vperm.xlu1 %10918, %v11336_v17   ;;  %v13280_v28 = vpop.permute.xlu1 %3010  ;;  %v958_v55 = vpop.f32.mrf.mxu0 }
 0x1b4   : > { %18799 = vst [vmem:[#allocation54_spill] sm:$0xff] %v13280_v28  ;;  %8815 = vmatmul.mubr.msk.f32.gmra.mxu1 %vm2208_vm0, %v18734_v53  ;;  %3340 = vmatpush1.msra.mxu0 %v18800_v22  ;;  %v13287_v12 = vadd.f32 %v13007_v27, %v958_v55  ;;  %v1709_v5 = vpop.f32.mrf.mxu1  ;;  %v18803_v27 = vld [vmem:[#allocation20_spill] sm:$0xff]  ;;  %vm2220_vm0 = vcmp.eq.s32.totalorder %v11685_v54, %v18777_v59 }
 0x1b5   : > { %4645 = vperm.xlu0 %10917, %v11460_v36   ;;  %8816 = vmatprep.mubr.msk.f32.mxu1 %vm2212_vm1, %v18734_v53  ;;  %v13293_v60 = vpop.permute.xlu0 %3763  ;;  %v960_v28 = vpop.f32.mrf.mxu0  ;;  %vm2224_vm1 = vcmp.eq.s32.totalorder %v11690_v56, %v18778_v63 }
 0x1b6   : > { %18801 = vst [vmem:[#allocation56_spill] sm:$0xff] %v13287_v12  ;;  %18802 = vst [vmem:[#allocation106_spill] sm:$0xff] %v13293_v60  ;;  %10459 = vmatmul.mubr.msk.f32.gmra.mxu0 %vm2240_vm2, %v18734_v53  ;;  %3341 = vmatprep.subr.mxu0 %v18592_v1  ;;  %v18806_v12 = vld [vmem:[#allocation59_spill] sm:$0xff]  ;;  %vm2264_vm2 = vcmp.eq.s32.totalorder %v18663_v18, %v12752_v11 }
 0x1b7   : > { %10461 = vmatprep.mubr.msk.f32.mxu0 %vm2243_vm3, %v18734_v53  ;;  %3342 = vmatpush2.msra.mxu0 %v18803_v27  ;;  %v13301_v55 = vpop.f32.mrf.mxu1 }
 0x1b8   : > { %3343 = vmatprep.subr.mxu0 %v18592_v1  ;;  %10490 = vmatprep.subr.mxu1 %v12673_v20  ;;  %v13307_v5 = vpop.f32.mrf.mxu0  ;;  %v13311_v22 = vpop.permute.xlu1 %3016 }
 0x1b9   : > { %18804 = vst [vmem:[#allocation20_spill] sm:$0xff] %v13307_v5  ;;  %4624 = vperm.xlu1 %10918, %v11371_v31   ;;  %8817 = vmatmul.mubr.msk.f32.gmra.mxu1 %vm2211_vm4, %v18734_v53  ;;  %18805 = vst [vmem:[#allocation107_spill] sm:$0xff] %v13311_v22  ;;  %v1714_v28 = vpop.f32.mrf.mxu1  ;;  %v18813_v22 = vld [vmem:[#allocation62_spill] sm:$0xff]  ;;  %vm2223_vm4 = vcmp.eq.s32.totalorder %v11685_v54, %v18778_v63 }
 0x1ba   : > { %3344 = vmatpush2.msra.mxu0 %v18806_v12  ;;  %10491 = vmatpush3.msra.mxu1 %v12673_v20  ;;  %v13317_v27 = vpop.permute.xlu0 %3772  ;;  %v965_v60 = vpop.f32.mrf.mxu0  ;;  %v18809_v20 = vld [vmem:[#allocation61_spill] sm:$0xff] }
 0x1bb   : > { %18807 = vst [vmem:[#allocation59_spill] sm:$0xff] %v13317_v27  ;;  %4651 = vperm.xlu0 %10917, %v11488_v62   ;;  %8818 = vmatprep.mubr.msk.f32.mxu1 %vm2215_vm5, %v18734_v53  ;;  %v13323_v34 = vpop.f32.mrf.mxu1  ;;  %vm2249_vm7 = vcmp.eq.s32.totalorder %v18663_v18, %v18809_v20  ;;  %v18810_v60 = vld [vmem:[#allocation60_spill] sm:$0xff]  ;;  %v18812_v27 = vld [vmem:[#allocation15_spill] sm:$0xff]  ;;  %vm2227_vm5 = vcmp.eq.s32.totalorder %v11690_v56, %v12547_v51 }
 0x1bc   : > { %18808 = vst [vmem:[#allocation108_spill] sm:$0xff] %v13323_v34  ;;  %10462 = vmatmul.mubr.msk.f32.gmra.mxu0 %vm2246_vm6, %v18734_v53  ;;  %3345 = vmatprep.subr.mxu0 %v18592_v1  ;;  %v968_v12 = vpop.f32.mrf.mxu0 }
 0x1bd   : > { %10464 = vmatprep.mubr.msk.f32.mxu0 %vm2249_vm7, %v18734_v53  ;;  %3346 = vmatpush2.msra.mxu0 %v18810_v60  ;;  %v13332_v28 = vadd.f32 %v13053_v16, %v968_v12  ;;  %v1719_v5 = vpop.f32.mrf.mxu1  ;;  %v18815_v16 = vld [vmem:[#allocation65_spill] sm:$0xff]  ;;  %v18819_v12 = vld [vmem:[#allocation64_spill] sm:$0xff] }
 0x1be   : > { %3347 = vmatprep.subr.mxu0 %v18592_v1  ;;  %4630 = vperm.xlu1 %10918, %v18812_v27   ;;  %v970_v34 = vpop.f32.mrf.mxu0  ;;  %vm2252_vm10 = vcmp.eq.s32.totalorder %v18663_v18, %v18815_v16 }
 0x1bf   : > { %18811 = vst [vmem:[#allocation61_spill] sm:$0xff] %v13332_v28  ;;  %8819 = vmatmul.mubr.msk.f32.gmra.mxu1 %vm2214_vm8, %v18734_v53  ;;  %3348 = vmatpush2.msra.mxu0 %v18813_v22  ;;  %v13342_v60 = vpop.permute.xlu1 %3760  ;;  %v18817_v22 = vld [vmem:[#allocation63_spill] sm:$0xff]  ;;  %vm2226_vm8 = vcmp.eq.s32.totalorder %v11685_v54, %v12547_v51  ;;  %v18846_v51 = vld [vmem:[#allocation77_spill] sm:$0xff] }
 0x1c0   : > { %18814 = vst [vmem:[#allocation60_spill] sm:$0xff] %v13342_v60  ;;  %4657 = vperm.xlu0 %10917, %v11518_v26   ;;  %8820 = vmatprep.mubr.msk.f32.mxu1 %vm2218_vm9, %v18734_v53  ;;  %v13348_v5 = vpop.permute.xlu0 %3778  ;;  %v13350_v33 = vpop.f32.mrf.mxu1  ;;  %vm2255_vm11 = vcmp.eq.s32.totalorder %v18663_v18, %v18817_v22  ;;  %v18820_v60 = vld [vmem:[#allocation68_spill] sm:$0xff]  ;;  %vm2230_vm9 = vcmp.eq.s32.totalorder %v11690_v56, %v18787_v15 }
 0x1c1   : > { %18816 = vst [vmem:[#allocation62_spill] sm:$0xff] %v13348_v5  ;;  %10465 = vmatmul.mubr.msk.f32.gmra.mxu0 %vm2252_vm10, %v18734_v53  ;;  %3349 = vmatprep.subr.mxu0 %v18592_v1  ;;  %v13356_v34 = vpop.f32.mrf.mxu0  ;;  %vm2276_vm10 = vcmp.eq.s32.totalorder %v18663_v18, %v12829_v46 }
 0x1c2   : > { %18818 = vst [vmem:[#allocation65_spill] sm:$0xff] %v13356_v34  ;;  %10467 = vmatprep.mubr.msk.f32.mxu0 %vm2255_vm11, %v18734_v53  ;;  %3350 = vmatpush2.msra.mxu0 %v18819_v12  ;;  %v1724_v28 = vpop.f32.mrf.mxu1  ;;  %vm2279_vm11 = vcmp.eq.s32.totalorder %v18663_v18, %v18846_v51 }
 0x1c3   : > { %3351 = vmatprep.subr.mxu0 %v18592_v1  ;;  %10492 = vmatprep.subr.mxu1 %v18820_v60  ;;  %v975_v5 = vpop.f32.mrf.mxu0 }
 0x1c4   : > { %4636 = vperm.xlu1 %10918, %v18821_v50   ;;  %8821 = vmatmul.mubr.msk.f32.gmra.mxu1 %vm2217_vm12, %v18734_v53  ;;  %v13366_v42 = vpop.permute.xlu1 %3766  ;;  %v13368_v34 = vpop.f32.mrf.mxu1  ;;  %vm2229_vm12 = vcmp.eq.s32.totalorder %v11685_v54, %v18787_v15 }
 0x1c5   : > { %18822 = vst [vmem:[#allocation63_spill] sm:$0xff] %v13366_v42  ;;  %18823 = vst [vmem:[#allocation64_spill] sm:$0xff] %v13368_v34  ;;  %3352 = vmatpush2.msra.mxu0 %v18824_v6  ;;  %10493 = vmatpush3.msra.mxu1 %v18820_v60  ;;  %v13374_v28 = vpop.permute.xlu0 %3784  ;;  %v978_v12 = vpop.f32.mrf.mxu0  ;;  %v18828_v6 = vld [vmem:[#allocation66_spill] sm:$0xff] }
 0x1c6   : > { %18825 = vst [vmem:[#allocation68_spill] sm:$0xff] %v13374_v28  ;;  %4663 = vperm.xlu0 %10917, %v11546_v25   ;;  %8822 = vmatprep.mubr.msk.f32.mxu1 %vm2221_vm13, %v18734_v53  ;;  %v13381_v5 = vadd.f32 %v13085_v35, %v978_v12  ;;  %v1729_v34 = vpop.f32.mrf.mxu1  ;;  %vm2261_vm15 = vcmp.eq.s32.totalorder %v18663_v18, %v18828_v6  ;;  %v18829_v28 = vld [vmem:[#allocation72_spill] sm:$0xff] }
 0x1c7   : > { %10468 = vmatmul.mubr.msk.f32.gmra.mxu0 %vm2258_vm14, %v18734_v53  ;;  %3353 = vmatprep.subr.mxu0 %v18592_v1  ;;  %v980_v60 = vpop.f32.mrf.mxu0  ;;  %vm2233_vm13 = vcmp.eq.s32.totalorder %v11690_v56, %v12579_v3  ;;  %vm2282_vm14 = vcmp.eq.s32.totalorder %v18663_v18, %v12872_v21 }
 0x1c8   : > { %18827 = vst [vmem:[#allocation67_spill] sm:$0xff] %v13381_v5  ;;  %10470 = vmatprep.mubr.msk.f32.mxu0 %vm2261_vm15, %v18734_v53  ;;  %3354 = vmatpush2.msra.mxu0 %v18829_v28  ;;  %v18835_v5 = vld [vmem:[#allocation73_spill] sm:$0xff]  ;;  %vm2232_vm15 = vcmp.eq.s32.totalorder %v11685_v54, %v12579_v3 }
 0x1c9   : > { %3355 = vmatprep.subr.mxu0 %v18592_v1  ;;  %4642 = vperm.xlu1 %10918, %v11463_v38   ;;  %v13393_v35 = vpop.permute.xlu1 %3769  ;;  %v13395_v34 = vpop.f32.mrf.mxu1 }
 0x1ca   : > { %18830 = vst [vmem:[#allocation69_spill] sm:$0xff] %v13393_v35  ;;  %8823 = vmatmul.mubr.msk.f32.gmra.mxu1 %vm2220_vm0, %v18734_v53  ;;  %3356 = vmatpush2.msra.mxu0 %v12765_v0  ;;  %v13401_v12 = vpop.permute.xlu0 %3790  ;;  %v13403_v28 = vpop.f32.mrf.mxu0  ;;  %v18833_v0 = vld [vmem:[#allocation71_spill] sm:$0xff]  ;;  %v18837_v35 = vld [vmem:[#allocation18_spill] sm:$0xff] }
 0x1cb   : > { %18831 = vst [vmem:[#allocation66_spill] sm:$0xff] %v13401_v12  ;;  %18832 = vst [vmem:[#allocation72_spill] sm:$0xff] %v13403_v28  ;;  %4669 = vperm.xlu0 %10917, %v11573_v39   ;;  %8824 = vmatprep.mubr.msk.f32.mxu1 %vm2224_vm1, %v18734_v53  ;;  %v1734_v59 = vpop.f32.mrf.mxu1  ;;  %vm2267_vm3 = vcmp.eq.s32.totalorder %v18663_v18, %v18833_v0 }
 0x1cc   : > { %10471 = vmatmul.mubr.msk.f32.gmra.mxu0 %vm2264_vm2, %v18734_v53  ;;  %3357 = vmatprep.subr.mxu0 %v18592_v1  ;;  %v985_v60 = vpop.f32.mrf.mxu0  ;;  %vm2236_vm2 = vcmp.eq.s32.totalorder %v11690_v56, %v18796_v4 }
 0x1cd   : > { %10473 = vmatprep.mubr.msk.f32.mxu0 %vm2267_vm3, %v18734_v53  ;;  %3358 = vmatpush2.msra.mxu0 %v12794_v43  ;;  %v13415_v28 = vpop.f32.mrf.mxu1 }
 0x1ce   : > { %18834 = vst [vmem:[#allocation71_spill] sm:$0xff] %v13415_v28  ;;  %3359 = vmatprep.subr.mxu0 %v18592_v1  ;;  %10494 = vmatprep.subr.mxu1 %v18835_v5  ;;  %v13421_v59 = vpop.permute.xlu1 %3775  ;;  %v988_v12 = vpop.f32.mrf.mxu0 }
 0x1cf   : > { %18836 = vst [vmem:[#allocation73_spill] sm:$0xff] %v13421_v59  ;;  %4648 = vperm.xlu1 %10918, %v18837_v35   ;;  %8825 = vmatmul.mubr.msk.f32.gmra.mxu1 %vm2223_vm4, %v18734_v53  ;;  %v13425_v60 = vpop.permute.xlu0 %3796  ;;  %v13428_v43 = vadd.f32 %v13122_v48, %v988_v12  ;;  %v1739_v28 = vpop.f32.mrf.mxu1  ;;  %v18840_v59 = vld [vmem:[#allocation22_spill] sm:$0xff]  ;;  %v18841_v48 = vld [vmem:[#allocation75_spill] sm:$0xff]  ;;  %vm2235_vm4 = vcmp.eq.s32.totalorder %v11685_v54, %v18796_v4  ;;  %v10978_v4 = vld [vmem:[%s18254_s2 + $0x178] sm:$0xff] }
 0x1d0   : > { %18838 = vst [vmem:[#allocation109_spill] sm:$0xff] %v13425_v60  ;;  %3360 = vmatpush2.msra.mxu0 %v12823_v57  ;;  %10495 = vmatpush3.msra.mxu1 %v18835_v5  ;;  %v990_v63 = vpop.f32.mrf.mxu0  ;;  %vm2270_vm6 = vcmp.eq.s32.totalorder %v18663_v18, %v18840_v59  ;;  %vm2273_vm7 = vcmp.eq.s32.totalorder %v18663_v18, %v18841_v48  ;;  %v18850_v60 = vld [vmem:[#allocation23_spill] sm:$0xff] }
 0x1d1   : > { %18839 = vst [vmem:[#allocation110_spill] sm:$0xff] %v13428_v43  ;;  %4675 = vperm.xlu0 %10917, %v18737_v14   ;;  %8826 = vmatprep.mubr.msk.f32.mxu1 %vm2227_vm5, %v18734_v53  ;;  %vm2239_vm5 = vcmp.eq.s32.totalorder %v11690_v56, %v12614_v7 }
 0x1d2   : > { %10474 = vmatmul.mubr.msk.f32.gmra.mxu0 %vm2270_vm6, %v18734_v53  ;;  %3361 = vmatprep.subr.mxu0 %v18592_v1  ;;  %v13442_v57 = vpop.f32.mrf.mxu1 }
 0x1d3   : > { %10476 = vmatprep.mubr.msk.f32.mxu0 %vm2273_vm7, %v18734_v53  ;;  %3362 = vmatpush2.msra.mxu0 %v12856_v47  ;;  %v13446_v5 = vpop.permute.xlu1 %3781  ;;  %v13448_v12 = vpop.f32.mrf.mxu0 }
 0x1d4   : > { %18842 = vst [vmem:[#allocation22_spill] sm:$0xff] %v13446_v5  ;;  %18843 = vst [vmem:[#allocation75_spill] sm:$0xff] %v13448_v12  ;;  %3363 = vmatprep.subr.mxu0 %v18592_v1  ;;  %4654 = vperm.xlu1 %10918, %v11521_v41   ;;  %v13454_v28 = vpop.permute.xlu0 %3802  ;;  %v1744_v63 = vpop.f32.mrf.mxu1 }
 0x1d5   : > { %18844 = vst [vmem:[#allocation111_spill] sm:$0xff] %v13454_v28  ;;  %8827 = vmatmul.mubr.msk.f32.gmra.mxu1 %vm2226_vm8, %v18734_v53  ;;  %3364 = vmatpush2.msra.mxu0 %v12889_v32  ;;  %v995_v47 = vpop.f32.mrf.mxu0  ;;  %vm2238_vm8 = vcmp.eq.s32.totalorder %v11685_v54, %v12614_v7 }
 0x1d6   : > { %4681 = vperm.xlu0 %10917, %v18746_v24   ;;  %8828 = vmatprep.mubr.msk.f32.mxu1 %vm2230_vm9, %v18734_v53  ;;  %v13464_v12 = vpop.f32.mrf.mxu1  ;;  %vm2242_vm9 = vcmp.eq.s32.totalorder %v11690_v56, %v12584_v37 }
 0x1d7   : > { %18845 = vst [vmem:[#allocation112_spill] sm:$0xff] %v13464_v12  ;;  %10477 = vmatmul.mubr.msk.f32.gmra.mxu0 %vm2276_vm10, %v18734_v53  ;;  %3365 = vmatprep.subr.mxu0 %v18592_v1  ;;  %v998_v32 = vpop.f32.mrf.mxu0  ;;  %v13481_v12 = vld [vmem:[%s18254_s2 + $0x140] sm:$0xff] }
 0x1d8   : > { %10479 = vmatprep.mubr.msk.f32.mxu0 %vm2279_vm11, %v18734_v53  ;;  %3366 = vmatpush2.msra.mxu0 %v12922_v8  ;;  %v13472_v63 = vpop.permute.xlu1 %3787  ;;  %v13475_v47 = vadd.f32 %v13150_v2, %v998_v32  ;;  %v1749_v43 = vpop.f32.mrf.mxu1  ;;  %v18853_v32 = vld [vmem:[#allocation11_spill] sm:$0xff] }
 0x1d9   : > { %18847 = vst [vmem:[#allocation77_spill] sm:$0xff] %v13472_v63  ;;  %3367 = vmatprep.subr.mxu0 %v18592_v1  ;;  %10496 = vmatprep.subr.mxu1 %v13481_v12  ;;  %v13486_v28 = vpop.permute.xlu0 %3808  ;;  %v1000_v8 = vpop.f32.mrf.mxu0  ;;  %vm3022_vm0 = vcmp.eq.s32.totalorder %v11690_v56, %v18853_v32  ;;  %vm3021_vm1 = vcmp.eq.s32.totalorder %v11685_v54, %v18853_v32 }
 0x1da   : > { %18848 = vst [vmem:[#allocation113_spill] sm:$0xff] %v13475_v47  ;;  %18849 = vst [vmem:[#allocation114_spill] sm:$0xff] %v13486_v28  ;;  %4660 = vperm.xlu1 %10918, %v18850_v60   ;;  %8829 = vmatmul.mubr.msk.f32.gmra.mxu1 %vm2229_vm12, %v18734_v53  ;;  %v18426_v47 = vmov 6   ;;  %v13538_v28 = vld [vmem:[%s18254_s2 + $0x138] sm:$0xff]  ;;  %vm2241_vm12 = vcmp.eq.s32.totalorder %v11685_v54, %v12584_v37  ;;  %v10980_v37 = vld [vmem:[%s18254_s2 + $0x170] sm:$0xff] }
 0x1db   : > { %3368 = vmatpush2.msra.mxu0 %v12953_v40  ;;  %10497 = vmatpush3.msra.mxu1 %v13481_v12  ;;  %v13494_v2 = vpop.f32.mrf.mxu1 }
 0x1dc   : > { %4687 = vperm.xlu0 %10917, %v18753_v23   ;;  %8830 = vmatprep.mubr.msk.f32.mxu1 %vm2233_vm13, %v18734_v53  ;;  %v13500_v15 = vpop.f32.mrf.mxu0  ;;  %vm2245_vm13 = vcmp.eq.s32.totalorder %v11690_v56, %v12646_v13 }
 0x1dd   : > { %18851 = vst [vmem:[#allocation23_spill] sm:$0xff] %v13500_v15  ;;  %10480 = vmatmul.mubr.msk.f32.gmra.mxu0 %vm2282_vm14, %v18734_v53  ;;  %3369 = vmatprep.subr.mxu0 %v18592_v1  ;;  %v13504_v40 = vpop.permute.xlu1 %3793  ;;  %v1754_v43 = vpop.f32.mrf.mxu1 }
 0x1de   : > { %18852 = vst [vmem:[#allocation115_spill] sm:$0xff] %v13504_v40  ;;  %3370 = vmatpush2.msra.mxu0 %v12985_v44  ;;  %4666 = vperm.xlu1 %10918, %v18658_v19   ;;  %v13512_v8 = vpop.permute.xlu0 %3814  ;;  %v1005_v15 = vpop.f32.mrf.mxu0  ;;  %v18856_v44 = vld [vmem:[#allocation38_spill] sm:$0xff]  ;;  %v18860_v40 = vld [vmem:[#allocation27_spill] sm:$0xff] }
 0x1df   : > { %18854 = vst [vmem:[#allocation11_spill] sm:$0xff] %v13512_v8  ;;  %3371 = vmatprep.subr.mxu0 %v18592_v1  ;;  %8831 = vmatmul.mubr.msk.f32.gmra.mxu1 %vm2232_vm15, %v18734_v53  ;;  %v13518_v43 = vpop.f32.mrf.mxu1  ;;  %v18857_v15 = vld [vmem:[#allocation82_spill] sm:$0xff] }
 0x1e0   : > { %18855 = vst [vmem:[#allocation116_spill] sm:$0xff] %v13518_v43  ;;  %3372 = vmatpush2.msra.mxu0 %v18856_v44  ;;  %10920 = vset.pattern.permute.xlu0 %v18426_v47  ;;  %v1008_v3 = vpop.f32.mrf.mxu0  ;;  %vm3025_vm3 = vcmp.eq.s32.totalorder %v11690_v56, %v18857_v15  ;;  %vm3024_vm6 = vcmp.eq.s32.totalorder %v11685_v54, %v18857_v15 }
 0x1e1   : > { %8992 = vmatprep.mubr.msk.f32.mxu0 %vm3022_vm0, %v18734_v53  ;;  %8832 = vmatprep.mubr.msk.f32.mxu1 %vm2236_vm2, %v18734_v53  ;;  %v13529_v8 = vadd.f32 %v13183_v58, %v1008_v3  ;;  %v1759_v43 = vpop.f32.mrf.mxu1  ;;  %v18863_v3 = vld [vmem:[#allocation85_spill] sm:$0xff]  ;;  %vm2244_vm0 = vcmp.eq.s32.totalorder %v11685_v54, %v12646_v13 }
 0x1e2   : > { %5431 = vperm.xlu0 %10920, %v18763_v9   ;;  %8993 = vmatmul.mubr.msk.f32.vlgmr.msra.gmra.mxu0 %vm3021_vm1, %v18734_v53  ;;  %v13533_v44 = vpop.permute.xlu1 %3799  ;;  %v1010_v47 = vpop.f32.mrf.mxu0  ;;  %vm3028_vm7 = vcmp.eq.s32.totalorder %v11690_v56, %v18863_v3  ;;  %vm3027_vm10 = vcmp.eq.s32.totalorder %v11685_v54, %v18863_v3  ;;  %vm2248_vm1 = vcmp.eq.s32.totalorder %v11690_v56, %v18809_v20 }
 0x1e3   : > { %18858 = vst [vmem:[#allocation38_spill] sm:$0xff] %v13529_v8  ;;  %18859 = vst [vmem:[#allocation82_spill] sm:$0xff] %v13533_v44  ;;  %10498 = vmatprep.subr.mxu1 %v13538_v28  ;;  %4672 = vperm.xlu1 %10918, %v18860_v40   ;;  %v13544_v58 = vpop.permute.xlu0 %3820 }
 0x1e4   : > { %18861 = vst [vmem:[#allocation117_spill] sm:$0xff] %v13544_v58  ;;  %8833 = vmatmul.mubr.msk.f32.gmra.mxu1 %vm2235_vm4, %v18734_v53  ;;  %8994 = vmatprep.mubr.msk.f32.mxu0 %vm3025_vm3, %v18734_v53  ;;  %v13552_v47 = vpop.f32.mrf.mxu1  ;;  %v18864_v58 = vld [vmem:[#allocation31_spill] sm:$0xff]  ;;  %vm2247_vm4 = vcmp.eq.s32.totalorder %v11685_v54, %v18809_v20 }
 0x1e5   : > { %10499 = vmatpush3.msra.mxu1 %v13538_v28  ;;  %8834 = vmatprep.mubr.msk.f32.mxu1 %vm2239_vm5, %v18734_v53  ;;  %v13556_v43 = vpop.f32.mrf.mxu0  ;;  %vm2251_vm5 = vcmp.eq.s32.totalorder %v11690_v56, %v18815_v16 }
 0x1e6   : > { %18862 = vst [vmem:[#allocation118_spill] sm:$0xff] %v13556_v43  ;;  %10562 = vmatprep.subr.mxu0 %v10978_v4  ;;  %5440 = vperm.xlu0 %10920, %v11262_v49   ;;  %v1764_v8 = vpop.f32.mrf.mxu1 }
 0x1e7   : > { %8995 = vmatmul.mubr.msk.f32.gmra.mxu0 %vm3024_vm6, %v18734_v53  ;;  %4678 = vperm.xlu1 %10918, %v18864_v58   ;;  %v13568_v44 = vpop.permute.xlu1 %3805  ;;  %v1015_v43 = vpop.f32.mrf.mxu0 }
 0x1e8   : > { %18865 = vst [vmem:[#allocation85_spill] sm:$0xff] %v13568_v44  ;;  %10563 = vmatpush3.msra.mxu0 %v10978_v4  ;;  %8835 = vmatmul.mubr.msk.f32.gmra.mxu1 %vm2238_vm8, %v18734_v53  ;;  %v13575_v8 = vpop.permute.xlu0 %3826  ;;  %v13577_v63 = vpop.f32.mrf.mxu1  ;;  %v13587_v43 = vld [vmem:[%s18254_s2 + $0x130] sm:$0xff]  ;;  %vm2250_vm8 = vcmp.eq.s32.totalorder %v11685_v54, %v18815_v16  ;;  %v13688_v16 = vld [vmem:[%s18254_s2 + $0x120] sm:$0xff] }
 0x1e9   : > { %18866 = vst [vmem:[#allocation31_spill] sm:$0xff] %v13575_v8  ;;  %18867 = vst [vmem:[#allocation119_spill] sm:$0xff] %v13577_v63  ;;  %8996 = vmatprep.mubr.msk.f32.mxu0 %vm3028_vm7, %v18734_v53  ;;  %8836 = vmatprep.mubr.msk.f32.mxu1 %vm2242_vm9, %v18734_v53  ;;  %v13581_v7 = vpop.f32.mrf.mxu0  ;;  %v18869_v8 = vld [vmem:[#allocation12_spill] sm:$0xff]  ;;  %v18870_v63 = vld [vmem:[#allocation34_spill] sm:$0xff]  ;;  %vm2254_vm9 = vcmp.eq.s32.totalorder %v11690_v56, %v18817_v22 }
 0x1ea   : > { %18868 = vst [vmem:[#allocation120_spill] sm:$0xff] %v13581_v7  ;;  %5446 = vperm.xlu0 %10920, %v11300_v61   ;;  %10500 = vmatprep.subr.mxu1 %v13587_v43  ;;  %v1769_v4 = vpop.f32.mrf.mxu1  ;;  %vm3031_vm11 = vcmp.eq.s32.totalorder %v11690_v56, %v18869_v8  ;;  %vm3030_vm14 = vcmp.eq.s32.totalorder %v11685_v54, %v18869_v8  ;;  %18887 = vst [vmem:[#allocation124_spill] sm:$0xff] %v13688_v16 }
 0x1eb   : > { %8997 = vmatmul.mubr.msk.f32.gmra.mxu0 %vm3027_vm10, %v18734_v53  ;;  %4684 = vperm.xlu1 %10918, %v18870_v63   ;;  %v1020_v7 = vpop.f32.mrf.mxu0 }
 0x1ec   : > { %8998 = vmatprep.mubr.msk.f32.mxu0 %vm3031_vm11, %v18734_v53  ;;  %8837 = vmatmul.mubr.msk.f32.gmra.mxu1 %vm2241_vm12, %v18734_v53  ;;  %v13600_v44 = vpop.permute.xlu1 %3811  ;;  %vm2253_vm12 = vcmp.eq.s32.totalorder %v11685_v54, %v18817_v22  ;;  %v10984_v22 = vld [vmem:[%s18254_s2 + $0x160] sm:$0xff] }
 0x1ed   : > { %18871 = vst [vmem:[#allocation12_spill] sm:$0xff] %v13600_v44  ;;  %10501 = vmatpush3.msra.mxu1 %v13587_v43  ;;  %8838 = vmatprep.mubr.msk.f32.mxu1 %vm2245_vm13, %v18734_v53  ;;  %v13604_v4 = vpop.permute.xlu0 %3832  ;;  %v13606_v5 = vpop.f32.mrf.mxu1  ;;  %v18874_v44 = vld [vmem:[#allocation87_spill] sm:$0xff]  ;;  %vm2257_vm13 = vcmp.eq.s32.totalorder %v11690_v56, %v18826_v30 }
 0x1ee   : > { %18872 = vst [vmem:[#allocation34_spill] sm:$0xff] %v13604_v4  ;;  %10564 = vmatprep.subr.mxu0 %v10980_v37  ;;  %5452 = vperm.xlu0 %10920, %v11336_v17   ;;  %v13614_v7 = vpop.f32.mrf.mxu0  ;;  %vm3034_vm15 = vcmp.eq.s32.totalorder %v11690_v56, %v18874_v44  ;;  %v18875_v4 = vmov 6   ;;  %v18876_v17 = vld [vmem:[#allocation2_spill] sm:$0xff]  ;;  %vm3033_vm2 = vcmp.eq.s32.totalorder %v11685_v54, %v18874_v44 }
 0x1ef   : > { %18873 = vst [vmem:[#allocation121_spill] sm:$0xff] %v13614_v7  ;;  %8999 = vmatmul.mubr.msk.f32.gmra.mxu0 %vm3030_vm14, %v18734_v53  ;;  %10919 = vset.pattern.permute.xlu1 %v18875_v4  ;;  %v1774_v42 = vpop.f32.mrf.mxu1  ;;  %v13645_v4 = vld [vmem:[%s18254_s2 + $0x128] sm:$0xff] }
 0x1f0   : > { %9000 = vmatprep.mubr.msk.f32.mxu0 %vm3034_vm15, %v18734_v53  ;;  %10565 = vmatpush3.msra.mxu0 %v10980_v37  ;;  %v1025_v61 = vpop.f32.mrf.mxu0  ;;  %v18881_v42 = vld [vmem:[#allocation83_spill] sm:$0xff] }
 0x1f1   : > { %8839 = vmatmul.mubr.msk.f32.gmra.mxu1 %vm2244_vm0, %v18734_v53  ;;  %5428 = vperm.xlu1 %10919, %v18876_v17   ;;  %v13627_v7 = vpop.permute.xlu1 %3817  ;;  %v13629_v49 = vpop.f32.mrf.mxu1  ;;  %vm3037_vm3 = vcmp.eq.s32.totalorder %v11690_v56, %v18881_v42  ;;  %vm3036_vm6 = vcmp.eq.s32.totalorder %v11685_v54, %v18881_v42  ;;  %vm2256_vm0 = vcmp.eq.s32.totalorder %v11685_v54, %v18826_v30 }
 0x1f2   : > { %18877 = vst [vmem:[#allocation87_spill] sm:$0xff] %v13627_v7  ;;  %18878 = vst [vmem:[#allocation2_spill] sm:$0xff] %v13629_v49  ;;  %8840 = vmatprep.mubr.msk.f32.mxu1 %vm2248_vm1, %v18734_v53  ;;  %5458 = vperm.xlu0 %10920, %v11371_v31   ;;  %v13635_v13 = vpop.permute.xlu0 %3838  ;;  %v13637_v61 = vpop.f32.mrf.mxu0  ;;  %vm2260_vm1 = vcmp.eq.s32.totalorder %v11690_v56, %v18828_v6 }
 0x1f3   : > { %18879 = vst [vmem:[#allocation122_spill] sm:$0xff] %v13635_v13  ;;  %18880 = vst [vmem:[#allocation123_spill] sm:$0xff] %v13637_v61  ;;  %9001 = vmatmul.mubr.msk.f32.gmra.mxu0 %vm3033_vm2, %v18734_v53  ;;  %10502 = vmatprep.subr.mxu1 %v13645_v4  ;;  %v1779_v37 = vpop.f32.mrf.mxu1  ;;  %v18883_v13 = vld [vmem:[#allocation37_spill] sm:$0xff] }
 0x1f4   : > { %9002 = vmatprep.mubr.msk.f32.mxu0 %vm3037_vm3, %v18734_v53  ;;  %10503 = vmatpush3.msra.mxu1 %v13645_v4  ;;  %v1030_v61 = vpop.f32.mrf.mxu0  ;;  %v10982_v37 = vld [vmem:[%s18254_s2 + $0x168] sm:$0xff]  ;;  %vm3040_vm7 = vcmp.eq.s32.totalorder %v11690_v56, %v18883_v13  ;;  %vm3039_vm10 = vcmp.eq.s32.totalorder %v11685_v54, %v18883_v13 }
 0x1f5   : > { %8841 = vmatmul.mubr.msk.f32.gmra.mxu1 %vm2247_vm4, %v18734_v53  ;;  %5434 = vperm.xlu1 %10919, %v11219_v29   ;;  %vm2259_vm4 = vcmp.eq.s32.totalorder %v11685_v54, %v18828_v6 }
 0x1f6   : > { %8842 = vmatprep.mubr.msk.f32.mxu1 %vm2251_vm5, %v18734_v53  ;;  %10566 = vmatprep.subr.mxu0 %v10982_v37  ;;  %v13662_v20 = vpop.permute.xlu1 %3823  ;;  %v13664_v61 = vpop.f32.mrf.mxu1  ;;  %vm2263_vm5 = vcmp.eq.s32.totalorder %v11690_v56, %v12752_v11 }
 0x1f7   : > { %18882 = vst [vmem:[#allocation83_spill] sm:$0xff] %v13662_v20  ;;  %9003 = vmatmul.mubr.msk.f32.gmra.mxu0 %vm3036_vm6, %v18734_v53  ;;  %5464 = vperm.xlu0 %10920, %v18812_v27   ;;  %v13670_v49 = vpop.permute.xlu0 %3844  ;;  %v18885_v20 = vld [vmem:[#allocation3_spill] sm:$0xff] }
 0x1f8   : > { %18884 = vst [vmem:[#allocation37_spill] sm:$0xff] %v13670_v49  ;;  %9004 = vmatprep.mubr.msk.f32.mxu0 %vm3040_vm7, %v18734_v53  ;;  %10567 = vmatpush3.msra.mxu0 %v10982_v37  ;;  %v10356_v7 = vpop.f32.mrf.mxu0  ;;  %v1784_v31 = vpop.f32.mrf.mxu1 }
 0x1f9   : > { %8843 = vmatmul.mubr.msk.f32.gmra.mxu1 %vm2250_vm8, %v18734_v53  ;;  %5437 = vperm.xlu1 %10919, %v18885_v20   ;;  %v13680_v27 = vadd.f32 %v10356_v7, %v13301_v55  ;;  %v18889_v55 = vld [vmem:[#allocation86_spill] sm:$0xff]  ;;  %vm2262_vm8 = vcmp.eq.s32.totalorder %v11685_v54, %v12752_v11  ;;  %v13799_v11 = vld [vmem:[%s18254_s2 + $0x110] sm:$0xff] }
 0x1fa   : > { %8844 = vmatprep.mubr.msk.f32.mxu1 %vm2254_vm9, %v18734_v53  ;;  %10504 = vmatprep.subr.mxu1 %v13688_v16  ;;  %v13691_v31 = vpop.f32.mrf.mxu0  ;;  %vm3043_vm11 = vcmp.eq.s32.totalorder %v11690_v56, %v18889_v55  ;;  %vm3042_vm14 = vcmp.eq.s32.totalorder %v11685_v54, %v18889_v55  ;;  %vm2266_vm9 = vcmp.eq.s32.totalorder %v11690_v56, %v18833_v0 }
 0x1fb   : > { %18886 = vst [vmem:[#allocation3_spill] sm:$0xff] %v13680_v27  ;;  %18888 = vst [vmem:[#allocation125_spill] sm:$0xff] %v13691_v31  ;;  %9005 = vmatmul.mubr.msk.f32.gmra.mxu0 %vm3039_vm10, %v18734_v53  ;;  %5470 = vperm.xlu0 %10920, %v18821_v50   ;;  %v13697_v7 = vpop.permute.xlu1 %3829  ;;  %v13699_v37 = vpop.f32.mrf.mxu1  ;;  %v18893_v31 = vld [vmem:[#allocation5_spill] sm:$0xff] }
 0x1fc   : > { %18890 = vst [vmem:[#allocation86_spill] sm:$0xff] %v13697_v7  ;;  %18891 = vst [vmem:[#allocation126_spill] sm:$0xff] %v13699_v37  ;;  %9006 = vmatprep.mubr.msk.f32.mxu0 %vm3043_vm11, %v18734_v53  ;;  %10505 = vmatpush3.msra.mxu1 %v13688_v16  ;;  %v13705_v49 = vpop.permute.xlu0 %3850  ;;  %v18895_v37 = vld [vmem:[#allocation41_spill] sm:$0xff] }
 0x1fd   : > { %18892 = vst [vmem:[#allocation127_spill] sm:$0xff] %v13705_v49  ;;  %8845 = vmatmul.mubr.msk.f32.gmra.mxu1 %vm2253_vm12, %v18734_v53  ;;  %5443 = vperm.xlu1 %10919, %v18893_v31   ;;  %v10359_v27 = vpop.f32.mrf.mxu0  ;;  %v1789_v7 = vpop.f32.mrf.mxu1  ;;  %vm3046_vm15 = vcmp.eq.s32.totalorder %v11690_v56, %v18895_v37  ;;  %vm3045_vm2 = vcmp.eq.s32.totalorder %v11685_v54, %v18895_v37 }
 0x1fe   : > { %8846 = vmatprep.mubr.msk.f32.mxu1 %vm2257_vm13, %v18734_v53  ;;  %10568 = vmatprep.subr.mxu0 %v10984_v22  ;;  %v13718_v49 = vadd.f32 %v10359_v27, %v13350_v33  ;;  %v18898_v27 = vld [vmem:[#allocation7_spill] sm:$0xff]  ;;  %v13743_v33 = vld [vmem:[%s18254_s2 + $0x118] sm:$0xff]  ;;  %vm2265_vm12 = vcmp.eq.s32.totalorder %v11685_v54, %v18833_v0  ;;  %vm2269_vm13 = vcmp.eq.s32.totalorder %v11690_v56, %v18840_v59  ;;  %v10988_v0 = vld [vmem:[%s18254_s2 + $0x150] sm:$0xff] }
 0x1ff   : > { %9007 = vmatmul.mubr.msk.f32.gmra.mxu0 %vm3042_vm14, %v18734_v53  ;;  %5476 = vperm.xlu0 %10920, %v11463_v38   ;;  %v13724_v7 = vpop.f32.mrf.mxu0  ;;  %v13729_v50 = vpop.permute.xlu1 %3835 }
 0x200   : > { %18894 = vst [vmem:[#allocation5_spill] sm:$0xff] %v13718_v49  ;;  %18896 = vst [vmem:[#allocation41_spill] sm:$0xff] %v13724_v7  ;;  %9008 = vmatprep.mubr.msk.f32.mxu0 %vm3046_vm15, %v18734_v53  ;;  %10569 = vmatpush3.msra.mxu0 %v10984_v22  ;;  %v13731_v16 = vpop.f32.mrf.mxu1 }
 0x201   : > { %18897 = vst [vmem:[#allocation128_spill] sm:$0xff] %v13729_v50  ;;  %8847 = vmatmul.mubr.msk.f32.gmra.mxu1 %vm2256_vm0, %v18734_v53  ;;  %5449 = vperm.xlu1 %10919, %v18898_v27   ;;  %v18900_v50 = vld [vmem:[#allocation89_spill] sm:$0xff]  ;;  %vm2268_vm0 = vcmp.eq.s32.totalorder %v11685_v54, %v18840_v59 }
 0x202   : > { %8848 = vmatprep.mubr.msk.f32.mxu1 %vm2260_vm1, %v18734_v53  ;;  %10506 = vmatprep.subr.mxu1 %v13743_v33  ;;  %v13746_v30 = vpop.permute.xlu0 %4594  ;;  %v10362_v22 = vpop.f32.mrf.mxu0  ;;  %vm3049_vm3 = vcmp.eq.s32.totalorder %v11690_v56, %v18900_v50  ;;  %vm3048_vm6 = vcmp.eq.s32.totalorder %v11685_v54, %v18900_v50  ;;  %vm2272_vm1 = vcmp.eq.s32.totalorder %v11690_v56, %v18841_v48 }
 0x203   : > { %18899 = vst [vmem:[#allocation7_spill] sm:$0xff] %v13746_v30  ;;  %9009 = vmatmul.mubr.msk.f32.gmra.mxu0 %vm3045_vm2, %v18734_v53  ;;  %5482 = vperm.xlu0 %10920, %v18837_v35   ;;  %v13753_v7 = vadd.f32 %v10362_v22, %v13395_v34  ;;  %v1794_v49 = vpop.f32.mrf.mxu1  ;;  %v18905_v34 = vld [vmem:[#allocation26_spill] sm:$0xff] }
 0x204   : > { %9010 = vmatprep.mubr.msk.f32.mxu0 %vm3049_vm3, %v18734_v53  ;;  %10507 = vmatpush3.msra.mxu1 %v13743_v33  ;;  %v13759_v30 = vpop.f32.mrf.mxu0  ;;  %v10986_v49 = vld [vmem:[%s18254_s2 + $0x158] sm:$0xff]  ;;  %vm3052_vm7 = vcmp.eq.s32.totalorder %v11690_v56, %v18905_v34  ;;  %vm3051_vm10 = vcmp.eq.s32.totalorder %v11685_v54, %v18905_v34 }
 0x205   : > { %18901 = vst [vmem:[#allocation89_spill] sm:$0xff] %v13753_v7  ;;  %18902 = vst [vmem:[#allocation129_spill] sm:$0xff] %v13759_v30  ;;  %8849 = vmatmul.mubr.msk.f32.gmra.mxu1 %vm2259_vm4, %v18734_v53  ;;  %5455 = vperm.xlu1 %10919, %v18691_v52   ;;  %v13765_v35 = vpop.f32.mrf.mxu1  ;;  %vm2271_vm4 = vcmp.eq.s32.totalorder %v11685_v54, %v18841_v48  ;;  %v10990_v48 = vld [vmem:[%s18254_s2 + $0x148] sm:$0xff] }
 0x206   : > { %18903 = vst [vmem:[#allocation130_spill] sm:$0xff] %v13765_v35  ;;  %8850 = vmatprep.mubr.msk.f32.mxu1 %vm2263_vm5, %v18734_v53  ;;  %10570 = vmatprep.subr.mxu0 %v10986_v49  ;;  %v13773_v6 = vpop.permute.xlu1 %3841  ;;  %vm2275_vm5 = vcmp.eq.s32.totalorder %v11690_v56, %v12829_v46 }
 0x207   : > { %18904 = vst [vmem:[#allocation131_spill] sm:$0xff] %v13773_v6  ;;  %9011 = vmatmul.mubr.msk.f32.gmra.mxu0 %vm3048_vm6, %v18734_v53  ;;  %5488 = vperm.xlu0 %10920, %v11521_v41   ;;  %v10365_v22 = vpop.f32.mrf.mxu0  ;;  %v1799_v35 = vpop.f32.mrf.mxu1  ;;  %v18908_v6 = vld [vmem:[#allocation13_spill] sm:$0xff] }
 0x208   : > { %9012 = vmatprep.mubr.msk.f32.mxu0 %vm3052_vm7, %v18734_v53  ;;  %10571 = vmatpush3.msra.mxu0 %v10986_v49  ;;  %v13782_v30 = vpop.permute.xlu0 %4603  ;;  %v13785_v7 = vadd.f32 %v10365_v22, %v13442_v57  ;;  %v18910_v57 = vld [vmem:[#allocation91_spill] sm:$0xff] }
 0x209   : > { %18906 = vst [vmem:[#allocation26_spill] sm:$0xff] %v13782_v30  ;;  %8851 = vmatmul.mubr.msk.f32.gmra.mxu1 %vm2262_vm8, %v18734_v53  ;;  %5461 = vperm.xlu1 %10919, %v18908_v6   ;;  %v13791_v41 = vpop.f32.mrf.mxu0  ;;  %vm3055_vm11 = vcmp.eq.s32.totalorder %v11690_v56, %v18910_v57  ;;  %vm3054_vm14 = vcmp.eq.s32.totalorder %v11685_v54, %v18910_v57 }
 0x20a   : > { %18907 = vst [vmem:[#allocation132_spill] sm:$0xff] %v13785_v7  ;;  %18909 = vst [vmem:[#allocation13_spill] sm:$0xff] %v13791_v41  ;;  %8852 = vmatprep.mubr.msk.f32.mxu1 %vm2266_vm9, %v18734_v53  ;;  %10508 = vmatprep.subr.mxu1 %v13799_v11  ;;  %v13802_v35 = vpop.f32.mrf.mxu1  ;;  %vm2274_vm8 = vcmp.eq.s32.totalorder %v11685_v54, %v12829_v46  ;;  %vm2278_vm9 = vcmp.eq.s32.totalorder %v11690_v56, %v18846_v51  ;;  %v13908_v46 = vld [vmem:[%s18254_s2 + $0x100] sm:$0xff] }
 0x20b   : > { %9013 = vmatmul.mubr.msk.f32.gmra.mxu0 %vm3051_vm10, %v18734_v53  ;;  %5494 = vperm.xlu0 %10920, %v18850_v60  }
 0x20c   : > { %9014 = vmatprep.mubr.msk.f32.mxu0 %vm3055_vm11, %v18734_v53  ;;  %10509 = vmatpush3.msra.mxu1 %v13799_v11  ;;  %v13812_v49 = vpop.permute.xlu1 %3847  ;;  %v10368_v22 = vpop.f32.mrf.mxu0 }
 0x20d   : > { %18911 = vst [vmem:[#allocation91_spill] sm:$0xff] %v13812_v49  ;;  %8853 = vmatmul.mubr.msk.f32.gmra.mxu1 %vm2265_vm12, %v18734_v53  ;;  %5467 = vperm.xlu1 %10919, %v11401_v45   ;;  %v13819_v30 = vadd.f32 %v10368_v22, %v13494_v2  ;;  %v1804_v41 = vpop.f32.mrf.mxu1  ;;  %v13827_v49 = vpop.permute.xlu0 %4609  ;;  %v18915_v2 = vld [vmem:[#allocation45_spill] sm:$0xff]  ;;  %vm2277_vm12 = vcmp.eq.s32.totalorder %v11685_v54, %v18846_v51 }
 0x20e   : > { %8854 = vmatprep.mubr.msk.f32.mxu1 %vm2269_vm13, %v18734_v53  ;;  %10572 = vmatprep.subr.mxu0 %v10988_v0  ;;  %18913 = vst [vmem:[#allocation134_spill] sm:$0xff] %v13827_v49  ;;  %v13829_v7 = vpop.f32.mrf.mxu0  ;;  %vm3058_vm15 = vcmp.eq.s32.totalorder %v11690_v56, %v18915_v2  ;;  %vm3057_vm2 = vcmp.eq.s32.totalorder %v11685_v54, %v18915_v2 }
 0x20f   : > { %18912 = vst [vmem:[#allocation133_spill] sm:$0xff] %v13819_v30  ;;  %18914 = vst [vmem:[#allocation135_spill] sm:$0xff] %v13829_v7  ;;  %9015 = vmatmul.mubr.msk.f32.gmra.mxu0 %vm3054_vm14, %v18734_v53  ;;  %5500 = vperm.xlu0 %10920, %v18658_v19   ;;  %v13835_v41 = vpop.f32.mrf.mxu1  ;;  %v18919_v7 = vld [vmem:[#allocation93_spill] sm:$0xff]  ;;  %vm2281_vm13 = vcmp.eq.s32.totalorder %v11690_v56, %v12872_v21 }
 0x210   : > { %18916 = vst [vmem:[#allocation45_spill] sm:$0xff] %v13835_v41  ;;  %9016 = vmatprep.mubr.msk.f32.mxu0 %vm3058_vm15, %v18734_v53  ;;  %10573 = vmatpush3.msra.mxu0 %v10988_v0  ;;  %v13850_v0 = vld [vmem:[%s18254_s2 + $0x108] sm:$0xff]  ;;  %vm3061_vm3 = vcmp.eq.s32.totalorder %v11690_v56, %v18919_v7  ;;  %vm3060_vm6 = vcmp.eq.s32.totalorder %v11685_v54, %v18919_v7 }
 0x211   : > { %8855 = vmatmul.mubr.msk.f32.gmra.mxu1 %vm2268_vm0, %v18734_v53  ;;  %5473 = vperm.xlu1 %10919, %v11430_v10   ;;  %v10371_v22 = vpop.f32.mrf.mxu0  ;;  %v13853_v59 = vpop.permute.xlu1 %3853  ;;  %vm2280_vm0 = vcmp.eq.s32.totalorder %v11685_v54, %v12872_v21 }
 0x212   : > { %8856 = vmatprep.mubr.msk.f32.mxu1 %vm2272_vm1, %v18734_v53  ;;  %10510 = vmatprep.subr.mxu1 %v13850_v0  ;;  %18917 = vst [vmem:[#allocation136_spill] sm:$0xff] %v13853_v59  ;;  %v13856_v49 = vadd.f32 %v10371_v22, %v13552_v47  ;;  %v1809_v41 = vpop.f32.mrf.mxu1  ;;  %vm3023_vm1 = vcmp.eq.s32.totalorder %v18663_v18, %v18853_v32 }
 0x213   : > { %9017 = vmatmul.mubr.msk.f32.gmra.mxu0 %vm3057_vm2, %v18734_v53  ;;  %5506 = vperm.xlu0 %10920, %v18860_v40   ;;  %v13862_v30 = vpop.f32.mrf.mxu0 }
 0x214   : > { %18918 = vst [vmem:[#allocation137_spill] sm:$0xff] %v13856_v49  ;;  %18920 = vst [vmem:[#allocation93_spill] sm:$0xff] %v13862_v30  ;;  %9018 = vmatprep.mubr.msk.f32.mxu0 %vm3061_vm3, %v18734_v53  ;;  %10511 = vmatpush3.msra.mxu1 %v13850_v0  ;;  %v13868_v59 = vpop.permute.xlu0 %4615  ;;  %v13870_v47 = vpop.f32.mrf.mxu1 }
 0x215   : > { %18921 = vst [vmem:[#allocation138_spill] sm:$0xff] %v13868_v59  ;;  %8857 = vmatmul.mubr.msk.f32.gmra.mxu1 %vm2271_vm4, %v18734_v53  ;;  %5479 = vperm.xlu1 %10919, %v11460_v36   ;;  %v18922_v59 = vld [vmem:[#allocation46_spill] sm:$0xff]  ;;  %vm3026_vm4 = vcmp.eq.s32.totalorder %v18663_v18, %v18857_v15 }
 0x216   : > { %8858 = vmatprep.mubr.msk.f32.mxu1 %vm2275_vm5, %v18734_v53  ;;  %10574 = vmatprep.subr.mxu0 %v10990_v48  ;;  %v10374_v41 = vpop.f32.mrf.mxu0  ;;  %v1814_v22 = vpop.f32.mrf.mxu1  ;;  %vm3064_vm7 = vcmp.eq.s32.totalorder %v11690_v56, %v18922_v59  ;;  %vm3063_vm10 = vcmp.eq.s32.totalorder %v11685_v54, %v18922_v59 }
 0x217   : > { %9019 = vmatmul.mubr.msk.f32.gmra.mxu0 %vm3060_vm6, %v18734_v53  ;;  %5512 = vperm.xlu0 %10920, %v18864_v58   ;;  %v13887_v30 = vadd.f32 %v10374_v41, %v13606_v5  ;;  %vm3029_vm6 = vcmp.eq.s32.totalorder %v18663_v18, %v18863_v3  ;;  %v14002_v3 = vld [vmem:[%s18254_s2 + $0x70] sm:$0xff] }
 0x218   : > { %9020 = vmatprep.mubr.msk.f32.mxu0 %vm3064_vm7, %v18734_v53  ;;  %10575 = vmatpush3.msra.mxu0 %v10990_v48  ;;  %v13892_v49 = vpop.permute.xlu1 %4597  ;;  %v13894_v40 = vpop.f32.mrf.mxu0  ;;  %v18927_v48 = vld [vmem:[#allocation96_spill] sm:$0xff] }
 0x219   : > { %18923 = vst [vmem:[#allocation46_spill] sm:$0xff] %v13892_v49  ;;  %18924 = vst [vmem:[#allocation139_spill] sm:$0xff] %v13894_v40  ;;  %8859 = vmatmul.mubr.msk.f32.gmra.mxu1 %vm2274_vm8, %v18734_v53  ;;  %5485 = vperm.xlu1 %10919, %v11488_v62   ;;  %v13900_v22 = vpop.f32.mrf.mxu1  ;;  %vm3067_vm11 = vcmp.eq.s32.totalorder %v11690_v56, %v18927_v48  ;;  %vm3066_vm14 = vcmp.eq.s32.totalorder %v11685_v54, %v18927_v48 }
 0x21a   : > { %18925 = vst [vmem:[#allocation140_spill] sm:$0xff] %v13900_v22  ;;  %8860 = vmatprep.mubr.msk.f32.mxu1 %vm2278_vm9, %v18734_v53  ;;  %10512 = vmatprep.subr.mxu1 %v13908_v46  ;;  %v13911_v5 = vpop.permute.xlu0 %4621  ;;  %vm3032_vm8 = vcmp.eq.s32.totalorder %v18663_v18, %v18869_v8 }
 0x21b   : > { %18926 = vst [vmem:[#allocation141_spill] sm:$0xff] %v13911_v5  ;;  %9021 = vmatmul.mubr.msk.f32.gmra.mxu0 %vm3063_vm10, %v18734_v53  ;;  %5518 = vperm.xlu0 %10920, %v18870_v63   ;;  %v10377_v41 = vpop.f32.mrf.mxu0  ;;  %v1819_v49 = vpop.f32.mrf.mxu1  ;;  %vm3035_vm10 = vcmp.eq.s32.totalorder %v18663_v18, %v18874_v44 }
 0x21c   : > { %9022 = vmatprep.mubr.msk.f32.mxu0 %vm3067_vm11, %v18734_v53  ;;  %10513 = vmatpush3.msra.mxu1 %v13908_v46  ;;  %v13922_v22 = vadd.f32 %v10377_v41, %v13664_v61  ;;  %v18466_v49 = vmov 7   ;;  %v18930_v41 = vld [vmem:[#allocation33_spill] sm:$0xff] }
 0x21d   : > { %8861 = vmatmul.mubr.msk.f32.gmra.mxu1 %vm2277_vm12, %v18734_v53  ;;  %5491 = vperm.xlu1 %10919, %v11518_v26   ;;  %v13928_v5 = vpop.f32.mrf.mxu0  ;;  %vm3070_vm15 = vcmp.eq.s32.totalorder %v11690_v56, %v18930_v41  ;;  %vm3069_vm2 = vcmp.eq.s32.totalorder %v11685_v54, %v18930_v41  ;;  %vm3038_vm12 = vcmp.eq.s32.totalorder %v18663_v18, %v18881_v42 }
 0x21e   : > { %18928 = vst [vmem:[#allocation96_spill] sm:$0xff] %v13928_v5  ;;  %8862 = vmatprep.mubr.msk.f32.mxu1 %vm2281_vm13, %v18734_v53  ;;  %10576 = vmatprep.subr.mxu0 %v13481_v12  ;;  %v13934_v51 = vpop.permute.xlu1 %4600  ;;  %v13936_v61 = vpop.f32.mrf.mxu1 }
 0x21f   : > { %18929 = vst [vmem:[#allocation142_spill] sm:$0xff] %v13934_v51  ;;  %9023 = vmatmul.mubr.msk.f32.gmra.mxu0 %vm3066_vm14, %v18734_v53  ;;  %10921 = vset.pattern.permute.xlu0 %v18466_v49  ;;  %vm3041_vm14 = vcmp.eq.s32.totalorder %v18663_v18, %v18883_v13 }
 0x220   : > { %9024 = vmatprep.mubr.msk.f32.mxu0 %vm3070_vm15, %v18734_v53  ;;  %10577 = vmatpush3.msra.mxu0 %v13481_v12  ;;  %v13946_v5 = vpop.permute.xlu0 %4627  ;;  %v10380_v51 = vpop.f32.mrf.mxu0 }
 0x221   : > { %18931 = vst [vmem:[#allocation33_spill] sm:$0xff] %v13946_v5  ;;  %6262 = vperm.xlu0 %10921, %v18876_v17   ;;  %8863 = vmatmul.mubr.msk.f32.gmra.mxu1 %vm2280_vm0, %v18734_v53  ;;  %v13953_v49 = vadd.f32 %v10380_v51, %v13731_v16  ;;  %v1824_v40 = vpop.f32.mrf.mxu1  ;;  %v18932_v17 = vld [vmem:[#allocation98_spill] sm:$0xff]  ;;  %v13980_v51 = vld [vmem:[%s18254_s2 + $0x78] sm:$0xff]  ;;  %vm3044_vm0 = vcmp.eq.s32.totalorder %v18663_v18, %v18889_v55 }
 0x222   : > { %5497 = vperm.xlu1 %10919, %v11546_v25   ;;  %10514 = vmatprep.mubr.msk.f32.mxu1 %vm3023_vm1, %v18734_v53  ;;  %v13959_v21 = vpop.f32.mrf.mxu0  ;;  %vm3073_vm3 = vcmp.eq.s32.totalorder %v11690_v56, %v18932_v17  ;;  %vm3072_vm5 = vcmp.eq.s32.totalorder %v11685_v54, %v18932_v17 }
 0x223   : > { %9025 = vmatmul.mubr.msk.f32.gmra.mxu0 %vm3069_vm2, %v18734_v53  ;;  %4143 = vmatprep.subr.mxu1 %v18592_v1  ;;  %v13965_v12 = vpop.permute.xlu1 %4606  ;;  %v13967_v32 = vpop.f32.mrf.mxu1  ;;  %vm3047_vm2 = vcmp.eq.s32.totalorder %v18663_v18, %v18895_v37 }
 0x224   : > { %18933 = vst [vmem:[#allocation98_spill] sm:$0xff] %v13965_v12  ;;  %18934 = vst [vmem:[#allocation143_spill] sm:$0xff] %v13967_v32  ;;  %9026 = vmatprep.mubr.msk.f32.mxu0 %vm3073_vm3, %v18734_v53  ;;  %10578 = vmatprep.subr.mxu0 %v13538_v28 }
 0x225   : > { %6271 = vperm.xlu0 %10921, %v18885_v20   ;;  %10515 = vmatmul.mubr.msk.f32.vlgmr.msra.gmra.mxu1 %vm3026_vm4, %v18734_v53  ;;  %v13975_v40 = vpop.permute.xlu0 %4633  ;;  %v10383_v16 = vpop.f32.mrf.mxu0  ;;  %vm3050_vm4 = vcmp.eq.s32.totalorder %v18663_v18, %v18900_v50 }
 0x226   : > { %18935 = vst [vmem:[#allocation144_spill] sm:$0xff] %v13975_v40  ;;  %4144 = vmatpush1.msra.mxu1 %v13980_v51  ;;  %5503 = vperm.xlu1 %10919, %v11573_v39   ;;  %v13989_v15 = vadd.f32 %v10383_v16, %v13802_v35  ;;  %v1829_v20 = vpop.f32.mrf.mxu1  ;;  %v18936_v40 = vld [vmem:[#allocation49_spill] sm:$0xff] }
 0x227   : > { %9027 = vmatmul.mubr.msk.f32.gmra.mxu0 %vm3072_vm5, %v18734_v53  ;;  %10517 = vmatprep.mubr.msk.f32.mxu1 %vm3029_vm6, %v18734_v53  ;;  %vm3076_vm7 = vcmp.eq.s32.totalorder %v11690_v56, %v18936_v40  ;;  %v13995_v5 = vpop.f32.mrf.mxu0  ;;  %vm3075_vm9 = vcmp.eq.s32.totalorder %v11685_v54, %v18936_v40  ;;  %vm3053_vm6 = vcmp.eq.s32.totalorder %v18663_v18, %v18905_v34  ;;  %v14157_v34 = vld [vmem:[%s18254_s2 + $0x30] sm:$0xff] }
 0x228   : > { %18937 = vst [vmem:[#allocation49_spill] sm:$0xff] %v13995_v5  ;;  %4145 = vmatprep.subr.mxu1 %v18592_v1  ;;  %9028 = vmatprep.mubr.msk.f32.mxu0 %vm3076_vm7, %v18734_v53  ;;  %v1832_v12 = vpop.f32.mrf.mxu1 }
 0x229   : > { %4146 = vmatpush1.msra.mxu1 %v14002_v3  ;;  %10579 = vmatpush3.msra.mxu0 %v13538_v28  ;;  %v14006_v35 = vpop.permute.xlu1 %4612 }
 0x22a   : > { %18938 = vst [vmem:[#allocation145_spill] sm:$0xff] %v14006_v35  ;;  %6277 = vperm.xlu0 %10921, %v18893_v31   ;;  %4147 = vmatprep.subr.mxu1 %v18592_v1  ;;  %v10386_v16 = vpop.f32.mrf.mxu0  ;;  %v1834_v20 = vpop.f32.mrf.mxu1  ;;  %v14024_v31 = vld [vmem:[%s18254_s2 + $0x68] sm:$0xff] }
 0x22b   : > { %10518 = vmatmul.mubr.msk.f32.gmra.mxu1 %vm3032_vm8, %v18734_v53  ;;  %5509 = vperm.xlu1 %10919, %v18737_v14   ;;  %v14016_v32 = vpop.permute.xlu0 %4639  ;;  %v14019_v28 = vadd.f32 %v10386_v16, %v13870_v47  ;;  %v18941_v47 = vld [vmem:[#allocation99_spill] sm:$0xff]  ;;  %v14042_v20 = vld [vmem:[%s18254_s2 + $0x60] sm:$0xff]  ;;  %vm3056_vm8 = vcmp.eq.s32.totalorder %v18663_v18, %v18910_v57 }
 0x22c   : > { %18939 = vst [vmem:[#allocation146_spill] sm:$0xff] %v14016_v32  ;;  %4148 = vmatpush1.msra.mxu1 %v14024_v31  ;;  %9029 = vmatmul.mubr.msk.f32.gmra.mxu0 %vm3075_vm9, %v18734_v53  ;;  %v14030_v8 = vpop.f32.mrf.mxu0  ;;  %vm3079_vm11 = vcmp.eq.s32.totalorder %v11690_v56, %v18941_v47  ;;  %vm3078_vm13 = vcmp.eq.s32.totalorder %v11685_v54, %v18941_v47 }
 0x22d   : > { %18940 = vst [vmem:[#allocation147_spill] sm:$0xff] %v14030_v8  ;;  %10520 = vmatprep.mubr.msk.f32.mxu1 %vm3035_vm10, %v18734_v53  ;;  %4149 = vmatprep.subr.mxu1 %v18592_v1  ;;  %v14036_v16 = vpop.f32.mrf.mxu1  ;;  %vm3059_vm10 = vcmp.eq.s32.totalorder %v18663_v18, %v18915_v2 }
 0x22e   : > { %18942 = vst [vmem:[#allocation99_spill] sm:$0xff] %v14036_v16  ;;  %9030 = vmatprep.mubr.msk.f32.mxu0 %vm3079_vm11, %v18734_v53  ;;  %4150 = vmatpush1.msra.mxu1 %v14042_v20  ;;  %v14045_v44 = vpop.permute.xlu1 %4618 }
 0x22f   : > { %18943 = vst [vmem:[#allocation148_spill] sm:$0xff] %v14045_v44  ;;  %6283 = vperm.xlu0 %10921, %v18898_v27   ;;  %4151 = vmatprep.subr.mxu1 %v18592_v1  ;;  %v10389_v32 = vpop.f32.mrf.mxu0  ;;  %v1839_v35 = vpop.f32.mrf.mxu1  ;;  %v14063_v27 = vld [vmem:[%s18254_s2 + $0x58] sm:$0xff] }
 0x230   : > { %10521 = vmatmul.mubr.msk.f32.gmra.mxu1 %vm3038_vm12, %v18734_v53  ;;  %5515 = vperm.xlu1 %10919, %v18746_v24   ;;  %v14055_v16 = vpop.permute.xlu0 %4645  ;;  %v14058_v44 = vadd.f32 %v10389_v32, %v13936_v61  ;;  %v18946_v61 = vld [vmem:[#allocation24_spill] sm:$0xff]  ;;  %vm3062_vm12 = vcmp.eq.s32.totalorder %v18663_v18, %v18919_v7 }
 0x231   : > { %18944 = vst [vmem:[#allocation149_spill] sm:$0xff] %v14055_v16  ;;  %4152 = vmatpush1.msra.mxu1 %v14063_v27  ;;  %9031 = vmatmul.mubr.msk.f32.gmra.mxu0 %vm3078_vm13, %v18734_v53  ;;  %v14069_v42 = vpop.f32.mrf.mxu0  ;;  %vm3082_vm15 = vcmp.eq.s32.totalorder %v11690_v56, %v18946_v61  ;;  %v14080_v35 = vld [vmem:[%s18254_s2 + $0x50] sm:$0xff]  ;;  %vm3081_vm1 = vcmp.eq.s32.totalorder %v11685_v54, %v18946_v61 }
 0x232   : > { %18945 = vst [vmem:[#allocation150_spill] sm:$0xff] %v14069_v42  ;;  %10523 = vmatprep.mubr.msk.f32.mxu1 %vm3041_vm14, %v18734_v53  ;;  %4153 = vmatprep.subr.mxu1 %v18592_v1  ;;  %v1842_v32 = vpop.f32.mrf.mxu1  ;;  %vm3065_vm14 = vcmp.eq.s32.totalorder %v18663_v18, %v18922_v59  ;;  %v18965_v7 = vld [vmem:[#allocation124_spill] sm:$0xff] }
 0x233   : > { %10580 = vmatprep.subr.mxu0 %v13587_v43  ;;  %9032 = vmatprep.mubr.msk.f32.mxu0 %vm3082_vm15, %v18734_v53  ;;  %v14233_v59 = vld [vmem:[%s18254_s2 + $0x10] sm:$0xff] }
 0x234   : > { %4154 = vmatpush1.msra.mxu1 %v14080_v35  ;;  %10581 = vmatpush3.msra.mxu0 %v13587_v43  ;;  %v14084_v13 = vpop.permute.xlu1 %4624  ;;  %v10392_v16 = vpop.f32.mrf.mxu0 }
 0x235   : > { %18947 = vst [vmem:[#allocation24_spill] sm:$0xff] %v14084_v13  ;;  %6289 = vperm.xlu0 %10921, %v18691_v52   ;;  %4155 = vmatprep.subr.mxu1 %v18592_v1  ;;  %v14090_v42 = vadd.f32 %v10392_v16, %v1832_v12  ;;  %v1844_v8 = vpop.f32.mrf.mxu1  ;;  %v14103_v52 = vld [vmem:[%s18254_s2 + $0x48] sm:$0xff] }
 0x236   : > { %10524 = vmatmul.mubr.msk.f32.gmra.mxu1 %vm3044_vm0, %v18734_v53  ;;  %5521 = vperm.xlu1 %10919, %v18753_v23   ;;  %v14096_v43 = vpop.permute.xlu0 %4651  ;;  %v14098_v13 = vpop.f32.mrf.mxu0  ;;  %v18951_v12 = vld [vmem:[#allocation51_spill] sm:$0xff]  ;;  %v14119_v8 = vld [vmem:[%s18254_s2 + $0x40] sm:$0xff]  ;;  %vm3068_vm0 = vcmp.eq.s32.totalorder %v18663_v18, %v18927_v48  ;;  %v18973_v48 = vld [vmem:[#allocation52_spill] sm:$0xff] }
 0x237   : > { %18948 = vst [vmem:[#allocation151_spill] sm:$0xff] %v14096_v43  ;;  %18949 = vst [vmem:[#allocation152_spill] sm:$0xff] %v14098_v13  ;;  %4156 = vmatpush1.msra.mxu1 %v14103_v52  ;;  %9033 = vmatmul.mubr.msk.f32.gmra.mxu0 %vm3081_vm1, %v18734_v53  ;;  %v14109_v55 = vpop.f32.mrf.mxu1  ;;  %vm3085_vm3 = vcmp.eq.s32.totalorder %v11690_v56, %v18951_v12  ;;  %v18953_v13 = vmov 7   ;;  %vm3084_vm5 = vcmp.eq.s32.totalorder %v11685_v54, %v18951_v12 }
 0x238   : > { %18950 = vst [vmem:[#allocation153_spill] sm:$0xff] %v14109_v55  ;;  %10526 = vmatprep.mubr.msk.f32.mxu1 %vm3047_vm2, %v18734_v53  ;;  %4157 = vmatprep.subr.mxu1 %v18592_v1  ;;  %vm3071_vm2 = vcmp.eq.s32.totalorder %v18663_v18, %v18930_v41  ;;  %v14274_v41 = vld [vmem:[%s18254_s2] sm:$0xff] }
 0x239   : > { %9034 = vmatprep.mubr.msk.f32.mxu0 %vm3085_vm3, %v18734_v53  ;;  %4158 = vmatpush1.msra.mxu1 %v14119_v8  ;;  %v14122_v16 = vpop.permute.xlu1 %4630  ;;  %v10395_v37 = vpop.f32.mrf.mxu0  ;;  %vm3097_vm3 = vcmp.eq.s32.totalorder %v11690_v56, %v18973_v48 }
 0x23a   : > { %18952 = vst [vmem:[#allocation51_spill] sm:$0xff] %v14122_v16  ;;  %6295 = vperm.xlu0 %10921, %v18908_v6   ;;  %4159 = vmatprep.subr.mxu1 %v18592_v1  ;;  %v14128_v43 = vadd.f32 %v10395_v37, %v1842_v32  ;;  %v1849_v55 = vpop.f32.mrf.mxu1  ;;  %v14141_v6 = vld [vmem:[%s18254_s2 + $0x38] sm:$0xff]  ;;  %v18956_v32 = vld [vmem:[#allocation42_spill] sm:$0xff] }
 0x23b   : > { %10527 = vmatmul.mubr.msk.f32.gmra.mxu1 %vm3050_vm4, %v18734_v53  ;;  %10922 = vset.pattern.permute.xlu1 %v18953_v13  ;;  %v14134_v5 = vpop.permute.xlu0 %4657  ;;  %v14136_v16 = vpop.f32.mrf.mxu0  ;;  %vm3088_vm7 = vcmp.eq.s32.totalorder %v11690_v56, %v18956_v32  ;;  %vm3087_vm9 = vcmp.eq.s32.totalorder %v11685_v54, %v18956_v32  ;;  %vm3074_vm4 = vcmp.eq.s32.totalorder %v18663_v18, %v18932_v17  ;;  %v18978_v17 = vld [vmem:[#allocation10_spill] sm:$0xff] }
 0x23c   : > { %18954 = vst [vmem:[#allocation154_spill] sm:$0xff] %v14134_v5  ;;  %18955 = vst [vmem:[#allocation155_spill] sm:$0xff] %v14136_v16  ;;  %4160 = vmatpush1.msra.mxu1 %v14141_v6  ;;  %9035 = vmatmul.mubr.msk.f32.gmra.mxu0 %vm3084_vm5, %v18734_v53  ;;  %v1852_v50 = vpop.f32.mrf.mxu1  ;;  %vm3096_vm5 = vcmp.eq.s32.totalorder %v11685_v54, %v18973_v48 }
 0x23d   : > { %10529 = vmatprep.mubr.msk.f32.mxu1 %vm3053_vm6, %v18734_v53  ;;  %4161 = vmatprep.subr.mxu1 %v18592_v1  ;;  %vm3077_vm6 = vcmp.eq.s32.totalorder %v18663_v18, %v18936_v40  ;;  %v14311_v40 = vld [vmem:[%s18254_s2 + $0xf0] sm:$0xff] }
 0x23e   : > { %10582 = vmatprep.subr.mxu0 %v13645_v4  ;;  %6265 = vperm.xlu1 %10922, %v18763_v9   ;;  %v10398_v13 = vpop.f32.mrf.mxu0  ;;  %v1854_v55 = vpop.f32.mrf.mxu1 }
 0x23f   : > { %9036 = vmatprep.mubr.msk.f32.mxu0 %vm3088_vm7, %v18734_v53  ;;  %4162 = vmatpush1.msra.mxu1 %v14157_v34  ;;  %v14160_v37 = vpop.permute.xlu1 %4636  ;;  %v14162_v5 = vadd.f32 %v10398_v13, %v1852_v50 }
 0x240   : > { %18957 = vst [vmem:[#allocation42_spill] sm:$0xff] %v14160_v37  ;;  %10583 = vmatpush3.msra.mxu0 %v13645_v4  ;;  %6301 = vperm.xlu0 %10921, %v11401_v45   ;;  %v14168_v9 = vpop.f32.mrf.mxu0  ;;  %v14181_v45 = vld [vmem:[%s18254_s2 + $0x28] sm:$0xff]  ;;  %v18961_v4 = vld [vmem:[#allocation32_spill] sm:$0xff]  ;;  %v14198_v37 = vld [vmem:[%s18254_s2 + $0x20] sm:$0xff] }
 0x241   : > { %18958 = vst [vmem:[#allocation156_spill] sm:$0xff] %v14168_v9  ;;  %4163 = vmatprep.subr.mxu1 %v18592_v1  ;;  %10530 = vmatmul.mubr.msk.f32.gmra.mxu1 %vm3056_vm8, %v18734_v53  ;;  %v14174_v55 = vpop.permute.xlu0 %4663  ;;  %v14176_v50 = vpop.f32.mrf.mxu1  ;;  %vm3091_vm11 = vcmp.eq.s32.totalorder %v11690_v56, %v18961_v4  ;;  %vm3090_vm13 = vcmp.eq.s32.totalorder %v11685_v54, %v18961_v4 }
 0x242   : > { %18959 = vst [vmem:[#allocation157_spill] sm:$0xff] %v14174_v55  ;;  %18960 = vst [vmem:[#allocation158_spill] sm:$0xff] %v14176_v50  ;;  %4164 = vmatpush1.msra.mxu1 %v14181_v45  ;;  %9037 = vmatmul.mubr.msk.f32.gmra.mxu0 %vm3087_vm9, %v18734_v53  ;;  %vm3080_vm8 = vcmp.eq.s32.totalorder %v18663_v18, %v18941_v47  ;;  %v18984_v47 = vld [vmem:[#allocation55_spill] sm:$0xff] }
 0x243   : > { %10532 = vmatprep.mubr.msk.f32.mxu1 %vm3059_vm10, %v18734_v53  ;;  %4165 = vmatprep.subr.mxu1 %v18592_v1  ;;  %v10401_v57 = vpop.f32.mrf.mxu0  ;;  %v1859_v13 = vpop.f32.mrf.mxu1  ;;  %vm3083_vm10 = vcmp.eq.s32.totalorder %v18663_v18, %v18946_v61  ;;  %v14352_v61 = vld [vmem:[%s18254_s2 + $0xe0] sm:$0xff] }
 0x244   : > { %6268 = vperm.xlu1 %10922, %v11219_v29   ;;  %9038 = vmatprep.mubr.msk.f32.mxu0 %vm3091_vm11, %v18734_v53  ;;  %v14193_v55 = vpop.permute.xlu1 %4642  ;;  %v14215_v13 = vld [vmem:[%s18254_s2 + $0x18] sm:$0xff]  ;;  %vm3103_vm11 = vcmp.eq.s32.totalorder %v11690_v56, %v18984_v47 }
 0x245   : > { %18962 = vst [vmem:[#allocation32_spill] sm:$0xff] %v14193_v55  ;;  %4166 = vmatpush1.msra.mxu1 %v14198_v37  ;;  %6307 = vperm.xlu0 %10921, %v11430_v10   ;;  %v14204_v2 = vpop.f32.mrf.mxu0  ;;  %v18967_v55 = vld [vmem:[#allocation102_spill] sm:$0xff] }
 0x246   : > { %18963 = vst [vmem:[#allocation159_spill] sm:$0xff] %v14204_v2  ;;  %4167 = vmatprep.subr.mxu1 %v18592_v1  ;;  %10533 = vmatmul.mubr.msk.f32.gmra.mxu1 %vm3062_vm12, %v18734_v53  ;;  %v14210_v29 = vpop.permute.xlu0 %4669  ;;  %vm3094_vm15 = vcmp.eq.s32.totalorder %v11690_v56, %v18967_v55  ;;  %vm3093_vm1 = vcmp.eq.s32.totalorder %v11685_v54, %v18967_v55 }
 0x247   : > { %18964 = vst [vmem:[#allocation160_spill] sm:$0xff] %v14210_v29  ;;  %4168 = vmatpush1.msra.mxu1 %v14215_v13  ;;  %9039 = vmatmul.mubr.msk.f32.gmra.mxu0 %vm3090_vm13, %v18734_v53  ;;  %v18966_v29 = vld [vmem:[#allocation6_spill] sm:$0xff]  ;;  %vm3086_vm12 = vcmp.eq.s32.totalorder %v18663_v18, %v18951_v12  ;;  %vm3102_vm13 = vcmp.eq.s32.totalorder %v11685_v54, %v18984_v47 }
 0x248   : > { %10535 = vmatprep.mubr.msk.f32.mxu1 %vm3065_vm14, %v18734_v53  ;;  %4169 = vmatprep.subr.mxu1 %v18592_v1  ;;  %v1862_v10 = vpop.f32.mrf.mxu1  ;;  %vm3089_vm14 = vcmp.eq.s32.totalorder %v18663_v18, %v18956_v32  ;;  %v14390_v32 = vld [vmem:[%s18254_s2 + $0xd0] sm:$0xff] }
 0x249   : > { %10584 = vmatprep.subr.mxu0 %v18965_v7  ;;  %6274 = vperm.xlu1 %10922, %v18966_v29   ;;  %v14227_v2 = vadd.f32 %v10401_v57, %v1862_v10  ;;  %v10436_v50 = vpop.f32.mrf.mxu0  ;;  %v18974_v10 = vld [vmem:[#allocation8_spill] sm:$0xff] }
 0x24a   : > { %9040 = vmatprep.mubr.msk.f32.mxu0 %vm3094_vm15, %v18734_v53  ;;  %4170 = vmatpush1.msra.mxu1 %v14233_v59  ;;  %v14236_v9 = vpop.permute.xlu1 %4648  ;;  %v1864_v16 = vpop.f32.mrf.mxu1 }
 0x24b   : > { %18968 = vst [vmem:[#allocation124_spill] sm:$0xff] %v14227_v2  ;;  %18969 = vst [vmem:[#allocation6_spill] sm:$0xff] %v14236_v9  ;;  %10585 = vmatpush3.msra.mxu0 %v18965_v7  ;;  %6313 = vperm.xlu0 %10921, %v11460_v36   ;;  %v14242_v57 = vpop.f32.mrf.mxu0  ;;  %v14253_v16 = vld [vmem:[%s18254_s2 + $0x8] sm:$0xff] }
 0x24c   : > { %18970 = vst [vmem:[#allocation102_spill] sm:$0xff] %v14242_v57  ;;  %4171 = vmatprep.subr.mxu1 %v18592_v1  ;;  %10536 = vmatmul.mubr.msk.f32.gmra.mxu1 %vm3068_vm0, %v18734_v53  ;;  %v14248_v29 = vpop.permute.xlu0 %4675  ;;  %v14291_v57 = vld [vmem:[%s18254_s2 + $0xf8] sm:$0xff]  ;;  %vm3092_vm0 = vcmp.eq.s32.totalorder %v18663_v18, %v18961_v4 }
 0x24d   : > { %18971 = vst [vmem:[#allocation161_spill] sm:$0xff] %v14248_v29  ;;  %4172 = vmatpush1.msra.mxu1 %v14253_v16  ;;  %9041 = vmatmul.mubr.msk.f32.gmra.mxu0 %vm3093_vm1, %v18734_v53  ;;  %v14259_v36 = vpop.f32.mrf.mxu1  ;;  %v18997_v4 = vld [vmem:[#allocation57_spill] sm:$0xff] }
 0x24e   : > { %18972 = vst [vmem:[#allocation162_spill] sm:$0xff] %v14259_v36  ;;  %10538 = vmatprep.mubr.msk.f32.mxu1 %vm3071_vm2, %v18734_v53  ;;  %4173 = vmatprep.subr.mxu1 %v18592_v1  ;;  %vm3095_vm2 = vcmp.eq.s32.totalorder %v18663_v18, %v18967_v55  ;;  %v14431_v55 = vld [vmem:[%s18254_s2 + $0xc0] sm:$0xff] }
 0x24f   : > { %6280 = vperm.xlu1 %10922, %v18974_v10   ;;  %9042 = vmatprep.mubr.msk.f32.mxu0 %vm3097_vm3, %v18734_v53  ;;  %v14267_v7 = vpop.permute.xlu1 %4654  ;;  %v14269_v29 = vpop.f32.mrf.mxu0  ;;  %vm3109_vm3 = vcmp.eq.s32.totalorder %v11690_v56, %v18997_v4 }
 0x250   : > { %18975 = vst [vmem:[#allocation52_spill] sm:$0xff] %v14267_v7  ;;  %4174 = vmatpush1.msra.mxu1 %v14274_v41  ;;  %6319 = vperm.xlu0 %10921, %v11488_v62   ;;  %v2543_v9 = vpop.f32.mrf.mxu1 }
 0x251   : > { %4175 = vmatprep.subr.mxu1 %v18592_v1  ;;  %10539 = vmatmul.mubr.msk.f32.gmra.mxu1 %vm3074_vm4, %v18734_v53  ;;  %v14284_v10 = vpop.permute.xlu0 %4681  ;;  %v14286_v7 = vpop.f32.mrf.mxu0  ;;  %v18979_v9 = vld [vmem:[#allocation53_spill] sm:$0xff]  ;;  %vm3098_vm4 = vcmp.eq.s32.totalorder %v18663_v18, %v18973_v48 }
 0x252   : > { %18976 = vst [vmem:[#allocation8_spill] sm:$0xff] %v14284_v10  ;;  %18977 = vst [vmem:[#allocation163_spill] sm:$0xff] %v14286_v7  ;;  %4176 = vmatpush2.msra.mxu1 %v14291_v57  ;;  %9043 = vmatmul.mubr.msk.f32.gmra.mxu0 %vm3096_vm5, %v18734_v53  ;;  %vm3100_vm7 = vcmp.eq.s32.totalorder %v11690_v56, %v18979_v9  ;;  %vm3099_vm9 = vcmp.eq.s32.totalorder %v11685_v54, %v18979_v9 }
 0x253   : > { %10541 = vmatprep.mubr.msk.f32.mxu1 %vm3077_vm6, %v18734_v53  ;;  %4177 = vmatprep.subr.mxu1 %v18592_v1  ;;  %v2546_v62 = vpop.f32.mrf.mxu1  ;;  %vm3108_vm5 = vcmp.eq.s32.totalorder %v11685_v54, %v18997_v4  ;;  %vm3101_vm6 = vcmp.eq.s32.totalorder %v18663_v18, %v18979_v9  ;;  %v14471_v9 = vld [vmem:[%s18254_s2 + $0xb0] sm:$0xff] }
 0x254   : > { %10586 = vmatprep.subr.mxu0 %v13743_v33  ;;  %6286 = vperm.xlu1 %10922, %v18978_v17   ;;  %v14303_v10 = vadd.f32 %v10436_v50, %v2546_v62  ;;  %v14305_v7 = vpop.f32.mrf.mxu0  ;;  %v18986_v17 = vld [vmem:[#allocation14_spill] sm:$0xff] }
 0x255   : > { %9044 = vmatprep.mubr.msk.f32.mxu0 %vm3100_vm7, %v18734_v53  ;;  %4178 = vmatpush2.msra.mxu1 %v14311_v40  ;;  %v14314_v36 = vpop.permute.xlu1 %4660  ;;  %v2548_v2 = vpop.f32.mrf.mxu1 }
 0x256   : > { %18980 = vst [vmem:[#allocation10_spill] sm:$0xff] %v14314_v36  ;;  %10587 = vmatpush3.msra.mxu0 %v13743_v33  ;;  %6325 = vperm.xlu0 %10921, %v11518_v26   ;;  %v14320_v50 = vpop.f32.mrf.mxu0  ;;  %v14331_v33 = vld [vmem:[%s18254_s2 + $0xe8] sm:$0xff] }
 0x257   : > { %18981 = vst [vmem:[#allocation53_spill] sm:$0xff] %v14320_v50  ;;  %4179 = vmatprep.subr.mxu1 %v18592_v1  ;;  %10542 = vmatmul.mubr.msk.f32.gmra.mxu1 %vm3080_vm8, %v18734_v53  ;;  %v14326_v62 = vpop.permute.xlu0 %4687  ;;  %v18991_v50 = vld [vmem:[#allocation54_spill] sm:$0xff]  ;;  %vm3104_vm8 = vcmp.eq.s32.totalorder %v18663_v18, %v18984_v47  ;;  %v19009_v47 = vld [vmem:[#allocation105_spill] sm:$0xff] }
 0x258   : > { %18982 = vst [vmem:[#allocation164_spill] sm:$0xff] %v14326_v62  ;;  %4180 = vmatpush2.msra.mxu1 %v14331_v33  ;;  %9045 = vmatmul.mubr.msk.f32.gmra.mxu0 %vm3099_vm9, %v18734_v53  ;;  %v14337_v26 = vpop.f32.mrf.mxu1  ;;  %vm3106_vm15 = vcmp.eq.s32.totalorder %v11690_v56, %v18991_v50  ;;  %vm3105_vm1 = vcmp.eq.s32.totalorder %v11685_v54, %v18991_v50 }
 0x259   : > { %18983 = vst [vmem:[#allocation165_spill] sm:$0xff] %v14337_v26  ;;  %10544 = vmatprep.mubr.msk.f32.mxu1 %vm3083_vm10, %v18734_v53  ;;  %4181 = vmatprep.subr.mxu1 %v18592_v1  ;;  %v14343_v2 = vpop.permute.xlu1 %4666  ;;  %vm3107_vm10 = vcmp.eq.s32.totalorder %v18663_v18, %v18991_v50  ;;  %v14512_v50 = vld [vmem:[%s18254_s2 + $0xa0] sm:$0xff] }
 0x25a   : > { %18985 = vst [vmem:[#allocation55_spill] sm:$0xff] %v14343_v2  ;;  %6292 = vperm.xlu1 %10922, %v18986_v17   ;;  %9046 = vmatprep.mubr.msk.f32.mxu0 %vm3103_vm11, %v18734_v53  ;;  %v14347_v62 = vpop.f32.mrf.mxu0  ;;  %v2553_v36 = vpop.f32.mrf.mxu1  ;;  %v14367_v17 = vld [vmem:[%s18254_s2 + $0xd8] sm:$0xff]  ;;  %vm3115_vm11 = vcmp.eq.s32.totalorder %v11690_v56, %v19009_v47 }
 0x25b   : > { %4182 = vmatpush2.msra.mxu1 %v14352_v61  ;;  %6331 = vperm.xlu0 %10921, %v11546_v25  }
 0x25c   : > { %4183 = vmatprep.subr.mxu1 %v18592_v1  ;;  %10545 = vmatmul.mubr.msk.f32.gmra.mxu1 %vm3086_vm12, %v18734_v53  ;;  %v14362_v36 = vpop.f32.mrf.mxu0  ;;  %vm3110_vm12 = vcmp.eq.s32.totalorder %v18663_v18, %v18997_v4 }
 0x25d   : > { %18987 = vst [vmem:[#allocation14_spill] sm:$0xff] %v14362_v36  ;;  %4184 = vmatpush2.msra.mxu1 %v14367_v17  ;;  %9047 = vmatmul.mubr.msk.f32.gmra.mxu0 %vm3102_vm13, %v18734_v53  ;;  %v14373_v25 = vpop.permute.xlu0 %5431  ;;  %v18990_v36 = vld [vmem:[#allocation15_spill] sm:$0xff]  ;;  %vm3114_vm13 = vcmp.eq.s32.totalorder %v11685_v54, %v19009_v47 }
 0x25e   : > { %18988 = vst [vmem:[#allocation166_spill] sm:$0xff] %v14373_v25  ;;  %10547 = vmatprep.mubr.msk.f32.mxu1 %vm3089_vm14, %v18734_v53  ;;  %4185 = vmatprep.subr.mxu1 %v18592_v1  ;;  %v14377_v12 = vpop.permute.xlu1 %4672  ;;  %v2556_v2 = vpop.f32.mrf.mxu1 }
 0x25f   : > { %18989 = vst [vmem:[#allocation167_spill] sm:$0xff] %v14377_v12  ;;  %10588 = vmatprep.subr.mxu0 %v13799_v11  ;;  %6298 = vperm.xlu1 %10922, %v18990_v36   ;;  %v14384_v26 = vadd.f32 %v14269_v29, %v2556_v2 }
 0x260   : > { %9048 = vmatprep.mubr.msk.f32.mxu0 %vm3106_vm15, %v18734_v53  ;;  %4186 = vmatpush2.msra.mxu1 %v14390_v32  ;;  %v14393_v25 = vpop.f32.mrf.mxu0  ;;  %v2558_v12 = vpop.f32.mrf.mxu1 }
 0x261   : > { %18992 = vst [vmem:[#allocation15_spill] sm:$0xff] %v14384_v26  ;;  %10589 = vmatpush3.msra.mxu0 %v13799_v11  ;;  %6337 = vperm.xlu0 %10921, %v11573_v39   ;;  %v14399_v29 = vpop.permute.xlu0 %5440  ;;  %v14412_v39 = vld [vmem:[%s18254_s2 + $0xc8] sm:$0xff]  ;;  %v18998_v12 = vld [vmem:[#allocation16_spill] sm:$0xff] }
 0x262   : > { %18993 = vst [vmem:[#allocation54_spill] sm:$0xff] %v14399_v29  ;;  %4187 = vmatprep.subr.mxu1 %v18592_v1  ;;  %10548 = vmatmul.mubr.msk.f32.gmra.mxu1 %vm3092_vm0, %v18734_v53  ;;  %v14405_v2 = vpop.permute.xlu1 %4678  ;;  %v14407_v36 = vpop.f32.mrf.mxu0 }
 0x263   : > { %18994 = vst [vmem:[#allocation168_spill] sm:$0xff] %v14405_v2  ;;  %18995 = vst [vmem:[#allocation169_spill] sm:$0xff] %v14407_v36  ;;  %4188 = vmatpush2.msra.mxu1 %v14412_v39  ;;  %9049 = vmatmul.mubr.msk.f32.gmra.mxu0 %vm3105_vm1, %v18734_v53  ;;  %v14418_v11 = vpop.f32.mrf.mxu1  ;;  %vm3116_vm1 = vcmp.eq.s32.totalorder %v18663_v18, %v19009_v47 }
 0x264   : > { %18996 = vst [vmem:[#allocation170_spill] sm:$0xff] %v14418_v11  ;;  %10550 = vmatprep.mubr.msk.f32.mxu1 %vm3095_vm2, %v18734_v53  ;;  %4189 = vmatprep.subr.mxu1 %v18592_v1 }
 0x265   : > { %6304 = vperm.xlu1 %10922, %v18998_v12   ;;  %9050 = vmatprep.mubr.msk.f32.mxu0 %vm3109_vm3, %v18734_v53  ;;  %v14426_v29 = vpop.permute.xlu0 %5446  ;;  %v2563_v2 = vpop.f32.mrf.mxu1 }
 0x266   : > { %18999 = vst [vmem:[#allocation57_spill] sm:$0xff] %v14426_v29  ;;  %4190 = vmatpush2.msra.mxu1 %v14431_v55  ;;  %6343 = vperm.xlu0 %10921, %v18737_v14   ;;  %v14437_v36 = vpop.permute.xlu1 %4684  ;;  %v14439_v12 = vpop.f32.mrf.mxu0  ;;  %v14448_v2 = vld [vmem:[%s18254_s2 + $0xb8] sm:$0xff] }
 0x267   : > { %19000 = vst [vmem:[#allocation16_spill] sm:$0xff] %v14437_v36  ;;  %4191 = vmatprep.subr.mxu1 %v18592_v1  ;;  %10551 = vmatmul.mubr.msk.f32.gmra.mxu1 %vm3098_vm4, %v18734_v53  ;;  %v19003_v36 = vld [vmem:[#allocation107_spill] sm:$0xff] }
 0x268   : > { %4192 = vmatpush2.msra.mxu1 %v14448_v2  ;;  %9051 = vmatmul.mubr.msk.f32.gmra.mxu0 %vm3108_vm5, %v18734_v53  ;;  %v14454_v14 = vpop.f32.mrf.mxu0  ;;  %vm3112_vm7 = vcmp.eq.s32.totalorder %v11690_v56, %v19003_v36  ;;  %vm3111_vm9 = vcmp.eq.s32.totalorder %v11685_v54, %v19003_v36  ;;  %vm3113_vm14 = vcmp.eq.s32.totalorder %v18663_v18, %v19003_v36  ;;  %v14549_v36 = vld [vmem:[%s18254_s2 + $0x90] sm:$0xff] }
 0x269   : > { %19001 = vst [vmem:[#allocation171_spill] sm:$0xff] %v14454_v14  ;;  %10553 = vmatprep.mubr.msk.f32.mxu1 %vm3101_vm6, %v18734_v53  ;;  %4193 = vmatprep.subr.mxu1 %v18592_v1  ;;  %v14458_v48 = vpop.permute.xlu0 %5452  ;;  %v2566_v29 = vpop.f32.mrf.mxu1 }
 0x26a   : > { %19002 = vst [vmem:[#allocation172_spill] sm:$0xff] %v14458_v48  ;;  %10590 = vmatprep.subr.mxu0 %v13850_v0  ;;  %6310 = vperm.xlu1 %10922, %v11463_v38   ;;  %v14465_v11 = vadd.f32 %v14305_v7, %v2566_v29 }
 0x26b   : > { %9052 = vmatprep.mubr.msk.f32.mxu0 %vm3112_vm7, %v18734_v53  ;;  %4194 = vmatpush2.msra.mxu1 %v14471_v9  ;;  %v14474_v48 = vpop.f32.mrf.mxu0  ;;  %v2568_v14 = vpop.f32.mrf.mxu1 }
 0x26c   : > { %19004 = vst [vmem:[#allocation107_spill] sm:$0xff] %v14465_v11  ;;  %10591 = vmatpush3.msra.mxu0 %v13850_v0  ;;  %6349 = vperm.xlu0 %10921, %v18746_v24   ;;  %v14480_v38 = vpop.permute.xlu1 %5428  ;;  %v14493_v24 = vld [vmem:[%s18254_s2 + $0xa8] sm:$0xff]  ;;  %v19010_v14 = vld [vmem:[#allocation18_spill] sm:$0xff] }
 0x26d   : > { %19005 = vst [vmem:[#allocation173_spill] sm:$0xff] %v14480_v38  ;;  %4195 = vmatprep.subr.mxu1 %v18592_v1  ;;  %10554 = vmatmul.mubr.msk.f32.gmra.mxu1 %vm3104_vm8, %v18734_v53  ;;  %v14486_v7 = vpop.permute.xlu0 %5458  ;;  %v14488_v29 = vpop.f32.mrf.mxu0 }
 0x26e   : > { %19006 = vst [vmem:[#allocation174_spill] sm:$0xff] %v14486_v7  ;;  %19007 = vst [vmem:[#allocation175_spill] sm:$0xff] %v14488_v29  ;;  %4196 = vmatpush2.msra.mxu1 %v14493_v24  ;;  %9053 = vmatmul.mubr.msk.f32.gmra.mxu0 %vm3111_vm9, %v18734_v53  ;;  %v14499_v0 = vpop.f32.mrf.mxu1 }
 0x26f   : > { %19008 = vst [vmem:[#allocation176_spill] sm:$0xff] %v14499_v0  ;;  %10556 = vmatprep.mubr.msk.f32.mxu1 %vm3107_vm10, %v18734_v53  ;;  %4197 = vmatprep.subr.mxu1 %v18592_v1 }
 0x270   : > { %6316 = vperm.xlu1 %10922, %v19010_v14   ;;  %9054 = vmatprep.mubr.msk.f32.mxu0 %vm3115_vm11, %v18734_v53  ;;  %v14507_v7 = vpop.permute.xlu1 %5434  ;;  %v2573_v38 = vpop.f32.mrf.mxu1  ;;  %v14529_v14 = vld [vmem:[%s18254_s2 + $0x98] sm:$0xff] }
 0x271   : > { %19011 = vst [vmem:[#allocation105_spill] sm:$0xff] %v14507_v7  ;;  %4198 = vmatpush2.msra.mxu1 %v14512_v50  ;;  %6355 = vperm.xlu0 %10921, %v18753_v23   ;;  %v14518_v29 = vpop.f32.mrf.mxu0  ;;  %v19015_v7 = vld [vmem:[#allocation21_spill] sm:$0xff] }
 0x272   : > { %4199 = vmatprep.subr.mxu1 %v18592_v1  ;;  %10557 = vmatmul.mubr.msk.f32.gmra.mxu1 %vm3110_vm12, %v18734_v53  ;;  %v14524_v38 = vpop.permute.xlu0 %5464 }
 0x273   : > { %19012 = vst [vmem:[#allocation18_spill] sm:$0xff] %v14524_v38  ;;  %4200 = vmatpush2.msra.mxu1 %v14529_v14  ;;  %9055 = vmatmul.mubr.msk.f32.gmra.mxu0 %vm3114_vm13, %v18734_v53  ;;  %v14535_v23 = vpop.f32.mrf.mxu0 }
 0x274   : > { %19013 = vst [vmem:[#allocation177_spill] sm:$0xff] %v14535_v23  ;;  %10559 = vmatprep.mubr.msk.f32.mxu1 %vm3113_vm14, %v18734_v53  ;;  %4201 = vmatprep.subr.mxu1 %v18592_v1  ;;  %v14539_v4 = vpop.permute.xlu1 %5437  ;;  %v2576_v38 = vpop.f32.mrf.mxu1  ;;  %v19017_v23 = vld [vmem:[#allocation60_spill] sm:$0xff] }
 0x275   : > { %19014 = vst [vmem:[#allocation178_spill] sm:$0xff] %v14539_v4  ;;  %10592 = vmatprep.subr.mxu0 %v13908_v46  ;;  %6322 = vperm.xlu1 %10922, %v19015_v7   ;;  %v14544_v0 = vadd.f32 %v14347_v62, %v2576_v38  ;;  %vm3857_vm15 = vcmp.eq.s32.totalorder %v18663_v18, %v19017_v23  ;;  %v19019_v7 = vld [vmem:[#allocation106_spill] sm:$0xff]  ;;  %v19020_v62 = vld [vmem:[#allocation3_spill] sm:$0xff] }
 0x276   : > { %4202 = vmatpush2.msra.mxu1 %v14549_v36  ;;  %10593 = vmatpush3.msra.mxu0 %v13908_v46  ;;  %v14555_v4 = vpop.permute.xlu0 %5470  ;;  %v14557_v11 = vpop.f32.mrf.mxu0  ;;  %vm3860_vm0 = vcmp.eq.s32.totalorder %v18663_v18, %v19019_v7  ;;  %vm3856_vm2 = vcmp.eq.s32.totalorder %v11690_v56, %v19017_v23  ;;  %vm3855_vm4 = vcmp.eq.s32.totalorder %v11685_v54, %v19017_v23  ;;  %v19032_v23 = vld [vmem:[#allocation69_spill] sm:$0xff] }
 0x277   : > { %19016 = vst [vmem:[#allocation21_spill] sm:$0xff] %v14544_v0  ;;  %19018 = vst [vmem:[#allocation60_spill] sm:$0xff] %v14555_v4  ;;  %10594 = vmatprep.mubr.msk.f32.mxu0 %vm3857_vm15, %v18734_v53  ;;  %7129 = vrot.lane.b32.xlu0 %v19020_v62, %s11106_s26  ;;  %v2578_v46 = vpop.f32.mrf.mxu1  ;;  %v14577_v0 = vld [vmem:[%s18254_s2 + $0x88] sm:$0xff]  ;;  %vm3859_vm5 = vcmp.eq.s32.totalorder %v11690_v56, %v19019_v7  ;;  %vm3866_vm6 = vcmp.eq.s32.totalorder %v18663_v18, %v19032_v23 }
 0x278   : > { %4203 = vmatprep.subr.mxu1 %v18592_v1  ;;  %10560 = vmatmul.mubr.msk.f32.gmra.mxu1 %vm3116_vm1, %v18734_v53  ;;  %v14570_v38 = vpop.permute.xlu1 %5443  ;;  %v14572_v4 = vpop.f32.mrf.mxu0  ;;  %v19025_v46 = vld [vmem:[#allocation63_spill] sm:$0xff]  ;;  %vm3858_vm8 = vcmp.eq.s32.totalorder %v11685_v54, %v19019_v7  ;;  %v19040_v7 = vld [vmem:[#allocation62_spill] sm:$0xff]  ;;  %vm3865_vm13 = vcmp.eq.s32.totalorder %v11690_v56, %v19032_v23 }
 0x279   : > { %19021 = vst [vmem:[#allocation106_spill] sm:$0xff] %v14570_v38  ;;  %19022 = vst [vmem:[#allocation3_spill] sm:$0xff] %v14572_v4  ;;  %4204 = vmatpush2.msra.mxu1 %v14577_v0  ;;  %9184 = vmatprep.mubr.msk.f32.mxu1 %vm3856_vm2, %v18734_v53  ;;  %v14581_v47 = vpop.f32.mrf.mxu1  ;;  %vm3863_vm3 = vcmp.eq.s32.totalorder %v18663_v18, %v19025_v46  ;;  %v14597_v4 = vld [vmem:[%s18254_s2 + $0x80] sm:$0xff]  ;;  %vm3862_vm9 = vcmp.eq.s32.totalorder %v11690_v56, %v19025_v46 }
 0x27a   : > { %19023 = vst [vmem:[#allocation179_spill] sm:$0xff] %v14581_v47  ;;  %4205 = vmatprep.subr.mxu1 %v18592_v1  ;;  %10595 = vmatmul.mubr.msk.f32.vlgmr.msra.gmra.mxu0 %vm3860_vm0, %v18734_v53  ;;  %v14588_v62 = vpop.permute.xlu0 %5476  ;;  %19026 = vst [vmem:[#allocation63_spill] sm:$0xff] %v14597_v4  ;;  %vm3875_vm11 = vcmp.eq.s32.totalorder %v18663_v18, %v19040_v7  ;;  %vm3861_vm12 = vcmp.eq.s32.totalorder %v11685_v54, %v19025_v46 }
 0x27b   : > { %19024 = vst [vmem:[#allocation180_spill] sm:$0xff] %v14588_v62  ;;  %4977 = vmatprep.subr.mxu0 %v18592_v1  ;;  %6328 = vperm.xlu1 %10922, %v18850_v60   ;;  %v2583_v38 = vpop.f32.mrf.mxu1  ;;  %v19028_v60 = vld [vmem:[#allocation5_spill] sm:$0xff]  ;;  %vm3864_vm0 = vcmp.eq.s32.totalorder %v11685_v54, %v19032_v23 }
 0x27c   : > { %4206 = vmatpush2.msra.mxu1 %v14597_v4  ;;  %10597 = vmatprep.mubr.msk.f32.mxu0 %vm3863_vm3, %v18734_v53  ;;  %v14601_v47 = vpop.permute.xlu1 %5449  ;;  %v14603_v62 = vpop.f32.mrf.mxu0  ;;  %v14614_v38 = vld [vmem:[%s18254_s2 + $0x178] sm:$0xff] }
 0x27d   : > { %19027 = vst [vmem:[#allocation181_spill] sm:$0xff] %v14601_v47  ;;  %4978 = vmatpush1.msra.mxu0 %v13980_v51  ;;  %7133 = vrot.lane.b32.xlu0 %v19028_v60, %s11106_s26  ;;  %19029 = vst [vmem:[#allocation5_spill] sm:$0xff] %v14614_v38 }
 0x27e   : > { %4979 = vmatprep.subr.mxu0 %v18592_v1  ;;  %10642 = vmatprep.subr.mxu1 %v14614_v38  ;;  %v14617_v47 = vpop.permute.xlu0 %5482  ;;  %v14619_v26 = vpop.f32.mrf.mxu0 }
 0x27f   : > { %19030 = vst [vmem:[#allocation182_spill] sm:$0xff] %v14617_v47  ;;  %19031 = vst [vmem:[#allocation183_spill] sm:$0xff] %v14619_v26  ;;  %9185 = vmatmul.mubr.msk.f32.vlgmr.msra.gmra.mxu1 %vm3855_vm4, %v18734_v53  ;;  %4980 = vmatpush1.msra.mxu0 %v14002_v3  ;;  %v2586_v51 = vpop.f32.mrf.mxu1  ;;  %v19034_v3 = vld [vmem:[#allocation59_spill] sm:$0xff] }
 0x280   : > { %10643 = vmatpush3.msra.mxu1 %v14614_v38  ;;  %9186 = vmatprep.mubr.msk.f32.mxu1 %vm3859_vm5, %v18734_v53  ;;  %v14629_v60 = vpop.permute.xlu1 %5455  ;;  %v14632_v47 = vadd.f32 %v14393_v25, %v2586_v51  ;;  %vm3869_vm7 = vcmp.eq.s32.totalorder %v18663_v18, %v19034_v3  ;;  %v19036_v25 = vld [vmem:[#allocation89_spill] sm:$0xff]  ;;  %vm3868_vm1 = vcmp.eq.s32.totalorder %v11690_v56, %v19034_v3 }
 0x281   : > { %19033 = vst [vmem:[#allocation69_spill] sm:$0xff] %v14629_v60  ;;  %10598 = vmatmul.mubr.msk.f32.gmra.mxu0 %vm3866_vm6, %v18734_v53  ;;  %4981 = vmatprep.subr.mxu0 %v18592_v1  ;;  %v14638_v26 = vpop.f32.mrf.mxu0  ;;  %v2588_v38 = vpop.f32.mrf.mxu1  ;;  %v19044_v60 = vld [vmem:[#allocation132_spill] sm:$0xff]  ;;  %vm3867_vm4 = vcmp.eq.s32.totalorder %v11685_v54, %v19034_v3  ;;  %v19064_v3 = vld [vmem:[#allocation115_spill] sm:$0xff] }
 0x282   : > { %6334 = vperm.xlu1 %10922, %v18658_v19   ;;  %10600 = vmatprep.mubr.msk.f32.mxu0 %vm3869_vm7, %v18734_v53  ;;  %v14642_v4 = vpop.permute.xlu0 %5488  ;;  %vm3890_vm6 = vcmp.eq.s32.totalorder %v18663_v18, %v19064_v3 }
 0x283   : > { %19035 = vst [vmem:[#allocation59_spill] sm:$0xff] %v14642_v4  ;;  %4982 = vmatpush1.msra.mxu0 %v14024_v31  ;;  %7137 = vrot.lane.b32.xlu0 %v19036_v25, %s11106_s26  ;;  %v14649_v51 = vpop.f32.mrf.mxu0  ;;  %v19039_v31 = vld [vmem:[#allocation73_spill] sm:$0xff] }
 0x284   : > { %19037 = vst [vmem:[#allocation89_spill] sm:$0xff] %v14649_v51  ;;  %4983 = vmatprep.subr.mxu0 %v18592_v1  ;;  %9187 = vmatmul.mubr.msk.f32.gmra.mxu1 %vm3858_vm8, %v18734_v53  ;;  %v14655_v19 = vpop.permute.xlu1 %5461  ;;  %v14657_v38 = vpop.f32.mrf.mxu1  ;;  %vm3872_vm10 = vcmp.eq.s32.totalorder %v18663_v18, %v19039_v31  ;;  %vm3871_vm5 = vcmp.eq.s32.totalorder %v11690_v56, %v19039_v31 }
 0x285   : > { %19038 = vst [vmem:[#allocation184_spill] sm:$0xff] %v14655_v19  ;;  %4984 = vmatpush1.msra.mxu0 %v14042_v20  ;;  %9188 = vmatprep.mubr.msk.f32.mxu1 %vm3862_vm9, %v18734_v53  ;;  %v19042_v19 = vld [vmem:[#allocation27_spill] sm:$0xff]  ;;  %vm3870_vm8 = vcmp.eq.s32.totalorder %v11685_v54, %v19039_v31  ;;  %vm3874_vm9 = vcmp.eq.s32.totalorder %v11690_v56, %v19040_v7 }
 0x286   : > { %10601 = vmatmul.mubr.msk.f32.gmra.mxu0 %vm3872_vm10, %v18734_v53  ;;  %4985 = vmatprep.subr.mxu0 %v18592_v1  ;;  %v14667_v25 = vpop.permute.xlu0 %5494  ;;  %v2593_v4 = vpop.f32.mrf.mxu1  ;;  %v19072_v31 = vld [vmem:[#allocation111_spill] sm:$0xff] }
 0x287   : > { %19041 = vst [vmem:[#allocation73_spill] sm:$0xff] %v14667_v25  ;;  %6340 = vperm.xlu1 %10922, %v19042_v19   ;;  %10603 = vmatprep.mubr.msk.f32.mxu0 %vm3875_vm11, %v18734_v53  ;;  %v14671_v20 = vpop.f32.mrf.mxu0  ;;  %v14682_v25 = vld [vmem:[%s18254_s2 + $0x170] sm:$0xff]  ;;  %v19048_v19 = vld [vmem:[#allocation22_spill] sm:$0xff]  ;;  %vm3899_vm11 = vcmp.eq.s32.totalorder %v18663_v18, %v19072_v31 }
 0x288   : > { %19043 = vst [vmem:[#allocation62_spill] sm:$0xff] %v14671_v20  ;;  %4986 = vmatpush1.msra.mxu0 %v14063_v27  ;;  %7141 = vrot.lane.b32.xlu0 %v19044_v60, %s11106_s26  ;;  %v14676_v51 = vpop.permute.xlu1 %5467  ;;  %vm3878_vm14 = vcmp.eq.s32.totalorder %v18663_v18, %v19048_v19 }
 0x289   : > { %19045 = vst [vmem:[#allocation27_spill] sm:$0xff] %v14676_v51  ;;  %4987 = vmatprep.subr.mxu0 %v18592_v1  ;;  %10644 = vmatprep.subr.mxu1 %v14682_v25  ;;  %v14687_v4 = vpop.f32.mrf.mxu0 }
 0x28a   : > { %19046 = vst [vmem:[#allocation132_spill] sm:$0xff] %v14687_v4  ;;  %9189 = vmatmul.mubr.msk.f32.gmra.mxu1 %vm3861_vm12, %v18734_v53  ;;  %4988 = vmatpush1.msra.mxu0 %v14080_v35  ;;  %v14693_v27 = vpop.permute.xlu0 %5500  ;;  %v2596_v60 = vpop.f32.mrf.mxu1  ;;  %v19049_v35 = vld [vmem:[#allocation68_spill] sm:$0xff]  ;;  %vm3873_vm12 = vcmp.eq.s32.totalorder %v11685_v54, %v19040_v7  ;;  %v19079_v7 = vld [vmem:[#allocation85_spill] sm:$0xff] }
 0x28b   : > { %19047 = vst [vmem:[#allocation185_spill] sm:$0xff] %v14693_v27  ;;  %10645 = vmatpush3.msra.mxu1 %v14682_v25  ;;  %9190 = vmatprep.mubr.msk.f32.mxu1 %vm3865_vm13, %v18734_v53  ;;  %v14700_v46 = vadd.f32 %v14439_v12, %v2596_v60  ;;  %vm3881_vm15 = vcmp.eq.s32.totalorder %v18663_v18, %v19049_v35  ;;  %v19051_v12 = vld [vmem:[#allocation133_spill] sm:$0xff] }
 0x28c   : > { %10604 = vmatmul.mubr.msk.f32.gmra.mxu0 %vm3878_vm14, %v18734_v53  ;;  %4989 = vmatprep.subr.mxu0 %v18592_v1  ;;  %v14706_v51 = vpop.permute.xlu1 %5473  ;;  %v14708_v27 = vpop.f32.mrf.mxu0  ;;  %vm3877_vm13 = vcmp.eq.s32.totalorder %v11690_v56, %v19048_v19  ;;  %vm3902_vm14 = vcmp.eq.s32.totalorder %v18663_v18, %v19079_v7 }
 0x28d   : > { %19050 = vst [vmem:[#allocation22_spill] sm:$0xff] %v14706_v51  ;;  %6346 = vperm.xlu1 %10922, %v18864_v58   ;;  %10606 = vmatprep.mubr.msk.f32.mxu0 %vm3881_vm15, %v18734_v53  ;;  %v2598_v4 = vpop.f32.mrf.mxu1  ;;  %v14750_v51 = vld [vmem:[%s18254_s2 + $0x168] sm:$0xff] }
 0x28e   : > { %4990 = vmatpush1.msra.mxu0 %v14103_v52  ;;  %7145 = vrot.lane.b32.xlu0 %v19051_v12, %s11106_s26  ;;  %v14717_v60 = vpop.permute.xlu0 %5506  ;;  %v14719_v20 = vpop.f32.mrf.mxu0  ;;  %v19054_v52 = vld [vmem:[#allocation77_spill] sm:$0xff]  ;;  %v19056_v4 = vld [vmem:[#allocation66_spill] sm:$0xff] }
 0x28f   : > { %19052 = vst [vmem:[#allocation68_spill] sm:$0xff] %v14717_v60  ;;  %19053 = vst [vmem:[#allocation133_spill] sm:$0xff] %v14719_v20  ;;  %4991 = vmatprep.subr.mxu0 %v18592_v1  ;;  %9191 = vmatmul.mubr.msk.f32.gmra.mxu1 %vm3864_vm0, %v18734_v53  ;;  %v14725_v58 = vpop.f32.mrf.mxu1  ;;  %vm3884_vm2 = vcmp.eq.s32.totalorder %v18663_v18, %v19054_v52  ;;  %vm3887_vm3 = vcmp.eq.s32.totalorder %v18663_v18, %v19056_v4 }
 0x290   : > { %4992 = vmatpush1.msra.mxu0 %v14119_v8  ;;  %9192 = vmatprep.mubr.msk.f32.mxu1 %vm3868_vm1, %v18734_v53  ;;  %v14731_v23 = vpop.permute.xlu1 %5479  ;;  %vm3876_vm0 = vcmp.eq.s32.totalorder %v11685_v54, %v19048_v19  ;;  %vm3880_vm1 = vcmp.eq.s32.totalorder %v11690_v56, %v19049_v35 }
 0x291   : > { %19055 = vst [vmem:[#allocation77_spill] sm:$0xff] %v14731_v23  ;;  %10607 = vmatmul.mubr.msk.f32.gmra.mxu0 %vm3884_vm2, %v18734_v53  ;;  %4993 = vmatprep.subr.mxu0 %v18592_v1  ;;  %v2603_v12 = vpop.f32.mrf.mxu1  ;;  %v19059_v23 = vld [vmem:[#allocation137_spill] sm:$0xff] }
 0x292   : > { %6352 = vperm.xlu1 %10922, %v18870_v63   ;;  %10609 = vmatprep.mubr.msk.f32.mxu0 %vm3887_vm3, %v18734_v53  ;;  %v14739_v8 = vpop.permute.xlu0 %5512  ;;  %v14741_v60 = vpop.f32.mrf.mxu0 }
 0x293   : > { %19057 = vst [vmem:[#allocation66_spill] sm:$0xff] %v14739_v8  ;;  %19058 = vst [vmem:[#allocation186_spill] sm:$0xff] %v14741_v60  ;;  %4994 = vmatpush1.msra.mxu0 %v14141_v6  ;;  %7149 = vrot.lane.b32.xlu0 %v19059_v23, %s11106_s26  ;;  %v19062_v23 = vld [vmem:[#allocation58_spill] sm:$0xff]  ;;  %v19063_v8 = vld [vmem:[#allocation125_spill] sm:$0xff] }
 0x294   : > { %4995 = vmatprep.subr.mxu0 %v18592_v1  ;;  %10646 = vmatprep.subr.mxu1 %v14750_v51  ;;  %v14755_v63 = vpop.permute.xlu1 %5485  ;;  %v14757_v12 = vpop.f32.mrf.mxu0  ;;  %v1933_v20 = vadd.f32 %v19063_v8, %v19062_v23 }
 0x295   : > { %19060 = vst [vmem:[#allocation137_spill] sm:$0xff] %v14755_v63  ;;  %19061 = vst [vmem:[#allocation187_spill] sm:$0xff] %v14757_v12  ;;  %9193 = vmatmul.mubr.msk.f32.gmra.mxu1 %vm3867_vm4, %v18734_v53  ;;  %4996 = vmatpush1.msra.mxu0 %v14157_v34  ;;  %v2606_v6 = vpop.f32.mrf.mxu1  ;;  %v19066_v34 = vld [vmem:[#allocation109_spill] sm:$0xff]  ;;  %vm3879_vm4 = vcmp.eq.s32.totalorder %v11685_v54, %v19049_v35  ;;  %v19093_v35 = vld [vmem:[#allocation87_spill] sm:$0xff] }
 0x296   : > { %10647 = vmatpush3.msra.mxu1 %v14750_v51  ;;  %9194 = vmatprep.mubr.msk.f32.mxu1 %vm3871_vm5, %v18734_v53  ;;  %v14769_v63 = vpop.permute.xlu0 %5518  ;;  %v14772_v12 = vadd.f32 %v14474_v48, %v2606_v6  ;;  %vm3893_vm7 = vcmp.eq.s32.totalorder %v18663_v18, %v19066_v34  ;;  %v19069_v6 = vld [vmem:[#allocation108_spill] sm:$0xff]  ;;  %vm3883_vm5 = vcmp.eq.s32.totalorder %v11690_v56, %v19054_v52 }
 0x297   : > { %19065 = vst [vmem:[#allocation58_spill] sm:$0xff] %v14769_v63  ;;  %10610 = vmatmul.mubr.msk.f32.gmra.mxu0 %vm3890_vm6, %v18734_v53  ;;  %4997 = vmatprep.subr.mxu0 %v18592_v1  ;;  %v14778_v8 = vpop.f32.mrf.mxu0  ;;  %v2608_v23 = vpop.f32.mrf.mxu1  ;;  %vm3914_vm6 = vcmp.eq.s32.totalorder %v18663_v18, %v19093_v35 }
 0x298   : > { %7127 = vrot.lane.b32.xlu1 %v1933_v20, %s11106_s26  ;;  %10612 = vmatprep.mubr.msk.f32.mxu0 %vm3893_vm7, %v18734_v53  ;;  %v14782_v60 = vpop.permute.xlu1 %5491  ;;  %v19070_v23 = vld [vmem:[#allocation41_spill] sm:$0xff] }
 0x299   : > { %19067 = vst [vmem:[#allocation125_spill] sm:$0xff] %v14782_v60  ;;  %4998 = vmatpush1.msra.mxu0 %v14181_v45  ;;  %7153 = vrot.lane.b32.xlu0 %v13887_v30, %s11106_s26  ;;  %v14789_v48 = vpop.f32.mrf.mxu0  ;;  %v1943_v45 = vadd.f32 %v19070_v23, %v19069_v6  ;;  %v19071_v30 = vld [vmem:[#allocation82_spill] sm:$0xff] }
 0x29a   : > { %19068 = vst [vmem:[#allocation115_spill] sm:$0xff] %v14789_v48  ;;  %4999 = vmatprep.subr.mxu0 %v18592_v1  ;;  %9195 = vmatmul.mubr.msk.f32.gmra.mxu1 %vm3870_vm8, %v18734_v53  ;;  %v14795_v20 = vpop.f32.mrf.mxu1  ;;  %vm3896_vm10 = vcmp.eq.s32.totalorder %v18663_v18, %v19071_v30  ;;  %v14822_v23 = vld [vmem:[%s18254_s2 + $0x160] sm:$0xff]  ;;  %vm3882_vm8 = vcmp.eq.s32.totalorder %v11685_v54, %v19054_v52 }
 0x29b   : > { %5000 = vmatpush1.msra.mxu0 %v14198_v37  ;;  %9196 = vmatprep.mubr.msk.f32.mxu1 %vm3874_vm9, %v18734_v53  ;;  %vm3886_vm9 = vcmp.eq.s32.totalorder %v11690_v56, %v19056_v4 }
 0x29c   : > { %10613 = vmatmul.mubr.msk.f32.gmra.mxu0 %vm3896_vm10, %v18734_v53  ;;  %5001 = vmatprep.subr.mxu0 %v18592_v1  ;;  %v14807_v63 = vpop.permute.xlu0 %6262  ;;  %v2613_v60 = vpop.f32.mrf.mxu1 }
 0x29d   : > { %19073 = vst [vmem:[#allocation109_spill] sm:$0xff] %v14807_v63  ;;  %7131 = vrot.lane.b32.xlu1 %v1943_v45, %s11106_s26  ;;  %10615 = vmatprep.mubr.msk.f32.mxu0 %vm3899_vm11, %v18734_v53  ;;  %v14811_v37 = vpop.permute.xlu1 %5497  ;;  %v14813_v6 = vpop.f32.mrf.mxu0  ;;  %v19077_v63 = vld [vmem:[#allocation64_spill] sm:$0xff] }
 0x29e   : > { %19074 = vst [vmem:[#allocation108_spill] sm:$0xff] %v14811_v37  ;;  %5002 = vmatpush1.msra.mxu0 %v14215_v13  ;;  %7157 = vrot.lane.b32.xlu0 %v13922_v22, %s11106_s26  ;;  %v19078_v37 = vld [vmem:[#allocation129_spill] sm:$0xff] }
 0x29f   : > { %5003 = vmatprep.subr.mxu0 %v18592_v1  ;;  %10648 = vmatprep.subr.mxu1 %v14822_v23  ;;  %v14827_v60 = vpop.f32.mrf.mxu0  ;;  %v2616_v45 = vpop.f32.mrf.mxu1  ;;  %v1953_v48 = vadd.f32 %v19078_v37, %v19077_v63 }
 0x2a0   : > { %19075 = vst [vmem:[#allocation41_spill] sm:$0xff] %v14827_v60  ;;  %9197 = vmatmul.mubr.msk.f32.gmra.mxu1 %vm3873_vm12, %v18734_v53  ;;  %5004 = vmatpush1.msra.mxu0 %v14233_v59  ;;  %v14833_v22 = vpop.permute.xlu0 %6271  ;;  %v14836_v13 = vadd.f32 %v14518_v29, %v2616_v45  ;;  %v19084_v45 = vld [vmem:[#allocation71_spill] sm:$0xff]  ;;  %vm3885_vm12 = vcmp.eq.s32.totalorder %v11685_v54, %v19056_v4  ;;  %v19106_v4 = vld [vmem:[#allocation86_spill] sm:$0xff] }
 0x2a1   : > { %19076 = vst [vmem:[#allocation82_spill] sm:$0xff] %v14833_v22  ;;  %10649 = vmatpush3.msra.mxu1 %v14822_v23  ;;  %9198 = vmatprep.mubr.msk.f32.mxu1 %vm3877_vm13, %v18734_v53  ;;  %v14844_v60 = vpop.permute.xlu1 %5503  ;;  %v2618_v59 = vpop.f32.mrf.mxu1  ;;  %v19081_v22 = vld [vmem:[#allocation114_spill] sm:$0xff]  ;;  %vm3889_vm13 = vcmp.eq.s32.totalorder %v11690_v56, %v19064_v3 }
 0x2a2   : > { %19080 = vst [vmem:[#allocation111_spill] sm:$0xff] %v14844_v60  ;;  %10616 = vmatmul.mubr.msk.f32.gmra.mxu0 %vm3902_vm14, %v18734_v53  ;;  %5005 = vmatprep.subr.mxu0 %v18592_v1  ;;  %vm3905_vm15 = vcmp.eq.s32.totalorder %v18663_v18, %v19081_v22  ;;  %v14850_v29 = vpop.f32.mrf.mxu0  ;;  %vm3926_vm14 = vcmp.eq.s32.totalorder %v18663_v18, %v19106_v4 }
 0x2a3   : > { %19082 = vst [vmem:[#allocation64_spill] sm:$0xff] %v14850_v29  ;;  %7135 = vrot.lane.b32.xlu1 %v1953_v48, %s11106_s26  ;;  %10618 = vmatprep.mubr.msk.f32.mxu0 %vm3905_vm15, %v18734_v53  ;;  %v19143_v29 = vld [vmem:[#allocation150_spill] sm:$0xff] }
 0x2a4   : > { %5006 = vmatpush1.msra.mxu0 %v14253_v16  ;;  %7161 = vrot.lane.b32.xlu0 %v13953_v49, %s11106_s26  ;;  %v3377_v63 = vpop.f32.mrf.mxu0  ;;  %v14859_v37 = vpop.f32.mrf.mxu1  ;;  %v19085_v16 = vld [vmem:[#allocation13_spill] sm:$0xff]  ;;  %v19086_v49 = vld [vmem:[#allocation12_spill] sm:$0xff] }
 0x2a5   : > { %5007 = vmatprep.subr.mxu0 %v18592_v1  ;;  %9199 = vmatmul.mubr.msk.f32.gmra.mxu1 %vm3876_vm0, %v18734_v53  ;;  %v14865_v48 = vpop.permute.xlu0 %6277  ;;  %v1963_v59 = vadd.f32 %v19085_v16, %v19084_v45  ;;  %vm3908_vm2 = vcmp.eq.s32.totalorder %v18663_v18, %v19086_v49  ;;  %v19087_v63 = vld [vmem:[#allocation11_spill] sm:$0xff]  ;;  %vm3888_vm0 = vcmp.eq.s32.totalorder %v11685_v54, %v19064_v3 }
 0x2a6   : > { %19083 = vst [vmem:[#allocation129_spill] sm:$0xff] %v14865_v48  ;;  %5008 = vmatpush1.msra.mxu0 %v14274_v41  ;;  %9200 = vmatprep.mubr.msk.f32.mxu1 %vm3880_vm1, %v18734_v53  ;;  %v2623_v19 = vpop.f32.mrf.mxu1  ;;  %vm3911_vm3 = vcmp.eq.s32.totalorder %v18663_v18, %v19087_v63  ;;  %v14877_v60 = vpop.permute.xlu1 %5509  ;;  %vm3892_vm1 = vcmp.eq.s32.totalorder %v11690_v56, %v19066_v34 }
 0x2a7   : > { %10619 = vmatmul.mubr.msk.f32.gmra.mxu0 %vm3908_vm2, %v18734_v53  ;;  %5009 = vmatprep.subr.mxu0 %v18592_v1  ;;  %19088 = vst [vmem:[#allocation85_spill] sm:$0xff] %v14877_v60  ;;  %v14879_v48 = vpop.f32.mrf.mxu0  ;;  %v14893_v19 = vld [vmem:[%s18254_s2 + $0x158] sm:$0xff] }
 0x2a8   : > { %7139 = vrot.lane.b32.xlu1 %v1963_v59, %s11106_s26  ;;  %10621 = vmatprep.mubr.msk.f32.mxu0 %vm3911_vm3, %v18734_v53  ;;  %v2626_v41 = vpop.f32.mrf.mxu1 }
 0x2a9   : > { %5010 = vmatpush2.msra.mxu0 %v14291_v57  ;;  %7165 = vrot.lane.b32.xlu0 %v13989_v15, %s11106_s26  ;;  %v3382_v45 = vpop.f32.mrf.mxu0  ;;  %v14887_v16 = vadd.f32 %v14557_v11, %v2626_v41  ;;  %v19091_v11 = vld [vmem:[#allocation112_spill] sm:$0xff]  ;;  %v19092_v41 = vld [vmem:[#allocation135_spill] sm:$0xff] }
 0x2aa   : > { %5011 = vmatprep.subr.mxu0 %v18592_v1  ;;  %10650 = vmatprep.subr.mxu1 %v14893_v19  ;;  %v14898_v57 = vpop.permute.xlu0 %6283  ;;  %v2628_v59 = vpop.f32.mrf.mxu1  ;;  %v1973_v45 = vadd.f32 %v19092_v41, %v19091_v11 }
 0x2ab   : > { %19089 = vst [vmem:[#allocation114_spill] sm:$0xff] %v14898_v57  ;;  %9201 = vmatmul.mubr.msk.f32.gmra.mxu1 %vm3879_vm4, %v18734_v53  ;;  %5012 = vmatpush2.msra.mxu0 %v14311_v40  ;;  %v14904_v15 = vpop.f32.mrf.mxu0  ;;  %v19094_v40 = vld [vmem:[#allocation117_spill] sm:$0xff]  ;;  %v14918_v57 = vpop.permute.xlu1 %5515  ;;  %vm3891_vm4 = vcmp.eq.s32.totalorder %v11685_v54, %v19066_v34 }
 0x2ac   : > { %19090 = vst [vmem:[#allocation71_spill] sm:$0xff] %v14904_v15  ;;  %10651 = vmatpush3.msra.mxu1 %v14893_v19  ;;  %9202 = vmatprep.mubr.msk.f32.mxu1 %vm3883_vm5, %v18734_v53  ;;  %v14912_v59 = vpop.f32.mrf.mxu1  ;;  %vm3917_vm7 = vcmp.eq.s32.totalorder %v18663_v18, %v19094_v40  ;;  %19095 = vst [vmem:[#allocation13_spill] sm:$0xff] %v14918_v57  ;;  %v19100_v57 = vld [vmem:[#allocation31_spill] sm:$0xff]  ;;  %vm3895_vm5 = vcmp.eq.s32.totalorder %v11690_v56, %v19071_v30 }
 0x2ad   : > { %10622 = vmatmul.mubr.msk.f32.gmra.mxu0 %vm3914_vm6, %v18734_v53  ;;  %5013 = vmatprep.subr.mxu0 %v18592_v1  ;;  %v3387_v60 = vpop.f32.mrf.mxu0  ;;  %vm3923_vm11 = vcmp.eq.s32.totalorder %v18663_v18, %v19100_v57 }
 0x2ae   : > { %7143 = vrot.lane.b32.xlu1 %v1973_v45, %s11106_s26  ;;  %10624 = vmatprep.mubr.msk.f32.mxu0 %vm3917_vm7, %v18734_v53  ;;  %v2633_v11 = vpop.f32.mrf.mxu1  ;;  %v19097_v45 = vld [vmem:[#allocation116_spill] sm:$0xff] }
 0x2af   : > { %5014 = vmatpush2.msra.mxu0 %v14331_v33  ;;  %7169 = vrot.lane.b32.xlu0 %v14019_v28, %s11106_s26  ;;  %v14927_v41 = vpop.f32.mrf.mxu0  ;;  %v19098_v11 = vld [vmem:[#allocation93_spill] sm:$0xff]  ;;  %v19099_v28 = vld [vmem:[#allocation83_spill] sm:$0xff] }
 0x2b0   : > { %5015 = vmatprep.subr.mxu0 %v18592_v1  ;;  %9203 = vmatmul.mubr.msk.f32.gmra.mxu1 %vm3882_vm8, %v18734_v53  ;;  %v14933_v60 = vpop.permute.xlu0 %6289  ;;  %v1983_v33 = vadd.f32 %v19098_v11, %v19097_v45  ;;  %vm3920_vm10 = vcmp.eq.s32.totalorder %v18663_v18, %v19099_v28  ;;  %vm3894_vm8 = vcmp.eq.s32.totalorder %v11685_v54, %v19071_v30 }
 0x2b1   : > { %19096 = vst [vmem:[#allocation12_spill] sm:$0xff] %v14933_v60  ;;  %5016 = vmatpush2.msra.mxu0 %v14352_v61  ;;  %9204 = vmatprep.mubr.msk.f32.mxu1 %vm3886_vm9, %v18734_v53  ;;  %v3392_v52 = vpop.f32.mrf.mxu0  ;;  %v2636_v15 = vpop.f32.mrf.mxu1  ;;  %vm3898_vm9 = vcmp.eq.s32.totalorder %v11690_v56, %v19072_v31 }
 0x2b2   : > { %10625 = vmatmul.mubr.msk.f32.gmra.mxu0 %vm3920_vm10, %v18734_v53  ;;  %5017 = vmatprep.subr.mxu0 %v18592_v1  ;;  %v14947_v45 = vpop.permute.xlu1 %5521  ;;  %v14950_v61 = vadd.f32 %v14603_v62, %v2636_v15 }
 0x2b3   : > { %7147 = vrot.lane.b32.xlu1 %v1983_v33, %s11106_s26  ;;  %10627 = vmatprep.mubr.msk.f32.mxu0 %vm3923_vm11, %v18734_v53  ;;  %19101 = vst [vmem:[#allocation11_spill] sm:$0xff] %v14947_v45  ;;  %v14952_v11 = vpop.f32.mrf.mxu0  ;;  %v2638_v52 = vpop.f32.mrf.mxu1  ;;  %v14961_v33 = vld [vmem:[%s18254_s2 + $0x150] sm:$0xff] }
 0x2b4   : > { %19102 = vst [vmem:[#allocation112_spill] sm:$0xff] %v14952_v11  ;;  %5018 = vmatpush2.msra.mxu0 %v14367_v17  ;;  %7173 = vrot.lane.b32.xlu0 %v14058_v44, %s11106_s26  ;;  %v19104_v17 = vld [vmem:[#allocation119_spill] sm:$0xff]  ;;  %v19115_v11 = vld [vmem:[#allocation122_spill] sm:$0xff] }
 0x2b5   : > { %5019 = vmatprep.subr.mxu0 %v18592_v1  ;;  %10652 = vmatprep.subr.mxu1 %v14961_v33  ;;  %v14966_v62 = vpop.permute.xlu0 %6295  ;;  %v3397_v15 = vpop.f32.mrf.mxu0  ;;  %v19105_v52 = vld [vmem:[#allocation139_spill] sm:$0xff]  ;;  %vm3935_vm3 = vcmp.eq.s32.totalorder %v18663_v18, %v19115_v11 }
 0x2b6   : > { %19103 = vst [vmem:[#allocation135_spill] sm:$0xff] %v14966_v62  ;;  %9205 = vmatmul.mubr.msk.f32.gmra.mxu1 %vm3885_vm12, %v18734_v53  ;;  %5020 = vmatpush2.msra.mxu0 %v14390_v32  ;;  %v14972_v44 = vpop.f32.mrf.mxu1  ;;  %v1993_v60 = vadd.f32 %v19105_v52, %v19104_v17  ;;  %v19108_v32 = vld [vmem:[#allocation34_spill] sm:$0xff]  ;;  %vm3897_vm12 = vcmp.eq.s32.totalorder %v11685_v54, %v19072_v31  ;;  %v19137_v31 = vld [vmem:[#allocation136_spill] sm:$0xff] }
 0x2b7   : > { %10653 = vmatpush3.msra.mxu1 %v14961_v33  ;;  %9206 = vmatprep.mubr.msk.f32.mxu1 %vm3889_vm13, %v18734_v53  ;;  %v14980_v15 = vpop.f32.mrf.mxu0  ;;  %vm3929_vm15 = vcmp.eq.s32.totalorder %v18663_v18, %v19108_v32  ;;  %vm3901_vm13 = vcmp.eq.s32.totalorder %v11690_v56, %v19079_v7 }
 0x2b8   : > { %19107 = vst [vmem:[#allocation87_spill] sm:$0xff] %v14980_v15  ;;  %10628 = vmatmul.mubr.msk.f32.gmra.mxu0 %vm3926_vm14, %v18734_v53  ;;  %5021 = vmatprep.subr.mxu0 %v18592_v1  ;;  %v2643_v62 = vpop.f32.mrf.mxu1  ;;  %vm3950_vm14 = vcmp.eq.s32.totalorder %v18663_v18, %v19137_v31  ;;  %v19159_v15 = vld [vmem:[#allocation155_spill] sm:$0xff] }
 0x2b9   : > { %7151 = vrot.lane.b32.xlu1 %v1993_v60, %s11106_s26  ;;  %10630 = vmatprep.mubr.msk.f32.mxu0 %vm3929_vm15, %v18734_v53  ;;  %v14988_v17 = vpop.permute.xlu1 %6265  ;;  %v3402_v52 = vpop.f32.mrf.mxu0 }
 0x2ba   : > { %19109 = vst [vmem:[#allocation117_spill] sm:$0xff] %v14988_v17  ;;  %5022 = vmatpush2.msra.mxu0 %v14412_v39  ;;  %7177 = vrot.lane.b32.xlu0 %v14090_v42, %s11106_s26  ;;  %v14995_v45 = vpop.f32.mrf.mxu1  ;;  %v19112_v39 = vld [vmem:[#allocation2_spill] sm:$0xff]  ;;  %v19113_v52 = vld [vmem:[#allocation96_spill] sm:$0xff] }
 0x2bb   : > { %5023 = vmatprep.subr.mxu0 %v18592_v1  ;;  %9207 = vmatmul.mubr.msk.f32.gmra.mxu1 %vm3888_vm0, %v18734_v53  ;;  %v15001_v60 = vpop.permute.xlu0 %6301  ;;  %v15003_v62 = vpop.f32.mrf.mxu0  ;;  %v2003_v17 = vadd.f32 %v19113_v52, %v19112_v39  ;;  %v19114_v42 = vld [vmem:[#allocation128_spill] sm:$0xff]  ;;  %vm3900_vm0 = vcmp.eq.s32.totalorder %v11685_v54, %v19079_v7 }
 0x2bc   : > { %19110 = vst [vmem:[#allocation116_spill] sm:$0xff] %v15001_v60  ;;  %19111 = vst [vmem:[#allocation93_spill] sm:$0xff] %v15003_v62  ;;  %5024 = vmatpush2.msra.mxu0 %v14431_v55  ;;  %9208 = vmatprep.mubr.msk.f32.mxu1 %vm3892_vm1, %v18734_v53  ;;  %vm3932_vm2 = vcmp.eq.s32.totalorder %v18663_v18, %v19114_v42  ;;  %v2648_v3 = vpop.f32.mrf.mxu1  ;;  %v19120_v62 = vld [vmem:[#allocation131_spill] sm:$0xff]  ;;  %vm3904_vm1 = vcmp.eq.s32.totalorder %v11690_v56, %v19081_v22 }
 0x2bd   : > { %10631 = vmatmul.mubr.msk.f32.gmra.mxu0 %vm3932_vm2, %v18734_v53  ;;  %5025 = vmatprep.subr.mxu0 %v18592_v1  ;;  %v3407_v60 = vpop.f32.mrf.mxu0  ;;  %v19119_v3 = vld [vmem:[#allocation126_spill] sm:$0xff]  ;;  %vm3938_vm6 = vcmp.eq.s32.totalorder %v18663_v18, %v19120_v62 }
 0x2be   : > { %7155 = vrot.lane.b32.xlu1 %v2003_v17, %s11106_s26  ;;  %10633 = vmatprep.mubr.msk.f32.mxu0 %vm3935_vm3, %v18734_v53  ;;  %v15017_v39 = vpop.f32.mrf.mxu1  ;;  %v15030_v60 = vld [vmem:[%s18254_s2 + $0x148] sm:$0xff] }
 0x2bf   : > { %5026 = vmatpush2.msra.mxu0 %v14448_v2  ;;  %7181 = vrot.lane.b32.xlu0 %v14128_v43, %s11106_s26  ;;  %v15022_v55 = vpop.permute.xlu1 %6268  ;;  %v15024_v52 = vpop.f32.mrf.mxu0 }
 0x2c0   : > { %19116 = vst [vmem:[#allocation83_spill] sm:$0xff] %v15022_v55  ;;  %19117 = vst [vmem:[#allocation31_spill] sm:$0xff] %v15024_v52  ;;  %5027 = vmatprep.subr.mxu0 %v18592_v1  ;;  %10654 = vmatprep.subr.mxu1 %v15030_v60  ;;  %v15035_v2 = vpop.permute.xlu0 %6307  ;;  %v2653_v17 = vpop.f32.mrf.mxu1  ;;  %v2013_v55 = vadd.f32 %v13959_v21, %v19119_v3 }
 0x2c1   : > { %19118 = vst [vmem:[#allocation119_spill] sm:$0xff] %v15035_v2  ;;  %9209 = vmatmul.mubr.msk.f32.gmra.mxu1 %vm3891_vm4, %v18734_v53  ;;  %5028 = vmatpush2.msra.mxu0 %v14471_v9  ;;  %v3412_v43 = vpop.f32.mrf.mxu0  ;;  %v19121_v9 = vld [vmem:[#allocation37_spill] sm:$0xff]  ;;  %vm3903_vm4 = vcmp.eq.s32.totalorder %v11685_v54, %v19081_v22 }
 0x2c2   : > { %10655 = vmatpush3.msra.mxu1 %v15030_v60  ;;  %9210 = vmatprep.mubr.msk.f32.mxu1 %vm3895_vm5, %v18734_v53  ;;  %v15047_v34 = vpop.f32.mrf.mxu1  ;;  %vm3941_vm7 = vcmp.eq.s32.totalorder %v18663_v18, %v19121_v9  ;;  %vm3907_vm5 = vcmp.eq.s32.totalorder %v11690_v56, %v19086_v49 }
 0x2c3   : > { %10634 = vmatmul.mubr.msk.f32.gmra.mxu0 %vm3938_vm6, %v18734_v53  ;;  %5029 = vmatprep.subr.mxu0 %v18592_v1  ;;  %v15053_v17 = vpop.f32.mrf.mxu0 }
 0x2c4   : > { %19122 = vst [vmem:[#allocation139_spill] sm:$0xff] %v15053_v17  ;;  %7159 = vrot.lane.b32.xlu1 %v2013_v55, %s11106_s26  ;;  %10636 = vmatprep.mubr.msk.f32.mxu0 %vm3941_vm7, %v18734_v53  ;;  %v15057_v21 = vpop.permute.xlu1 %6274  ;;  %v2658_v43 = vpop.f32.mrf.mxu1 }
 0x2c5   : > { %19123 = vst [vmem:[#allocation86_spill] sm:$0xff] %v15057_v21  ;;  %5030 = vmatpush2.msra.mxu0 %v14493_v24  ;;  %7185 = vrot.lane.b32.xlu0 %v14162_v5, %s11106_s26  ;;  %v3417_v3 = vpop.f32.mrf.mxu0  ;;  %v19126_v43 = vld [vmem:[#allocation130_spill] sm:$0xff]  ;;  %v19127_v24 = vld [vmem:[#allocation49_spill] sm:$0xff]  ;;  %v19128_v5 = vld [vmem:[#allocation91_spill] sm:$0xff] }
 0x2c6   : > { %5031 = vmatprep.subr.mxu0 %v18592_v1  ;;  %9211 = vmatmul.mubr.msk.f32.gmra.mxu1 %vm3894_vm8, %v18734_v53  ;;  %v15068_v55 = vpop.permute.xlu0 %6313  ;;  %v15070_v2 = vpop.f32.mrf.mxu1  ;;  %v2023_v21 = vadd.f32 %v19127_v24, %v19126_v43  ;;  %vm3944_vm10 = vcmp.eq.s32.totalorder %v18663_v18, %v19128_v5  ;;  %v19130_v3 = vld [vmem:[#allocation127_spill] sm:$0xff]  ;;  %v19131_v43 = vld [vmem:[#allocation124_spill] sm:$0xff]  ;;  %vm3906_vm8 = vcmp.eq.s32.totalorder %v11685_v54, %v19086_v49 }
 0x2c7   : > { %19124 = vst [vmem:[#allocation34_spill] sm:$0xff] %v15068_v55  ;;  %19125 = vst [vmem:[#allocation2_spill] sm:$0xff] %v15070_v2  ;;  %5032 = vmatpush2.msra.mxu0 %v14512_v50  ;;  %9212 = vmatprep.mubr.msk.f32.mxu1 %vm3898_vm9, %v18734_v53  ;;  %v15078_v30 = vpop.f32.mrf.mxu0  ;;  %vm3947_vm11 = vcmp.eq.s32.totalorder %v18663_v18, %v19130_v3  ;;  %vm3910_vm9 = vcmp.eq.s32.totalorder %v11690_v56, %v19087_v63 }
 0x2c8   : > { %19129 = vst [vmem:[#allocation96_spill] sm:$0xff] %v15078_v30  ;;  %10637 = vmatmul.mubr.msk.f32.gmra.mxu0 %vm3944_vm10, %v18734_v53  ;;  %5033 = vmatprep.subr.mxu0 %v18592_v1  ;;  %v2663_v55 = vpop.f32.mrf.mxu1 }
 0x2c9   : > { %7163 = vrot.lane.b32.xlu1 %v2023_v21, %s11106_s26  ;;  %10639 = vmatprep.mubr.msk.f32.mxu0 %vm3947_vm11, %v18734_v53  ;;  %v3422_v50 = vpop.f32.mrf.mxu0  ;;  %v15097_v55 = vld [vmem:[%s18254_s2 + $0x140] sm:$0xff] }
 0x2ca   : > { %5034 = vmatpush2.msra.mxu0 %v14529_v14  ;;  %7189 = vrot.lane.b32.xlu0 %v19131_v43, %s11106_s26  ;;  %v15089_v24 = vpop.permute.xlu1 %6280  ;;  %v15091_v17 = vpop.f32.mrf.mxu1  ;;  %v19135_v43 = vld [vmem:[#allocation45_spill] sm:$0xff] }
 0x2cb   : > { %19132 = vst [vmem:[#allocation128_spill] sm:$0xff] %v15089_v24  ;;  %5035 = vmatprep.subr.mxu0 %v18592_v1  ;;  %10656 = vmatprep.subr.mxu1 %v15097_v55  ;;  %v15102_v14 = vpop.permute.xlu0 %6319  ;;  %v15104_v21 = vpop.f32.mrf.mxu0  ;;  %v19136_v24 = vld [vmem:[#allocation147_spill] sm:$0xff] }
 0x2cc   : > { %19133 = vst [vmem:[#allocation122_spill] sm:$0xff] %v15102_v14  ;;  %19134 = vst [vmem:[#allocation126_spill] sm:$0xff] %v15104_v21  ;;  %9213 = vmatmul.mubr.msk.f32.gmra.mxu1 %vm3897_vm12, %v18734_v53  ;;  %5036 = vmatpush2.msra.mxu0 %v14549_v36  ;;  %v2668_v50 = vpop.f32.mrf.mxu1  ;;  %v2033_v30 = vadd.f32 %v19136_v24, %v19135_v43  ;;  %v19138_v36 = vld [vmem:[#allocation7_spill] sm:$0xff]  ;;  %v19142_v43 = vld [vmem:[#allocation140_spill] sm:$0xff]  ;;  %vm3909_vm12 = vcmp.eq.s32.totalorder %v11685_v54, %v19087_v63 }
 0x2cd   : > { %10657 = vmatpush3.msra.mxu1 %v15097_v55  ;;  %9214 = vmatprep.mubr.msk.f32.mxu1 %vm3901_vm13, %v18734_v53  ;;  %v3427_v14 = vpop.f32.mrf.mxu0  ;;  %vm4690_vm15 = vcmp.eq.s32.totalorder %v11690_v56, %v19138_v36  ;;  %v2043_v52 = vadd.f32 %v19143_v29, %v19142_v43  ;;  %vm4689_vm2 = vcmp.eq.s32.totalorder %v11685_v54, %v19138_v36  ;;  %v19146_v29 = vld [vmem:[#allocation46_spill] sm:$0xff]  ;;  %v19148_v43 = vld [vmem:[#allocation15_spill] sm:$0xff] }
 0x2ce   : > { %10640 = vmatmul.mubr.msk.f32.gmra.mxu0 %vm3950_vm14, %v18734_v53  ;;  %5037 = vmatprep.subr.mxu0 %v18592_v1  ;;  %v15120_v21 = vpop.f32.mrf.mxu1  ;;  %vm4693_vm3 = vcmp.eq.s32.totalorder %v11690_v56, %v19146_v29  ;;  %vm4692_vm6 = vcmp.eq.s32.totalorder %v11685_v54, %v19146_v29  ;;  %vm3913_vm13 = vcmp.eq.s32.totalorder %v11690_v56, %v19093_v35  ;;  %v19167_v63 = vld [vmem:[#allocation98_spill] sm:$0xff] }
 0x2cf   : > { %19139 = vst [vmem:[#allocation131_spill] sm:$0xff] %v15120_v21  ;;  %7167 = vrot.lane.b32.xlu1 %v2033_v30, %s11106_s26  ;;  %5038 = vmatpush2.msra.mxu0 %v14577_v0  ;;  %v15124_v24 = vpop.permute.xlu1 %6286  ;;  %v15126_v50 = vpop.f32.mrf.mxu0 }
 0x2d0   : > { %19140 = vst [vmem:[#allocation37_spill] sm:$0xff] %v15124_v24  ;;  %19141 = vst [vmem:[#allocation130_spill] sm:$0xff] %v15126_v50  ;;  %7257 = vrot.lane.b32.xlu0 %v14303_v10, %s11107_s27  ;;  %5039 = vmatprep.subr.mxu0 %v18592_v1  ;;  %v2673_v14 = vpop.f32.mrf.mxu1  ;;  %v19145_v10 = vld [vmem:[#allocation63_spill] sm:$0xff]  ;;  %v19151_v24 = vld [vmem:[#allocation152_spill] sm:$0xff] }
 0x2d1   : > { %9376 = vmatprep.mubr.msk.f32.mxu0 %vm4690_vm15, %v18734_v53  ;;  %9215 = vmatmul.mubr.msk.f32.gmra.mxu1 %vm3900_vm0, %v18734_v53  ;;  %v15139_v0 = vpop.permute.xlu0 %6325  ;;  %v3432_v30 = vpop.f32.mrf.mxu0  ;;  %v19154_v50 = vld [vmem:[#allocation5_spill] sm:$0xff]  ;;  %vm4702_vm15 = vcmp.eq.s32.totalorder %v11690_v56, %v19167_v63  ;;  %vm3912_vm0 = vcmp.eq.s32.totalorder %v11685_v54, %v19093_v35  ;;  %v19173_v35 = vld [vmem:[#allocation134_spill] sm:$0xff] }
 0x2d2   : > { %19144 = vst [vmem:[#allocation49_spill] sm:$0xff] %v15139_v0  ;;  %5040 = vmatpush2.msra.mxu0 %v19145_v10  ;;  %9216 = vmatprep.mubr.msk.f32.mxu1 %vm3904_vm1, %v18734_v53  ;;  %v15145_v7 = vpop.f32.mrf.mxu1  ;;  %v15161_v10 = vld [vmem:[%s18254_s2 + $0x138] sm:$0xff]  ;;  %vm3916_vm1 = vcmp.eq.s32.totalorder %v11690_v56, %v19094_v40 }
 0x2d3   : > { %9377 = vmatmul.mubr.msk.f32.vlgmr.msra.gmra.mxu0 %vm4689_vm2, %v18734_v53  ;;  %7171 = vrot.lane.b32.xlu1 %v2043_v52, %s11106_s26  ;;  %v15151_v14 = vpop.f32.mrf.mxu0  ;;  %vm4701_vm2 = vcmp.eq.s32.totalorder %v11685_v54, %v19167_v63 }
 0x2d4   : > { %19147 = vst [vmem:[#allocation91_spill] sm:$0xff] %v15151_v14  ;;  %9378 = vmatprep.mubr.msk.f32.mxu0 %vm4693_vm3, %v18734_v53  ;;  %7261 = vrot.lane.b32.xlu0 %v19148_v43, %s11107_s27  ;;  %v2678_v30 = vpop.f32.mrf.mxu1  ;;  %v19150_v43 = vld [vmem:[#allocation143_spill] sm:$0xff]  ;;  %vm4705_vm3 = vcmp.eq.s32.totalorder %v11690_v56, %v19173_v35 }
 0x2d5   : > { %10658 = vmatprep.subr.mxu1 %v15161_v10  ;;  %9217 = vmatmul.mubr.msk.f32.gmra.mxu1 %vm3903_vm4, %v18734_v53  ;;  %v15167_v52 = vpop.permute.xlu1 %6292  ;;  %v3437_v0 = vpop.f32.mrf.mxu0  ;;  %v2053_v14 = vadd.f32 %v19151_v24, %v19150_v43  ;;  %v19157_v43 = vld [vmem:[#allocation107_spill] sm:$0xff]  ;;  %vm3915_vm4 = vcmp.eq.s32.totalorder %v11685_v54, %v19094_v40  ;;  %v19178_v40 = vld [vmem:[#allocation145_spill] sm:$0xff] }
 0x2d6   : > { %19149 = vst [vmem:[#allocation127_spill] sm:$0xff] %v15167_v52  ;;  %10659 = vmatpush3.msra.mxu1 %v15161_v10  ;;  %9218 = vmatprep.mubr.msk.f32.mxu1 %vm3907_vm5, %v18734_v53  ;;  %v15175_v22 = vpop.permute.xlu0 %6331  ;;  %v15177_v30 = vpop.f32.mrf.mxu1  ;;  %v19155_v52 = vld [vmem:[#allocation142_spill] sm:$0xff]  ;;  %vm3919_vm5 = vcmp.eq.s32.totalorder %v11690_v56, %v19099_v28 }
 0x2d7   : > { %19152 = vst [vmem:[#allocation124_spill] sm:$0xff] %v15175_v22  ;;  %19153 = vst [vmem:[#allocation45_spill] sm:$0xff] %v15177_v30  ;;  %9379 = vmatmul.mubr.msk.f32.gmra.mxu0 %vm4692_vm6, %v18734_v53  ;;  %10722 = vmatprep.subr.mxu0 %v19154_v50  ;;  %vm4696_vm7 = vcmp.eq.s32.totalorder %v11690_v56, %v19155_v52  ;;  %v15183_v0 = vpop.f32.mrf.mxu0  ;;  %v19158_v30 = vld [vmem:[#allocation99_spill] sm:$0xff]  ;;  %vm4695_vm10 = vcmp.eq.s32.totalorder %v11685_v54, %v19155_v52  ;;  %v19166_v52 = vld [vmem:[#allocation156_spill] sm:$0xff] }
 0x2d8   : > { %19156 = vst [vmem:[#allocation147_spill] sm:$0xff] %v15183_v0  ;;  %7175 = vrot.lane.b32.xlu1 %v2053_v14, %s11106_s26  ;;  %9380 = vmatprep.mubr.msk.f32.mxu0 %vm4696_vm7, %v18734_v53  ;;  %v2683_v24 = vpop.f32.mrf.mxu1  ;;  %v2063_v21 = vadd.f32 %v19159_v15, %v19158_v30  ;;  %v19161_v15 = vld [vmem:[#allocation26_spill] sm:$0xff]  ;;  %v19165_v0 = vld [vmem:[#allocation153_spill] sm:$0xff]  ;;  %vm4704_vm6 = vcmp.eq.s32.totalorder %v11685_v54, %v19173_v35 }
 0x2d9   : > { %10723 = vmatpush3.msra.mxu0 %v19154_v50  ;;  %7265 = vrot.lane.b32.xlu0 %v19157_v43, %s11107_s27  ;;  %v3442_v22 = vpop.f32.mrf.mxu0  ;;  %v15202_v50 = vld [vmem:[%s18254_s2 + $0x130] sm:$0xff]  ;;  %vm4699_vm11 = vcmp.eq.s32.totalorder %v11690_v56, %v19161_v15  ;;  %v19164_v43 = vld [vmem:[#allocation21_spill] sm:$0xff]  ;;  %v2073_v2 = vadd.f32 %v19166_v52, %v19165_v0  ;;  %vm4698_vm14 = vcmp.eq.s32.totalorder %v11685_v54, %v19161_v15 }
 0x2da   : > { %9219 = vmatmul.mubr.msk.f32.gmra.mxu1 %vm3906_vm8, %v18734_v53  ;;  %10660 = vmatprep.subr.mxu1 %v15202_v50  ;;  %v15205_v49 = vpop.permute.xlu1 %6298  ;;  %v15207_v14 = vpop.f32.mrf.mxu1  ;;  %vm4708_vm7 = vcmp.eq.s32.totalorder %v11690_v56, %v19178_v40  ;;  %vm3918_vm8 = vcmp.eq.s32.totalorder %v11685_v54, %v19099_v28 }
 0x2db   : > { %19160 = vst [vmem:[#allocation136_spill] sm:$0xff] %v15205_v49  ;;  %9220 = vmatprep.mubr.msk.f32.mxu1 %vm3910_vm9, %v18734_v53  ;;  %9381 = vmatmul.mubr.msk.f32.gmra.mxu0 %vm4695_vm10, %v18734_v53  ;;  %v15213_v22 = vpop.f32.mrf.mxu0  ;;  %vm3922_vm9 = vcmp.eq.s32.totalorder %v11690_v56, %v19100_v57  ;;  %vm4707_vm10 = vcmp.eq.s32.totalorder %v11685_v54, %v19178_v40 }
 0x2dc   : > { %19162 = vst [vmem:[#allocation7_spill] sm:$0xff] %v15213_v22  ;;  %7179 = vrot.lane.b32.xlu1 %v2063_v21, %s11106_s26  ;;  %9382 = vmatprep.mubr.msk.f32.mxu0 %vm4699_vm11, %v18734_v53  ;;  %v15217_v30 = vpop.permute.xlu0 %6337  ;;  %v2688_v24 = vpop.f32.mrf.mxu1  ;;  %v19172_v22 = vld [vmem:[#allocation159_spill] sm:$0xff] }
 0x2dd   : > { %19163 = vst [vmem:[#allocation140_spill] sm:$0xff] %v15217_v30  ;;  %7269 = vrot.lane.b32.xlu0 %v19164_v43, %s11107_s27  ;;  %10661 = vmatpush3.msra.mxu1 %v15202_v50  ;;  %v3447_v49 = vpop.f32.mrf.mxu0  ;;  %v19171_v30 = vld [vmem:[#allocation158_spill] sm:$0xff] }
 0x2de   : > { %9221 = vmatmul.mubr.msk.f32.gmra.mxu1 %vm3909_vm12, %v18734_v53  ;;  %10724 = vmatprep.subr.mxu0 %v14682_v25  ;;  %v15232_v21 = vpop.f32.mrf.mxu1  ;;  %vm3921_vm12 = vcmp.eq.s32.totalorder %v11685_v54, %v19100_v57  ;;  %v19189_v57 = vld [vmem:[#allocation148_spill] sm:$0xff] }
 0x2df   : > { %9222 = vmatprep.mubr.msk.f32.mxu1 %vm3913_vm13, %v18734_v53  ;;  %9383 = vmatmul.mubr.msk.f32.gmra.mxu0 %vm4698_vm14, %v18734_v53  ;;  %v15238_v52 = vpop.f32.mrf.mxu0  ;;  %vm3925_vm13 = vcmp.eq.s32.totalorder %v11690_v56, %v19106_v4 }
 0x2e0   : > { %19168 = vst [vmem:[#allocation150_spill] sm:$0xff] %v15238_v52  ;;  %7183 = vrot.lane.b32.xlu1 %v2073_v2, %s11106_s26  ;;  %9384 = vmatprep.mubr.msk.f32.mxu0 %vm4702_vm15, %v18734_v53  ;;  %v15242_v0 = vpop.permute.xlu1 %6304  ;;  %v2693_v49 = vpop.f32.mrf.mxu1  ;;  %v2083_v52 = vadd.f32 %v19172_v22, %v19171_v30  ;;  %vm4714_vm15 = vcmp.eq.s32.totalorder %v11690_v56, %v19189_v57 }
 0x2e1   : > { %19169 = vst [vmem:[#allocation63_spill] sm:$0xff] %v15242_v0  ;;  %10725 = vmatpush3.msra.mxu0 %v14682_v25  ;;  %7273 = vrot.lane.b32.xlu0 %v14632_v47, %s11107_s27  ;;  %v15249_v24 = vpop.permute.xlu0 %6343  ;;  %v3452_v43 = vpop.f32.mrf.mxu0  ;;  %v15261_v47 = vld [vmem:[%s18254_s2 + $0x128] sm:$0xff] }
 0x2e2   : > { %19170 = vst [vmem:[#allocation46_spill] sm:$0xff] %v15249_v24  ;;  %9223 = vmatmul.mubr.msk.f32.gmra.mxu1 %vm3912_vm0, %v18734_v53  ;;  %10662 = vmatprep.subr.mxu1 %v15261_v47  ;;  %v15264_v25 = vpop.f32.mrf.mxu1  ;;  %v19176_v43 = vld [vmem:[#allocation162_spill] sm:$0xff]  ;;  %vm3924_vm0 = vcmp.eq.s32.totalorder %v11685_v54, %v19106_v4  ;;  %v19195_v4 = vld [vmem:[#allocation141_spill] sm:$0xff] }
 0x2e3   : > { %9224 = vmatprep.mubr.msk.f32.mxu1 %vm3916_vm1, %v18734_v53  ;;  %9385 = vmatmul.mubr.msk.f32.gmra.mxu0 %vm4701_vm2, %v18734_v53  ;;  %v15270_v2 = vpop.f32.mrf.mxu0  ;;  %v19177_v24 = vld [vmem:[#allocation102_spill] sm:$0xff]  ;;  %vm3928_vm1 = vcmp.eq.s32.totalorder %v11690_v56, %v19108_v32  ;;  %vm4713_vm2 = vcmp.eq.s32.totalorder %v11685_v54, %v19189_v57 }
 0x2e4   : > { %19174 = vst [vmem:[#allocation15_spill] sm:$0xff] %v15270_v2  ;;  %7187 = vrot.lane.b32.xlu1 %v2083_v52, %s11106_s26  ;;  %9386 = vmatprep.mubr.msk.f32.mxu0 %vm4705_vm3, %v18734_v53  ;;  %v2698_v22 = vpop.f32.mrf.mxu1  ;;  %v2767_v0 = vadd.f32 %v19177_v24, %v19176_v43  ;;  %v19181_v43 = vld [vmem:[#allocation165_spill] sm:$0xff]  ;;  %vm4717_vm3 = vcmp.eq.s32.totalorder %v11690_v56, %v19195_v4 }
 0x2e5   : > { %7277 = vrot.lane.b32.xlu0 %v14700_v46, %s11107_s27  ;;  %10663 = vmatpush3.msra.mxu1 %v15261_v47  ;;  %v15279_v30 = vpop.permute.xlu1 %6310  ;;  %v3457_v49 = vpop.f32.mrf.mxu0  ;;  %v19188_v2 = vld [vmem:[#allocation53_spill] sm:$0xff] }
 0x2e6   : > { %19175 = vst [vmem:[#allocation143_spill] sm:$0xff] %v15279_v30  ;;  %9225 = vmatmul.mubr.msk.f32.gmra.mxu1 %vm3915_vm4, %v18734_v53  ;;  %10726 = vmatprep.subr.mxu0 %v14750_v51  ;;  %v15289_v46 = vpop.f32.mrf.mxu1  ;;  %v19182_v30 = vld [vmem:[#allocation163_spill] sm:$0xff]  ;;  %vm3927_vm4 = vcmp.eq.s32.totalorder %v11685_v54, %v19108_v32  ;;  %v19198_v32 = vld [vmem:[#allocation24_spill] sm:$0xff] }
 0x2e7   : > { %9226 = vmatprep.mubr.msk.f32.mxu1 %vm3919_vm5, %v18734_v53  ;;  %9387 = vmatmul.mubr.msk.f32.gmra.mxu0 %vm4704_vm6, %v18734_v53  ;;  %v15295_v52 = vpop.permute.xlu0 %6349  ;;  %v15297_v24 = vpop.f32.mrf.mxu0  ;;  %vm3931_vm5 = vcmp.eq.s32.totalorder %v11690_v56, %v19114_v42  ;;  %vm4716_vm6 = vcmp.eq.s32.totalorder %v11685_v54, %v19195_v4 }
 0x2e8   : > { %19179 = vst [vmem:[#allocation152_spill] sm:$0xff] %v15295_v52  ;;  %19180 = vst [vmem:[#allocation5_spill] sm:$0xff] %v15297_v24  ;;  %7255 = vrot.lane.b32.xlu1 %v2767_v0, %s11107_s27  ;;  %9388 = vmatprep.mubr.msk.f32.mxu0 %vm4708_vm7, %v18734_v53  ;;  %v15301_v22 = vpop.f32.mrf.mxu1  ;;  %v2777_v52 = vadd.f32 %v19182_v30, %v19181_v43  ;;  %vm4720_vm7 = vcmp.eq.s32.totalorder %v11690_v56, %v19198_v32 }
 0x2e9   : > { %10727 = vmatpush3.msra.mxu0 %v14750_v51  ;;  %7281 = vrot.lane.b32.xlu0 %v14772_v12, %s11107_s27  ;;  %v3462_v49 = vpop.f32.mrf.mxu0  ;;  %v15318_v51 = vld [vmem:[%s18254_s2 + $0x120] sm:$0xff] }
 0x2ea   : > { %9227 = vmatmul.mubr.msk.f32.gmra.mxu1 %vm3918_vm8, %v18734_v53  ;;  %10664 = vmatprep.subr.mxu1 %v15318_v51  ;;  %v19183_v12 = vld [vmem:[#allocation138_spill] sm:$0xff]  ;;  %vm3930_vm8 = vcmp.eq.s32.totalorder %v11685_v54, %v19114_v42 }
 0x2eb   : > { %9228 = vmatprep.mubr.msk.f32.mxu1 %vm3922_vm9, %v18734_v53  ;;  %9389 = vmatmul.mubr.msk.f32.gmra.mxu0 %vm4707_vm10, %v18734_v53  ;;  %vm4711_vm11 = vcmp.eq.s32.totalorder %v11690_v56, %v19183_v12  ;;  %v15325_v28 = vpop.permute.xlu1 %6316  ;;  %v15327_v0 = vpop.f32.mrf.mxu1  ;;  %vm4710_vm14 = vcmp.eq.s32.totalorder %v11685_v54, %v19183_v12  ;;  %vm3934_vm9 = vcmp.eq.s32.totalorder %v11690_v56, %v19115_v11  ;;  %v19202_v42 = vld [vmem:[#allocation62_spill] sm:$0xff] }
 0x2ec   : > { %19184 = vst [vmem:[#allocation107_spill] sm:$0xff] %v15325_v28  ;;  %7259 = vrot.lane.b32.xlu1 %v2777_v52, %s11107_s27  ;;  %9390 = vmatprep.mubr.msk.f32.mxu0 %vm4711_vm11, %v18734_v53  ;;  %v15331_v30 = vpop.permute.xlu0 %6355  ;;  %v15333_v49 = vpop.f32.mrf.mxu0  ;;  %v19187_v28 = vld [vmem:[#allocation170_spill] sm:$0xff]  ;;  %vm4719_vm10 = vcmp.eq.s32.totalorder %v11685_v54, %v19198_v32 }
 0x2ed   : > { %19185 = vst [vmem:[#allocation99_spill] sm:$0xff] %v15331_v30  ;;  %19186 = vst [vmem:[#allocation155_spill] sm:$0xff] %v15333_v49  ;;  %7285 = vrot.lane.b32.xlu0 %v14836_v13, %s11107_s27  ;;  %10665 = vmatpush3.msra.mxu1 %v15318_v51  ;;  %v15340_v43 = vpop.f32.mrf.mxu1  ;;  %v2787_v24 = vadd.f32 %v19188_v2, %v19187_v28  ;;  %v19193_v30 = vld [vmem:[#allocation14_spill] sm:$0xff] }
 0x2ee   : > { %9229 = vmatmul.mubr.msk.f32.gmra.mxu1 %vm3921_vm12, %v18734_v53  ;;  %10728 = vmatprep.subr.mxu0 %v14822_v23  ;;  %v3467_v13 = vpop.f32.mrf.mxu0  ;;  %vm3933_vm12 = vcmp.eq.s32.totalorder %v11685_v54, %v19115_v11 }
 0x2ef   : > { %9230 = vmatprep.mubr.msk.f32.mxu1 %vm3925_vm13, %v18734_v53  ;;  %9391 = vmatmul.mubr.msk.f32.gmra.mxu0 %vm4710_vm14, %v18734_v53  ;;  %v19192_v13 = vld [vmem:[#allocation176_spill] sm:$0xff]  ;;  %vm3937_vm13 = vcmp.eq.s32.totalorder %v11690_v56, %v19120_v62 }
 0x2f0   : > { %7263 = vrot.lane.b32.xlu1 %v2787_v24, %s11107_s27  ;;  %9392 = vmatprep.mubr.msk.f32.mxu0 %vm4714_vm15, %v18734_v53  ;;  %v15356_v2 = vpop.permute.xlu1 %6322  ;;  %v15363_v52 = vpop.f32.mrf.mxu1  ;;  %v2797_v49 = vadd.f32 %v19193_v30, %v19192_v13  ;;  %v19196_v13 = vld [vmem:[#allocation179_spill] sm:$0xff] }
 0x2f1   : > { %19190 = vst [vmem:[#allocation26_spill] sm:$0xff] %v15356_v2  ;;  %10729 = vmatpush3.msra.mxu0 %v14822_v23  ;;  %7289 = vrot.lane.b32.xlu0 %v14887_v16, %s11107_s27  ;;  %v15365_v28 = vpop.f32.mrf.mxu0  ;;  %v15377_v23 = vld [vmem:[%s18254_s2 + $0x118] sm:$0xff]  ;;  %v15380_v16 = vpop.permute.xlu0 %7129 }
 0x2f2   : > { %19191 = vst [vmem:[#allocation21_spill] sm:$0xff] %v15365_v28  ;;  %9231 = vmatmul.mubr.msk.f32.gmra.mxu1 %vm3924_vm0, %v18734_v53  ;;  %10666 = vmatprep.subr.mxu1 %v15377_v23  ;;  %19194 = vst [vmem:[#allocation153_spill] sm:$0xff] %v15380_v16  ;;  %v15386_v24 = vpop.f32.mrf.mxu1  ;;  %v19197_v16 = vld [vmem:[#allocation169_spill] sm:$0xff]  ;;  %vm3936_vm0 = vcmp.eq.s32.totalorder %v11685_v54, %v19120_v62 }
 0x2f3   : > { %9232 = vmatprep.mubr.msk.f32.mxu1 %vm3928_vm1, %v18734_v53  ;;  %9393 = vmatmul.mubr.msk.f32.gmra.mxu0 %vm4713_vm2, %v18734_v53  ;;  %v3472_v30 = vpop.f32.mrf.mxu0  ;;  %v2807_v2 = vadd.f32 %v19197_v16, %v19196_v13  ;;  %vm3940_vm1 = vcmp.eq.s32.totalorder %v11690_v56, %v19121_v9 }
 0x2f4   : > { %7267 = vrot.lane.b32.xlu1 %v2797_v49, %s11107_s27  ;;  %9394 = vmatprep.mubr.msk.f32.mxu0 %vm4717_vm3, %v18734_v53 }
 0x2f5   : > { %7293 = vrot.lane.b32.xlu0 %v14950_v61, %s11107_s27  ;;  %10667 = vmatpush3.msra.mxu1 %v15377_v23  ;;  %v2872_v61 = vadd.f32 %v14638_v26, %v14995_v45  ;;  %v15417_v13 = vpop.permute.xlu0 %7133  ;;  %v19201_v45 = vld [vmem:[#allocation171_spill] sm:$0xff] }
 0x2f6   : > { %9233 = vmatmul.mubr.msk.f32.gmra.mxu1 %vm3927_vm4, %v18734_v53  ;;  %10730 = vmatprep.subr.mxu0 %v14893_v19  ;;  %v15403_v49 = vpop.f32.mrf.mxu1  ;;  %v15411_v16 = vpop.permute.xlu1 %6328  ;;  %19200 = vst [vmem:[#allocation98_spill] sm:$0xff] %v15417_v13  ;;  %vm3939_vm4 = vcmp.eq.s32.totalorder %v11685_v54, %v19121_v9  ;;  %v19214_v9 = vld [vmem:[#allocation42_spill] sm:$0xff] }
 0x2f7   : > { %9234 = vmatprep.mubr.msk.f32.mxu1 %vm3931_vm5, %v18734_v53  ;;  %9395 = vmatmul.mubr.msk.f32.gmra.mxu0 %vm4716_vm6, %v18734_v53  ;;  %19199 = vst [vmem:[#allocation156_spill] sm:$0xff] %v15411_v16  ;;  %v15413_v30 = vpop.f32.mrf.mxu0  ;;  %v2817_v16 = vadd.f32 %v19201_v45, %v14657_v38  ;;  %v19203_v38 = vld [vmem:[#allocation33_spill] sm:$0xff]  ;;  %vm3943_vm5 = vcmp.eq.s32.totalorder %v11690_v56, %v19128_v5 }
 0x2f8   : > { %7271 = vrot.lane.b32.xlu1 %v2807_v2, %s11107_s27  ;;  %9396 = vmatprep.mubr.msk.f32.mxu0 %vm4720_vm7, %v18734_v53  ;;  %v15419_v28 = vpop.f32.mrf.mxu1  ;;  %v2882_v2 = vadd.f32 %v19202_v42, %v15047_v34  ;;  %vm4723_vm11 = vcmp.eq.s32.totalorder %v11690_v56, %v19203_v38  ;;  %v19205_v42 = vld [vmem:[#allocation175_spill] sm:$0xff]  ;;  %vm4722_vm14 = vcmp.eq.s32.totalorder %v11685_v54, %v19203_v38 }
 0x2f9   : > { %10731 = vmatpush3.msra.mxu0 %v14893_v19  ;;  %7297 = vrot.lane.b32.xlu0 %v2872_v61, %s11107_s27  ;;  %v3477_v26 = vpop.f32.mrf.mxu0  ;;  %v15435_v19 = vld [vmem:[%s18254_s2 + $0x110] sm:$0xff]  ;;  %v2827_v13 = vadd.f32 %v19205_v42, %v14725_v58  ;;  %v15466_v11 = vpop.permute.xlu0 %7137  ;;  %v19207_v58 = vld [vmem:[#allocation51_spill] sm:$0xff]  ;;  %v19208_v42 = vld [vmem:[#allocation186_spill] sm:$0xff]  ;;  %vm4732_vm7 = vcmp.eq.s32.totalorder %v11690_v56, %v19214_v9 }
 0x2fa   : > { %9235 = vmatmul.mubr.msk.f32.gmra.mxu1 %vm3930_vm8, %v18734_v53  ;;  %10668 = vmatprep.subr.mxu1 %v15435_v19  ;;  %19206 = vst [vmem:[#allocation159_spill] sm:$0xff] %v15466_v11  ;;  %vm4726_vm15 = vcmp.eq.s32.totalorder %v11690_v56, %v19207_v58  ;;  %vm4725_vm2 = vcmp.eq.s32.totalorder %v11685_v54, %v19207_v58 }
 0x2fb   : > { %9236 = vmatprep.mubr.msk.f32.mxu1 %vm3934_vm9, %v18734_v53  ;;  %9397 = vmatmul.mubr.msk.f32.gmra.mxu0 %vm4719_vm10, %v18734_v53  ;;  %v15444_v61 = vpop.f32.mrf.mxu1  ;;  %vm3942_vm8 = vcmp.eq.s32.totalorder %v11685_v54, %v19128_v5  ;;  %vm3946_vm9 = vcmp.eq.s32.totalorder %v11690_v56, %v19130_v3  ;;  %vm4731_vm10 = vcmp.eq.s32.totalorder %v11685_v54, %v19214_v9  ;;  %v19218_v5 = vld [vmem:[#allocation146_spill] sm:$0xff] }
 0x2fc   : > { %7275 = vrot.lane.b32.xlu1 %v2817_v16, %s11107_s27  ;;  %9398 = vmatprep.mubr.msk.f32.mxu0 %vm4723_vm11, %v18734_v53  ;;  %v15448_v26 = vpop.f32.mrf.mxu0  ;;  %vm4735_vm11 = vcmp.eq.s32.totalorder %v11690_v56, %v19218_v5 }
 0x2fd   : > { %7301 = vrot.lane.b32.xlu0 %v2882_v2, %s11107_s27  ;;  %10669 = vmatpush3.msra.mxu1 %v15435_v19  ;;  %v15454_v34 = vpop.permute.xlu1 %6334  ;;  %v15456_v45 = vpop.f32.mrf.mxu1  ;;  %v2892_v2 = vadd.f32 %v14708_v27, %v15091_v17  ;;  %v19209_v17 = vld [vmem:[#allocation177_spill] sm:$0xff] }
 0x2fe   : > { %19204 = vst [vmem:[#allocation158_spill] sm:$0xff] %v15454_v34  ;;  %9237 = vmatmul.mubr.msk.f32.gmra.mxu1 %vm3933_vm12, %v18734_v53  ;;  %10732 = vmatprep.subr.mxu0 %v14961_v33  ;;  %v3482_v16 = vpop.f32.mrf.mxu0  ;;  %v2837_v11 = vadd.f32 %v19209_v17, %v14795_v20  ;;  %v19211_v20 = vld [vmem:[#allocation144_spill] sm:$0xff]  ;;  %v19213_v17 = vld [vmem:[#allocation3_spill] sm:$0xff]  ;;  %vm3945_vm12 = vcmp.eq.s32.totalorder %v11685_v54, %v19130_v3  ;;  %v19241_v34 = vld [vmem:[#allocation45_spill] sm:$0xff] }
 0x2ff   : > { %9238 = vmatprep.mubr.msk.f32.mxu1 %vm3937_vm13, %v18734_v53  ;;  %9399 = vmatmul.mubr.msk.f32.gmra.mxu0 %vm4722_vm14, %v18734_v53  ;;  %v2902_v16 = vadd.f32 %v19208_v42, %v15145_v7  ;;  %vm4729_vm3 = vcmp.eq.s32.totalorder %v11690_v56, %v19211_v20  ;;  %vm4728_vm6 = vcmp.eq.s32.totalorder %v11685_v54, %v19211_v20 }
 0x300   : > { %7279 = vrot.lane.b32.xlu1 %v2827_v13, %s11107_s27  ;;  %9400 = vmatprep.mubr.msk.f32.mxu0 %vm4726_vm15, %v18734_v53  ;;  %vm3949_vm13 = vcmp.eq.s32.totalorder %v11690_v56, %v19137_v31  ;;  %vm4734_vm14 = vcmp.eq.s32.totalorder %v11685_v54, %v19218_v5 }
 0x301   : > { %10733 = vmatpush3.msra.mxu0 %v14961_v33  ;;  %7305 = vrot.lane.b32.xlu0 %v2892_v2, %s11107_s27  ;;  %v15482_v27 = vpop.f32.mrf.mxu1  ;;  %v15494_v33 = vld [vmem:[%s18254_s2 + $0x108] sm:$0xff]  ;;  %v15509_v2 = vpop.permute.xlu0 %7141 }
 0x302   : > { %9239 = vmatmul.mubr.msk.f32.gmra.mxu1 %vm3936_vm0, %v18734_v53  ;;  %10670 = vmatprep.subr.mxu1 %v15494_v33  ;;  %v15497_v62 = vpop.permute.xlu1 %6340  ;;  %v15499_v7 = vpop.f32.mrf.mxu0  ;;  %19212 = vst [vmem:[#allocation162_spill] sm:$0xff] %v15509_v2  ;;  %vm3948_vm0 = vcmp.eq.s32.totalorder %v11685_v54, %v19137_v31 }
 0x303   : > { %19210 = vst [vmem:[#allocation134_spill] sm:$0xff] %v15497_v62  ;;  %9240 = vmatprep.mubr.msk.f32.mxu1 %vm3940_vm1, %v18734_v53  ;;  %9401 = vmatmul.mubr.msk.f32.gmra.mxu0 %vm4725_vm2, %v18734_v53  ;;  %v15505_v13 = vpop.f32.mrf.mxu1  ;;  %v2847_v62 = vadd.f32 %v19213_v17, %v14859_v37  ;;  %vm4691_vm2 = vcmp.eq.s32.totalorder %v18663_v18, %v19138_v36 }
 0x304   : > { %7283 = vrot.lane.b32.xlu1 %v2837_v11, %s11107_s27  ;;  %9402 = vmatprep.mubr.msk.f32.mxu0 %vm4729_vm3, %v18734_v53  ;;  %v3487_v42 = vpop.f32.mrf.mxu0  ;;  %v2912_v11 = vadd.f32 %v14778_v8, %v15207_v14  ;;  %v15545_v8 = vld [vmem:[%s18254_s2 + $0x100] sm:$0xff] }
 0x305   : > { %7309 = vrot.lane.b32.xlu0 %v2902_v16, %s11107_s27  ;;  %10671 = vmatpush3.msra.mxu1 %v15494_v33 }
 0x306   : > { %9241 = vmatmul.mubr.msk.f32.gmra.mxu1 %vm3939_vm4, %v18734_v53  ;;  %10734 = vmatprep.subr.mxu0 %v15030_v60  ;;  %v15525_v16 = vpop.f32.mrf.mxu1  ;;  %vm4694_vm4 = vcmp.eq.s32.totalorder %v18663_v18, %v19146_v29  ;;  %v19228_v29 = vld [vmem:[#allocation2_spill] sm:$0xff] }
 0x307   : > { %9242 = vmatprep.mubr.msk.f32.mxu1 %vm3943_vm5, %v18734_v53  ;;  %9403 = vmatmul.mubr.msk.f32.gmra.mxu0 %vm4728_vm6, %v18734_v53  ;;  %v15531_v37 = vpop.f32.mrf.mxu0 }
 0x308   : > { %7287 = vrot.lane.b32.xlu1 %v2847_v62, %s11107_s27  ;;  %9404 = vmatprep.mubr.msk.f32.mxu0 %vm4732_vm7, %v18734_v53  ;;  %v15535_v42 = vpop.permute.xlu1 %6346  ;;  %v15537_v17 = vpop.f32.mrf.mxu1  ;;  %v19216_v62 = vld [vmem:[#allocation183_spill] sm:$0xff] }
 0x309   : > { %19215 = vst [vmem:[#allocation102_spill] sm:$0xff] %v15535_v42  ;;  %10735 = vmatpush3.msra.mxu0 %v15030_v60  ;;  %10672 = vmatprep.subr.mxu1 %v15545_v8  ;;  %v3492_v14 = vpop.f32.mrf.mxu0  ;;  %v2857_v2 = vadd.f32 %v19216_v62, %v14912_v59  ;;  %v15556_v60 = vpop.permute.xlu0 %7145 }
 0x30a   : > { %9243 = vmatmul.mubr.msk.f32.gmra.mxu1 %vm3942_vm8, %v18734_v53  ;;  %7313 = vrot.lane.b32.xlu0 %v2912_v11, %s11107_s27  ;;  %19217 = vst [vmem:[#allocation145_spill] sm:$0xff] %v15556_v60  ;;  %v2922_v11 = vadd.f32 %v14813_v6, %v15264_v25  ;;  %v19221_v6 = vld [vmem:[#allocation32_spill] sm:$0xff]  ;;  %vm4700_vm8 = vcmp.eq.s32.totalorder %v18663_v18, %v19161_v15 }
 0x30b   : > { %9244 = vmatprep.mubr.msk.f32.mxu1 %vm3946_vm9, %v18734_v53  ;;  %9405 = vmatmul.mubr.msk.f32.gmra.mxu0 %vm4731_vm10, %v18734_v53  ;;  %vm4738_vm15 = vcmp.eq.s32.totalorder %v11690_v56, %v19221_v6  ;;  %vm4737_vm1 = vcmp.eq.s32.totalorder %v11685_v54, %v19221_v6  ;;  %vm4703_vm10 = vcmp.eq.s32.totalorder %v18663_v18, %v19167_v63 }
 0x30c   : > { %7291 = vrot.lane.b32.xlu1 %v2857_v2, %s11107_s27  ;;  %9406 = vmatprep.mubr.msk.f32.mxu0 %vm4735_vm11, %v18734_v53  ;;  %v15564_v59 = vpop.f32.mrf.mxu1  ;;  %v19220_v2 = vld [vmem:[#allocation89_spill] sm:$0xff] }
 0x30d   : > { %10673 = vmatpush3.msra.mxu1 %v15545_v8  ;;  %10736 = vmatprep.subr.mxu0 %v15097_v55  ;;  %v15572_v14 = vpop.permute.xlu1 %6352  ;;  %v15574_v62 = vpop.f32.mrf.mxu0  ;;  %v2867_v60 = vadd.f32 %v19220_v2, %v14972_v44 }
 0x30e   : > { %19219 = vst [vmem:[#allocation165_spill] sm:$0xff] %v15572_v14  ;;  %9245 = vmatmul.mubr.msk.f32.gmra.mxu1 %vm3945_vm12, %v18734_v53  ;;  %10737 = vmatpush3.msra.mxu0 %v15097_v55  ;;  %v15584_v3 = vpop.f32.mrf.mxu1  ;;  %v15592_v25 = vpop.permute.xlu0 %7149  ;;  %v3606_v55 = vadd.f32 %v15289_v46, %v14879_v48  ;;  %v19225_v48 = vld [vmem:[#allocation149_spill] sm:$0xff]  ;;  %vm4706_vm12 = vcmp.eq.s32.totalorder %v18663_v18, %v19173_v35 }
 0x30f   : > { %9246 = vmatprep.mubr.msk.f32.mxu1 %vm3949_vm13, %v18734_v53  ;;  %9407 = vmatmul.mubr.msk.f32.gmra.mxu0 %vm4734_vm14, %v18734_v53  ;;  %v3497_v44 = vpop.f32.mrf.mxu0  ;;  %19222 = vst [vmem:[#allocation163_spill] sm:$0xff] %v15592_v25  ;;  %vm4741_vm3 = vcmp.eq.s32.totalorder %v11690_v56, %v19225_v48  ;;  %vm4740_vm5 = vcmp.eq.s32.totalorder %v11685_v54, %v19225_v48  ;;  %v15721_v35 = vld [vmem:[%s18254_s2 + $0x58] sm:$0xff] }
 0x310   : > { %7295 = vrot.lane.b32.xlu1 %v2867_v60, %s11107_s27  ;;  %9408 = vmatprep.mubr.msk.f32.mxu0 %vm4738_vm15, %v18734_v53  ;;  %v19224_v60 = vld [vmem:[#allocation132_spill] sm:$0xff]  ;;  %vm4709_vm14 = vcmp.eq.s32.totalorder %v18663_v18, %v19178_v40 }
 0x311   : > { %5811 = vmatprep.subr.mxu1 %v18592_v1  ;;  %7317 = vrot.lane.b32.xlu0 %v2922_v11, %s11107_s27  ;;  %v15600_v2 = vpop.permute.xlu1 %7127  ;;  %v15602_v14 = vpop.f32.mrf.mxu1  ;;  %v2877_v44 = vadd.f32 %v19224_v60, %v15017_v39  ;;  %v3616_v11 = vadd.f32 %v15327_v0, %v14927_v41  ;;  %v19231_v0 = vld [vmem:[#allocation6_spill] sm:$0xff]  ;;  %v15744_v40 = vld [vmem:[%s18254_s2 + $0x50] sm:$0xff] }
 0x312   : > { %19223 = vst [vmem:[#allocation138_spill] sm:$0xff] %v15600_v2  ;;  %9247 = vmatmul.mubr.msk.f32.gmra.mxu1 %vm3948_vm0, %v18734_v53  ;;  %10738 = vmatprep.subr.mxu0 %v15161_v10  ;;  %v15612_v31 = vpop.f32.mrf.mxu0  ;;  %v15634_v60 = vpop.permute.xlu0 %7153  ;;  %vm4744_vm7 = vcmp.eq.s32.totalorder %v11690_v56, %v19231_v0  ;;  %vm4743_vm9 = vcmp.eq.s32.totalorder %v11685_v54, %v19231_v0  ;;  %v15679_v2 = vld [vmem:[%s18254_s2 + $0x68] sm:$0xff]  ;;  %19247 = vst [vmem:[#allocation62_spill] sm:$0xff] %v15744_v40 }
 0x313   : > { %9409 = vmatmul.mubr.msk.f32.gmra.mxu0 %vm4737_vm1, %v18734_v53  ;;  %10674 = vmatprep.mubr.msk.f32.mxu1 %vm4691_vm2, %v18734_v53  ;;  %v15618_v39 = vpop.f32.mrf.mxu1  ;;  %19227 = vst [vmem:[#allocation53_spill] sm:$0xff] %v15634_v60  ;;  %19236 = vst [vmem:[#allocation14_spill] sm:$0xff] %v15679_v2  ;;  %vm4712_vm0 = vcmp.eq.s32.totalorder %v18663_v18, %v19183_v12  ;;  %v15765_v12 = vld [vmem:[%s18254_s2 + $0x48] sm:$0xff]  ;;  %vm4715_vm2 = vcmp.eq.s32.totalorder %v18663_v18, %v19189_v57  ;;  %v15786_v57 = vld [vmem:[%s18254_s2 + $0x40] sm:$0xff] }
 0x314   : > { %7299 = vrot.lane.b32.xlu1 %v2877_v44, %s11107_s27  ;;  %9410 = vmatprep.mubr.msk.f32.mxu0 %vm4741_vm3, %v18734_v53  ;;  %v3502_v46 = vpop.f32.mrf.mxu0  ;;  %v19229_v44 = vld [vmem:[#allocation133_spill] sm:$0xff]  ;;  %19253 = vst [vmem:[#allocation51_spill] sm:$0xff] %v15786_v57 }
 0x315   : > { %10739 = vmatpush3.msra.mxu0 %v15161_v10  ;;  %7385 = vrot.lane.b32.xlu0 %v3606_v55, %s11108_s18  ;;  %v15626_v36 = vpop.permute.xlu1 %7131  ;;  %v2887_v10 = vadd.f32 %v19229_v44, %v19228_v29  ;;  %v15641_v55 = vld [vmem:[%s18254_s2 + $0x78] sm:$0xff]  ;;  %v19230_v46 = vld [vmem:[#allocation142_spill] sm:$0xff] }
 0x316   : > { %19226 = vst [vmem:[#allocation170_spill] sm:$0xff] %v15626_v36  ;;  %10675 = vmatmul.mubr.msk.f32.vlgmr.msra.gmra.mxu1 %vm4694_vm4, %v18734_v53  ;;  %10740 = vmatprep.subr.mxu0 %v15202_v50  ;;  %vm4697_vm6 = vcmp.eq.s32.totalorder %v18663_v18, %v19230_v46  ;;  %v15664_v46 = vld [vmem:[%s18254_s2 + $0x70] sm:$0xff]  ;;  %v15685_v15 = vpop.permute.xlu0 %7157  ;;  %vm4718_vm4 = vcmp.eq.s32.totalorder %v18663_v18, %v19195_v4 }
 0x317   : > { %5812 = vmatpush1.msra.mxu1 %v15641_v55  ;;  %9411 = vmatmul.mubr.msk.f32.gmra.mxu0 %vm4740_vm5, %v18734_v53  ;;  %v15647_v41 = vpop.f32.mrf.mxu1  ;;  %19237 = vst [vmem:[#allocation141_spill] sm:$0xff] %v15685_v15  ;;  %v15704_v15 = vld [vmem:[%s18254_s2 + $0x60] sm:$0xff] }
 0x318   : > { %10677 = vmatprep.mubr.msk.f32.mxu1 %vm4697_vm6, %v18734_v53  ;;  %5813 = vmatprep.subr.mxu1 %v18592_v1  ;;  %v15653_v29 = vpop.f32.mrf.mxu0  ;;  %vm4721_vm6 = vcmp.eq.s32.totalorder %v18663_v18, %v19198_v32  ;;  %v15825_v32 = vld [vmem:[%s18254_s2 + $0x30] sm:$0xff] }
 0x319   : > { %19232 = vst [vmem:[#allocation148_spill] sm:$0xff] %v15653_v29  ;;  %7303 = vrot.lane.b32.xlu1 %v2887_v10, %s11107_s27  ;;  %9412 = vmatprep.mubr.msk.f32.mxu0 %vm4744_vm7, %v18734_v53  ;;  %v15657_v44 = vpop.permute.xlu1 %7135  ;;  %v15659_v60 = vpop.f32.mrf.mxu1  ;;  %v19234_v10 = vld [vmem:[#allocation131_spill] sm:$0xff]  ;;  %19259 = vst [vmem:[#allocation144_spill] sm:$0xff] %v15825_v32 }
 0x31a   : > { %19233 = vst [vmem:[#allocation176_spill] sm:$0xff] %v15657_v44  ;;  %5814 = vmatpush1.msra.mxu1 %v15664_v46  ;;  %7389 = vrot.lane.b32.xlu0 %v3616_v11, %s11108_s18  ;;  %v3507_v25 = vpop.f32.mrf.mxu0  ;;  %v19235_v44 = vld [vmem:[#allocation187_spill] sm:$0xff] }
 0x31b   : > { %5815 = vmatprep.subr.mxu1 %v18592_v1  ;;  %10678 = vmatmul.mubr.msk.f32.gmra.mxu1 %vm4700_vm8, %v18734_v53  ;;  %v2897_v36 = vadd.f32 %v19235_v44, %v19234_v10  ;;  %v19238_v11 = vld [vmem:[#allocation151_spill] sm:$0xff]  ;;  %vm4724_vm8 = vcmp.eq.s32.totalorder %v18663_v18, %v19203_v38 }
 0x31c   : > { %5816 = vmatpush1.msra.mxu1 %v15679_v2  ;;  %9413 = vmatmul.mubr.msk.f32.gmra.mxu0 %vm4743_vm9, %v18734_v53  ;;  %v15687_v25 = vpop.f32.mrf.mxu1  ;;  %vm4747_vm11 = vcmp.eq.s32.totalorder %v11690_v56, %v19238_v11  ;;  %vm4746_vm13 = vcmp.eq.s32.totalorder %v11685_v54, %v19238_v11  ;;  %v19242_v29 = vld [vmem:[#allocation115_spill] sm:$0xff] }
 0x31d   : > { %10680 = vmatprep.mubr.msk.f32.mxu1 %vm4703_vm10, %v18734_v53  ;;  %5817 = vmatprep.subr.mxu1 %v18592_v1  ;;  %v15693_v44 = vpop.permute.xlu1 %7139  ;;  %v15695_v10 = vpop.f32.mrf.mxu0  ;;  %v2907_v2 = vadd.f32 %v19242_v29, %v19241_v34  ;;  %v15851_v38 = vld [vmem:[%s18254_s2 + $0x28] sm:$0xff]  ;;  %vm4727_vm10 = vcmp.eq.s32.totalorder %v18663_v18, %v19207_v58 }
 0x31e   : > { %19239 = vst [vmem:[#allocation179_spill] sm:$0xff] %v15693_v44  ;;  %7307 = vrot.lane.b32.xlu1 %v2897_v36, %s11107_s27  ;;  %9414 = vmatprep.mubr.msk.f32.mxu0 %vm4747_vm11, %v18734_v53  ;;  %v15699_v63 = vpop.f32.mrf.mxu1  ;;  %v19240_v36 = vld [vmem:[#allocation87_spill] sm:$0xff]  ;;  %v15733_v34 = vpop.permute.xlu0 %7161 }
 0x31f   : > { %5818 = vmatpush1.msra.mxu1 %v15704_v15  ;;  %10741 = vmatpush3.msra.mxu0 %v15202_v50  ;;  %v3512_v44 = vpop.f32.mrf.mxu0  ;;  %v3626_v42 = vadd.f32 %v15363_v52, %v19240_v36  ;;  %v19244_v52 = vld [vmem:[#allocation52_spill] sm:$0xff]  ;;  %19245 = vst [vmem:[#allocation24_spill] sm:$0xff] %v15733_v34 }
 0x320   : > { %5819 = vmatprep.subr.mxu1 %v18592_v1  ;;  %10681 = vmatmul.mubr.msk.f32.gmra.mxu1 %vm4706_vm12, %v18734_v53  ;;  %vm4750_vm15 = vcmp.eq.s32.totalorder %v11690_v56, %v19244_v52  ;;  %vm4749_vm1 = vcmp.eq.s32.totalorder %v11685_v54, %v19244_v52  ;;  %vm4730_vm12 = vcmp.eq.s32.totalorder %v18663_v18, %v19211_v20 }
 0x321   : > { %5820 = vmatpush1.msra.mxu1 %v15721_v35  ;;  %9415 = vmatmul.mubr.msk.f32.gmra.mxu0 %vm4746_vm13, %v18734_v53  ;;  %v15727_v50 = vpop.permute.xlu1 %7143 }
 0x322   : > { %19243 = vst [vmem:[#allocation169_spill] sm:$0xff] %v15727_v50  ;;  %10683 = vmatprep.mubr.msk.f32.mxu1 %vm4709_vm14, %v18734_v53  ;;  %5821 = vmatprep.subr.mxu1 %v18592_v1  ;;  %v15735_v29 = vpop.f32.mrf.mxu1  ;;  %vm4733_vm14 = vcmp.eq.s32.totalorder %v18663_v18, %v19214_v9  ;;  %v15911_v9 = vld [vmem:[%s18254_s2 + $0x10] sm:$0xff] }
 0x323   : > { %7311 = vrot.lane.b32.xlu1 %v2907_v2, %s11107_s27  ;;  %9416 = vmatprep.mubr.msk.f32.mxu0 %vm4750_vm15, %v18734_v53  ;;  %v15739_v44 = vpop.f32.mrf.mxu0  ;;  %v19248_v2 = vld [vmem:[#allocation31_spill] sm:$0xff]  ;;  %19272 = vst [vmem:[#allocation132_spill] sm:$0xff] %v15911_v9 }
 0x324   : > { %19246 = vst [vmem:[#allocation171_spill] sm:$0xff] %v15739_v44  ;;  %5822 = vmatpush1.msra.mxu1 %v15744_v40  ;;  %7393 = vrot.lane.b32.xlu0 %v3626_v42, %s11108_s18  ;;  %v15750_v36 = vpop.f32.mrf.mxu1  ;;  %v3636_v34 = vadd.f32 %v15403_v49, %v19248_v2  ;;  %v19250_v42 = vld [vmem:[#allocation41_spill] sm:$0xff]  ;;  %v19251_v49 = vld [vmem:[#allocation154_spill] sm:$0xff] }
 0x325   : > { %5823 = vmatprep.subr.mxu1 %v18592_v1  ;;  %10684 = vmatmul.mubr.msk.f32.gmra.mxu1 %vm4712_vm0, %v18734_v53  ;;  %v15758_v50 = vpop.permute.xlu1 %7147  ;;  %v3517_v40 = vpop.f32.mrf.mxu0  ;;  %v2917_v44 = vadd.f32 %v19250_v42, %v15232_v21  ;;  %vm4753_vm3 = vcmp.eq.s32.totalorder %v11690_v56, %v19251_v49  ;;  %vm4752_vm5 = vcmp.eq.s32.totalorder %v11685_v54, %v19251_v49 }
 0x326   : > { %19249 = vst [vmem:[#allocation33_spill] sm:$0xff] %v15758_v50  ;;  %5824 = vmatpush1.msra.mxu1 %v15765_v12  ;;  %9417 = vmatmul.mubr.msk.f32.gmra.mxu0 %vm4749_vm1, %v18734_v53  ;;  %v15779_v40 = vpop.permute.xlu0 %7165  ;;  %vm4736_vm0 = vcmp.eq.s32.totalorder %v18663_v18, %v19218_v5 }
 0x327   : > { %10686 = vmatprep.mubr.msk.f32.mxu1 %vm4715_vm2, %v18734_v53  ;;  %5825 = vmatprep.subr.mxu1 %v18592_v1  ;;  %v15775_v21 = vpop.f32.mrf.mxu1  ;;  %19252 = vst [vmem:[#allocation175_spill] sm:$0xff] %v15779_v40  ;;  %v19254_v40 = vld [vmem:[#allocation64_spill] sm:$0xff]  ;;  %vm4739_vm2 = vcmp.eq.s32.totalorder %v18663_v18, %v19221_v6 }
 0x328   : > { %7315 = vrot.lane.b32.xlu1 %v2917_v44, %s11107_s27  ;;  %9418 = vmatprep.mubr.msk.f32.mxu0 %vm4753_vm3, %v18734_v53  ;;  %v15781_v2 = vpop.f32.mrf.mxu0  ;;  %v3601_v50 = vadd.f32 %v15301_v22, %v19254_v40  ;;  %v19258_v22 = vld [vmem:[#allocation10_spill] sm:$0xff] }
 0x329   : > { %5826 = vmatpush1.msra.mxu1 %v15786_v57  ;;  %7397 = vrot.lane.b32.xlu0 %v3636_v34, %s11108_s18  ;;  %v15792_v42 = vpop.f32.mrf.mxu1  ;;  %v15803_v34 = vld [vmem:[%s18254_s2 + $0x38] sm:$0xff]  ;;  %v19257_v57 = vld [vmem:[#allocation96_spill] sm:$0xff]  ;;  %vm4756_vm7 = vcmp.eq.s32.totalorder %v11690_v56, %v19258_v22  ;;  %vm4755_vm9 = vcmp.eq.s32.totalorder %v11685_v54, %v19258_v22 }
 0x32a   : > { %5827 = vmatprep.subr.mxu1 %v18592_v1  ;;  %10687 = vmatmul.mubr.msk.f32.gmra.mxu1 %vm4718_vm4, %v18734_v53  ;;  %v3522_v44 = vpop.f32.mrf.mxu0  ;;  %19255 = vst [vmem:[#allocation186_spill] sm:$0xff] %v15803_v34  ;;  %vm4742_vm4 = vcmp.eq.s32.totalorder %v18663_v18, %v19225_v48 }
 0x32b   : > { %5828 = vmatpush1.msra.mxu1 %v15803_v34  ;;  %9419 = vmatmul.mubr.msk.f32.gmra.mxu0 %vm4752_vm5, %v18734_v53  ;;  %v15809_v4 = vpop.permute.xlu1 %7151  ;;  %v3646_v44 = vadd.f32 %v15444_v61, %v19257_v57  ;;  %v15828_v61 = vpop.permute.xlu0 %7169 }
 0x32c   : > { %19256 = vst [vmem:[#allocation177_spill] sm:$0xff] %v15809_v4  ;;  %10689 = vmatprep.mubr.msk.f32.mxu1 %vm4721_vm6, %v18734_v53  ;;  %5829 = vmatprep.subr.mxu1 %v18592_v1  ;;  %19260 = vst [vmem:[#allocation3_spill] sm:$0xff] %v15828_v61  ;;  %v19262_v4 = vld [vmem:[#allocation130_spill] sm:$0xff]  ;;  %vm4745_vm6 = vcmp.eq.s32.totalorder %v18663_v18, %v19231_v0 }
 0x32d   : > { %10742 = vmatprep.subr.mxu0 %v15261_v47  ;;  %7383 = vrot.lane.b32.xlu1 %v3601_v50, %s11108_s18  ;;  %v15819_v40 = vpop.f32.mrf.mxu1  ;;  %v3656_v34 = vadd.f32 %v15482_v27, %v19262_v4  ;;  %v19265_v27 = vld [vmem:[#allocation157_spill] sm:$0xff] }
 0x32e   : > { %9420 = vmatprep.mubr.msk.f32.mxu0 %vm4756_vm7, %v18734_v53  ;;  %5830 = vmatpush1.msra.mxu1 %v15825_v32  ;;  %v15830_v57 = vpop.f32.mrf.mxu0  ;;  %v19264_v32 = vld [vmem:[#allocation71_spill] sm:$0xff]  ;;  %vm4759_vm11 = vcmp.eq.s32.totalorder %v11690_v56, %v19265_v27  ;;  %vm4758_vm13 = vcmp.eq.s32.totalorder %v11685_v54, %v19265_v27 }
 0x32f   : > { %19261 = vst [vmem:[#allocation42_spill] sm:$0xff] %v15830_v57  ;;  %10743 = vmatpush3.msra.mxu0 %v15261_v47  ;;  %5831 = vmatprep.subr.mxu1 %v18592_v1  ;;  %v15836_v50 = vpop.f32.mrf.mxu1  ;;  %v3611_v57 = vadd.f32 %v15340_v43, %v19264_v32  ;;  %v15876_v58 = vpop.permute.xlu0 %7173 }
 0x330   : > { %7401 = vrot.lane.b32.xlu0 %v3646_v44, %s11108_s18  ;;  %10690 = vmatmul.mubr.msk.f32.gmra.mxu1 %vm4724_vm8, %v18734_v53  ;;  %v15844_v61 = vpop.permute.xlu1 %7155  ;;  %v3527_v47 = vpop.f32.mrf.mxu0  ;;  %v15870_v44 = vld [vmem:[%s18254_s2 + $0x20] sm:$0xff]  ;;  %19266 = vst [vmem:[#allocation146_spill] sm:$0xff] %v15876_v58  ;;  %v19270_v58 = vld [vmem:[#allocation147_spill] sm:$0xff]  ;;  %vm4748_vm8 = vcmp.eq.s32.totalorder %v18663_v18, %v19238_v11 }
 0x331   : > { %19263 = vst [vmem:[#allocation183_spill] sm:$0xff] %v15844_v61  ;;  %5832 = vmatpush1.msra.mxu1 %v15851_v38  ;;  %9421 = vmatmul.mubr.msk.f32.gmra.mxu0 %vm4755_vm9, %v18734_v53  ;;  %v19267_v47 = vld [vmem:[#allocation112_spill] sm:$0xff]  ;;  %v16021_v11 = vld [vmem:[%s18254_s2 + $0xe8] sm:$0xff] }
 0x332   : > { %10692 = vmatprep.mubr.msk.f32.mxu1 %vm4727_vm10, %v18734_v53  ;;  %5833 = vmatprep.subr.mxu1 %v18592_v1  ;;  %v15861_v43 = vpop.f32.mrf.mxu1  ;;  %v3621_v61 = vadd.f32 %v15386_v24, %v19267_v47  ;;  %v19271_v24 = vld [vmem:[#allocation55_spill] sm:$0xff]  ;;  %vm4751_vm10 = vcmp.eq.s32.totalorder %v18663_v18, %v19244_v52  ;;  %v16040_v52 = vld [vmem:[%s18254_s2 + $0xe0] sm:$0xff] }
 0x333   : > { %7387 = vrot.lane.b32.xlu1 %v3611_v57, %s11108_s18  ;;  %9422 = vmatprep.mubr.msk.f32.mxu0 %vm4759_vm11, %v18734_v53  ;;  %v15865_v4 = vpop.f32.mrf.mxu0  ;;  %vm4762_vm15 = vcmp.eq.s32.totalorder %v11690_v56, %v19271_v24  ;;  %vm4761_vm1 = vcmp.eq.s32.totalorder %v11685_v54, %v19271_v24 }
 0x334   : > { %5834 = vmatpush1.msra.mxu1 %v15870_v44  ;;  %7405 = vrot.lane.b32.xlu0 %v3656_v34, %s11108_s18  ;;  %v15878_v32 = vpop.f32.mrf.mxu1  ;;  %v15889_v34 = vld [vmem:[%s18254_s2 + $0x18] sm:$0xff] }
 0x335   : > { %5835 = vmatprep.subr.mxu1 %v18592_v1  ;;  %10693 = vmatmul.mubr.msk.f32.gmra.mxu1 %vm4730_vm12, %v18734_v53  ;;  %v3532_v57 = vpop.f32.mrf.mxu0  ;;  %19268 = vst [vmem:[#allocation89_spill] sm:$0xff] %v15889_v34  ;;  %vm4754_vm12 = vcmp.eq.s32.totalorder %v18663_v18, %v19251_v49 }
 0x336   : > { %5836 = vmatpush1.msra.mxu1 %v15889_v34  ;;  %9423 = vmatmul.mubr.msk.f32.gmra.mxu0 %vm4758_vm13, %v18734_v53  ;;  %v15895_v20 = vpop.permute.xlu1 %7159  ;;  %v3666_v57 = vadd.f32 %v15525_v16, %v19270_v58  ;;  %v15918_v16 = vpop.permute.xlu0 %7177  ;;  %v19274_v58 = vld [vmem:[#allocation150_spill] sm:$0xff]  ;;  %v19276_v34 = vld [vmem:[#allocation93_spill] sm:$0xff] }
 0x337   : > { %19269 = vst [vmem:[#allocation32_spill] sm:$0xff] %v15895_v20  ;;  %10695 = vmatprep.mubr.msk.f32.mxu1 %vm4733_vm14, %v18734_v53  ;;  %5837 = vmatprep.subr.mxu1 %v18592_v1  ;;  %19273 = vst [vmem:[#allocation149_spill] sm:$0xff] %v15918_v16  ;;  %v3676_v20 = vadd.f32 %v15564_v59, %v19274_v58  ;;  %v3631_v5 = vadd.f32 %v15419_v28, %v19276_v34  ;;  %v15937_v16 = vld [vmem:[%s18254_s2 + $0x8] sm:$0xff]  ;;  %v19277_v59 = vld [vmem:[#allocation160_spill] sm:$0xff] }
 0x338   : > { %10744 = vmatprep.subr.mxu0 %v15318_v51  ;;  %7391 = vrot.lane.b32.xlu1 %v3621_v61, %s11108_s18  ;;  %v15905_v47 = vpop.f32.mrf.mxu1  ;;  %vm4765_vm3 = vcmp.eq.s32.totalorder %v11690_v56, %v19277_v59  ;;  %v15954_v34 = vld [vmem:[%s18254_s2] sm:$0xff]  ;;  %vm4764_vm5 = vcmp.eq.s32.totalorder %v11685_v54, %v19277_v59  ;;  %v19280_v58 = vld [vmem:[#allocation139_spill] sm:$0xff]  ;;  %vm4757_vm14 = vcmp.eq.s32.totalorder %v18663_v18, %v19258_v22 }
 0x339   : > { %9424 = vmatprep.mubr.msk.f32.mxu0 %vm4762_vm15, %v18734_v53  ;;  %5838 = vmatpush1.msra.mxu1 %v15911_v9  ;;  %19278 = vst [vmem:[#allocation133_spill] sm:$0xff] %v15954_v34 }
 0x33a   : > { %10745 = vmatpush3.msra.mxu0 %v15318_v51  ;;  %5839 = vmatprep.subr.mxu1 %v18592_v1  ;;  %v15920_v61 = vpop.f32.mrf.mxu0  ;;  %v15930_v9 = vpop.f32.mrf.mxu1 }
 0x33b   : > { %7409 = vrot.lane.b32.xlu0 %v3666_v57, %s11108_s18  ;;  %10696 = vmatmul.mubr.msk.f32.gmra.mxu1 %vm4736_vm0, %v18734_v53  ;;  %v15928_v51 = vpop.permute.xlu1 %7163  ;;  %v15966_v57 = vpop.permute.xlu0 %7181  ;;  %vm4760_vm0 = vcmp.eq.s32.totalorder %v18663_v18, %v19265_v27  ;;  %v16107_v27 = vld [vmem:[%s18254_s2 + $0xc8] sm:$0xff] }
 0x33c   : > { %19275 = vst [vmem:[#allocation2_spill] sm:$0xff] %v15928_v51  ;;  %5840 = vmatpush1.msra.mxu1 %v15937_v16  ;;  %9425 = vmatmul.mubr.msk.f32.gmra.mxu0 %vm4761_vm1, %v18734_v53  ;;  %v15947_v28 = vpop.f32.mrf.mxu0  ;;  %19279 = vst [vmem:[#allocation142_spill] sm:$0xff] %v15966_v57  ;;  %v19283_v57 = vld [vmem:[#allocation5_spill] sm:$0xff] }
 0x33d   : > { %10698 = vmatprep.mubr.msk.f32.mxu1 %vm4739_vm2, %v18734_v53  ;;  %5841 = vmatprep.subr.mxu1 %v18592_v1  ;;  %vm4763_vm2 = vcmp.eq.s32.totalorder %v18663_v18, %v19271_v24  ;;  %v16128_v24 = vld [vmem:[%s18254_s2 + $0xc0] sm:$0xff] }
 0x33e   : > { %7395 = vrot.lane.b32.xlu1 %v3631_v5, %s11108_s18  ;;  %9426 = vmatprep.mubr.msk.f32.mxu0 %vm4765_vm3, %v18734_v53  ;;  %v3641_v5 = vadd.f32 %v15456_v45, %v19280_v58  ;;  %v19284_v58 = vld [vmem:[#allocation167_spill] sm:$0xff] }
 0x33f   : > { %5842 = vmatpush1.msra.mxu1 %v15954_v34  ;;  %7413 = vrot.lane.b32.xlu0 %v3676_v20, %s11108_s18  ;;  %v15960_v6 = vpop.f32.mrf.mxu1  ;;  %v15973_v20 = vld [vmem:[%s18254_s2 + $0xf8] sm:$0xff]  ;;  %v3686_v34 = vadd.f32 %v15602_v14, %v19283_v57  ;;  %vm4768_vm7 = vcmp.eq.s32.totalorder %v11690_v56, %v19284_v58  ;;  %v15997_v14 = vld [vmem:[%s18254_s2 + $0xf0] sm:$0xff]  ;;  %vm4767_vm9 = vcmp.eq.s32.totalorder %v11685_v54, %v19284_v58 }
 0x340   : > { %5843 = vmatprep.subr.mxu1 %v18592_v1  ;;  %10699 = vmatmul.mubr.msk.f32.gmra.mxu1 %vm4742_vm4, %v18734_v53  ;;  %19281 = vst [vmem:[#allocation6_spill] sm:$0xff] %v15973_v20  ;;  %19285 = vst [vmem:[#allocation187_spill] sm:$0xff] %v15997_v14  ;;  %vm4766_vm4 = vcmp.eq.s32.totalorder %v18663_v18, %v19277_v59 }
 0x341   : > { %5844 = vmatpush2.msra.mxu1 %v15973_v20  ;;  %9427 = vmatmul.mubr.msk.f32.gmra.mxu0 %vm4764_vm5, %v18734_v53  ;;  %v15979_v48 = vpop.permute.xlu1 %7167  ;;  %v15981_v51 = vpop.f32.mrf.mxu0 }
 0x342   : > { %19282 = vst [vmem:[#allocation131_spill] sm:$0xff] %v15979_v48  ;;  %10701 = vmatprep.mubr.msk.f32.mxu1 %vm4745_vm6, %v18734_v53  ;;  %5845 = vmatprep.subr.mxu1 %v18592_v1  ;;  %v4211_v45 = vpop.f32.mrf.mxu1  ;;  %vm4769_vm6 = vcmp.eq.s32.totalorder %v18663_v18, %v19284_v58 }
 0x343   : > { %10746 = vmatprep.subr.mxu0 %v15377_v23  ;;  %7399 = vrot.lane.b32.xlu1 %v3641_v5, %s11108_s18  ;;  %v15991_v0 = vpop.f32.mrf.mxu0  ;;  %v19287_v45 = vld [vmem:[#allocation21_spill] sm:$0xff] }
 0x344   : > { %9428 = vmatprep.mubr.msk.f32.mxu0 %vm4768_vm7, %v18734_v53  ;;  %5846 = vmatpush2.msra.mxu1 %v15997_v14  ;;  %v16000_v57 = vpop.f32.mrf.mxu1  ;;  %v3696_v48 = vadd.f32 %v15647_v41, %v19287_v45  ;;  %v16027_v41 = vpop.permute.xlu0 %7185 }
 0x345   : > { %10747 = vmatpush3.msra.mxu0 %v15377_v23  ;;  %5847 = vmatprep.subr.mxu1 %v18592_v1  ;;  %v16006_v5 = vpop.permute.xlu1 %7171  ;;  %v19288_v23 = vld [vmem:[#allocation126_spill] sm:$0xff]  ;;  %19289 = vst [vmem:[#allocation87_spill] sm:$0xff] %v16027_v41 }
 0x346   : > { %19286 = vst [vmem:[#allocation151_spill] sm:$0xff] %v16006_v5  ;;  %7417 = vrot.lane.b32.xlu0 %v3686_v34, %s11108_s18  ;;  %10702 = vmatmul.mubr.msk.f32.gmra.mxu1 %vm4748_vm8, %v18734_v53  ;;  %v16014_v14 = vpop.f32.mrf.mxu0  ;;  %v3651_v20 = vadd.f32 %v15505_v13, %v19288_v23  ;;  %v4216_v34 = vpop.f32.mrf.mxu1  ;;  %v19290_v13 = vld [vmem:[#allocation161_spill] sm:$0xff]  ;;  %v3706_v5 = vadd.f32 %v15687_v25, %v15448_v26  ;;  %v16085_v26 = vld [vmem:[%s18254_s2 + $0xd0] sm:$0xff] }
 0x347   : > { %5848 = vmatpush2.msra.mxu1 %v16021_v11  ;;  %9429 = vmatmul.mubr.msk.f32.gmra.mxu0 %vm4767_vm9, %v18734_v53  ;;  %vm4771_vm11 = vcmp.eq.s32.totalorder %v11690_v56, %v19290_v13  ;;  %vm4770_vm13 = vcmp.eq.s32.totalorder %v11685_v54, %v19290_v13  ;;  %vm4772_vm8 = vcmp.eq.s32.totalorder %v18663_v18, %v19290_v13  ;;  %v16195_v13 = vld [vmem:[%s18254_s2 + $0xa8] sm:$0xff] }
 0x348   : > { %10704 = vmatprep.mubr.msk.f32.mxu1 %vm4751_vm10, %v18734_v53  ;;  %5849 = vmatprep.subr.mxu1 %v18592_v1  ;;  %v16033_v45 = vpop.f32.mrf.mxu0 }
 0x349   : > { %7403 = vrot.lane.b32.xlu1 %v3651_v20, %s11108_s18  ;;  %9430 = vmatprep.mubr.msk.f32.mxu0 %vm4771_vm11, %v18734_v53  ;;  %v19292_v20 = vld [vmem:[#allocation91_spill] sm:$0xff] }
 0x34a   : > { %5850 = vmatpush2.msra.mxu1 %v16040_v52  ;;  %7421 = vrot.lane.b32.xlu0 %v3696_v48, %s11108_s18  ;;  %v16046_v23 = vpop.permute.xlu1 %7175  ;;  %v16048_v34 = vpop.f32.mrf.mxu1  ;;  %v3661_v41 = vadd.f32 %v15537_v17, %v19292_v20  ;;  %v16059_v48 = vld [vmem:[%s18254_s2 + $0xd8] sm:$0xff]  ;;  %v19295_v20 = vld [vmem:[#allocation168_spill] sm:$0xff] }
 0x34b   : > { %19291 = vst [vmem:[#allocation45_spill] sm:$0xff] %v16046_v23  ;;  %5851 = vmatprep.subr.mxu1 %v18592_v1  ;;  %10705 = vmatmul.mubr.msk.f32.gmra.mxu1 %vm4754_vm12, %v18734_v53  ;;  %19293 = vst [vmem:[#allocation115_spill] sm:$0xff] %v16059_v48  ;;  %v16071_v17 = vpop.permute.xlu0 %7189  ;;  %vm4774_vm15 = vcmp.eq.s32.totalorder %v11690_v56, %v19295_v20  ;;  %vm4773_vm1 = vcmp.eq.s32.totalorder %v11685_v54, %v19295_v20 }
 0x34c   : > { %5852 = vmatpush2.msra.mxu1 %v16059_v48  ;;  %9431 = vmatmul.mubr.msk.f32.gmra.mxu0 %vm4770_vm13, %v18734_v53  ;;  %v16065_v49 = vpop.f32.mrf.mxu0  ;;  %v4221_v23 = vpop.f32.mrf.mxu1  ;;  %19294 = vst [vmem:[#allocation52_spill] sm:$0xff] %v16071_v17  ;;  %v19297_v17 = vld [vmem:[#allocation7_spill] sm:$0xff]  ;;  %vm4775_vm10 = vcmp.eq.s32.totalorder %v18663_v18, %v19295_v20  ;;  %v16216_v20 = vld [vmem:[%s18254_s2 + $0xa0] sm:$0xff] }
 0x34d   : > { %10707 = vmatprep.mubr.msk.f32.mxu1 %vm4757_vm14, %v18734_v53  ;;  %5853 = vmatprep.subr.mxu1 %v18592_v1 }
 0x34e   : > { %10748 = vmatprep.subr.mxu0 %v15435_v19  ;;  %7407 = vrot.lane.b32.xlu1 %v3661_v41, %s11108_s18  ;;  %v16077_v22 = vpop.permute.xlu1 %7179  ;;  %v16079_v48 = vpop.f32.mrf.mxu0  ;;  %v3716_v41 = vadd.f32 %v15735_v29, %v15531_v37  ;;  %v19299_v29 = vld [vmem:[#allocation8_spill] sm:$0xff] }
 0x34f   : > { %19296 = vst [vmem:[#allocation31_spill] sm:$0xff] %v16077_v22  ;;  %9432 = vmatprep.mubr.msk.f32.mxu0 %vm4774_vm15, %v18734_v53  ;;  %5854 = vmatpush2.msra.mxu1 %v16085_v26  ;;  %v16088_v25 = vpop.f32.mrf.mxu1  ;;  %vm4777_vm3 = vcmp.eq.s32.totalorder %v11690_v56, %v19299_v29  ;;  %vm4776_vm5 = vcmp.eq.s32.totalorder %v11685_v54, %v19299_v29 }
 0x350   : > { %10749 = vmatpush3.msra.mxu0 %v15435_v19  ;;  %5855 = vmatprep.subr.mxu1 %v18592_v1  ;;  %v3671_v19 = vadd.f32 %v15584_v3, %v19297_v17  ;;  %v16119_v3 = vpop.permute.xlu0 %7257  ;;  %vm4778_vm12 = vcmp.eq.s32.totalorder %v18663_v18, %v19299_v29 }
 0x351   : > { %7425 = vrot.lane.b32.xlu0 %v3706_v5, %s11108_s18  ;;  %10708 = vmatmul.mubr.msk.f32.gmra.mxu1 %vm4760_vm0, %v18734_v53  ;;  %v16100_v23 = vpop.f32.mrf.mxu0  ;;  %v4226_v22 = vpop.f32.mrf.mxu1  ;;  %19300 = vst [vmem:[#allocation154_spill] sm:$0xff] %v16119_v3  ;;  %v3726_v3 = vadd.f32 %v15775_v21, %v15612_v31  ;;  %v16171_v31 = vld [vmem:[%s18254_s2 + $0xb0] sm:$0xff] }
 0x352   : > { %5856 = vmatpush2.msra.mxu1 %v16107_v27  ;;  %9433 = vmatmul.mubr.msk.f32.gmra.mxu0 %vm4773_vm1, %v18734_v53  ;;  %v16113_v37 = vpop.permute.xlu1 %7183  ;;  %19305 = vst [vmem:[#allocation10_spill] sm:$0xff] %v16171_v31 }
 0x353   : > { %19298 = vst [vmem:[#allocation41_spill] sm:$0xff] %v16113_v37  ;;  %10710 = vmatprep.mubr.msk.f32.mxu1 %vm4763_vm2, %v18734_v53  ;;  %5857 = vmatprep.subr.mxu1 %v18592_v1  ;;  %v16121_v5 = vpop.f32.mrf.mxu0 }
 0x354   : > { %7411 = vrot.lane.b32.xlu1 %v3671_v19, %s11108_s18  ;;  %9434 = vmatprep.mubr.msk.f32.mxu0 %vm4777_vm3, %v18734_v53  ;;  %v19302_v19 = vld [vmem:[#allocation15_spill] sm:$0xff] }
 0x355   : > { %5858 = vmatpush2.msra.mxu1 %v16128_v24  ;;  %7429 = vrot.lane.b32.xlu0 %v3716_v41, %s11108_s18  ;;  %v16134_v17 = vpop.f32.mrf.mxu1  ;;  %v3681_v37 = vadd.f32 %v15618_v39, %v19302_v19  ;;  %v16147_v41 = vld [vmem:[%s18254_s2 + $0xb8] sm:$0xff]  ;;  %v19303_v19 = vld [vmem:[#allocation16_spill] sm:$0xff] }
 0x356   : > { %5859 = vmatprep.subr.mxu1 %v18592_v1  ;;  %10711 = vmatmul.mubr.msk.f32.gmra.mxu1 %vm4766_vm4, %v18734_v53  ;;  %v16140_v22 = vpop.permute.xlu1 %7187  ;;  %vm4780_vm7 = vcmp.eq.s32.totalorder %v11690_v56, %v19303_v19  ;;  %vm4779_vm9 = vcmp.eq.s32.totalorder %v11685_v54, %v19303_v19  ;;  %vm4781_vm14 = vcmp.eq.s32.totalorder %v18663_v18, %v19303_v19  ;;  %v16254_v19 = vld [vmem:[%s18254_s2 + $0x90] sm:$0xff] }
 0x357   : > { %19301 = vst [vmem:[#allocation64_spill] sm:$0xff] %v16140_v22  ;;  %5860 = vmatpush2.msra.mxu1 %v16147_v41  ;;  %9435 = vmatmul.mubr.msk.f32.gmra.mxu0 %vm4776_vm5, %v18734_v53  ;;  %v16153_v59 = vpop.f32.mrf.mxu0  ;;  %v4231_v39 = vpop.f32.mrf.mxu1 }
 0x358   : > { %10713 = vmatprep.mubr.msk.f32.mxu1 %vm4769_vm6, %v18734_v53  ;;  %5861 = vmatprep.subr.mxu1 %v18592_v1  ;;  %v16163_v22 = vpop.permute.xlu0 %7261 }
 0x359   : > { %10750 = vmatprep.subr.mxu0 %v15494_v33  ;;  %7415 = vrot.lane.b32.xlu1 %v3681_v37, %s11108_s18  ;;  %19304 = vst [vmem:[#allocation96_spill] sm:$0xff] %v16163_v22  ;;  %v16165_v58 = vpop.f32.mrf.mxu0  ;;  %v3736_v37 = vadd.f32 %v15819_v40, %v15695_v10  ;;  %v19308_v10 = vld [vmem:[#allocation164_spill] sm:$0xff] }
 0x35a   : > { %9436 = vmatprep.mubr.msk.f32.mxu0 %vm4780_vm7, %v18734_v53  ;;  %5862 = vmatpush2.msra.mxu1 %v16171_v31  ;;  %v16174_v21 = vpop.permute.xlu1 %7255  ;;  %v16176_v39 = vpop.f32.mrf.mxu1  ;;  %v19307_v31 = vld [vmem:[#allocation155_spill] sm:$0xff]  ;;  %vm4783_vm11 = vcmp.eq.s32.totalorder %v11690_v56, %v19308_v10  ;;  %vm4782_vm13 = vcmp.eq.s32.totalorder %v11685_v54, %v19308_v10  ;;  %vm4784_vm0 = vcmp.eq.s32.totalorder %v18663_v18, %v19308_v10 }
 0x35b   : > { %19306 = vst [vmem:[#allocation130_spill] sm:$0xff] %v16174_v21  ;;  %10751 = vmatpush3.msra.mxu0 %v15494_v33  ;;  %5863 = vmatprep.subr.mxu1 %v18592_v1  ;;  %v3691_v33 = vadd.f32 %v15659_v60, %v19307_v31  ;;  %v16283_v10 = vld [vmem:[%s18254_s2 + $0x88] sm:$0xff] }
 0x35c   : > { %7433 = vrot.lane.b32.xlu0 %v3726_v3, %s11108_s18  ;;  %10714 = vmatmul.mubr.msk.f32.gmra.mxu1 %vm4772_vm8, %v18734_v53  ;;  %v16188_v22 = vpop.f32.mrf.mxu0  ;;  %v4236_v21 = vpop.f32.mrf.mxu1 }
 0x35d   : > { %5864 = vmatpush2.msra.mxu1 %v16195_v13  ;;  %9437 = vmatmul.mubr.msk.f32.gmra.mxu0 %vm4779_vm9, %v18734_v53  ;;  %v16211_v3 = vpop.permute.xlu0 %7265  ;;  %v3701_v21 = vadd.f32 %v15699_v63, %v15413_v30 }
 0x35e   : > { %10716 = vmatprep.mubr.msk.f32.mxu1 %vm4775_vm10, %v18734_v53  ;;  %5865 = vmatprep.subr.mxu1 %v18592_v1  ;;  %v16205_v60 = vpop.permute.xlu1 %7259  ;;  %v16207_v40 = vpop.f32.mrf.mxu0  ;;  %19310 = vst [vmem:[#allocation157_spill] sm:$0xff] %v16211_v3  ;;  %v3746_v3 = vadd.f32 %v15861_v43, %v15781_v2  ;;  %v19312_v2 = vld [vmem:[#allocation173_spill] sm:$0xff] }
 0x35f   : > { %19309 = vst [vmem:[#allocation71_spill] sm:$0xff] %v16205_v60  ;;  %7419 = vrot.lane.b32.xlu1 %v3691_v33, %s11108_s18  ;;  %9438 = vmatprep.mubr.msk.f32.mxu0 %vm4783_vm11, %v18734_v53  ;;  %v16233_v33 = vld [vmem:[%s18254_s2 + $0x98] sm:$0xff]  ;;  %vm5525_vm15 = vcmp.eq.s32.totalorder %v18663_v18, %v19312_v2  ;;  %vm5524_vm1 = vcmp.eq.s32.totalorder %v11690_v56, %v19312_v2 }
 0x360   : > { %5866 = vmatpush2.msra.mxu1 %v16216_v20  ;;  %7437 = vrot.lane.b32.xlu0 %v3736_v37, %s11108_s18  ;;  %v16222_v31 = vpop.f32.mrf.mxu1  ;;  %vm5523_vm4 = vcmp.eq.s32.totalorder %v11685_v54, %v19312_v2  ;;  %v19322_v2 = vld [vmem:[#allocation178_spill] sm:$0xff] }
 0x361   : > { %5867 = vmatprep.subr.mxu1 %v18592_v1  ;;  %10717 = vmatmul.mubr.msk.f32.gmra.mxu1 %vm4778_vm12, %v18734_v53  ;;  %v16260_v43 = vpop.permute.xlu0 %7269  ;;  %vm5534_vm6 = vcmp.eq.s32.totalorder %v18663_v18, %v19322_v2 }
 0x362   : > { %5868 = vmatpush2.msra.mxu1 %v16233_v33  ;;  %9439 = vmatmul.mubr.msk.f32.gmra.mxu0 %vm4782_vm13, %v18734_v53  ;;  %v16239_v29 = vpop.permute.xlu1 %7263  ;;  %v16241_v37 = vpop.f32.mrf.mxu0  ;;  %19313 = vst [vmem:[#allocation147_spill] sm:$0xff] %v16260_v43  ;;  %v19316_v43 = vld [vmem:[#allocation166_spill] sm:$0xff]  ;;  %vm5533_vm13 = vcmp.eq.s32.totalorder %v11690_v56, %v19322_v2 }
 0x363   : > { %19311 = vst [vmem:[#allocation112_spill] sm:$0xff] %v16239_v29  ;;  %10719 = vmatprep.mubr.msk.f32.mxu1 %vm4781_vm14, %v18734_v53  ;;  %5869 = vmatprep.subr.mxu1 %v18592_v1  ;;  %v4241_v30 = vpop.f32.mrf.mxu1  ;;  %vm5528_vm2 = vcmp.eq.s32.totalorder %v18663_v18, %v19316_v43  ;;  %v3711_v29 = vadd.f32 %v15750_v36, %v15499_v7  ;;  %v19317_v7 = vld [vmem:[#allocation105_spill] sm:$0xff] }
 0x364   : > { %10752 = vmatprep.subr.mxu0 %v15545_v8  ;;  %7423 = vrot.lane.b32.xlu1 %v3701_v21, %s11108_s18  ;;  %v16249_v63 = vpop.f32.mrf.mxu0  ;;  %vm5531_vm3 = vcmp.eq.s32.totalorder %v18663_v18, %v19317_v7  ;;  %vm5527_vm5 = vcmp.eq.s32.totalorder %v11690_v56, %v19316_v43  ;;  %vm5526_vm8 = vcmp.eq.s32.totalorder %v11685_v54, %v19316_v43 }
 0x365   : > { %5870 = vmatpush2.msra.mxu1 %v16254_v19  ;;  %10753 = vmatpush3.msra.mxu0 %v15545_v8  ;;  %v16262_v30 = vpop.f32.mrf.mxu1  ;;  %vm5530_vm9 = vcmp.eq.s32.totalorder %v11690_v56, %v19317_v7  ;;  %vm5529_vm12 = vcmp.eq.s32.totalorder %v11685_v54, %v19317_v7 }
 0x366   : > { %10754 = vmatprep.mubr.msk.f32.mxu0 %vm5525_vm15, %v18734_v53  ;;  %5871 = vmatprep.subr.mxu1 %v18592_v1  ;;  %v16268_v21 = vpop.permute.xlu1 %7267 }
 0x367   : > { %19314 = vst [vmem:[#allocation55_spill] sm:$0xff] %v16268_v21  ;;  %7441 = vrot.lane.b32.xlu0 %v3746_v3, %s11108_s18  ;;  %10720 = vmatmul.mubr.msk.f32.gmra.mxu1 %vm4784_vm0, %v18734_v53  ;;  %v16274_v8 = vpop.f32.mrf.mxu0  ;;  %v4246_v3 = vpop.f32.mrf.mxu1  ;;  %v3756_v21 = vadd.f32 %v15905_v47, %v15865_v4  ;;  %vm5532_vm0 = vcmp.eq.s32.totalorder %v11685_v54, %v19322_v2  ;;  %v19342_v2 = vld [vmem:[#allocation69_spill] sm:$0xff] }
 0x368   : > { %19315 = vst [vmem:[#allocation150_spill] sm:$0xff] %v16274_v8  ;;  %5872 = vmatpush2.msra.mxu1 %v16283_v10  ;;  %9568 = vmatprep.mubr.msk.f32.mxu1 %vm5524_vm1, %v18734_v53  ;;  %v16302_v3 = vld [vmem:[%s18254_s2 + $0x80] sm:$0xff]  ;;  %v16306_v4 = vpop.permute.xlu0 %7273 }
 0x369   : > { %5873 = vmatprep.subr.mxu1 %v18592_v1  ;;  %10755 = vmatmul.mubr.msk.f32.vlgmr.msra.gmra.mxu0 %vm5528_vm2, %v18734_v53  ;;  %v16291_v60 = vpop.f32.mrf.mxu0  ;;  %19319 = vst [vmem:[#allocation160_spill] sm:$0xff] %v16306_v4  ;;  %v3721_v4 = vadd.f32 %v15792_v42, %v15574_v62  ;;  %v19325_v42 = vld [vmem:[#allocation14_spill] sm:$0xff]  ;;  %vm5552_vm2 = vcmp.eq.s32.totalorder %v18663_v18, %v19342_v2 }
 0x36a   : > { %6645 = vmatprep.subr.mxu0 %v18592_v1  ;;  %7427 = vrot.lane.b32.xlu1 %v3711_v29, %s11108_s18  ;;  %v16297_v36 = vpop.permute.xlu1 %7271  ;;  %v11072_v29 = vld [vmem:[%s18254_s2 + $0x178] sm:$0xff] }
 0x36b   : > { %19318 = vst [vmem:[#allocation93_spill] sm:$0xff] %v16297_v36  ;;  %5874 = vmatpush2.msra.mxu1 %v16302_v3  ;;  %10757 = vmatprep.mubr.msk.f32.mxu0 %vm5531_vm3, %v18734_v53  ;;  %v16308_v47 = vpop.f32.mrf.mxu1 }
 0x36c   : > { %6646 = vmatpush1.msra.mxu0 %v15641_v55  ;;  %10802 = vmatprep.subr.mxu1 %v11072_v29  ;;  %v16343_v62 = vpop.permute.xlu0 %7277 }
 0x36d   : > { %6647 = vmatprep.subr.mxu0 %v18592_v1  ;;  %7445 = vrot.lane.b32.xlu0 %v3756_v21, %s11108_s18  ;;  %v16318_v36 = vpop.f32.mrf.mxu0  ;;  %v4251_v8 = vpop.f32.mrf.mxu1  ;;  %19324 = vst [vmem:[#allocation167_spill] sm:$0xff] %v16343_v62  ;;  %v19328_v62 = vld [vmem:[#allocation148_spill] sm:$0xff] }
 0x36e   : > { %19320 = vst [vmem:[#allocation139_spill] sm:$0xff] %v16318_v36  ;;  %9569 = vmatmul.mubr.msk.f32.vlgmr.msra.gmra.mxu1 %vm5523_vm4, %v18734_v53  ;;  %6648 = vmatpush1.msra.mxu0 %v15664_v46  ;;  %v16324_v55 = vpop.permute.xlu1 %7275  ;;  %v19323_v46 = vld [vmem:[#allocation54_spill] sm:$0xff] }
 0x36f   : > { %19321 = vst [vmem:[#allocation5_spill] sm:$0xff] %v16324_v55  ;;  %10803 = vmatpush3.msra.mxu1 %v11072_v29  ;;  %9570 = vmatprep.mubr.msk.f32.mxu1 %vm5527_vm5, %v18734_v53  ;;  %v16331_v21 = vpop.f32.mrf.mxu0  ;;  %vm5537_vm7 = vcmp.eq.s32.totalorder %v18663_v18, %v19323_v46  ;;  %v19329_v36 = vld [vmem:[#allocation106_spill] sm:$0xff]  ;;  %vm5536_vm1 = vcmp.eq.s32.totalorder %v11690_v56, %v19323_v46 }
 0x370   : > { %10758 = vmatmul.mubr.msk.f32.gmra.mxu0 %vm5534_vm6, %v18734_v53  ;;  %6649 = vmatprep.subr.mxu0 %v18592_v1  ;;  %v16337_v8 = vpop.f32.mrf.mxu1  ;;  %vm5540_vm10 = vcmp.eq.s32.totalorder %v18663_v18, %v19329_v36  ;;  %vm5535_vm4 = vcmp.eq.s32.totalorder %v11685_v54, %v19323_v46  ;;  %vm5539_vm5 = vcmp.eq.s32.totalorder %v11690_v56, %v19329_v36 }
 0x371   : > { %7431 = vrot.lane.b32.xlu1 %v3721_v4, %s11108_s18  ;;  %10760 = vmatprep.mubr.msk.f32.mxu0 %vm5537_vm7, %v18734_v53  ;;  %v4440_v4 = vadd.f32 %v15920_v61, %v16000_v57  ;;  %v19331_v61 = vld [vmem:[#allocation57_spill] sm:$0xff]  ;;  %v16381_v57 = vpop.permute.xlu0 %7281 }
 0x372   : > { %6650 = vmatpush1.msra.mxu0 %v19325_v42  ;;  %9571 = vmatmul.mubr.msk.f32.gmra.mxu1 %vm5526_vm8, %v18734_v53  ;;  %v16349_v29 = vpop.permute.xlu1 %7279  ;;  %v16351_v55 = vpop.f32.mrf.mxu0  ;;  %v3731_v42 = vadd.f32 %v15836_v50, %v19328_v62  ;;  %vm5543_vm11 = vcmp.eq.s32.totalorder %v18663_v18, %v19331_v61  ;;  %19333 = vst [vmem:[#allocation168_spill] sm:$0xff] %v16381_v57 }
 0x373   : > { %19326 = vst [vmem:[#allocation21_spill] sm:$0xff] %v16349_v29  ;;  %19327 = vst [vmem:[#allocation126_spill] sm:$0xff] %v16351_v55  ;;  %6651 = vmatprep.subr.mxu0 %v18592_v1  ;;  %9572 = vmatprep.mubr.msk.f32.mxu1 %vm5530_vm9, %v18734_v53  ;;  %v4256_v43 = vpop.f32.mrf.mxu1  ;;  %v11073_v29 = vld [vmem:[%s18254_s2 + $0x170] sm:$0xff]  ;;  %vm5538_vm8 = vcmp.eq.s32.totalorder %v11685_v54, %v19329_v36  ;;  %vm5542_vm9 = vcmp.eq.s32.totalorder %v11690_v56, %v19331_v61 }
 0x374   : > { %6652 = vmatpush1.msra.mxu0 %v15704_v15  ;;  %10804 = vmatprep.subr.mxu1 %v11073_v29  ;;  %v16365_v55 = vpop.f32.mrf.mxu0 }
 0x375   : > { %19330 = vst [vmem:[#allocation161_spill] sm:$0xff] %v16365_v55  ;;  %10761 = vmatmul.mubr.msk.f32.gmra.mxu0 %vm5540_vm10, %v18734_v53  ;;  %6653 = vmatprep.subr.mxu0 %v18592_v1  ;;  %v19336_v55 = vld [vmem:[#allocation62_spill] sm:$0xff]  ;;  %v16424_v57 = vpop.permute.xlu0 %7285 }
 0x376   : > { %7435 = vrot.lane.b32.xlu1 %v3731_v42, %s11108_s18  ;;  %10763 = vmatprep.mubr.msk.f32.mxu0 %vm5543_vm11, %v18734_v53  ;;  %v16373_v15 = vpop.f32.mrf.mxu1  ;;  %v16375_v50 = vpop.permute.xlu1 %7283  ;;  %v19335_v42 = vld [vmem:[#allocation171_spill] sm:$0xff]  ;;  %19343 = vst [vmem:[#allocation15_spill] sm:$0xff] %v16424_v57 }
 0x377   : > { %19332 = vst [vmem:[#allocation91_spill] sm:$0xff] %v16375_v50  ;;  %6654 = vmatpush1.msra.mxu0 %v15721_v35  ;;  %7513 = vrot.lane.b32.xlu0 %v4440_v4, %s11109_s17  ;;  %v3741_v50 = vadd.f32 %v15878_v32, %v19335_v42  ;;  %v19337_v35 = vld [vmem:[#allocation181_spill] sm:$0xff]  ;;  %v19339_v32 = vld [vmem:[#allocation172_spill] sm:$0xff] }
 0x378   : > { %6655 = vmatprep.subr.mxu0 %v18592_v1  ;;  %9573 = vmatmul.mubr.msk.f32.gmra.mxu1 %vm5529_vm12, %v18734_v53  ;;  %v16385_v62 = vpop.f32.mrf.mxu0  ;;  %v4261_v43 = vpop.f32.mrf.mxu1  ;;  %vm5546_vm14 = vcmp.eq.s32.totalorder %v18663_v18, %v19337_v35  ;;  %vm5549_vm15 = vcmp.eq.s32.totalorder %v18663_v18, %v19339_v32  ;;  %vm5541_vm12 = vcmp.eq.s32.totalorder %v11685_v54, %v19331_v61 }
 0x379   : > { %19334 = vst [vmem:[#allocation7_spill] sm:$0xff] %v16385_v62  ;;  %6656 = vmatpush1.msra.mxu0 %v19336_v55  ;;  %10805 = vmatpush3.msra.mxu1 %v11073_v29  ;;  %v19340_v43 = vld [vmem:[#allocation42_spill] sm:$0xff]  ;;  %v16459_v46 = vpop.permute.xlu0 %7289 }
 0x37a   : > { %9574 = vmatprep.mubr.msk.f32.mxu1 %vm5533_vm13, %v18734_v53  ;;  %10764 = vmatmul.mubr.msk.f32.gmra.mxu0 %vm5546_vm14, %v18734_v53  ;;  %v16396_v7 = vpop.f32.mrf.mxu0  ;;  %v16398_v4 = vpop.permute.xlu1 %7287  ;;  %v3751_v42 = vadd.f32 %v15930_v9, %v19340_v43  ;;  %19350 = vst [vmem:[#allocation164_spill] sm:$0xff] %v16459_v46  ;;  %vm5545_vm13 = vcmp.eq.s32.totalorder %v11690_v56, %v19337_v35 }
 0x37b   : > { %19338 = vst [vmem:[#allocation8_spill] sm:$0xff] %v16398_v4  ;;  %6657 = vmatprep.subr.mxu0 %v18592_v1  ;;  %7439 = vrot.lane.b32.xlu1 %v3741_v50, %s11108_s18  ;;  %v16404_v55 = vpop.f32.mrf.mxu1  ;;  %v4450_v4 = vadd.f32 %v15981_v51, %v16088_v25  ;;  %v19346_v51 = vld [vmem:[#allocation186_spill] sm:$0xff]  ;;  %v11074_v25 = vld [vmem:[%s18254_s2 + $0x168] sm:$0xff] }
 0x37c   : > { %10766 = vmatprep.mubr.msk.f32.mxu0 %vm5549_vm15, %v18734_v53  ;;  %6658 = vmatpush1.msra.mxu0 %v15765_v12  ;;  %v19341_v12 = vld [vmem:[#allocation51_spill] sm:$0xff] }
 0x37d   : > { %6659 = vmatprep.subr.mxu0 %v18592_v1  ;;  %9575 = vmatmul.mubr.msk.f32.gmra.mxu1 %vm5532_vm0, %v18734_v53  ;;  %v16414_v29 = vpop.f32.mrf.mxu0  ;;  %v4266_v50 = vpop.f32.mrf.mxu1  ;;  %vm5544_vm0 = vcmp.eq.s32.totalorder %v11685_v54, %v19337_v35  ;;  %v19364_v35 = vld [vmem:[#allocation77_spill] sm:$0xff] }
 0x37e   : > { %6660 = vmatpush1.msra.mxu0 %v19341_v12  ;;  %9576 = vmatprep.mubr.msk.f32.mxu1 %vm5536_vm1, %v18734_v53  ;;  %v16426_v62 = vpop.permute.xlu1 %7291  ;;  %v19345_v50 = vld [vmem:[#allocation174_spill] sm:$0xff]  ;;  %vm5548_vm1 = vcmp.eq.s32.totalorder %v11690_v56, %v19339_v32 }
 0x37f   : > { %19344 = vst [vmem:[#allocation16_spill] sm:$0xff] %v16426_v62  ;;  %10767 = vmatmul.mubr.msk.f32.gmra.mxu0 %vm5552_vm2, %v18734_v53  ;;  %6661 = vmatprep.subr.mxu0 %v18592_v1  ;;  %vm5555_vm3 = vcmp.eq.s32.totalorder %v18663_v18, %v19345_v50  ;;  %v16432_v9 = vpop.f32.mrf.mxu0  ;;  %v4435_v62 = vadd.f32 %v15947_v28, %v15960_v6 }
 0x380   : > { %7443 = vrot.lane.b32.xlu1 %v3751_v42, %s11108_s18  ;;  %10769 = vmatprep.mubr.msk.f32.mxu0 %vm5555_vm3, %v18734_v53  ;;  %v19348_v42 = vld [vmem:[#allocation144_spill] sm:$0xff]  ;;  %vm5576_vm2 = vcmp.eq.s32.totalorder %v18663_v18, %v19364_v35 }
 0x381   : > { %6662 = vmatpush1.msra.mxu0 %v19346_v51  ;;  %10806 = vmatprep.subr.mxu1 %v11074_v25  ;;  %v16440_v43 = vpop.f32.mrf.mxu1 }
 0x382   : > { %6663 = vmatprep.subr.mxu0 %v18592_v1  ;;  %7517 = vrot.lane.b32.xlu0 %v4450_v4, %s11109_s17  ;;  %v16446_v12 = vpop.permute.xlu1 %7295  ;;  %v19349_v4 = vld [vmem:[#allocation184_spill] sm:$0xff] }
 0x383   : > { %19347 = vst [vmem:[#allocation155_spill] sm:$0xff] %v16446_v12  ;;  %9577 = vmatmul.mubr.msk.f32.gmra.mxu1 %vm5535_vm4, %v18734_v53  ;;  %6664 = vmatpush1.msra.mxu0 %v19348_v42  ;;  %v16452_v51 = vpop.f32.mrf.mxu0  ;;  %vm5558_vm6 = vcmp.eq.s32.totalorder %v18663_v18, %v19349_v4  ;;  %v4271_v12 = vpop.f32.mrf.mxu1  ;;  %v19351_v42 = vld [vmem:[#allocation18_spill] sm:$0xff]  ;;  %vm5547_vm4 = vcmp.eq.s32.totalorder %v11685_v54, %v19339_v32 }
 0x384   : > { %10807 = vmatpush3.msra.mxu1 %v11074_v25  ;;  %9578 = vmatprep.mubr.msk.f32.mxu1 %vm5539_vm5, %v18734_v53  ;;  %vm5561_vm7 = vcmp.eq.s32.totalorder %v18663_v18, %v19351_v42  ;;  %v4445_v12 = vadd.f32 %v15991_v0, %v16048_v34  ;;  %vm5551_vm5 = vcmp.eq.s32.totalorder %v11690_v56, %v19342_v2 }
 0x385   : > { %10770 = vmatmul.mubr.msk.f32.gmra.mxu0 %vm5558_vm6, %v18734_v53  ;;  %6665 = vmatprep.subr.mxu0 %v18592_v1  ;;  %v16465_v57 = vpop.f32.mrf.mxu0 }
 0x386   : > { %7511 = vrot.lane.b32.xlu1 %v4435_v62, %s11109_s17  ;;  %10772 = vmatprep.mubr.msk.f32.mxu0 %vm5561_vm7, %v18734_v53  ;;  %v16471_v28 = vpop.f32.mrf.mxu1  ;;  %v16473_v6 = vpop.permute.xlu1 %7299  ;;  %v4460_v62 = vadd.f32 %v16014_v14, %v16176_v39  ;;  %v19354_v14 = vld [vmem:[#allocation60_spill] sm:$0xff] }
 0x387   : > { %19352 = vst [vmem:[#allocation173_spill] sm:$0xff] %v16473_v6  ;;  %6666 = vmatpush1.msra.mxu0 %v15851_v38  ;;  %9579 = vmatmul.mubr.msk.f32.gmra.mxu1 %vm5538_vm8, %v18734_v53  ;;  %v19353_v38 = vld [vmem:[#allocation27_spill] sm:$0xff]  ;;  %v11075_v6 = vld [vmem:[%s18254_s2 + $0x160] sm:$0xff]  ;;  %vm5567_vm11 = vcmp.eq.s32.totalorder %v18663_v18, %v19354_v14  ;;  %v16497_v39 = vpop.permute.xlu0 %7293  ;;  %vm5550_vm8 = vcmp.eq.s32.totalorder %v11685_v54, %v19342_v2  ;;  %v19374_v2 = vld [vmem:[#allocation73_spill] sm:$0xff] }
 0x388   : > { %6667 = vmatprep.subr.mxu0 %v18592_v1  ;;  %9580 = vmatprep.mubr.msk.f32.mxu1 %vm5542_vm9, %v18734_v53  ;;  %v16483_v25 = vpop.f32.mrf.mxu0  ;;  %v4276_v36 = vpop.f32.mrf.mxu1  ;;  %vm5564_vm10 = vcmp.eq.s32.totalorder %v18663_v18, %v19353_v38  ;;  %19355 = vst [vmem:[#allocation166_spill] sm:$0xff] %v16497_v39  ;;  %v19358_v39 = vld [vmem:[#allocation132_spill] sm:$0xff]  ;;  %vm5554_vm9 = vcmp.eq.s32.totalorder %v11690_v56, %v19345_v50 }
 0x389   : > { %6668 = vmatpush1.msra.mxu0 %v15870_v44  ;;  %10808 = vmatprep.subr.mxu1 %v11075_v6  ;;  %v19356_v44 = vld [vmem:[#allocation89_spill] sm:$0xff] }
 0x38a   : > { %10773 = vmatmul.mubr.msk.f32.gmra.mxu0 %vm5564_vm10, %v18734_v53  ;;  %6669 = vmatprep.subr.mxu0 %v18592_v1  ;;  %v16499_v0 = vpop.f32.mrf.mxu0 }
 0x38b   : > { %7515 = vrot.lane.b32.xlu1 %v4445_v12, %s11109_s17  ;;  %10775 = vmatprep.mubr.msk.f32.mxu0 %vm5567_vm11, %v18734_v53  ;;  %v16509_v36 = vpop.permute.xlu1 %7303  ;;  %v4455_v12 = vadd.f32 %v16033_v45, %v16134_v17  ;;  %v19360_v45 = vld [vmem:[#allocation180_spill] sm:$0xff]  ;;  %v16528_v17 = vpop.permute.xlu0 %7297  ;;  %vm5591_vm11 = vcmp.eq.s32.totalorder %v18663_v18, %v19374_v2 }
 0x38c   : > { %6670 = vmatpush1.msra.mxu0 %v19356_v44  ;;  %7521 = vrot.lane.b32.xlu0 %v4460_v62, %s11109_s17  ;;  %v16507_v34 = vpop.f32.mrf.mxu1  ;;  %19357 = vst [vmem:[#allocation105_spill] sm:$0xff] %v16509_v36  ;;  %v19359_v62 = vld [vmem:[#allocation22_spill] sm:$0xff]  ;;  %vm5573_vm15 = vcmp.eq.s32.totalorder %v18663_v18, %v19360_v45  ;;  %19361 = vst [vmem:[#allocation178_spill] sm:$0xff] %v16528_v17  ;;  %v19363_v36 = vld [vmem:[#allocation133_spill] sm:$0xff] }
 0x38d   : > { %6671 = vmatprep.subr.mxu0 %v18592_v1  ;;  %9581 = vmatmul.mubr.msk.f32.gmra.mxu1 %vm5541_vm12, %v18734_v53  ;;  %vm5570_vm14 = vcmp.eq.s32.totalorder %v18663_v18, %v19359_v62  ;;  %vm5553_vm12 = vcmp.eq.s32.totalorder %v11685_v54, %v19345_v50 }
 0x38e   : > { %6672 = vmatpush1.msra.mxu0 %v19358_v39  ;;  %10809 = vmatpush3.msra.mxu1 %v11075_v6  ;;  %v16520_v61 = vpop.f32.mrf.mxu0  ;;  %v4281_v44 = vpop.f32.mrf.mxu1 }
 0x38f   : > { %9582 = vmatprep.mubr.msk.f32.mxu1 %vm5545_vm13, %v18734_v53  ;;  %10776 = vmatmul.mubr.msk.f32.gmra.mxu0 %vm5570_vm14, %v18734_v53  ;;  %v4465_v44 = vadd.f32 %v16079_v48, %v16222_v31  ;;  %v19366_v31 = vld [vmem:[#allocation6_spill] sm:$0xff]  ;;  %vm5557_vm13 = vcmp.eq.s32.totalorder %v11690_v56, %v19349_v4 }
 0x390   : > { %6673 = vmatprep.subr.mxu0 %v18592_v1  ;;  %7519 = vrot.lane.b32.xlu1 %v4455_v12, %s11109_s17  ;;  %v16530_v6 = vpop.f32.mrf.mxu0  ;;  %v16542_v12 = vpop.permute.xlu1 %7307 }
 0x391   : > { %10778 = vmatprep.mubr.msk.f32.mxu0 %vm5573_vm15, %v18734_v53  ;;  %6674 = vmatpush1.msra.mxu0 %v15937_v16  ;;  %v16536_v39 = vpop.f32.mrf.mxu1  ;;  %19362 = vst [vmem:[#allocation54_spill] sm:$0xff] %v16542_v12  ;;  %v4470_v16 = vadd.f32 %v16065_v49, %v16262_v30  ;;  %v19365_v12 = vld [vmem:[#allocation182_spill] sm:$0xff]  ;;  %v11076_v30 = vld [vmem:[%s18254_s2 + $0x158] sm:$0xff] }
 0x392   : > { %6675 = vmatprep.subr.mxu0 %v18592_v1  ;;  %9583 = vmatmul.mubr.msk.f32.gmra.mxu1 %vm5544_vm0, %v18734_v53  ;;  %vm5579_vm3 = vcmp.eq.s32.totalorder %v18663_v18, %v19365_v12  ;;  %vm5556_vm0 = vcmp.eq.s32.totalorder %v11685_v54, %v19349_v4  ;;  %v19382_v4 = vld [vmem:[#allocation68_spill] sm:$0xff] }
 0x393   : > { %6676 = vmatpush1.msra.mxu0 %v19363_v36  ;;  %9584 = vmatprep.mubr.msk.f32.mxu1 %vm5548_vm1, %v18734_v53  ;;  %v16552_v17 = vpop.f32.mrf.mxu0  ;;  %v4286_v46 = vpop.f32.mrf.mxu1  ;;  %vm5560_vm1 = vcmp.eq.s32.totalorder %v11690_v56, %v19351_v42 }
 0x394   : > { %10779 = vmatmul.mubr.msk.f32.gmra.mxu0 %vm5576_vm2, %v18734_v53  ;;  %6677 = vmatprep.subr.mxu0 %v18592_v1  ;;  %v16566_v46 = vpop.permute.xlu0 %7301 }
 0x395   : > { %7523 = vrot.lane.b32.xlu1 %v4465_v44, %s11109_s17  ;;  %10781 = vmatprep.mubr.msk.f32.mxu0 %vm5579_vm3, %v18734_v53  ;;  %v5045_v48 = vpop.f32.mrf.mxu0  ;;  %v16560_v49 = vpop.f32.mrf.mxu1  ;;  %19367 = vst [vmem:[#allocation14_spill] sm:$0xff] %v16566_v46  ;;  %vm5603_vm3 = vcmp.eq.s32.totalorder %v18663_v18, %v19382_v4 }
 0x396   : > { %6678 = vmatpush2.msra.mxu0 %v19366_v31  ;;  %10810 = vmatprep.subr.mxu1 %v11076_v30  ;;  %v4475_v48 = vadd.f32 %v16121_v5, %v16308_v47  ;;  %v19368_v31 = vld [vmem:[#allocation187_spill] sm:$0xff]  ;;  %v16580_v46 = vpop.permute.xlu1 %7311 }
 0x397   : > { %6679 = vmatprep.subr.mxu0 %v18592_v1  ;;  %7525 = vrot.lane.b32.xlu0 %v4470_v16, %s11109_s17  ;;  %v16572_v36 = vpop.f32.mrf.mxu0  ;;  %v4291_v44 = vpop.f32.mrf.mxu1  ;;  %19369 = vst [vmem:[#allocation148_spill] sm:$0xff] %v16580_v46  ;;  %v19370_v16 = vld [vmem:[#allocation137_spill] sm:$0xff]  ;;  %v19371_v5 = vld [vmem:[#allocation59_spill] sm:$0xff] }
 0x398   : > { %9585 = vmatmul.mubr.msk.f32.gmra.mxu1 %vm5547_vm4, %v18734_v53  ;;  %6680 = vmatpush2.msra.mxu0 %v19368_v31  ;;  %vm5582_vm6 = vcmp.eq.s32.totalorder %v18663_v18, %v19370_v16  ;;  %vm5585_vm7 = vcmp.eq.s32.totalorder %v18663_v18, %v19371_v5  ;;  %v4480_v31 = vadd.f32 %v16100_v23, %v16337_v8 }
 0x399   : > { %10811 = vmatpush3.msra.mxu1 %v11076_v30  ;;  %9586 = vmatprep.mubr.msk.f32.mxu1 %vm5551_vm5, %v18734_v53  ;;  %v5050_v32 = vpop.f32.mrf.mxu0  ;;  %vm5559_vm4 = vcmp.eq.s32.totalorder %v11685_v54, %v19351_v42  ;;  %vm5563_vm5 = vcmp.eq.s32.totalorder %v11690_v56, %v19353_v38 }
 0x39a   : > { %10782 = vmatmul.mubr.msk.f32.gmra.mxu0 %vm5582_vm6, %v18734_v53  ;;  %6681 = vmatprep.subr.mxu0 %v18592_v1  ;;  %v16589_v47 = vpop.f32.mrf.mxu1  ;;  %v16615_v8 = vpop.permute.xlu1 %7315 }
 0x39b   : > { %10784 = vmatprep.mubr.msk.f32.mxu0 %vm5585_vm7, %v18734_v53  ;;  %6682 = vmatpush2.msra.mxu0 %v16021_v11  ;;  %v16593_v30 = vpop.f32.mrf.mxu0  ;;  %v19372_v11 = vld [vmem:[#allocation125_spill] sm:$0xff]  ;;  %19375 = vst [vmem:[#allocation57_spill] sm:$0xff] %v16615_v8  ;;  %v4485_v8 = vadd.f32 %v16165_v58, %v16373_v15 }
 0x39c   : > { %7527 = vrot.lane.b32.xlu1 %v4475_v48, %s11109_s17  ;;  %6683 = vmatprep.subr.mxu0 %v18592_v1  ;;  %v4296_v44 = vpop.f32.mrf.mxu1  ;;  %vm5588_vm10 = vcmp.eq.s32.totalorder %v18663_v18, %v19372_v11  ;;  %v16607_v48 = vpop.permute.xlu0 %7305 }
 0x39d   : > { %9587 = vmatmul.mubr.msk.f32.gmra.mxu1 %vm5550_vm8, %v18734_v53  ;;  %6684 = vmatpush2.msra.mxu0 %v16040_v52  ;;  %19373 = vst [vmem:[#allocation106_spill] sm:$0xff] %v16607_v48  ;;  %v5055_v32 = vpop.f32.mrf.mxu0  ;;  %v19376_v44 = vld [vmem:[#allocation115_spill] sm:$0xff]  ;;  %vm5562_vm8 = vcmp.eq.s32.totalorder %v11685_v54, %v19353_v38  ;;  %v19391_v38 = vld [vmem:[#allocation58_spill] sm:$0xff] }
 0x39e   : > { %9588 = vmatprep.mubr.msk.f32.mxu1 %vm5554_vm9, %v18734_v53  ;;  %10785 = vmatmul.mubr.msk.f32.gmra.mxu0 %vm5588_vm10, %v18734_v53  ;;  %v16613_v23 = vpop.f32.mrf.mxu1  ;;  %v11077_v32 = vld [vmem:[%s18254_s2 + $0x150] sm:$0xff]  ;;  %vm5566_vm9 = vcmp.eq.s32.totalorder %v11690_v56, %v19354_v14 }
 0x39f   : > { %6685 = vmatprep.subr.mxu0 %v18592_v1  ;;  %10787 = vmatprep.mubr.msk.f32.mxu0 %vm5591_vm11, %v18734_v53  ;;  %v16619_v52 = vpop.f32.mrf.mxu0  ;;  %v16648_v58 = vpop.permute.xlu1 %7383  ;;  %vm5615_vm11 = vcmp.eq.s32.totalorder %v18663_v18, %v19391_v38 }
 0x3a0   : > { %6686 = vmatpush2.msra.mxu0 %v19376_v44  ;;  %10812 = vmatprep.subr.mxu1 %v11077_v32  ;;  %v4301_v46 = vpop.f32.mrf.mxu1  ;;  %v16640_v50 = vpop.permute.xlu0 %7309  ;;  %19380 = vst [vmem:[#allocation62_spill] sm:$0xff] %v16648_v58 }
 0x3a1   : > { %6687 = vmatprep.subr.mxu0 %v18592_v1  ;;  %7529 = vrot.lane.b32.xlu0 %v4480_v31, %s11109_s17  ;;  %v5060_v48 = vpop.f32.mrf.mxu0  ;;  %v19377_v46 = vld [vmem:[#allocation108_spill] sm:$0xff]  ;;  %19378 = vst [vmem:[#allocation171_spill] sm:$0xff] %v16640_v50  ;;  %v4490_v50 = vadd.f32 %v16153_v59, %v16404_v55 }
 0x3a2   : > { %9589 = vmatmul.mubr.msk.f32.gmra.mxu1 %vm5553_vm12, %v18734_v53  ;;  %6688 = vmatpush2.msra.mxu0 %v16085_v26  ;;  %v16635_v44 = vpop.f32.mrf.mxu1  ;;  %vm5594_vm14 = vcmp.eq.s32.totalorder %v18663_v18, %v19377_v46  ;;  %v19379_v26 = vld [vmem:[#allocation185_spill] sm:$0xff]  ;;  %vm5565_vm12 = vcmp.eq.s32.totalorder %v11685_v54, %v19354_v14 }
 0x3a3   : > { %10813 = vmatpush3.msra.mxu1 %v11077_v32  ;;  %9590 = vmatprep.mubr.msk.f32.mxu1 %vm5557_vm13, %v18734_v53  ;;  %v16642_v31 = vpop.f32.mrf.mxu0  ;;  %vm5597_vm15 = vcmp.eq.s32.totalorder %v18663_v18, %v19379_v26  ;;  %vm5569_vm13 = vcmp.eq.s32.totalorder %v11690_v56, %v19359_v62 }
 0x3a4   : > { %10788 = vmatmul.mubr.msk.f32.gmra.mxu0 %vm5594_vm14, %v18734_v53  ;;  %6689 = vmatprep.subr.mxu0 %v18592_v1  ;;  %v4306_v15 = vpop.f32.mrf.mxu1  ;;  %v16673_v55 = vpop.permute.xlu0 %7313 }
 0x3a5   : > { %10790 = vmatprep.mubr.msk.f32.mxu0 %vm5597_vm15, %v18734_v53  ;;  %6690 = vmatpush2.msra.mxu0 %v16107_v27  ;;  %v5065_v48 = vpop.f32.mrf.mxu0  ;;  %v19381_v27 = vld [vmem:[#allocation111_spill] sm:$0xff]  ;;  %19383 = vst [vmem:[#allocation181_spill] sm:$0xff] %v16673_v55 }
 0x3a6   : > { %7531 = vrot.lane.b32.xlu1 %v4485_v8, %s11109_s17  ;;  %6691 = vmatprep.subr.mxu0 %v18592_v1  ;;  %v16656_v32 = vpop.f32.mrf.mxu1  ;;  %vm5600_vm2 = vcmp.eq.s32.totalorder %v18663_v18, %v19381_v27  ;;  %v11078_v15 = vld [vmem:[%s18254_s2 + $0x148] sm:$0xff]  ;;  %v16680_v48 = vpop.permute.xlu1 %7387 }
 0x3a7   : > { %9591 = vmatmul.mubr.msk.f32.gmra.mxu1 %vm5556_vm0, %v18734_v53  ;;  %6692 = vmatpush2.msra.mxu0 %v16128_v24  ;;  %v16666_v8 = vpop.f32.mrf.mxu0  ;;  %19384 = vst [vmem:[#allocation172_spill] sm:$0xff] %v16680_v48  ;;  %v4500_v48 = vadd.f32 %v16188_v22, %v16471_v28  ;;  %vm5568_vm0 = vcmp.eq.s32.totalorder %v11685_v54, %v19359_v62 }
 0x3a8   : > { %9592 = vmatprep.mubr.msk.f32.mxu1 %vm5560_vm1, %v18734_v53  ;;  %10791 = vmatmul.mubr.msk.f32.gmra.mxu0 %vm5600_vm2, %v18734_v53  ;;  %v4311_v59 = vpop.f32.mrf.mxu1  ;;  %vm5572_vm2 = vcmp.eq.s32.totalorder %v11690_v56, %v19360_v45 }
 0x3a9   : > { %6693 = vmatprep.subr.mxu0 %v18592_v1  ;;  %10793 = vmatprep.mubr.msk.f32.mxu0 %vm5603_vm3, %v18734_v53  ;;  %v5070_v24 = vpop.f32.mrf.mxu0 }
 0x3aa   : > { %6694 = vmatpush2.msra.mxu0 %v16147_v41  ;;  %10814 = vmatprep.subr.mxu1 %v11078_v15  ;;  %v16682_v58 = vpop.f32.mrf.mxu1  ;;  %v4495_v41 = vadd.f32 %v16207_v40, %v16440_v43  ;;  %v19385_v24 = vld [vmem:[#allocation10_spill] sm:$0xff] }
 0x3ab   : > { %6695 = vmatprep.subr.mxu0 %v18592_v1  ;;  %7533 = vrot.lane.b32.xlu0 %v4490_v50, %s11109_s17  ;;  %v16688_v59 = vpop.f32.mrf.mxu0  ;;  %v19386_v50 = vld [vmem:[#allocation85_spill] sm:$0xff]  ;;  %v19387_v40 = vld [vmem:[#allocation66_spill] sm:$0xff] }
 0x3ac   : > { %9593 = vmatmul.mubr.msk.f32.gmra.mxu1 %vm5559_vm4, %v18734_v53  ;;  %6696 = vmatpush2.msra.mxu0 %v19385_v24  ;;  %v4316_v55 = vpop.f32.mrf.mxu1  ;;  %vm5606_vm6 = vcmp.eq.s32.totalorder %v18663_v18, %v19386_v50  ;;  %vm5609_vm7 = vcmp.eq.s32.totalorder %v18663_v18, %v19387_v40  ;;  %v16705_v24 = vpop.permute.xlu0 %7317  ;;  %vm5571_vm4 = vcmp.eq.s32.totalorder %v11685_v54, %v19360_v45 }
 0x3ad   : > { %10815 = vmatpush3.msra.mxu1 %v11078_v15  ;;  %9594 = vmatprep.mubr.msk.f32.mxu1 %vm5563_vm5, %v18734_v53  ;;  %v5075_v42 = vpop.f32.mrf.mxu0  ;;  %19388 = vst [vmem:[#allocation42_spill] sm:$0xff] %v16705_v24  ;;  %v16715_v15 = vpop.permute.xlu1 %7391  ;;  %v4505_v24 = vadd.f32 %v16249_v63, %v16507_v34  ;;  %v19393_v63 = vld [vmem:[#allocation109_spill] sm:$0xff]  ;;  %vm5575_vm5 = vcmp.eq.s32.totalorder %v11690_v56, %v19364_v35 }
 0x3ae   : > { %10794 = vmatmul.mubr.msk.f32.gmra.mxu0 %vm5606_vm6, %v18734_v53  ;;  %6697 = vmatprep.subr.mxu0 %v18592_v1  ;;  %v16703_v43 = vpop.f32.mrf.mxu1  ;;  %19389 = vst [vmem:[#allocation51_spill] sm:$0xff] %v16715_v15  ;;  %vm6358_vm15 = vcmp.eq.s32.totalorder %v11690_v56, %v19393_v63  ;;  %vm6357_vm1 = vcmp.eq.s32.totalorder %v11685_v54, %v19393_v63 }
 0x3af   : > { %10796 = vmatprep.mubr.msk.f32.mxu0 %vm5609_vm7, %v18734_v53  ;;  %6698 = vmatpush2.msra.mxu0 %v16195_v13  ;;  %v16709_v55 = vpop.f32.mrf.mxu0  ;;  %v19390_v13 = vld [vmem:[#allocation13_spill] sm:$0xff] }
 0x3b0   : > { %7535 = vrot.lane.b32.xlu1 %v4495_v41, %s11109_s17  ;;  %6699 = vmatprep.subr.mxu0 %v18592_v1  ;;  %v4321_v42 = vpop.f32.mrf.mxu1  ;;  %vm5612_vm10 = vcmp.eq.s32.totalorder %v18663_v18, %v19390_v13 }
 0x3b1   : > { %9595 = vmatmul.mubr.msk.f32.gmra.mxu1 %vm5562_vm8, %v18734_v53  ;;  %6700 = vmatpush2.msra.mxu0 %v16216_v20  ;;  %v5080_v41 = vpop.f32.mrf.mxu0  ;;  %v11079_v20 = vld [vmem:[%s18254_s2 + $0x140] sm:$0xff]  ;;  %vm5574_vm8 = vcmp.eq.s32.totalorder %v11685_v54, %v19364_v35  ;;  %v19400_v35 = vld [vmem:[#allocation161_spill] sm:$0xff] }
 0x3b2   : > { %9596 = vmatprep.mubr.msk.f32.mxu1 %vm5566_vm9, %v18734_v53  ;;  %10797 = vmatmul.mubr.msk.f32.gmra.mxu0 %vm5612_vm10, %v18734_v53  ;;  %v16729_v42 = vpop.f32.mrf.mxu1  ;;  %v16739_v41 = vpop.permute.xlu0 %7385  ;;  %vm5578_vm9 = vcmp.eq.s32.totalorder %v11690_v56, %v19365_v12 }
 0x3b3   : > { %6701 = vmatprep.subr.mxu0 %v18592_v1  ;;  %10799 = vmatprep.mubr.msk.f32.mxu0 %vm5615_vm11, %v18734_v53  ;;  %v16733_v22 = vpop.f32.mrf.mxu0 }
 0x3b4   : > { %6702 = vmatpush2.msra.mxu0 %v16233_v33  ;;  %10816 = vmatprep.subr.mxu1 %v11079_v20  ;;  %v4326_v28 = vpop.f32.mrf.mxu1  ;;  %v16751_v33 = vpop.permute.xlu1 %7395 }
 0x3b5   : > { %6703 = vmatprep.subr.mxu0 %v18592_v1  ;;  %7537 = vrot.lane.b32.xlu0 %v4500_v48, %s11109_s17  ;;  %v5085_v15 = vpop.f32.mrf.mxu0  ;;  %v19392_v48 = vld [vmem:[#allocation11_spill] sm:$0xff] }
 0x3b6   : > { %9597 = vmatmul.mubr.msk.f32.gmra.mxu1 %vm5565_vm12, %v18734_v53  ;;  %6704 = vmatpush2.msra.mxu0 %v16254_v19  ;;  %v16753_v28 = vpop.f32.mrf.mxu1  ;;  %vm5618_vm14 = vcmp.eq.s32.totalorder %v18663_v18, %v19392_v48  ;;  %v4510_v15 = vadd.f32 %v16241_v37, %v16536_v39  ;;  %vm5577_vm12 = vcmp.eq.s32.totalorder %v11685_v54, %v19365_v12 }
 0x3b7   : > { %10817 = vmatpush3.msra.mxu1 %v11079_v20  ;;  %9598 = vmatprep.mubr.msk.f32.mxu1 %vm5569_vm13, %v18734_v53  ;;  %v16758_v14 = vpop.f32.mrf.mxu0  ;;  %vm5581_vm13 = vcmp.eq.s32.totalorder %v11690_v56, %v19370_v16  ;;  %v4545_v12 = vadd.f32 %v16396_v7, %v16703_v43  ;;  %v19404_v43 = vld [vmem:[#allocation7_spill] sm:$0xff] }
 0x3b8   : > { %10800 = vmatmul.mubr.msk.f32.gmra.mxu0 %vm5618_vm14, %v18734_v53  ;;  %6705 = vmatprep.subr.mxu0 %v18592_v1  ;;  %v4331_v19 = vpop.f32.mrf.mxu1  ;;  %v16790_v62 = vpop.permute.xlu1 %7399 }
 0x3b9   : > { %6706 = vmatpush2.msra.mxu0 %v16283_v10  ;;  %9760 = vmatprep.mubr.msk.f32.mxu0 %vm6358_vm15, %v18734_v53  ;;  %v5090_v34 = vpop.f32.mrf.mxu0  ;;  %v16776_v19 = vpop.permute.xlu0 %7389  ;;  %v19394_v10 = vld [vmem:[#allocation117_spill] sm:$0xff]  ;;  %19395 = vst [vmem:[#allocation69_spill] sm:$0xff] %v16790_v62 }
 0x3ba   : > { %7539 = vrot.lane.b32.xlu1 %v4505_v24, %s11109_s17  ;;  %6707 = vmatprep.subr.mxu0 %v18592_v1  ;;  %v16772_v20 = vpop.f32.mrf.mxu1  ;;  %v4515_v1 = vadd.f32 %v16291_v60, %v16560_v49  ;;  %vm6361_vm3 = vcmp.eq.s32.totalorder %v11690_v56, %v19394_v10  ;;  %v19396_v49 = vld [vmem:[#allocation150_spill] sm:$0xff]  ;;  %vm6360_vm6 = vcmp.eq.s32.totalorder %v11685_v54, %v19394_v10 }
 0x3bb   : > { %9599 = vmatmul.mubr.msk.f32.gmra.mxu1 %vm5568_vm0, %v18734_v53  ;;  %6708 = vmatpush2.msra.mxu0 %v16302_v3  ;;  %v16784_v37 = vpop.f32.mrf.mxu0  ;;  %v11080_v3 = vld [vmem:[%s18254_s2 + $0x138] sm:$0xff]  ;;  %v4520_v24 = vadd.f32 %v19396_v49, %v16589_v47  ;;  %v19397_v47 = vld [vmem:[#allocation83_spill] sm:$0xff]  ;;  %vm5580_vm0 = vcmp.eq.s32.totalorder %v11685_v54, %v19370_v16  ;;  %v4555_v16 = vadd.f32 %v16432_v9, %v16753_v28 }
 0x3bc   : > { %9600 = vmatprep.mubr.msk.f32.mxu1 %vm5572_vm2, %v18734_v53  ;;  %9761 = vmatmul.mubr.msk.f32.vlgmr.msra.gmra.mxu0 %vm6357_vm1, %v18734_v53  ;;  %v4336_v39 = vpop.f32.mrf.mxu1  ;;  %vm6364_vm7 = vcmp.eq.s32.totalorder %v11690_v56, %v19397_v47  ;;  %v16828_v49 = vpop.permute.xlu1 %7403  ;;  %vm6363_vm10 = vcmp.eq.s32.totalorder %v11685_v54, %v19397_v47  ;;  %vm5584_vm1 = vcmp.eq.s32.totalorder %v11690_v56, %v19371_v5 }
 0x3bd   : > { %9762 = vmatprep.mubr.msk.f32.mxu0 %vm6361_vm3, %v18734_v53  ;;  %10818 = vmatprep.subr.mxu1 %v11080_v3  ;;  %v5095_v60 = vpop.f32.mrf.mxu0  ;;  %19399 = vst [vmem:[#allocation174_spill] sm:$0xff] %v16828_v49  ;;  %v4560_v28 = vadd.f32 %v16414_v29, %v16772_v20  ;;  %v19406_v29 = vld [vmem:[#allocation128_spill] sm:$0xff] }
 0x3be   : > { %7541 = vrot.lane.b32.xlu0 %v4510_v15, %s11109_s17  ;;  %10819 = vmatpush3.msra.mxu1 %v11080_v3  ;;  %v16801_v34 = vpop.f32.mrf.mxu1  ;;  %v4525_v15 = vadd.f32 %v16331_v21, %v16613_v23  ;;  %v16817_v3 = vpop.permute.xlu0 %7393  ;;  %v19398_v23 = vld [vmem:[#allocation139_spill] sm:$0xff] }
 0x3bf   : > { %9601 = vmatmul.mubr.msk.f32.gmra.mxu1 %vm5571_vm4, %v18734_v53  ;;  %7543 = vrot.lane.b32.xlu1 %v4515_v1, %s11109_s17  ;;  %v16811_v45 = vpop.f32.mrf.mxu0  ;;  %v11081_v1 = vld [vmem:[%s18254_s2 + $0x130] sm:$0xff]  ;;  %v4530_v60 = vadd.f32 %v19398_v23, %v16635_v44  ;;  %v19401_v44 = vld [vmem:[#allocation82_spill] sm:$0xff]  ;;  %v11082_v23 = vld [vmem:[%s18254_s2 + $0x128] sm:$0xff]  ;;  %vm5583_vm4 = vcmp.eq.s32.totalorder %v11685_v54, %v19371_v5  ;;  %v4565_v5 = vadd.f32 %v16465_v57, %v16801_v34 }
 0x3c0   : > { %9602 = vmatprep.mubr.msk.f32.mxu1 %vm5575_vm5, %v18734_v53  ;;  %9763 = vmatmul.mubr.msk.f32.gmra.mxu0 %vm6360_vm6, %v18734_v53  ;;  %v4341_v39 = vpop.f32.mrf.mxu1  ;;  %vm6367_vm11 = vcmp.eq.s32.totalorder %v11690_v56, %v19401_v44  ;;  %vm6366_vm14 = vcmp.eq.s32.totalorder %v11685_v54, %v19401_v44  ;;  %vm5587_vm5 = vcmp.eq.s32.totalorder %v11690_v56, %v19372_v11 }
 0x3c1   : > { %9764 = vmatprep.mubr.msk.f32.mxu0 %vm6364_vm7, %v18734_v53  ;;  %10820 = vmatprep.subr.mxu1 %v11081_v1  ;;  %v5100_v21 = vpop.f32.mrf.mxu0  ;;  %vm6376_vm7 = vcmp.eq.s32.totalorder %v11690_v56, %v19406_v29 }
 0x3c2   : > { %7545 = vrot.lane.b32.xlu0 %v4520_v24, %s11109_s17  ;;  %10821 = vmatpush3.msra.mxu1 %v11081_v1  ;;  %v16830_v39 = vpop.f32.mrf.mxu1  ;;  %v4535_v24 = vadd.f32 %v19400_v35, %v16656_v32  ;;  %v19402_v32 = vld [vmem:[#allocation126_spill] sm:$0xff] }
 0x3c3   : > { %9603 = vmatmul.mubr.msk.f32.gmra.mxu1 %vm5574_vm8, %v18734_v53  ;;  %7547 = vrot.lane.b32.xlu1 %v4525_v15, %s11109_s17  ;;  %v16840_v1 = vpop.f32.mrf.mxu0  ;;  %v4540_v35 = vadd.f32 %v19402_v32, %v16682_v58  ;;  %v19403_v58 = vld [vmem:[#allocation86_spill] sm:$0xff]  ;;  %v4550_v32 = vadd.f32 %v19404_v43, %v16729_v42  ;;  %v19405_v42 = vld [vmem:[#allocation129_spill] sm:$0xff]  ;;  %vm5586_vm8 = vcmp.eq.s32.totalorder %v11685_v54, %v19372_v11 }
 0x3c4   : > { %9604 = vmatprep.mubr.msk.f32.mxu1 %vm5578_vm9, %v18734_v53  ;;  %9765 = vmatmul.mubr.msk.f32.gmra.mxu0 %vm6363_vm10, %v18734_v53  ;;  %v4346_v21 = vpop.f32.mrf.mxu1  ;;  %vm6370_vm15 = vcmp.eq.s32.totalorder %v11690_v56, %v19403_v58  ;;  %vm6369_vm2 = vcmp.eq.s32.totalorder %v11685_v54, %v19403_v58  ;;  %vm6373_vm3 = vcmp.eq.s32.totalorder %v11690_v56, %v19405_v42 }
 0x3c5   : > { %9766 = vmatprep.mubr.msk.f32.mxu0 %vm6367_vm11, %v18734_v53  ;;  %10822 = vmatprep.subr.mxu1 %v11082_v23  ;;  %v5105_v15 = vpop.f32.mrf.mxu0  ;;  %v16857_v21 = vpop.permute.xlu0 %7397  ;;  %vm6372_vm6 = vcmp.eq.s32.totalorder %v11685_v54, %v19405_v42  ;;  %v4570_v57 = vadd.f32 %v16452_v51, %v16830_v39  ;;  %vm5590_vm9 = vcmp.eq.s32.totalorder %v11690_v56, %v19374_v2  ;;  %v19407_v51 = vld [vmem:[#allocation114_spill] sm:$0xff] }
 0x3c6   : > { %7549 = vrot.lane.b32.xlu0 %v4530_v60, %s11109_s17  ;;  %10823 = vmatpush3.msra.mxu1 %v11082_v23  ;;  %v16855_v49 = vpop.f32.mrf.mxu1  ;;  %v16873_v23 = vpop.permute.xlu1 %7407  ;;  %vm6375_vm10 = vcmp.eq.s32.totalorder %v11685_v54, %v19406_v29  ;;  %vm6379_vm11 = vcmp.eq.s32.totalorder %v11690_v56, %v19407_v51 }
 0x3c7   : > { %9605 = vmatmul.mubr.msk.f32.gmra.mxu1 %vm5577_vm12, %v18734_v53  ;;  %7551 = vrot.lane.b32.xlu1 %v4535_v24, %s11109_s17  ;;  %v16867_v60 = vpop.f32.mrf.mxu0  ;;  %v11083_v24 = vld [vmem:[%s18254_s2 + $0x120] sm:$0xff]  ;;  %v4575_v11 = vadd.f32 %v16499_v0, %v16855_v49  ;;  %vm5589_vm12 = vcmp.eq.s32.totalorder %v11685_v54, %v19374_v2 }
 0x3c8   : > { %9606 = vmatprep.mubr.msk.f32.mxu1 %vm5581_vm13, %v18734_v53  ;;  %9767 = vmatmul.mubr.msk.f32.gmra.mxu0 %vm6366_vm14, %v18734_v53  ;;  %v4351_v15 = vpop.f32.mrf.mxu1  ;;  %vm5593_vm13 = vcmp.eq.s32.totalorder %v11690_v56, %v19377_v46  ;;  %vm6378_vm14 = vcmp.eq.s32.totalorder %v11685_v54, %v19407_v51 }
 0x3c9   : > { %9768 = vmatprep.mubr.msk.f32.mxu0 %vm6370_vm15, %v18734_v53  ;;  %10824 = vmatprep.subr.mxu1 %v11083_v24  ;;  %v5110_v7 = vpop.f32.mrf.mxu0 }
 0x3ca   : > { %7553 = vrot.lane.b32.xlu0 %v4540_v35, %s11109_s17  ;;  %10825 = vmatpush3.msra.mxu1 %v11083_v24  ;;  %v4354_v62 = vpop.f32.mrf.mxu1  ;;  %v16898_v24 = vpop.permute.xlu0 %7401 }
 0x3cb   : > { %9607 = vmatmul.mubr.msk.f32.gmra.mxu1 %vm5580_vm0, %v18734_v53  ;;  %7555 = vrot.lane.b32.xlu1 %v4545_v12, %s11109_s17  ;;  %v16892_v15 = vpop.f32.mrf.mxu0  ;;  %v11084_v12 = vld [vmem:[%s18254_s2 + $0x118] sm:$0xff]  ;;  %v16909_v7 = vpop.permute.xlu1 %7411  ;;  %v4580_v49 = vadd.f32 %v16483_v25, %v4354_v62  ;;  %vm5592_vm0 = vcmp.eq.s32.totalorder %v11685_v54, %v19377_v46 }
 0x3cc   : > { %9608 = vmatprep.mubr.msk.f32.mxu1 %vm5584_vm1, %v18734_v53  ;;  %9769 = vmatmul.mubr.msk.f32.gmra.mxu0 %vm6369_vm2, %v18734_v53  ;;  %v4356_v35 = vpop.f32.mrf.mxu1  ;;  %v19408_v25 = vld [vmem:[#allocation37_spill] sm:$0xff]  ;;  %vm5596_vm1 = vcmp.eq.s32.totalorder %v11690_v56, %v19379_v26 }
 0x3cd   : > { %9770 = vmatprep.mubr.msk.f32.mxu0 %vm6373_vm3, %v18734_v53  ;;  %10826 = vmatprep.subr.mxu1 %v11084_v12  ;;  %v5115_v9 = vpop.f32.mrf.mxu0  ;;  %v11085_v35 = vld [vmem:[%s18254_s2 + $0x110] sm:$0xff]  ;;  %vm6382_vm15 = vcmp.eq.s32.totalorder %v11690_v56, %v19408_v25  ;;  %vm6381_vm2 = vcmp.eq.s32.totalorder %v11685_v54, %v19408_v25 }
 0x3ce   : > { %7557 = vrot.lane.b32.xlu0 %v4550_v32, %s11109_s17  ;;  %10827 = vmatpush3.msra.mxu1 %v11084_v12  ;;  %v4359_v43 = vpop.f32.mrf.mxu1  ;;  %v16934_v12 = vpop.permute.xlu0 %7405 }
 0x3cf   : > { %9609 = vmatmul.mubr.msk.f32.gmra.mxu1 %vm5583_vm4, %v18734_v53  ;;  %7559 = vrot.lane.b32.xlu1 %v4555_v16, %s11109_s17  ;;  %v16919_v32 = vpop.f32.mrf.mxu0  ;;  %v16950_v39 = vpop.permute.xlu1 %7415  ;;  %vm5595_vm4 = vcmp.eq.s32.totalorder %v11685_v54, %v19379_v26 }
 0x3d0   : > { %9610 = vmatprep.mubr.msk.f32.mxu1 %vm5587_vm5, %v18734_v53  ;;  %9771 = vmatmul.mubr.msk.f32.gmra.mxu0 %vm6372_vm6, %v18734_v53  ;;  %v4361_v20 = vpop.f32.mrf.mxu1  ;;  %vm5599_vm5 = vcmp.eq.s32.totalorder %v11690_v56, %v19381_v27 }
 0x3d1   : > { %9772 = vmatprep.mubr.msk.f32.mxu0 %vm6376_vm7, %v18734_v53  ;;  %10828 = vmatprep.subr.mxu1 %v11085_v35  ;;  %v5120_v16 = vpop.f32.mrf.mxu0 }
 0x3d2   : > { %7561 = vrot.lane.b32.xlu0 %v4560_v28, %s11109_s17  ;;  %10829 = vmatpush3.msra.mxu1 %v11085_v35  ;;  %v4364_v34 = vpop.f32.mrf.mxu1  ;;  %v4585_v35 = vadd.f32 %v16530_v6, %v4359_v43  ;;  %v16973_v62 = vpop.permute.xlu0 %7409 }
 0x3d3   : > { %9611 = vmatmul.mubr.msk.f32.gmra.mxu1 %vm5586_vm8, %v18734_v53  ;;  %7563 = vrot.lane.b32.xlu1 %v4565_v5, %s11109_s17  ;;  %v16944_v9 = vpop.f32.mrf.mxu0  ;;  %v11086_v5 = vld [vmem:[%s18254_s2 + $0x108] sm:$0xff]  ;;  %v16981_v43 = vpop.permute.xlu1 %7419  ;;  %vm5598_vm8 = vcmp.eq.s32.totalorder %v11685_v54, %v19381_v27 }
 0x3d4   : > { %9612 = vmatprep.mubr.msk.f32.mxu1 %vm5590_vm9, %v18734_v53  ;;  %9773 = vmatmul.mubr.msk.f32.gmra.mxu0 %vm6375_vm10, %v18734_v53  ;;  %v4366_v28 = vpop.f32.mrf.mxu1  ;;  %vm5602_vm9 = vcmp.eq.s32.totalorder %v11690_v56, %v19382_v4  ;;  %v19412_v27 = vld [vmem:[#allocation135_spill] sm:$0xff] }
 0x3d5   : > { %9774 = vmatprep.mubr.msk.f32.mxu0 %vm6379_vm11, %v18734_v53  ;;  %10830 = vmatprep.subr.mxu1 %v11086_v5  ;;  %v5125_v0 = vpop.f32.mrf.mxu0  ;;  %vm6391_vm11 = vcmp.eq.s32.totalorder %v11690_v56, %v19412_v27 }
 0x3d6   : > { %7565 = vrot.lane.b32.xlu0 %v4570_v57, %s11109_s17  ;;  %10831 = vmatpush3.msra.mxu1 %v11086_v5  ;;  %v10676_v20 = vpop.f32.mrf.mxu1  ;;  %v11087_v57 = vld [vmem:[%s18254_s2 + $0x100] sm:$0xff]  ;;  %v19409_v5 = vld [vmem:[#allocation12_spill] sm:$0xff] }
 0x3d7   : > { %9613 = vmatmul.mubr.msk.f32.gmra.mxu1 %vm5589_vm12, %v18734_v53  ;;  %7567 = vrot.lane.b32.xlu1 %v4575_v11, %s11109_s17  ;;  %v16967_v16 = vpop.f32.mrf.mxu0  ;;  %v4590_v11 = vadd.f32 %v16520_v61, %v4364_v34  ;;  %vm6385_vm3 = vcmp.eq.s32.totalorder %v11690_v56, %v19409_v5  ;;  %vm6384_vm6 = vcmp.eq.s32.totalorder %v11685_v54, %v19409_v5 }
 0x3d8   : > { %9614 = vmatprep.mubr.msk.f32.mxu1 %vm5593_vm13, %v18734_v53  ;;  %9775 = vmatmul.mubr.msk.f32.gmra.mxu0 %vm6378_vm14, %v18734_v53  ;;  %v5268_v2 = vpop.f32.mrf.mxu1  ;;  %vm5601_vm12 = vcmp.eq.s32.totalorder %v11685_v54, %v19382_v4  ;;  %vm5605_vm13 = vcmp.eq.s32.totalorder %v11690_v56, %v19386_v50  ;;  %vm6390_vm14 = vcmp.eq.s32.totalorder %v11685_v54, %v19412_v27  ;;  %v19414_v4 = vld [vmem:[#allocation136_spill] sm:$0xff] }
 0x3d9   : > { %9776 = vmatprep.mubr.msk.f32.mxu0 %vm6382_vm15, %v18734_v53  ;;  %10832 = vmatprep.subr.mxu1 %v11087_v57  ;;  %v5130_v6 = vpop.f32.mrf.mxu0  ;;  %v5269_v28 = vadd.f32 %v5268_v2, %v16552_v17  ;;  %v5274_v17 = vadd.f32 %v10676_v20, %v16572_v36  ;;  %v19410_v36 = vld [vmem:[#allocation127_spill] sm:$0xff]  ;;  %v17016_v20 = vpop.permute.xlu1 %7423  ;;  %vm6394_vm15 = vcmp.eq.s32.totalorder %v11690_v56, %v19414_v4 }
 0x3da   : > { %7569 = vrot.lane.b32.xlu0 %v4580_v49, %s11109_s17  ;;  %10833 = vmatpush3.msra.mxu1 %v11087_v57  ;;  %v17003_v49 = vpop.permute.xlu0 %7413  ;;  %vm6388_vm7 = vcmp.eq.s32.totalorder %v11690_v56, %v19410_v36  ;;  %19411 = vst [vmem:[#allocation186_spill] sm:$0xff] %v17016_v20  ;;  %vm6387_vm10 = vcmp.eq.s32.totalorder %v11685_v54, %v19410_v36 }
 0x3db   : > { %9615 = vmatmul.mubr.msk.f32.gmra.mxu1 %vm5592_vm0, %v18734_v53  ;;  %7571 = vrot.lane.b32.xlu1 %v4585_v35, %s11109_s17  ;;  %v10679_v46 = vpop.f32.mrf.mxu1  ;;  %vm5604_vm0 = vcmp.eq.s32.totalorder %v11685_v54, %v19386_v50  ;;  %v19415_v50 = vld [vmem:[#allocation116_spill] sm:$0xff] }
 0x3dc   : > { %9616 = vmatprep.mubr.msk.f32.mxu1 %vm5596_vm1, %v18734_v53  ;;  %9777 = vmatmul.mubr.msk.f32.gmra.mxu0 %vm6381_vm2, %v18734_v53  ;;  %v16996_v61 = vpop.f32.mrf.mxu0  ;;  %vm5608_vm1 = vcmp.eq.s32.totalorder %v11690_v56, %v19387_v40  ;;  %vm6393_vm2 = vcmp.eq.s32.totalorder %v11685_v54, %v19414_v4 }
 0x3dd   : > { %9778 = vmatprep.mubr.msk.f32.mxu0 %vm6385_vm3, %v18734_v53  ;;  %v5278_v34 = vpop.f32.mrf.mxu1  ;;  %vm6397_vm3 = vcmp.eq.s32.totalorder %v11690_v56, %v19415_v50 }
 0x3de   : > { %7573 = vrot.lane.b32.xlu0 %v4590_v11, %s11109_s17  ;;  %v5135_v0 = vpop.f32.mrf.mxu0  ;;  %v5279_v26 = vadd.f32 %v5278_v34, %v16593_v30  ;;  %v5284_v30 = vadd.f32 %v10679_v46, %v16619_v52  ;;  %v17036_v52 = vpop.permute.xlu0 %7417  ;;  %s11111_s17 = smov 96  }
 0x3df   : > { %9617 = vmatmul.mubr.msk.f32.gmra.mxu1 %vm5595_vm4, %v18734_v53  ;;  %7639 = vrot.lane.b32.xlu1 %v5269_v28, %s11110_s24  ;;  %v17041_v46 = vpop.permute.xlu1 %7427  ;;  %vm5607_vm4 = vcmp.eq.s32.totalorder %v11685_v54, %v19387_v40 }
 0x3e0   : > { %9618 = vmatprep.mubr.msk.f32.mxu1 %vm5599_vm5, %v18734_v53  ;;  %9779 = vmatmul.mubr.msk.f32.gmra.mxu0 %vm6384_vm6, %v18734_v53  ;;  %v10682_v35 = vpop.f32.mrf.mxu1  ;;  %19413 = vst [vmem:[#allocation144_spill] sm:$0xff] %v17041_v46  ;;  %vm5611_vm5 = vcmp.eq.s32.totalorder %v11690_v56, %v19390_v13  ;;  %vm6396_vm6 = vcmp.eq.s32.totalorder %v11685_v54, %v19415_v50  ;;  %v19458_v46 = vld [vmem:[#allocation52_spill] sm:$0xff] }
 0x3e1   : > { %9780 = vmatprep.mubr.msk.f32.mxu0 %vm6388_vm7, %v18734_v53  ;;  %v17019_v2 = vpop.f32.mrf.mxu0 }
 0x3e2   : > { %7641 = vrot.lane.b32.xlu0 %v5274_v17, %s11110_s24  ;;  %v5288_v57 = vpop.f32.mrf.mxu1 }
 0x3e3   : > { %9619 = vmatmul.mubr.msk.f32.gmra.mxu1 %vm5598_vm8, %v18734_v53  ;;  %7643 = vrot.lane.b32.xlu1 %v5279_v26, %s11110_s24  ;;  %v5289_v6 = vadd.f32 %v5288_v57, %v16642_v31  ;;  %v5140_v11 = vpop.f32.mrf.mxu0  ;;  %v5294_v31 = vadd.f32 %v10682_v35, %v16666_v8  ;;  %vm5610_vm8 = vcmp.eq.s32.totalorder %v11685_v54, %v19390_v13  ;;  %v19419_v13 = vld [vmem:[#allocation119_spill] sm:$0xff] }
 0x3e4   : > { %9620 = vmatprep.mubr.msk.f32.mxu1 %vm5602_vm9, %v18734_v53  ;;  %9781 = vmatmul.mubr.msk.f32.gmra.mxu0 %vm6387_vm10, %v18734_v53  ;;  %vm5614_vm9 = vcmp.eq.s32.totalorder %v11690_v56, %v19391_v38 }
 0x3e5   : > { %9782 = vmatprep.mubr.msk.f32.mxu0 %vm6391_vm11, %v18734_v53  ;;  %v10685_v28 = vpop.f32.mrf.mxu1  ;;  %vm6403_vm11 = vcmp.eq.s32.totalorder %v11690_v56, %v19419_v13 }
 0x3e6   : > { %7645 = vrot.lane.b32.xlu0 %v5284_v30, %s11110_s24  ;;  %v17045_v34 = vpop.f32.mrf.mxu0  ;;  %v5304_v26 = vadd.f32 %v10685_v28, %v16709_v55  ;;  %v17063_v30 = vpop.permute.xlu0 %7421 }
 0x3e7   : > { %9621 = vmatmul.mubr.msk.f32.gmra.mxu1 %vm5601_vm12, %v18734_v53  ;;  %7647 = vrot.lane.b32.xlu1 %v5289_v6, %s11110_s24  ;;  %v5298_v17 = vpop.f32.mrf.mxu1  ;;  %v17077_v55 = vpop.permute.xlu1 %7431  ;;  %vm5613_vm12 = vcmp.eq.s32.totalorder %v11685_v54, %v19391_v38  ;;  %v19421_v38 = vld [vmem:[#allocation143_spill] sm:$0xff] }
 0x3e8   : > { %9622 = vmatprep.mubr.msk.f32.mxu1 %vm5605_vm13, %v18734_v53  ;;  %9783 = vmatmul.mubr.msk.f32.gmra.mxu0 %vm6390_vm14, %v18734_v53  ;;  %v5299_v8 = vadd.f32 %v5298_v17, %v16688_v59  ;;  %v5145_v0 = vpop.f32.mrf.mxu0  ;;  %19416 = vst [vmem:[#allocation184_spill] sm:$0xff] %v17077_v55  ;;  %vm5617_vm13 = vcmp.eq.s32.totalorder %v11690_v56, %v19392_v48 }
 0x3e9   : > { %9784 = vmatprep.mubr.msk.f32.mxu0 %vm6394_vm15, %v18734_v53  ;;  %vm6402_vm14 = vcmp.eq.s32.totalorder %v11685_v54, %v19419_v13  ;;  %vm6406_vm15 = vcmp.eq.s32.totalorder %v11690_v56, %v19421_v38 }
 0x3ea   : > { %7649 = vrot.lane.b32.xlu0 %v5294_v31, %s11110_s24  ;;  %v10688_v35 = vpop.f32.mrf.mxu1  ;;  %v17095_v31 = vpop.permute.xlu0 %7425 }
 0x3eb   : > { %9623 = vmatmul.mubr.msk.f32.gmra.mxu1 %vm5604_vm0, %v18734_v53  ;;  %7651 = vrot.lane.b32.xlu1 %v5299_v8, %s11110_s24  ;;  %v17071_v59 = vpop.f32.mrf.mxu0  ;;  %v5314_v28 = vadd.f32 %v10688_v35, %v16758_v14  ;;  %v17102_v17 = vpop.permute.xlu1 %7435  ;;  %vm5616_vm0 = vcmp.eq.s32.totalorder %v11685_v54, %v19392_v48 }
 0x3ec   : > { %9624 = vmatprep.mubr.msk.f32.mxu1 %vm5608_vm1, %v18734_v53  ;;  %9785 = vmatmul.mubr.msk.f32.gmra.mxu0 %vm6393_vm2, %v18734_v53  ;;  %v5308_v57 = vpop.f32.mrf.mxu1  ;;  %19418 = vst [vmem:[#allocation18_spill] sm:$0xff] %v17102_v17  ;;  %vm6405_vm1 = vcmp.eq.s32.totalorder %v11685_v54, %v19421_v38  ;;  %vm6359_vm2 = vcmp.eq.s32.totalorder %v18663_v18, %v19393_v63 }
 0x3ed   : > { %9786 = vmatprep.mubr.msk.f32.mxu0 %vm6397_vm3, %v18734_v53  ;;  %v5309_v6 = vadd.f32 %v5308_v57, %v16733_v22  ;;  %v5150_v11 = vpop.f32.mrf.mxu0  ;;  %v19417_v22 = vld [vmem:[#allocation63_spill] sm:$0xff] }
 0x3ee   : > { %7653 = vrot.lane.b32.xlu0 %v5304_v26, %s11110_s24  ;;  %vm6400_vm7 = vcmp.eq.s32.totalorder %v11690_v56, %v19417_v22  ;;  %vm6399_vm10 = vcmp.eq.s32.totalorder %v11685_v54, %v19417_v22 }
 0x3ef   : > { %9625 = vmatmul.mubr.msk.f32.gmra.mxu1 %vm5607_vm4, %v18734_v53  ;;  %7655 = vrot.lane.b32.xlu1 %v5309_v6, %s11110_s24  ;;  %v17124_v6 = vpop.permute.xlu0 %7429  ;;  %vm6362_vm4 = vcmp.eq.s32.totalorder %v18663_v18, %v19394_v10  ;;  %v19425_v10 = vld [vmem:[#allocation107_spill] sm:$0xff] }
 0x3f0   : > { %9626 = vmatprep.mubr.msk.f32.mxu1 %vm5611_vm5, %v18734_v53  ;;  %9787 = vmatmul.mubr.msk.f32.gmra.mxu0 %vm6396_vm6, %v18734_v53  ;;  %v10691_v40 = vpop.f32.mrf.mxu1  ;;  %19420 = vst [vmem:[#allocation27_spill] sm:$0xff] %v17124_v6  ;;  %vm6365_vm6 = vcmp.eq.s32.totalorder %v18663_v18, %v19397_v47 }
 0x3f1   : > { %9788 = vmatprep.mubr.msk.f32.mxu0 %vm6400_vm7, %v18734_v53  ;;  %v17098_v14 = vpop.f32.mrf.mxu0  ;;  %v5324_v8 = vadd.f32 %v10691_v40, %v16811_v45  ;;  %vm6412_vm7 = vcmp.eq.s32.totalorder %v11690_v56, %v19425_v10 }
 0x3f2   : > { %7657 = vrot.lane.b32.xlu0 %v5314_v28, %s11110_s24  ;;  %v5318_v0 = vpop.f32.mrf.mxu1 }
 0x3f3   : > { %9627 = vmatmul.mubr.msk.f32.gmra.mxu1 %vm5610_vm8, %v18734_v53  ;;  %v5319_v26 = vadd.f32 %v5318_v0, %v16784_v37  ;;  %v5155_v35 = vpop.f32.mrf.mxu0  ;;  %vm6368_vm8 = vcmp.eq.s32.totalorder %v18663_v18, %v19401_v44  ;;  %v19427_v44 = vld [vmem:[#allocation122_spill] sm:$0xff] }
 0x3f4   : > { %9628 = vmatprep.mubr.msk.f32.mxu1 %vm5614_vm9, %v18734_v53  ;;  %9789 = vmatmul.mubr.msk.f32.gmra.mxu0 %vm6399_vm10, %v18734_v53  ;;  %vm6411_vm9 = vcmp.eq.s32.totalorder %v11685_v54, %v19425_v10  ;;  %vm6371_vm10 = vcmp.eq.s32.totalorder %v18663_v18, %v19403_v58 }
 0x3f5   : > { %9790 = vmatprep.mubr.msk.f32.mxu0 %vm6403_vm11, %v18734_v53  ;;  %v10694_v45 = vpop.f32.mrf.mxu1  ;;  %7659 = vrot.lane.b32.xlu1 %v5319_v26, %s11110_s24  ;;  %v17155_v26 = vpop.permute.xlu0 %7433  ;;  %vm6415_vm11 = vcmp.eq.s32.totalorder %v11690_v56, %v19427_v44 }
 0x3f6   : > { %7661 = vrot.lane.b32.xlu0 %v5324_v8, %s11110_s24  ;;  %v5334_v37 = vadd.f32 %v10694_v45, %v16867_v60  ;;  %v17122_v57 = vpop.f32.mrf.mxu0  ;;  %v17135_v60 = vpop.permute.xlu1 %7439  ;;  %19424 = vst [vmem:[#allocation89_spill] sm:$0xff] %v17155_v26  ;;  %v19448_v26 = vld [vmem:[#allocation121_spill] sm:$0xff] }
 0x3f7   : > { %9629 = vmatmul.mubr.msk.f32.gmra.mxu1 %vm5613_vm12, %v18734_v53  ;;  %v5328_v11 = vpop.f32.mrf.mxu1  ;;  %19422 = vst [vmem:[#allocation60_spill] sm:$0xff] %v17135_v60  ;;  %vm6374_vm12 = vcmp.eq.s32.totalorder %v18663_v18, %v19405_v42 }
 0x3f8   : > { %9630 = vmatprep.mubr.msk.f32.mxu1 %vm5617_vm13, %v18734_v53  ;;  %9791 = vmatmul.mubr.msk.f32.gmra.mxu0 %vm6402_vm14, %v18734_v53  ;;  %v5329_v28 = vadd.f32 %v5328_v11, %v16840_v1  ;;  %v5160_v40 = vpop.f32.mrf.mxu0  ;;  %v19423_v1 = vld [vmem:[#allocation34_spill] sm:$0xff]  ;;  %vm6414_vm13 = vcmp.eq.s32.totalorder %v11685_v54, %v19427_v44  ;;  %vm6377_vm14 = vcmp.eq.s32.totalorder %v18663_v18, %v19406_v29 }
 0x3f9   : > { %9792 = vmatprep.mubr.msk.f32.mxu0 %vm6406_vm15, %v18734_v53  ;;  %vm6409_vm3 = vcmp.eq.s32.totalorder %v11690_v56, %v19423_v1  ;;  %vm6408_vm5 = vcmp.eq.s32.totalorder %v11685_v54, %v19423_v1 }
 0x3fa   : > { %7665 = vrot.lane.b32.xlu0 %v5334_v37, %s11110_s24  ;;  %7663 = vrot.lane.b32.xlu1 %v5329_v28, %s11110_s24  ;;  %v17160_v63 = vpop.permute.xlu1 %7443  ;;  %v17180_v28 = vpop.permute.xlu0 %7437 }
 0x3fb   : > { %9631 = vmatmul.mubr.msk.f32.gmra.mxu1 %vm5616_vm0, %v18734_v53  ;;  %v10697_v8 = vpop.f32.mrf.mxu1  ;;  %19426 = vst [vmem:[#allocation132_spill] sm:$0xff] %v17180_v28  ;;  %vm6380_vm0 = vcmp.eq.s32.totalorder %v18663_v18, %v19407_v51 }
 0x3fc   : > { %9793 = vmatmul.mubr.msk.f32.gmra.mxu0 %vm6405_vm1, %v18734_v53  ;;  %10834 = vmatprep.mubr.msk.f32.mxu1 %vm6359_vm2, %v18734_v53  ;;  %v5344_v48 = vadd.f32 %v10697_v8, %v16919_v32  ;;  %v17153_v0 = vpop.f32.mrf.mxu0  ;;  %vm6383_vm2 = vcmp.eq.s32.totalorder %v18663_v18, %v19408_v25 }
 0x3fd   : > { %9794 = vmatprep.mubr.msk.f32.mxu0 %vm6409_vm3, %v18734_v53  ;;  %v5338_v35 = vpop.f32.mrf.mxu1 }
 0x3fe   : > { %v5339_v45 = vadd.f32 %v5338_v35, %v16892_v15  ;;  %v5165_v37 = vpop.f32.mrf.mxu0  ;;  %7669 = vrot.lane.b32.xlu0 %v5344_v48, %s11110_s24  ;;  %v17193_v8 = vpop.permute.xlu1 %7511  ;;  %v19428_v35 = vld [vmem:[#allocation26_spill] sm:$0xff] }
 0x3ff   : > { %10835 = vmatmul.mubr.msk.f32.vlgmr.msra.gmra.mxu1 %vm6362_vm4, %v18734_v53  ;;  %vm6418_vm15 = vcmp.eq.s32.totalorder %v11690_v56, %v19428_v35  ;;  %vm6417_vm1 = vcmp.eq.s32.totalorder %v11685_v54, %v19428_v35  ;;  %vm6386_vm4 = vcmp.eq.s32.totalorder %v18663_v18, %v19409_v5  ;;  %v19431_v5 = vld [vmem:[#allocation156_spill] sm:$0xff] }
 0x400   : > { %9795 = vmatmul.mubr.msk.f32.gmra.mxu0 %vm6408_vm5, %v18734_v53  ;;  %10837 = vmatprep.mubr.msk.f32.mxu1 %vm6365_vm6, %v18734_v53  ;;  %v10700_v32 = vpop.f32.mrf.mxu1  ;;  %vm6389_vm6 = vcmp.eq.s32.totalorder %v18663_v18, %v19410_v36 }
 0x401   : > { %9796 = vmatprep.mubr.msk.f32.mxu0 %vm6412_vm7, %v18734_v53  ;;  %v5354_v15 = vadd.f32 %v10700_v32, %v16967_v16  ;;  %7667 = vrot.lane.b32.xlu1 %v5339_v45, %s11110_s24  ;;  %v17176_v11 = vpop.f32.mrf.mxu0  ;;  %v17211_v45 = vpop.permute.xlu0 %7441  ;;  %vm6424_vm7 = vcmp.eq.s32.totalorder %v11690_v56, %v19431_v5 }
 0x402   : > { %v5348_v47 = vpop.f32.mrf.mxu1  ;;  %19429 = vst [vmem:[#allocation22_spill] sm:$0xff] %v17211_v45  ;;  %v17218_v29 = vpop.permute.xlu1 %7515 }
 0x403   : > { %10838 = vmatmul.mubr.msk.f32.gmra.mxu1 %vm6368_vm8, %v18734_v53  ;;  %v5349_v16 = vadd.f32 %v5348_v47, %v16944_v9  ;;  %v5170_v40 = vpop.f32.mrf.mxu0  ;;  %7673 = vrot.lane.b32.xlu0 %v5354_v15, %s11110_s24  ;;  %vm6392_vm8 = vcmp.eq.s32.totalorder %v18663_v18, %v19412_v27  ;;  %v19432_v27 = vld [vmem:[#allocation124_spill] sm:$0xff] }
 0x404   : > { %9797 = vmatmul.mubr.msk.f32.gmra.mxu0 %vm6411_vm9, %v18734_v53  ;;  %10840 = vmatprep.mubr.msk.f32.mxu1 %vm6371_vm10, %v18734_v53  ;;  %vm6423_vm9 = vcmp.eq.s32.totalorder %v11685_v54, %v19431_v5  ;;  %vm6395_vm10 = vcmp.eq.s32.totalorder %v18663_v18, %v19414_v4 }
 0x405   : > { %9798 = vmatprep.mubr.msk.f32.mxu0 %vm6415_vm11, %v18734_v53  ;;  %7671 = vrot.lane.b32.xlu1 %v5349_v16, %s11110_s24  ;;  %v17238_v40 = vpop.permute.xlu0 %7445  ;;  %vm6427_vm11 = vcmp.eq.s32.totalorder %v11690_v56, %v19432_v27 }
 0x406   : > { %v10703_v58 = vpop.f32.mrf.mxu1 }
 0x407   : > { %10841 = vmatmul.mubr.msk.f32.gmra.mxu1 %vm6374_vm12, %v18734_v53  ;;  %v5364_v9 = vadd.f32 %v10703_v58, %v17019_v2  ;;  %v17205_v48 = vpop.f32.mrf.mxu0  ;;  %vm6398_vm12 = vcmp.eq.s32.totalorder %v18663_v18, %v19415_v50  ;;  %v19433_v50 = vld [vmem:[#allocation158_spill] sm:$0xff] }
 0x408   : > { %9799 = vmatmul.mubr.msk.f32.gmra.mxu0 %vm6414_vm13, %v18734_v53  ;;  %10843 = vmatprep.mubr.msk.f32.mxu1 %vm6377_vm14, %v18734_v53  ;;  %v5358_v42 = vpop.f32.mrf.mxu1  ;;  %vm6426_vm13 = vcmp.eq.s32.totalorder %v11685_v54, %v19432_v27  ;;  %vm6401_vm14 = vcmp.eq.s32.totalorder %v18663_v18, %v19417_v22 }
 0x409   : > { %9800 = vmatprep.mubr.msk.f32.mxu0 %vm6418_vm15, %v18734_v53  ;;  %v5359_v37 = vadd.f32 %v5358_v42, %v16996_v61  ;;  %v5175_v32 = vpop.f32.mrf.mxu0  ;;  %7677 = vrot.lane.b32.xlu0 %v5364_v9, %s11110_s24  ;;  %v19430_v61 = vld [vmem:[#allocation49_spill] sm:$0xff]  ;;  %v17258_v9 = vpop.permute.xlu0 %7513  ;;  %vm6430_vm15 = vcmp.eq.s32.totalorder %v11690_v56, %v19433_v50 }
 0x40a   : > { %vm6421_vm3 = vcmp.eq.s32.totalorder %v11690_v56, %v19430_v61  ;;  %vm6420_vm5 = vcmp.eq.s32.totalorder %v11685_v54, %v19430_v61 }
 0x40b   : > { %10844 = vmatmul.mubr.msk.f32.gmra.mxu1 %vm6380_vm0, %v18734_v53  ;;  %v10706_v2 = vpop.f32.mrf.mxu1  ;;  %7675 = vrot.lane.b32.xlu1 %v5359_v37, %s11110_s24  ;;  %vm6404_vm0 = vcmp.eq.s32.totalorder %v18663_v18, %v19419_v13 }
 0x40c   : > { %9801 = vmatmul.mubr.msk.f32.gmra.mxu0 %vm6417_vm1, %v18734_v53  ;;  %10846 = vmatprep.mubr.msk.f32.mxu1 %vm6383_vm2, %v18734_v53  ;;  %v5374_v51 = vadd.f32 %v10706_v2, %v17071_v59  ;;  %v17231_v15 = vpop.f32.mrf.mxu0  ;;  %vm6429_vm1 = vcmp.eq.s32.totalorder %v11685_v54, %v19433_v50  ;;  %vm6407_vm2 = vcmp.eq.s32.totalorder %v18663_v18, %v19421_v38 }
 0x40d   : > { %9802 = vmatprep.mubr.msk.f32.mxu0 %vm6421_vm3, %v18734_v53  ;;  %v5368_v47 = vpop.f32.mrf.mxu1  ;;  %v17277_v2 = vpop.permute.xlu0 %7517 }
 0x40e   : > { %v5369_v25 = vadd.f32 %v5368_v47, %v17045_v34  ;;  %v5180_v16 = vpop.f32.mrf.mxu0  ;;  %7681 = vrot.lane.b32.xlu0 %v5374_v51, %s11110_s24  ;;  %v17249_v34 = vpop.permute.xlu1 %7519 }
 0x40f   : > { %10847 = vmatmul.mubr.msk.f32.gmra.mxu1 %vm6386_vm4, %v18734_v53  ;;  %vm6410_vm4 = vcmp.eq.s32.totalorder %v18663_v18, %v19423_v1  ;;  %v19435_v1 = vld [vmem:[#allocation134_spill] sm:$0xff] }
 0x410   : > { %9803 = vmatmul.mubr.msk.f32.gmra.mxu0 %vm6420_vm5, %v18734_v53  ;;  %10849 = vmatprep.mubr.msk.f32.mxu1 %vm6389_vm6, %v18734_v53  ;;  %vm6413_vm6 = vcmp.eq.s32.totalorder %v18663_v18, %v19425_v10 }
 0x411   : > { %9804 = vmatprep.mubr.msk.f32.mxu0 %vm6424_vm7, %v18734_v53  ;;  %v10709_v59 = vpop.f32.mrf.mxu1  ;;  %7679 = vrot.lane.b32.xlu1 %v5369_v25, %s11110_s24  ;;  %v17294_v22 = vpop.permute.xlu0 %7521  ;;  %vm6436_vm7 = vcmp.eq.s32.totalorder %v11690_v56, %v19435_v1 }
 0x412   : > { %v5384_v58 = vadd.f32 %v10709_v59, %v17122_v57  ;;  %v17256_v36 = vpop.f32.mrf.mxu0  ;;  %v17274_v32 = vpop.permute.xlu1 %7523 }
 0x413   : > { %10850 = vmatmul.mubr.msk.f32.gmra.mxu1 %vm6392_vm8, %v18734_v53  ;;  %v5378_v42 = vpop.f32.mrf.mxu1  ;;  %vm6416_vm8 = vcmp.eq.s32.totalorder %v18663_v18, %v19427_v44 }
 0x414   : > { %9805 = vmatmul.mubr.msk.f32.gmra.mxu0 %vm6423_vm9, %v18734_v53  ;;  %10852 = vmatprep.mubr.msk.f32.mxu1 %vm6395_vm10, %v18734_v53  ;;  %v5379_v57 = vadd.f32 %v5378_v42, %v17098_v14  ;;  %v5185_v37 = vpop.f32.mrf.mxu0  ;;  %vm6435_vm9 = vcmp.eq.s32.totalorder %v11685_v54, %v19435_v1  ;;  %vm6419_vm10 = vcmp.eq.s32.totalorder %v18663_v18, %v19428_v35 }
 0x415   : > { %9806 = vmatprep.mubr.msk.f32.mxu0 %vm6427_vm11, %v18734_v53  ;;  %7685 = vrot.lane.b32.xlu0 %v5384_v58, %s11110_s24  ;;  %v17319_v37 = vpop.permute.xlu0 %7525 }
 0x416   : > { %v10712_v4 = vpop.f32.mrf.mxu1  ;;  %7683 = vrot.lane.b32.xlu1 %v5379_v57, %s11110_s24 }
 0x417   : > { %10853 = vmatmul.mubr.msk.f32.gmra.mxu1 %vm6398_vm12, %v18734_v53  ;;  %v5394_v14 = vadd.f32 %v10712_v4, %v17176_v11  ;;  %v5188_v51 = vpop.f32.mrf.mxu0  ;;  %v17302_v11 = vpop.permute.xlu1 %7527  ;;  %vm6422_vm12 = vcmp.eq.s32.totalorder %v18663_v18, %v19430_v61  ;;  %v19437_v61 = vld [vmem:[#allocation102_spill] sm:$0xff] }
 0x418   : > { %9807 = vmatmul.mubr.msk.f32.gmra.mxu0 %vm6426_vm13, %v18734_v53  ;;  %10855 = vmatprep.mubr.msk.f32.mxu1 %vm6401_vm14, %v18734_v53  ;;  %v5388_v47 = vpop.f32.mrf.mxu1  ;;  %vm6425_vm14 = vcmp.eq.s32.totalorder %v18663_v18, %v19431_v5 }
 0x419   : > { %9808 = vmatprep.mubr.msk.f32.mxu0 %vm6430_vm15, %v18734_v53  ;;  %v5389_v25 = vadd.f32 %v5388_v47, %v17153_v0  ;;  %v5190_v16 = vpop.f32.mrf.mxu0  ;;  %7689 = vrot.lane.b32.xlu0 %v5394_v14, %s11110_s24  ;;  %v19434_v0 = vld [vmem:[#allocation140_spill] sm:$0xff]  ;;  %v17336_v47 = vpop.permute.xlu0 %7529  ;;  %vm6442_vm15 = vcmp.eq.s32.totalorder %v11690_v56, %v19437_v61 }
 0x41a   : > { %vm6433_vm3 = vcmp.eq.s32.totalorder %v11690_v56, %v19434_v0  ;;  %vm6432_vm5 = vcmp.eq.s32.totalorder %v11685_v54, %v19434_v0 }
 0x41b   : > { %10856 = vmatmul.mubr.msk.f32.gmra.mxu1 %vm6404_vm0, %v18734_v53  ;;  %7687 = vrot.lane.b32.xlu1 %v5389_v25, %s11110_s24  ;;  %v17327_v10 = vpop.permute.xlu1 %7531  ;;  %v19436_v25 = vld [vmem:[#allocation46_spill] sm:$0xff]  ;;  %vm6428_vm0 = vcmp.eq.s32.totalorder %v18663_v18, %v19432_v27 }
 0x41c   : > { %9809 = vmatmul.mubr.msk.f32.gmra.mxu0 %vm6429_vm1, %v18734_v53  ;;  %10858 = vmatprep.mubr.msk.f32.mxu1 %vm6407_vm2, %v18734_v53  ;;  %v10715_v13 = vpop.f32.mrf.mxu1  ;;  %vm6439_vm11 = vcmp.eq.s32.totalorder %v11690_v56, %v19436_v25  ;;  %vm6438_vm13 = vcmp.eq.s32.totalorder %v11685_v54, %v19436_v25  ;;  %vm6441_vm1 = vcmp.eq.s32.totalorder %v11685_v54, %v19437_v61 }
 0x41d   : > { %9810 = vmatprep.mubr.msk.f32.mxu0 %vm6433_vm3, %v18734_v53  ;;  %v5404_v59 = vadd.f32 %v10715_v13, %v17231_v15  ;;  %v5193_v58 = vpop.f32.mrf.mxu0  ;;  %vm6431_vm2 = vcmp.eq.s32.totalorder %v18663_v18, %v19433_v50 }
 0x41e   : > { %v5398_v38 = vpop.f32.mrf.mxu1 }
 0x41f   : > { %10859 = vmatmul.mubr.msk.f32.gmra.mxu1 %vm6410_vm4, %v18734_v53  ;;  %v5399_v42 = vadd.f32 %v5398_v38, %v17205_v48  ;;  %v5195_v57 = vpop.f32.mrf.mxu0  ;;  %7693 = vrot.lane.b32.xlu0 %v5404_v59, %s11110_s24  ;;  %vm6434_vm4 = vcmp.eq.s32.totalorder %v18663_v18, %v19434_v0 }
 0x420   : > { %9811 = vmatmul.mubr.msk.f32.gmra.mxu0 %vm6432_vm5, %v18734_v53  ;;  %10861 = vmatprep.mubr.msk.f32.mxu1 %vm6413_vm6, %v18734_v53  ;;  %v19438_v57 = vld [vmem:[#allocation152_spill] sm:$0xff]  ;;  %vm6437_vm6 = vcmp.eq.s32.totalorder %v18663_v18, %v19435_v1 }
 0x421   : > { %9812 = vmatprep.mubr.msk.f32.mxu0 %vm6436_vm7, %v18734_v53  ;;  %v10718_v15 = vpop.f32.mrf.mxu1  ;;  %7691 = vrot.lane.b32.xlu1 %v5399_v42, %s11110_s24  ;;  %vm6445_vm3 = vcmp.eq.s32.totalorder %v11690_v56, %v19438_v57  ;;  %vm6444_vm5 = vcmp.eq.s32.totalorder %v11685_v54, %v19438_v57 }
 0x422   : > { %v5414_v48 = vadd.f32 %v10718_v15, %v5188_v51  ;;  %v5198_v4 = vpop.f32.mrf.mxu0  ;;  %v17355_v16 = vpop.permute.xlu1 %7535 }
 0x423   : > { %10862 = vmatmul.mubr.msk.f32.gmra.mxu1 %vm6416_vm8, %v18734_v53  ;;  %v5408_v14 = vpop.f32.mrf.mxu1  ;;  %vm6440_vm8 = vcmp.eq.s32.totalorder %v18663_v18, %v19436_v25 }
 0x424   : > { %9813 = vmatmul.mubr.msk.f32.gmra.mxu0 %vm6435_vm9, %v18734_v53  ;;  %10864 = vmatprep.mubr.msk.f32.mxu1 %vm6419_vm10, %v18734_v53  ;;  %v5409_v44 = vadd.f32 %v5408_v14, %v17256_v36  ;;  %v5200_v51 = vpop.f32.mrf.mxu0  ;;  %v17353_v36 = vpop.permute.xlu0 %7533  ;;  %vm6443_vm10 = vcmp.eq.s32.totalorder %v18663_v18, %v19437_v61 }
 0x425   : > { %9814 = vmatprep.mubr.msk.f32.mxu0 %vm6439_vm11, %v18734_v53  ;;  %7697 = vrot.lane.b32.xlu0 %v5414_v48, %s11110_s24 }
 0x426   : > { %7695 = vrot.lane.b32.xlu1 %v5409_v44, %s11110_s24 }
 0x427   : > { %10865 = vmatmul.mubr.msk.f32.gmra.mxu1 %vm6422_vm12, %v18734_v53  ;;  %v10721_v35 = vpop.f32.mrf.mxu1  ;;  %vm6446_vm12 = vcmp.eq.s32.totalorder %v18663_v18, %v19438_v57 }
 0x428   : > { %9815 = vmatmul.mubr.msk.f32.gmra.mxu0 %vm6438_vm13, %v18734_v53  ;;  %10867 = vmatprep.mubr.msk.f32.mxu1 %vm6425_vm14, %v18734_v53  ;;  %v5424_v13 = vadd.f32 %v10721_v35, %v5198_v4  ;;  %v17370_v42 = vpop.permute.xlu0 %7537  ;;  %v19439_v4 = vld [vmem:[#allocation165_spill] sm:$0xff]  ;;  %v19440_v35 = vld [vmem:[#allocation99_spill] sm:$0xff] }
 0x429   : > { %9816 = vmatprep.mubr.msk.f32.mxu0 %vm6442_vm15, %v18734_v53  ;;  %v10756_v59 = vpop.f32.mrf.mxu0  ;;  %v5418_v38 = vpop.f32.mrf.mxu1  ;;  %vm6448_vm7 = vcmp.eq.s32.totalorder %v11690_v56, %v19439_v4  ;;  %vm6447_vm9 = vcmp.eq.s32.totalorder %v11685_v54, %v19439_v4  ;;  %vm6451_vm11 = vcmp.eq.s32.totalorder %v11690_v56, %v19440_v35  ;;  %vm6450_vm13 = vcmp.eq.s32.totalorder %v11685_v54, %v19440_v35 }
 0x42a   : > { %v5419_v5 = vadd.f32 %v5418_v38, %v5193_v58  ;;  %7701 = vrot.lane.b32.xlu0 %v5424_v13, %s11110_s24  ;;  %vm6449_vm14 = vcmp.eq.s32.totalorder %v18663_v18, %v19439_v4  ;;  %vm6452_vm15 = vcmp.eq.s32.totalorder %v18663_v18, %v19440_v35 }
 0x42b   : > { %10868 = vmatmul.mubr.msk.f32.gmra.mxu1 %vm6428_vm0, %v18734_v53  ;;  %v6102_v27 = vpop.f32.mrf.mxu0  ;;  %vm7991_vm0 = vcmask 130048  }
 0x42c   : > { %9817 = vmatmul.mubr.msk.f32.gmra.mxu0 %vm6441_vm1, %v18734_v53  ;;  %10870 = vmatprep.mubr.msk.f32.mxu1 %vm6431_vm2, %v18734_v53  ;;  %v17376_v58 = vpop.permute.xlu1 %7539  ;;  %vm8024_vm1 = vcmask 261120   ;;  %vm8057_vm2 = vcmask 392192  }
 0x42d   : > { %9818 = vmatprep.mubr.msk.f32.mxu0 %vm6445_vm3, %v18734_v53  ;;  %7699 = vrot.lane.b32.xlu1 %v5419_v5, %s11110_s24  ;;  %vm8090_vm3 = vcmask 523264  }
 0x42e   : > { %v5877_v50 = vpop.f32.mrf.mxu1 }
 0x42f   : > { %10871 = vmatmul.mubr.msk.f32.gmra.mxu1 %vm6434_vm4, %v18734_v53  ;;  %v6103_v15 = vadd.f32 %v6102_v27, %v5877_v50  ;;  %vm8123_vm4 = vcmask 654336  }
 0x430   : > { %9819 = vmatmul.mubr.msk.f32.gmra.mxu0 %vm6444_vm5, %v18734_v53  ;;  %10873 = vmatprep.mubr.msk.f32.mxu1 %vm6437_vm6, %v18734_v53  ;;  %v17389_v48 = vpop.permute.xlu0 %7541  ;;  %v10759_v0 = vpop.f32.mrf.mxu0  ;;  %vm8189_vm5 = vcmask 916480   ;;  %vm8156_vm6 = vcmask 785408  }
 0x431   : > { %9820 = vmatprep.mubr.msk.f32.mxu0 %vm6448_vm7, %v18734_v53  ;;  %v17394_v14 = vpop.permute.xlu1 %7543  ;;  %v5879_v44 = vpop.f32.mrf.mxu1  ;;  %7767 = vrot.lane.b32.xlu1 %v6103_v15, %s11111_s17 }
 0x432   : > { %v6112_v1 = vpop.f32.mrf.mxu0 }
 0x433   : > { %10874 = vmatmul.mubr.msk.f32.gmra.mxu1 %vm6440_vm8, %v18734_v53  ;;  %v5882_v51 = vpop.f32.mrf.mxu1 }
 0x434   : > { %9821 = vmatmul.mubr.msk.f32.gmra.mxu0 %vm6447_vm9, %v18734_v53  ;;  %10876 = vmatprep.mubr.msk.f32.mxu1 %vm6443_vm10, %v18734_v53  ;;  %v17408_v13 = vpop.permute.xlu0 %7545  ;;  %v6108_v25 = vadd.f32 %v10756_v59, %v5882_v51 }
 0x435   : > { %9822 = vmatprep.mubr.msk.f32.mxu0 %vm6451_vm11, %v18734_v53  ;;  %v17411_v38 = vpop.permute.xlu1 %7547  ;;  %v10762_v5 = vpop.f32.mrf.mxu0 }
 0x436   : > { %v5884_v61 = vpop.f32.mrf.mxu1  ;;  %7769 = vrot.lane.b32.xlu0 %v6108_v25, %s11111_s17 }
 0x437   : > { %10877 = vmatmul.mubr.msk.f32.gmra.mxu1 %vm6446_vm12, %v18734_v53  ;;  %v6122_v56 = vpop.f32.mrf.mxu0 }
 0x438   : > { %9823 = vmatmul.mubr.msk.f32.gmra.mxu0 %vm6450_vm13, %v18734_v53  ;;  %10879 = vmatprep.mubr.msk.f32.mxu1 %vm6449_vm14, %v18734_v53  ;;  %v17423_v59 = vpop.permute.xlu0 %7549  ;;  %v5887_v27 = vpop.f32.mrf.mxu1 }
 0x439   : > { %v17425_v57 = vpop.permute.xlu1 %7551  ;;  %v6113_v50 = vadd.f32 %v6112_v1, %v5887_v27 }
 0x43a   : > { %19441 = vst [vmem:[#allocation180_spill] sm:$0xff] %v17425_v57  ;;  %v17429_v15 = vpop.f32.mrf.mxu0  ;;  %v5889_v54 = vpop.f32.mrf.mxu1  ;;  %v19460_v57 = vld [vmem:[#allocation42_spill] sm:$0xff] }
 0x43b   : > { %10880 = vmatmul.mubr.msk.f32.gmra.mxu1 %vm6452_vm15, %v18734_v53  ;;  %7771 = vrot.lane.b32.xlu1 %v6113_v50, %s11111_s17 }
 0x43c   : > { %v17433_v4 = vpop.permute.xlu0 %7553  ;;  %v6132_v44 = vpop.f32.mrf.mxu0 }
 0x43d   : > { %v5892_v51 = vpop.f32.mrf.mxu1  ;;  %v17435_v61 = vpop.permute.xlu1 %7555 }
 0x43e   : > { %v6118_v25 = vadd.f32 %v10759_v0, %v5892_v51  ;;  %19442 = vst [vmem:[#allocation133_spill] sm:$0xff] %v17435_v61 }
 0x43f   : > { %v17437_v60 = vpop.f32.mrf.mxu0  ;;  %v5894_v1 = vpop.f32.mrf.mxu1 }
 0x440   : > { %7773 = vrot.lane.b32.xlu0 %v6118_v25, %s11111_s17  ;;  %v17440_v18 = vpop.permute.xlu0 %7557 }
 0x441   : > { %19443 = vst [vmem:[#allocation77_spill] sm:$0xff] %v17440_v18  ;;  %v17442_v35 = vpop.f32.mrf.mxu0  ;;  %v17444_v27 = vpop.permute.xlu1 %7559  ;;  %v19457_v18 = vld [vmem:[#allocation57_spill] sm:$0xff] }
 0x442   : > { %19444 = vst [vmem:[#allocation182_spill] sm:$0xff] %v17444_v27  ;;  %v19449_v27 = vld [vmem:[#allocation104_spill] sm:$0xff] }
 0x443   : > { %v5897_v53 = vpop.f32.mrf.mxu1  ;;  %v1249_v61 = vadd.f32 %v19449_v27, %v19448_v26  ;;  %v19456_v26 = vld [vmem:[#allocation74_spill] sm:$0xff] }
 0x444   : > { %v6123_v50 = vadd.f32 %v6122_v56, %v5897_v53  ;;  %v17446_v54 = vpop.permute.xlu0 %7561 }
 0x445   : > { %19445 = vst [vmem:[#allocation6_spill] sm:$0xff] %v17446_v54  ;;  %v17448_v45 = vpop.f32.mrf.mxu0  ;;  %v5899_v0 = vpop.f32.mrf.mxu1  ;;  %v19453_v54 = vld [vmem:[#allocation64_spill] sm:$0xff] }
 0x446   : > { %7775 = vrot.lane.b32.xlu1 %v6123_v50, %s11111_s17  ;;  %v17451_v51 = vpop.permute.xlu1 %7563  ;;  %v19451_v50 = vld [vmem:[#allocation123_spill] sm:$0xff]  ;;  %v19452_v0 = vld [vmem:[#allocation50_spill] sm:$0xff] }
 0x447   : > { %19446 = vst [vmem:[#allocation187_spill] sm:$0xff] %v17451_v51  ;;  %v17453_v1 = vpop.f32.mrf.mxu0  ;;  %v5902_v25 = vpop.f32.mrf.mxu1  ;;  %v1254_v51 = vadd.f32 %v19452_v0, %v19451_v50  ;;  %v19459_v0 = vld [vmem:[#allocation138_spill] sm:$0xff] }
 0x448   : > { %v6128_v17 = vadd.f32 %v10762_v5, %v5902_v25  ;;  %v17455_v28 = vpop.permute.xlu0 %7565  ;;  %v8022_v5 = vsel %vm7991_vm0, %v1249_v61, %v19453_v54 }
 0x449   : > { %19447 = vst [vmem:[#allocation137_spill] sm:$0xff] %v17455_v28  ;;  %v5904_v55 = vpop.f32.mrf.mxu1  ;;  %v19455_v28 = vld [vmem:[#allocation70_spill] sm:$0xff]  ;;  %v8023_v6 = vsel %vm7991_vm0, %v1254_v51, %v19458_v46  ;;  %v19462_v51 = vld [vmem:[#allocation17_spill] sm:$0xff] }
 0x44a   : > { %v17459_v56 = vpop.f32.mrf.mxu0  ;;  %7777 = vrot.lane.b32.xlu0 %v6128_v17, %s11111_s17  ;;  %v17462_v53 = vpop.permute.xlu1 %7567  ;;  %v1099_v27 = vadd.f32 %v19456_v26, %v19455_v28  ;;  %v8055_v17 = vsel %vm8024_vm1, %v8022_v5, %v19457_v18  ;;  %v8056_v28 = vsel %vm8024_vm1, %v8023_v6, %v19460_v57  ;;  %v19461_v5 = vld [vmem:[#allocation130_spill] sm:$0xff] }
 0x44b   : > { %19450 = vst [vmem:[#allocation59_spill] sm:$0xff] %v17462_v53  ;;  %v8088_v50 = vsel %vm8057_vm2, %v8055_v17, %v17160_v63  ;;  %v8089_v63 = vsel %vm8057_vm2, %v8056_v28, %v17238_v40  ;;  %v19464_v17 = vld [vmem:[#allocation62_spill] sm:$0xff] }
 0x44c   : > { %v17468_v25 = vpop.f32.mrf.mxu0  ;;  %v17470_v55 = vpop.permute.xlu0 %7569  ;;  %v19467_v28 = vld [vmem:[#allocation170_spill] sm:$0xff] }
 0x44d   : > { %19454 = vst [vmem:[#allocation125_spill] sm:$0xff] %v17470_v55  ;;  %v5907_v53 = vpop.f32.mrf.mxu1  ;;  %v7992_v55 = vsel %vm7991_vm0, %v1099_v27, %v19459_v0 }
 0x44e   : > { %v6133_v61 = vadd.f32 %v6132_v44, %v5907_v53  ;;  %v7572_v54 = vpop.permute.xlu1 %7571  ;;  %v8025_v46 = vsel %vm8024_vm1, %v7992_v55, %v19461_v5  ;;  %v19463_v53 = vld [vmem:[#allocation76_spill] sm:$0xff] }
 0x44f   : > { %v17484_v26 = vpop.f32.mrf.mxu0  ;;  %v5909_v20 = vpop.f32.mrf.mxu1  ;;  %v17487_v18 = vsel %vm8090_vm3, %v8088_v50, %v7572_v54  ;;  %v1109_v27 = vadd.f32 %v19463_v53, %v19462_v51  ;;  %v8058_v6 = vsel %vm8057_vm2, %v8025_v46, %v19464_v17  ;;  %v19465_v50 = vld [vmem:[#allocation153_spill] sm:$0xff]  ;;  %v19468_v51 = vld [vmem:[#allocation154_spill] sm:$0xff] }
 0x450   : > { %7779 = vrot.lane.b32.xlu1 %v6133_v61, %s11111_s17  ;;  %v7574_v44 = vpop.permute.xlu0 %7573  ;;  %v19466_v54 = vld [vmem:[#allocation9_spill] sm:$0xff]  ;;  %v8091_v40 = vsel %vm8090_vm3, %v8058_v6, %v17193_v8 }
 0x451   : > { %v17498_v57 = vpop.f32.mrf.mxu0  ;;  %v17501_v20 = vsel %vm8090_vm3, %v8089_v63, %v7574_v44  ;;  %v7993_v55 = vsel %vm7991_vm0, %v19466_v54, %v19465_v50  ;;  %v7994_v5 = vsel %vm7991_vm0, %v1109_v27, %v19467_v28  ;;  %v19469_v44 = vld [vmem:[#allocation71_spill] sm:$0xff]  ;;  %v19470_v54 = vld [vmem:[#allocation172_spill] sm:$0xff]  ;;  %v19473_v28 = vld [vmem:[#allocation98_spill] sm:$0xff] }
 0x452   : > { %v5912_v61 = vpop.f32.mrf.mxu1  ;;  %v7640_v0 = vpop.permute.xlu1 %7639  ;;  %v8026_v46 = vsel %vm8024_vm1, %v7993_v55, %v19468_v51  ;;  %v8027_v17 = vsel %vm8024_vm1, %v7994_v5, %v19469_v44  ;;  %v19474_v5 = vld [vmem:[#allocation78_spill] sm:$0xff] }
 0x453   : > { %v6138_v53 = vadd.f32 %v17429_v15, %v5912_v61  ;;  %v17514_v63 = vsel %vm8123_vm4, %v8091_v40, %v7640_v0  ;;  %v8059_v8 = vsel %vm8057_vm2, %v8026_v46, %v16739_v41  ;;  %v8060_v27 = vsel %vm8057_vm2, %v8027_v17, %v19470_v54  ;;  %v19471_v40 = vld [vmem:[#allocation79_spill] sm:$0xff] }
 0x454   : > { %v17520_v6 = vpop.f32.mrf.mxu0  ;;  %v5914_v50 = vpop.f32.mrf.mxu1  ;;  %v8092_v55 = vsel %vm8090_vm3, %v8059_v8, %v17258_v9  ;;  %v19472_v61 = vld [vmem:[#allocation19_spill] sm:$0xff]  ;;  %v7995_v51 = vsel %vm7991_vm0, %v19474_v5, %v19473_v28  ;;  %v8093_v41 = vsel %vm8090_vm3, %v8060_v27, %v17218_v29  ;;  %v19475_v9 = vld [vmem:[#allocation96_spill] sm:$0xff]  ;;  %v19479_v5 = vld [vmem:[#allocation29_spill] sm:$0xff] }
 0x455   : > { %7781 = vrot.lane.b32.xlu0 %v6138_v53, %s11111_s17  ;;  %v7642_v15 = vpop.permute.xlu0 %7641  ;;  %v1119_v0 = vadd.f32 %v19472_v61, %v19471_v40  ;;  %v8028_v53 = vsel %vm8024_vm1, %v7995_v51, %v19475_v9  ;;  %v19477_v50 = vld [vmem:[#allocation176_spill] sm:$0xff]  ;;  %v19482_v9 = vld [vmem:[#allocation81_spill] sm:$0xff] }
 0x456   : > { %v17534_v46 = vpop.f32.mrf.mxu0  ;;  %v17537_v44 = vsel %vm8123_vm4, %v8092_v55, %v7642_v15  ;;  %v7644_v17 = vpop.permute.xlu1 %7643  ;;  %v8061_v40 = vsel %vm8057_vm2, %v8028_v53, %v16776_v19  ;;  %v19478_v29 = vld [vmem:[#allocation112_spill] sm:$0xff] }
 0x457   : > { %v17542_v8 = vsel %vm8123_vm4, %v8093_v41, %v7644_v17  ;;  %v7996_v54 = vsel %vm7991_vm0, %v1119_v0, %v19477_v50  ;;  %v8094_v55 = vsel %vm8090_vm3, %v8061_v40, %v17277_v2  ;;  %v19480_v51 = vld [vmem:[#allocation80_spill] sm:$0xff]  ;;  %v19481_v17 = vld [vmem:[#allocation159_spill] sm:$0xff]  ;;  %v19484_v2 = vld [vmem:[#allocation157_spill] sm:$0xff] }
 0x458   : > { %19476 = vst [vmem:[#allocation73_spill] sm:$0xff] %v17542_v8  ;;  %v5917_v61 = vpop.f32.mrf.mxu1  ;;  %v8029_v27 = vsel %vm8024_vm1, %v7996_v54, %v19478_v29  ;;  %v1129_v41 = vadd.f32 %v19480_v51, %v19479_v5  ;;  %v7997_v0 = vsel %vm7991_vm0, %v19482_v9, %v19481_v17  ;;  %v19483_v50 = vld [vmem:[#allocation51_spill] sm:$0xff] }
 0x459   : > { %v6143_v15 = vadd.f32 %v17442_v35, %v5917_v61  ;;  %v7646_v28 = vpop.permute.xlu0 %7645  ;;  %v8062_v19 = vsel %vm8057_vm2, %v8029_v27, %v19483_v50  ;;  %v8030_v35 = vsel %vm8024_vm1, %v7997_v0, %v19484_v2  ;;  %v19485_v29 = vld [vmem:[#allocation179_spill] sm:$0xff] }
 0x45a   : > { %v17560_v53 = vpop.f32.mrf.mxu0  ;;  %v5919_v8 = vpop.f32.mrf.mxu1  ;;  %v17563_v54 = vsel %vm8123_vm4, %v8094_v55, %v7646_v28  ;;  %v8095_v40 = vsel %vm8090_vm3, %v8062_v19, %v17249_v34  ;;  %v7998_v5 = vsel %vm7991_vm0, %v1129_v41, %v19485_v29  ;;  %v8063_v27 = vsel %vm8057_vm2, %v8030_v35, %v16817_v3  ;;  %v19486_v55 = vld [vmem:[#allocation90_spill] sm:$0xff]  ;;  %v19487_v28 = vld [vmem:[#allocation25_spill] sm:$0xff]  ;;  %v19488_v9 = vld [vmem:[#allocation55_spill] sm:$0xff] }
 0x45b   : > { %7783 = vrot.lane.b32.xlu1 %v6143_v15, %s11111_s17  ;;  %v7648_v61 = vpop.permute.xlu1 %7647  ;;  %v1139_v17 = vadd.f32 %v19487_v28, %v19486_v55  ;;  %v8031_v34 = vsel %vm8024_vm1, %v7998_v5, %v19488_v9  ;;  %v8096_v15 = vsel %vm8090_vm3, %v8063_v27, %v17294_v22  ;;  %v19489_v41 = vld [vmem:[#allocation162_spill] sm:$0xff]  ;;  %v19490_v19 = vld [vmem:[#allocation88_spill] sm:$0xff]  ;;  %v19491_v29 = vld [vmem:[#allocation147_spill] sm:$0xff] }
 0x45c   : > { %v17574_v51 = vpop.f32.mrf.mxu0  ;;  %v17577_v8 = vsel %vm8123_vm4, %v8095_v40, %v7648_v61  ;;  %v7999_v3 = vsel %vm7991_vm0, %v19490_v19, %v19489_v41  ;;  %v8064_v2 = vsel %vm8057_vm2, %v8031_v34, %v16751_v33  ;;  %v19492_v28 = vld [vmem:[#allocation169_spill] sm:$0xff]  ;;  %v19494_v41 = vld [vmem:[#allocation43_spill] sm:$0xff]  ;;  %v19495_v19 = vld [vmem:[#allocation84_spill] sm:$0xff] }
 0x45d   : > { %v5922_v0 = vpop.f32.mrf.mxu1  ;;  %v7650_v50 = vpop.permute.xlu0 %7649  ;;  %v8032_v5 = vsel %vm8024_vm1, %v7999_v3, %v19491_v29  ;;  %v8097_v22 = vsel %vm8090_vm3, %v8064_v2, %v17274_v32  ;;  %v8000_v9 = vsel %vm7991_vm0, %v1139_v17, %v19492_v28  ;;  %v1149_v17 = vadd.f32 %v19495_v19, %v19494_v41  ;;  %v19496_v3 = vld [vmem:[#allocation145_spill] sm:$0xff]  ;;  %v19497_v2 = vld [vmem:[#allocation94_spill] sm:$0xff] }
 0x45e   : > { %v6148_v35 = vadd.f32 %v17437_v60, %v5922_v0  ;;  %v17591_v40 = vpop.f32.mrf.mxu0  ;;  %v17594_v61 = vsel %vm8123_vm4, %v8096_v15, %v7650_v50  ;;  %v8065_v33 = vsel %vm8057_vm2, %v8032_v5, %v16857_v21  ;;  %v19493_v15 = vld [vmem:[#allocation93_spill] sm:$0xff]  ;;  %v8001_v21 = vsel %vm7991_vm0, %v19497_v2, %v19496_v3  ;;  %v19502_v2 = vld [vmem:[#allocation163_spill] sm:$0xff] }
 0x45f   : > { %v5924_v27 = vpop.f32.mrf.mxu1  ;;  %v7652_v55 = vpop.permute.xlu1 %7651  ;;  %v8033_v0 = vsel %vm8024_vm1, %v8000_v9, %v19493_v15  ;;  %v8098_v32 = vsel %vm8090_vm3, %v8065_v33, %v17319_v37  ;;  %v19498_v29 = vld [vmem:[#allocation69_spill] sm:$0xff] }
 0x460   : > { %v17604_v60 = vpop.f32.mrf.mxu0  ;;  %7785 = vrot.lane.b32.xlu0 %v6148_v35, %s11111_s17  ;;  %v17608_v34 = vsel %vm8123_vm4, %v8097_v22, %v7652_v55  ;;  %v8066_v35 = vsel %vm8057_vm2, %v8033_v0, %v19498_v29  ;;  %v19499_v27 = vld [vmem:[#allocation160_spill] sm:$0xff]  ;;  %v19500_v33 = vld [vmem:[#allocation33_spill] sm:$0xff] }
 0x461   : > { %v7654_v50 = vpop.permute.xlu0 %7653  ;;  %v8034_v55 = vsel %vm8024_vm1, %v8001_v21, %v19499_v27  ;;  %v8099_v37 = vsel %vm8090_vm3, %v8066_v35, %v17302_v11  ;;  %v8002_v15 = vsel %vm7991_vm0, %v1149_v17, %v19500_v33  ;;  %v19503_v17 = vld [vmem:[#allocation48_spill] sm:$0xff] }
 0x462   : > { %v5927_v5 = vpop.f32.mrf.mxu1  ;;  %v17622_v22 = vsel %vm8123_vm4, %v8098_v32, %v7654_v50  ;;  %v8067_v41 = vsel %vm8057_vm2, %v8034_v55, %v16898_v24  ;;  %v19501_v50 = vld [vmem:[#allocation5_spill] sm:$0xff]  ;;  %v8003_v21 = vsel %vm7991_vm0, %v19503_v17, %v19502_v2  ;;  %v19504_v24 = vld [vmem:[#allocation174_spill] sm:$0xff]  ;;  %v19505_v27 = vld [vmem:[#allocation28_spill] sm:$0xff] }
 0x463   : > { %v6153_v28 = vadd.f32 %v17453_v1, %v5927_v5  ;;  %v7656_v9 = vpop.permute.xlu1 %7655  ;;  %v8035_v3 = vsel %vm8024_vm1, %v8002_v15, %v19501_v50  ;;  %v8100_v11 = vsel %vm8090_vm3, %v8067_v41, %v17336_v47  ;;  %v19506_v55 = vld [vmem:[#allocation35_spill] sm:$0xff] }
 0x464   : > { %v17633_v0 = vpop.f32.mrf.mxu0  ;;  %v5929_v19 = vpop.f32.mrf.mxu1  ;;  %v17636_v32 = vsel %vm8123_vm4, %v8099_v37, %v7656_v9  ;;  %v8068_v29 = vsel %vm8057_vm2, %v8035_v3, %v19504_v24  ;;  %v1159_v37 = vadd.f32 %v19506_v55, %v19505_v27  ;;  %v19507_v9 = vld [vmem:[#allocation167_spill] sm:$0xff]  ;;  %v19510_v24 = vld [vmem:[#allocation4_spill] sm:$0xff] }
 0x465   : > { %7787 = vrot.lane.b32.xlu1 %v6153_v28, %s11111_s17  ;;  %v7658_v1 = vpop.permute.xlu0 %7657  ;;  %v8036_v47 = vsel %vm8024_vm1, %v8003_v21, %v19507_v9  ;;  %v8101_v28 = vsel %vm8090_vm3, %v8068_v29, %v17327_v10  ;;  %v19509_v21 = vld [vmem:[#allocation53_spill] sm:$0xff] }
 0x466   : > { %v17648_v35 = vpop.f32.mrf.mxu0  ;;  %v17651_v5 = vsel %vm8123_vm4, %v8100_v11, %v7658_v1  ;;  %v8069_v41 = vsel %vm8057_vm2, %v8036_v47, %v16934_v12  ;;  %v19508_v11 = vld [vmem:[#allocation177_spill] sm:$0xff]  ;;  %v8005_v29 = vsel %vm7991_vm0, %v19510_v24, %v19509_v21  ;;  %v19516_v21 = vld [vmem:[#allocation47_spill] sm:$0xff] }
 0x467   : > { %v5932_v33 = vpop.f32.mrf.mxu1  ;;  %v7660_v15 = vpop.permute.xlu1 %7659  ;;  %v8004_v1 = vsel %vm7991_vm0, %v1159_v37, %v19508_v11  ;;  %v8102_v2 = vsel %vm8090_vm3, %v8069_v41, %v17353_v36  ;;  %v19511_v12 = vld [vmem:[#allocation21_spill] sm:$0xff]  ;;  %v19512_v37 = vld [vmem:[#allocation168_spill] sm:$0xff] }
 0x468   : > { %v6158_v19 = vadd.f32 %v17448_v45, %v5932_v33  ;;  %v17662_v50 = vpop.f32.mrf.mxu0  ;;  %v17665_v3 = vsel %vm8123_vm4, %v8101_v28, %v7660_v15  ;;  %v8037_v45 = vsel %vm8024_vm1, %v8004_v1, %v19511_v12  ;;  %v8038_v9 = vsel %vm8024_vm1, %v8005_v29, %v19512_v37  ;;  %v19518_v12 = vld [vmem:[#allocation183_spill] sm:$0xff] }
 0x469   : > { %v5934_v17 = vpop.f32.mrf.mxu1  ;;  %v7662_v10 = vpop.permute.xlu0 %7661  ;;  %v8070_v36 = vsel %vm8057_vm2, %v8037_v45, %v16873_v23  ;;  %v8071_v47 = vsel %vm8057_vm2, %v8038_v9, %v16973_v62 }
 0x46a   : > { %v17676_v27 = vpop.f32.mrf.mxu0  ;;  %7789 = vrot.lane.b32.xlu0 %v6158_v19, %s11111_s17  ;;  %v17680_v55 = vsel %vm8123_vm4, %v8102_v2, %v7662_v10  ;;  %v8103_v28 = vsel %vm8090_vm3, %v8070_v36, %v17355_v16  ;;  %v8104_v41 = vsel %vm8090_vm3, %v8071_v47, %v17370_v42  ;;  %v19513_v2 = vld [vmem:[#allocation40_spill] sm:$0xff]  ;;  %v19515_v10 = vld [vmem:[#allocation141_spill] sm:$0xff]  ;;  %v19517_v42 = vld [vmem:[#allocation15_spill] sm:$0xff] }
 0x46b   : > { %v19514_v17 = vld [vmem:[#allocation92_spill] sm:$0xff]  ;;  %v8007_v62 = vsel %vm7991_vm0, %v19516_v21, %v19515_v10  ;;  %v19519_v36 = vld [vmem:[#allocation103_spill] sm:$0xff] }
 0x46c   : > { %v5937_v33 = vpop.f32.mrf.mxu1  ;;  %v7664_v15 = vpop.permute.xlu1 %7663  ;;  %v1169_v23 = vadd.f32 %v19514_v17, %v19513_v2  ;;  %v19520_v47 = vld [vmem:[#allocation95_spill] sm:$0xff]  ;;  %v19523_v17 = vld [vmem:[#allocation56_spill] sm:$0xff] }
 0x46d   : > { %v6163_v19 = vadd.f32 %v17468_v25, %v5937_v33  ;;  %v7666_v11 = vpop.permute.xlu0 %7665  ;;  %v17694_v1 = vsel %vm8123_vm4, %v8103_v28, %v7664_v15  ;;  %v8040_v25 = vsel %vm8024_vm1, %v8007_v62, %v19517_v42  ;;  %v1179_v28 = vadd.f32 %v19520_v47, %v19519_v36  ;;  %v19521_v33 = vld [vmem:[#allocation91_spill] sm:$0xff]  ;;  %v19526_v47 = vld [vmem:[#allocation8_spill] sm:$0xff] }
 0x46e   : > { %v17701_v24 = vpop.f32.mrf.mxu0  ;;  %v5939_v16 = vpop.f32.mrf.mxu1  ;;  %v17704_v29 = vsel %vm8123_vm4, %v8104_v41, %v7666_v11  ;;  %v8006_v45 = vsel %vm7991_vm0, %v1169_v23, %v19518_v12  ;;  %v8073_v37 = vsel %vm8057_vm2, %v8040_v25, %v17003_v49 }
 0x46f   : > { %7791 = vrot.lane.b32.xlu1 %v6163_v19, %s11111_s17  ;;  %v8039_v15 = vsel %vm8024_vm1, %v8006_v45, %v19521_v33  ;;  %v8106_v41 = vsel %vm8090_vm3, %v8073_v37, %v17389_v48  ;;  %v19522_v19 = vld [vmem:[#allocation24_spill] sm:$0xff] }
 0x470   : > { %v17713_v9 = vpop.f32.mrf.mxu0  ;;  %v8009_v23 = vsel %vm7991_vm0, %v19523_v17, %v19522_v19  ;;  %v8072_v49 = vsel %vm8057_vm2, %v8039_v15, %v16909_v7  ;;  %v19524_v16 = vld [vmem:[#allocation164_spill] sm:$0xff] }
 0x471   : > { %v5942_v11 = vpop.f32.mrf.mxu1  ;;  %v7670_v2 = vpop.permute.xlu0 %7669  ;;  %v8042_v42 = vsel %vm8024_vm1, %v8009_v23, %v19524_v16  ;;  %v8105_v48 = vsel %vm8090_vm3, %v8072_v49, %v17376_v58  ;;  %v19525_v45 = vld [vmem:[#allocation32_spill] sm:$0xff]  ;;  %v19528_v23 = vld [vmem:[#allocation97_spill] sm:$0xff] }
 0x472   : > { %v6168_v10 = vadd.f32 %v17459_v56, %v5942_v11  ;;  %v17727_v21 = vpop.f32.mrf.mxu0  ;;  %v17730_v62 = vsel %vm8123_vm4, %v8106_v41, %v7670_v2  ;;  %v8008_v37 = vsel %vm7991_vm0, %v1179_v28, %v19525_v45  ;;  %v8075_v7 = vsel %vm8057_vm2, %v8042_v42, %v17036_v52  ;;  %v19527_v17 = vld [vmem:[#allocation20_spill] sm:$0xff]  ;;  %v19530_v16 = vld [vmem:[#allocation61_spill] sm:$0xff] }
 0x473   : > { %v5944_v25 = vpop.f32.mrf.mxu1  ;;  %v7668_v12 = vpop.permute.xlu1 %7667  ;;  %v8041_v33 = vsel %vm8024_vm1, %v8008_v37, %v19526_v47  ;;  %v8108_v58 = vsel %vm8090_vm3, %v8075_v7, %v17408_v13  ;;  %v1189_v49 = vadd.f32 %v19528_v23, %v19527_v17  ;;  %v19533_v7 = vld [vmem:[#allocation16_spill] sm:$0xff] }
 0x474   : > { %v17740_v56 = vpop.f32.mrf.mxu0  ;;  %7793 = vrot.lane.b32.xlu0 %v6168_v10, %s11111_s17  ;;  %v17744_v36 = vsel %vm8123_vm4, %v8105_v48, %v7668_v12  ;;  %v8074_v28 = vsel %vm8057_vm2, %v8041_v33, %v16950_v39  ;;  %v19529_v10 = vld [vmem:[#allocation175_spill] sm:$0xff]  ;;  %v19531_v25 = vld [vmem:[#allocation166_spill] sm:$0xff] }
 0x475   : > { %v7674_v15 = vpop.permute.xlu0 %7673  ;;  %v8107_v11 = vsel %vm8090_vm3, %v8074_v28, %v17394_v14  ;;  %v8011_v13 = vsel %vm7991_vm0, %v19530_v16, %v19529_v10  ;;  %v19532_v14 = vld [vmem:[#allocation2_spill] sm:$0xff]  ;;  %v19536_v10 = vld [vmem:[#allocation65_spill] sm:$0xff] }
 0x476   : > { %v5947_v41 = vpop.f32.mrf.mxu1  ;;  %v17753_v52 = vsel %vm8123_vm4, %v8108_v58, %v7674_v15  ;;  %v8044_v12 = vsel %vm8024_vm1, %v8011_v13, %v19531_v25  ;;  %v19537_v16 = vld [vmem:[#allocation30_spill] sm:$0xff] }
 0x477   : > { %v6173_v2 = vadd.f32 %v17498_v57, %v5947_v41  ;;  %v7672_v19 = vpop.permute.xlu1 %7671  ;;  %v8010_v57 = vsel %vm7991_vm0, %v1189_v49, %v19532_v14  ;;  %v8077_v45 = vsel %vm8057_vm2, %v8044_v12, %v17063_v30  ;;  %v19534_v30 = vld [vmem:[#allocation3_spill] sm:$0xff]  ;;  %v1199_v13 = vadd.f32 %v19537_v16, %v19536_v10  ;;  %v19545_v16 = vld [vmem:[#allocation146_spill] sm:$0xff] }
 0x478   : > { %v17763_v42 = vpop.f32.mrf.mxu0  ;;  %v5949_v39 = vpop.f32.mrf.mxu1  ;;  %v17766_v48 = vsel %vm8123_vm4, %v8107_v11, %v7672_v19  ;;  %v8043_v47 = vsel %vm8024_vm1, %v8010_v57, %v19533_v7  ;;  %v8110_v33 = vsel %vm8090_vm3, %v8077_v45, %v17423_v59  ;;  %v19535_v19 = vld [vmem:[#allocation67_spill] sm:$0xff] }
 0x479   : > { %7795 = vrot.lane.b32.xlu1 %v6173_v2, %s11111_s17  ;;  %v8076_v28 = vsel %vm8057_vm2, %v8043_v47, %v16981_v43  ;;  %v8013_v17 = vsel %vm7991_vm0, %v19535_v19, %v19534_v30  ;;  %v19538_v43 = vld [vmem:[#allocation178_spill] sm:$0xff]  ;;  %v19539_v57 = vld [vmem:[#allocation131_spill] sm:$0xff] }
 0x47a   : > { %v17775_v37 = vpop.f32.mrf.mxu0  ;;  %v8109_v23 = vsel %vm8090_vm3, %v8076_v28, %v17411_v38  ;;  %v8012_v38 = vsel %vm7991_vm0, %v1199_v13, %v19539_v57  ;;  %v19546_v13 = vld [vmem:[#allocation110_spill] sm:$0xff] }
 0x47b   : > { %v5952_v58 = vpop.f32.mrf.mxu1  ;;  %v7678_v15 = vpop.permute.xlu0 %7677 }
 0x47c   : > { %v6178_v41 = vadd.f32 %v17484_v26, %v5952_v58  ;;  %v17784_v11 = vpop.f32.mrf.mxu0  ;;  %v17787_v2 = vsel %vm8123_vm4, %v8110_v33, %v7678_v15  ;;  %v8046_v26 = vsel %vm8024_vm1, %v8013_v17, %v19538_v43  ;;  %v19540_v58 = vld [vmem:[#allocation155_spill] sm:$0xff]  ;;  %v19542_v17 = vld [vmem:[#allocation72_spill] sm:$0xff]  ;;  %v8015_v43 = vsel %vm7991_vm0, %v19546_v13, %v19545_v16  ;;  %v19556_v16 = vld [vmem:[#allocation113_spill] sm:$0xff] }
 0x47d   : > { %v5954_v59 = vpop.f32.mrf.mxu1  ;;  %v7676_v49 = vpop.permute.xlu1 %7675  ;;  %v8079_v12 = vsel %vm8057_vm2, %v8046_v26, %v17095_v31  ;;  %v8045_v15 = vsel %vm8024_vm1, %v8012_v38, %v19540_v58  ;;  %v19541_v31 = vld [vmem:[#allocation186_spill] sm:$0xff] }
 0x47e   : > { %v6713_v39 = vpop.f32.mrf.mxu0  ;;  %7797 = vrot.lane.b32.xlu0 %v6178_v41, %s11111_s17  ;;  %v17800_v25 = vsel %vm8123_vm4, %v8109_v23, %v7676_v49  ;;  %v8112_v45 = vsel %vm8090_vm3, %v8079_v12, %v17433_v4  ;;  %v8078_v30 = vsel %vm8057_vm2, %v8045_v15, %v19541_v31  ;;  %v19543_v4 = vld [vmem:[#allocation100_spill] sm:$0xff]  ;;  %v19548_v38 = vld [vmem:[#allocation14_spill] sm:$0xff]  ;;  %v19550_v15 = vld [vmem:[#allocation27_spill] sm:$0xff] }
 0x47f   : > { %v5957_v14 = vpop.f32.mrf.mxu1  ;;  %v1209_v23 = vadd.f32 %v19543_v4, %v19542_v17  ;;  %v19553_v17 = vld [vmem:[#allocation144_spill] sm:$0xff] }
 0x480   : > { %v6183_v7 = vadd.f32 %v17534_v46, %v5957_v14  ;;  %v17809_v47 = vpop.f32.mrf.mxu0  ;;  %v7682_v33 = vpop.permute.xlu0 %7681  ;;  %v19544_v46 = vld [vmem:[#allocation180_spill] sm:$0xff]  ;;  %v19547_v14 = vld [vmem:[#allocation151_spill] sm:$0xff] }
 0x481   : > { %v5959_v28 = vpop.f32.mrf.mxu1  ;;  %v17814_v41 = vsel %vm8123_vm4, %v8112_v45, %v7682_v33  ;;  %v8111_v59 = vsel %vm8090_vm3, %v8078_v30, %v19544_v46  ;;  %v8014_v57 = vsel %vm7991_vm0, %v1209_v23, %v19547_v14  ;;  %v8048_v45 = vsel %vm8024_vm1, %v8015_v43, %v19548_v38  ;;  %v19549_v33 = vld [vmem:[#allocation173_spill] sm:$0xff]  ;;  %v19552_v30 = vld [vmem:[#allocation36_spill] sm:$0xff] }
 0x482   : > { %7799 = vrot.lane.b32.xlu1 %v6183_v7, %s11111_s17  ;;  %v6718_v19 = vpop.f32.mrf.mxu0  ;;  %v8047_v58 = vsel %vm8024_vm1, %v8014_v57, %v19549_v33  ;;  %v8081_v28 = vsel %vm8057_vm2, %v8048_v45, %v19550_v15  ;;  %v19554_v23 = vld [vmem:[#allocation77_spill] sm:$0xff] }
 0x483   : > { %v5962_v49 = vpop.f32.mrf.mxu1  ;;  %v7680_v10 = vpop.permute.xlu1 %7679  ;;  %v8080_v4 = vsel %vm8057_vm2, %v8047_v58, %v19553_v17  ;;  %v8114_v46 = vsel %vm8090_vm3, %v8081_v28, %v19554_v23  ;;  %v19557_v43 = vld [vmem:[#allocation133_spill] sm:$0xff]  ;;  %v19562_v23 = vld [vmem:[#allocation6_spill] sm:$0xff] }
 0x484   : > { %v6188_v26 = vadd.f32 %v17520_v6, %v5962_v49  ;;  %v17827_v39 = vpop.f32.mrf.mxu0  ;;  %v17830_v12 = vsel %vm8123_vm4, %v8111_v59, %v7680_v10  ;;  %v19551_v6 = vld [vmem:[#allocation75_spill] sm:$0xff]  ;;  %v19555_v10 = vld [vmem:[#allocation149_spill] sm:$0xff]  ;;  %v8113_v14 = vsel %vm8090_vm3, %v8080_v4, %v19557_v43 }
 0x485   : > { %v5964_v7 = vpop.f32.mrf.mxu1  ;;  %v1219_v19 = vadd.f32 %v19552_v30, %v19551_v6  ;;  %v8017_v13 = vsel %vm7991_vm0, %v19556_v16, %v19555_v10  ;;  %v19559_v28 = vld [vmem:[#allocation45_spill] sm:$0xff]  ;;  %v19563_v10 = vld [vmem:[#allocation184_spill] sm:$0xff] }
 0x486   : > { %v6723_v31 = vpop.f32.mrf.mxu0  ;;  %7801 = vrot.lane.b32.xlu0 %v6188_v26, %s11111_s17  ;;  %v19558_v7 = vld [vmem:[#allocation106_spill] sm:$0xff]  ;;  %v19560_v6 = vld [vmem:[#allocation89_spill] sm:$0xff] }
 0x487   : > { %v5967_v59 = vpop.f32.mrf.mxu1  ;;  %v7686_v49 = vpop.permute.xlu0 %7685  ;;  %v8050_v33 = vsel %vm8024_vm1, %v8017_v13, %v19558_v7  ;;  %v8016_v31 = vsel %vm7991_vm0, %v1219_v19, %v19559_v28  ;;  %v19561_v17 = vld [vmem:[#allocation105_spill] sm:$0xff] }
 0x488   : > { %v6193_v26 = vadd.f32 %v17574_v51, %v5967_v59  ;;  %v17853_v57 = vpop.f32.mrf.mxu0  ;;  %v17856_v38 = vsel %vm8123_vm4, %v8114_v46, %v7686_v49  ;;  %v7684_v45 = vpop.permute.xlu1 %7683  ;;  %v8083_v30 = vsel %vm8057_vm2, %v8050_v33, %v19560_v6  ;;  %v8049_v4 = vsel %vm8024_vm1, %v8016_v31, %v19561_v17  ;;  %v19565_v33 = vld [vmem:[#allocation23_spill] sm:$0xff]  ;;  %v19567_v31 = vld [vmem:[#allocation142_spill] sm:$0xff] }
 0x489   : > { %v5969_v58 = vpop.f32.mrf.mxu1  ;;  %v17861_v15 = vsel %vm8123_vm4, %v8113_v14, %v7684_v45  ;;  %v8116_v46 = vsel %vm8090_vm3, %v8083_v30, %v19562_v23  ;;  %v8082_v16 = vsel %vm8057_vm2, %v8049_v4, %v19563_v10  ;;  %v19564_v14 = vld [vmem:[#allocation182_spill] sm:$0xff]  ;;  %v19569_v17 = vld [vmem:[#allocation171_spill] sm:$0xff] }
 0x48a   : > { %7803 = vrot.lane.b32.xlu1 %v6193_v26, %s11111_s17  ;;  %v6728_v51 = vpop.f32.mrf.mxu0  ;;  %v8115_v26 = vsel %vm8090_vm3, %v8082_v16, %v19564_v14  ;;  %v19566_v58 = vld [vmem:[#allocation101_spill] sm:$0xff]  ;;  %v19568_v6 = vld [vmem:[#allocation38_spill] sm:$0xff] }
 0x48b   : > { %v5972_v59 = vpop.f32.mrf.mxu1  ;;  %v7690_v49 = vpop.permute.xlu0 %7689  ;;  %v1229_v28 = vadd.f32 %v19566_v58, %v19565_v33  ;;  %v8019_v30 = vsel %vm7991_vm0, %v19568_v6, %v19567_v31  ;;  %v19573_v33 = vld [vmem:[#allocation137_spill] sm:$0xff]  ;;  %v19574_v31 = vld [vmem:[#allocation120_spill] sm:$0xff]  ;;  %v19575_v6 = vld [vmem:[#allocation39_spill] sm:$0xff] }
 0x48c   : > { %v6198_v13 = vadd.f32 %v17560_v53, %v5972_v59  ;;  %v17875_v19 = vpop.f32.mrf.mxu0  ;;  %v17878_v43 = vsel %vm8123_vm4, %v8116_v46, %v7690_v49  ;;  %v8052_v4 = vsel %vm8024_vm1, %v8019_v30, %v19569_v17  ;;  %v19570_v46 = vld [vmem:[#allocation31_spill] sm:$0xff]  ;;  %v19571_v49 = vld [vmem:[#allocation132_spill] sm:$0xff]  ;;  %v1244_v30 = vadd.f32 %v19575_v6, %v19574_v31  ;;  %v19582_v6 = vld [vmem:[#allocation181_spill] sm:$0xff] }
 0x48d   : > { %v5974_v45 = vpop.f32.mrf.mxu1  ;;  %v7688_v7 = vpop.permute.xlu1 %7687  ;;  %v8018_v59 = vsel %vm7991_vm0, %v1229_v28, %v19570_v46  ;;  %v8085_v10 = vsel %vm8057_vm2, %v8052_v4, %v19571_v49  ;;  %v19577_v4 = vld [vmem:[#allocation118_spill] sm:$0xff] }
 0x48e   : > { %v6733_v51 = vpop.f32.mrf.mxu0  ;;  %7805 = vrot.lane.b32.xlu0 %v6198_v13, %s11111_s17  ;;  %v17889_v53 = vsel %vm8123_vm4, %v8115_v26, %v7688_v7  ;;  %v19572_v45 = vld [vmem:[#allocation54_spill] sm:$0xff]  ;;  %v8118_v26 = vsel %vm8090_vm3, %v8085_v10, %v19573_v33  ;;  %v19580_v33 = vld [vmem:[#allocation87_spill] sm:$0xff] }
 0x48f   : > { %v5977_v23 = vpop.f32.mrf.mxu1  ;;  %v8051_v13 = vsel %vm8024_vm1, %v8018_v59, %v19572_v45  ;;  %v19576_v51 = vld [vmem:[#allocation18_spill] sm:$0xff]  ;;  %v19579_v59 = vld [vmem:[#allocation187_spill] sm:$0xff] }
 0x490   : > { %v6203_v16 = vadd.f32 %v17604_v60, %v5977_v23  ;;  %v17898_v14 = vpop.f32.mrf.mxu0  ;;  %v8084_v28 = vsel %vm8057_vm2, %v8051_v13, %v19576_v51  ;;  %v19578_v23 = vld [vmem:[#allocation44_spill] sm:$0xff] }
 0x491   : > { %v5979_v7 = vpop.f32.mrf.mxu1  ;;  %v7694_v58 = vpop.permute.xlu0 %7693  ;;  %v1239_v46 = vadd.f32 %v19578_v23, %v19577_v4  ;;  %v8117_v49 = vsel %vm8090_vm3, %v8084_v28, %v19579_v59  ;;  %v19583_v28 = vld [vmem:[#allocation148_spill] sm:$0xff]  ;;  %v19584_v23 = vld [vmem:[#allocation22_spill] sm:$0xff] }
 0x492   : > { %7807 = vrot.lane.b32.xlu1 %v6203_v16, %s11111_s17  ;;  %v6738_v17 = vpop.f32.mrf.mxu0  ;;  %v17910_v60 = vsel %vm8123_vm4, %v8118_v26, %v7694_v58  ;;  %v8021_v7 = vsel %vm7991_vm0, %v1244_v30, %v19580_v33  ;;  %v19581_v26 = vld [vmem:[#allocation41_spill] sm:$0xff] }
 0x493   : > { %v5982_v10 = vpop.f32.mrf.mxu1  ;;  %v7692_v45 = vpop.permute.xlu1 %7691  ;;  %v8020_v58 = vsel %vm7991_vm0, %v1239_v46, %v19581_v26  ;;  %v8054_v51 = vsel %vm8024_vm1, %v8021_v7, %v19582_v6  ;;  %v19587_v26 = vld [vmem:[#allocation59_spill] sm:$0xff] }
 0x494   : > { %v6208_v31 = vadd.f32 %v17591_v40, %v5982_v10  ;;  %v17919_v13 = vpop.f32.mrf.mxu0  ;;  %v17922_v16 = vsel %vm8123_vm4, %v8117_v49, %v7692_v45  ;;  %v8053_v4 = vsel %vm8024_vm1, %v8020_v58, %v19583_v28  ;;  %v8087_v30 = vsel %vm8057_vm2, %v8054_v51, %v19584_v23  ;;  %v19585_v40 = vld [vmem:[#allocation60_spill] sm:$0xff]  ;;  %v19586_v10 = vld [vmem:[#allocation125_spill] sm:$0xff] }
 0x495   : > { %v5984_v17 = vpop.f32.mrf.mxu1  ;;  %v8086_v49 = vsel %vm8057_vm2, %v8053_v4, %v19585_v40  ;;  %v8120_v45 = vsel %vm8090_vm3, %v8087_v30, %v19586_v10 }
 0x496   : > { %v6743_v59 = vpop.f32.mrf.mxu0  ;;  %7809 = vrot.lane.b32.xlu0 %v6208_v31, %s11111_s17  ;;  %v8119_v7 = vsel %vm8090_vm3, %v8086_v49, %v19587_v26 }
 0x497   : > { %v5987_v46 = vpop.f32.mrf.mxu1  ;;  %v7698_v33 = vpop.permute.xlu0 %7697 }
 0x498   : > { %v6213_v6 = vadd.f32 %v17648_v35, %v5987_v46  ;;  %v17940_v58 = vpop.f32.mrf.mxu0  ;;  %v17943_v51 = vsel %vm8123_vm4, %v8120_v45, %v7698_v33  ;;  %v7696_v17 = vpop.permute.xlu1 %7695 }
 0x499   : > { %19588 = vst [vmem:[#allocation115_spill] sm:$0xff] %v17943_v51  ;;  %v5989_v31 = vpop.f32.mrf.mxu1  ;;  %v17946_v28 = vsel %vm8123_vm4, %v8119_v7, %v7696_v17 }
 0x49a   : > { %19589 = vst [vmem:[#allocation108_spill] sm:$0xff] %v17946_v28  ;;  %7811 = vrot.lane.b32.xlu1 %v6213_v6, %s11111_s17  ;;  %v6748_v4 = vpop.f32.mrf.mxu0 }
 0x49b   : > { %v5992_v23 = vpop.f32.mrf.mxu1 }
 0x49c   : > { %v6218_v30 = vadd.f32 %v17633_v0, %v5992_v23  ;;  %v17950_v59 = vpop.f32.mrf.mxu0  ;;  %v7702_v40 = vpop.permute.xlu0 %7701 }
 0x49d   : > { %v5994_v35 = vpop.f32.mrf.mxu1  ;;  %v17954_v49 = vsel %vm8123_vm4, %v17501_v20, %v7702_v40 }
 0x49e   : > { %19590 = vst [vmem:[#allocation185_spill] sm:$0xff] %v17954_v49  ;;  %v6753_v10 = vpop.f32.mrf.mxu0  ;;  %7813 = vrot.lane.b32.xlu0 %v6218_v30, %s11111_s17 }
 0x49f   : > { %v5997_v45 = vpop.f32.mrf.mxu1  ;;  %v7700_v46 = vpop.permute.xlu1 %7699 }
 0x4a0   : > { %v6223_v33 = vadd.f32 %v17676_v27, %v5997_v45  ;;  %v17958_v26 = vpop.f32.mrf.mxu0  ;;  %v17962_v0 = vsel %vm8123_vm4, %v17487_v18, %v7700_v46 }
 0x4a1   : > { %19591 = vst [vmem:[#allocation111_spill] sm:$0xff] %v17962_v0  ;;  %v5999_v7 = vpop.f32.mrf.mxu1 }
 0x4a2   : > { %7815 = vrot.lane.b32.xlu1 %v6223_v33, %s11111_s17  ;;  %v6758_v6 = vpop.f32.mrf.mxu0 }
 0x4a3   : > { %v6002_v17 = vpop.f32.mrf.mxu1 }
 0x4a4   : > { %v6228_v20 = vadd.f32 %v17662_v50, %v6002_v17  ;;  %v17966_v31 = vpop.f32.mrf.mxu0 }
 0x4a5   : > { %v6004_v4 = vpop.f32.mrf.mxu1 }
 0x4a6   : > { %v6763_v23 = vpop.f32.mrf.mxu0  ;;  %7817 = vrot.lane.b32.xlu0 %v6228_v20, %s11111_s17 }
 0x4a7   : > { %v6007_v27 = vpop.f32.mrf.mxu1 }
 0x4a8   : > { %v6233_v30 = vadd.f32 %v17713_v9, %v6007_v27  ;;  %v17970_v40 = vpop.f32.mrf.mxu0 }
 0x4a9   : > { %v6009_v18 = vpop.f32.mrf.mxu1 }
 0x4aa   : > { %7819 = vrot.lane.b32.xlu1 %v6233_v30, %s11111_s17  ;;  %v6768_v35 = vpop.f32.mrf.mxu0 }
 0x4ab   : > { %v6012_v10 = vpop.f32.mrf.mxu1 }
 0x4ac   : > { %v6238_v45 = vadd.f32 %v17701_v24, %v6012_v10  ;;  %v17974_v46 = vpop.f32.mrf.mxu0 }
 0x4ad   : > { %v6014_v50 = vpop.f32.mrf.mxu1 }
 0x4ae   : > { %v6773_v33 = vpop.f32.mrf.mxu0  ;;  %7821 = vrot.lane.b32.xlu0 %v6238_v45, %s11111_s17 }
 0x4af   : > { %v6017_v7 = vpop.f32.mrf.mxu1 }
 0x4b0   : > { %v6243_v6 = vadd.f32 %v17740_v56, %v6017_v7  ;;  %v17978_v17 = vpop.f32.mrf.mxu0 }
 0x4b1   : > { %v6019_v9 = vpop.f32.mrf.mxu1 }
 0x4b2   : > { %7823 = vrot.lane.b32.xlu1 %v6243_v6, %s11111_s17  ;;  %v6778_v20 = vpop.f32.mrf.mxu0 }
 0x4b3   : > { %v6022_v4 = vpop.f32.mrf.mxu1 }
 0x4b4   : > { %v6248_v23 = vadd.f32 %v17727_v21, %v6022_v4  ;;  %v17982_v27 = vpop.f32.mrf.mxu0 }
 0x4b5   : > { %v6024_v24 = vpop.f32.mrf.mxu1 }
 0x4b6   : > { %v6783_v30 = vpop.f32.mrf.mxu0  ;;  %7825 = vrot.lane.b32.xlu0 %v6248_v23, %s11111_s17 }
 0x4b7   : > { %v6027_v18 = vpop.f32.mrf.mxu1 }
 0x4b8   : > { %v6253_v35 = vadd.f32 %v17775_v37, %v6027_v18  ;;  %v17986_v10 = vpop.f32.mrf.mxu0 }
 0x4b9   : > { %v6029_v56 = vpop.f32.mrf.mxu1 }
 0x4ba   : > { %7827 = vrot.lane.b32.xlu1 %v6253_v35, %s11111_s17  ;;  %v6788_v45 = vpop.f32.mrf.mxu0 }
 0x4bb   : > { %v6032_v50 = vpop.f32.mrf.mxu1 }
 0x4bc   : > { %v6258_v33 = vadd.f32 %v17763_v42, %v6032_v50  ;;  %v17990_v7 = vpop.f32.mrf.mxu0 }
 0x4bd   : > { %v6034_v21 = vpop.f32.mrf.mxu1 }
 0x4be   : > { %v6793_v6 = vpop.f32.mrf.mxu0  ;;  %7829 = vrot.lane.b32.xlu0 %v6258_v33, %s11111_s17 }
 0x4bf   : > { %v10836_v9 = vpop.f32.mrf.mxu1 }
 0x4c0   : > { %v6942_v20 = vadd.f32 %v10836_v9, %v17809_v47  ;;  %v17994_v4 = vpop.f32.mrf.mxu0 }
 0x4c1   : > { %v6936_v37 = vpop.f32.mrf.mxu1 }
 0x4c2   : > { %v6937_v23 = vadd.f32 %v6936_v37, %v17784_v11  ;;  %v6798_v24 = vpop.f32.mrf.mxu0  ;;  %7897 = vrot.lane.b32.xlu0 %v6942_v20, %s11112_s25 }
 0x4c3   : > { %v10839_v30 = vpop.f32.mrf.mxu1 }
 0x4c4   : > { %v6952_v42 = vadd.f32 %v10839_v30, %v17853_v57  ;;  %7895 = vrot.lane.b32.xlu1 %v6937_v23, %s11112_s25  ;;  %v18000_v18 = vpop.f32.mrf.mxu0 }
 0x4c5   : > { %v6946_v35 = vpop.f32.mrf.mxu1 }
 0x4c6   : > { %v6947_v56 = vadd.f32 %v6946_v35, %v17827_v39  ;;  %v6803_v47 = vpop.f32.mrf.mxu0  ;;  %7901 = vrot.lane.b32.xlu0 %v6952_v42, %s11112_s25 }
 0x4c7   : > { %v10842_v45 = vpop.f32.mrf.mxu1 }
 0x4c8   : > { %v6962_v11 = vadd.f32 %v10842_v45, %v17898_v14  ;;  %7899 = vrot.lane.b32.xlu1 %v6947_v56, %s11112_s25  ;;  %v6806_v50 = vpop.f32.mrf.mxu0 }
 0x4c9   : > { %v6956_v33 = vpop.f32.mrf.mxu1 }
 0x4ca   : > { %v6957_v21 = vadd.f32 %v6956_v33, %v17875_v19  ;;  %v6808_v57 = vpop.f32.mrf.mxu0  ;;  %7905 = vrot.lane.b32.xlu0 %v6962_v11, %s11112_s25 }
 0x4cb   : > { %v10845_v6 = vpop.f32.mrf.mxu1 }
 0x4cc   : > { %v6972_v9 = vadd.f32 %v10845_v6, %v17940_v58  ;;  %7903 = vrot.lane.b32.xlu1 %v6957_v21, %s11112_s25  ;;  %v6811_v39 = vpop.f32.mrf.mxu0 }
 0x4cd   : > { %v6966_v20 = vpop.f32.mrf.mxu1 }
 0x4ce   : > { %v6967_v37 = vadd.f32 %v6966_v20, %v17919_v13  ;;  %v6813_v23 = vpop.f32.mrf.mxu0  ;;  %7909 = vrot.lane.b32.xlu0 %v6972_v9, %s11112_s25 }
 0x4cf   : > { %v10848_v14 = vpop.f32.mrf.mxu1 }
 0x4d0   : > { %v6982_v24 = vadd.f32 %v10848_v14, %v17958_v26  ;;  %7907 = vrot.lane.b32.xlu1 %v6967_v37, %s11112_s25  ;;  %v6816_v19 = vpop.f32.mrf.mxu0 }
 0x4d1   : > { %v6976_v30 = vpop.f32.mrf.mxu1 }
 0x4d2   : > { %v6977_v42 = vadd.f32 %v6976_v30, %v17950_v59  ;;  %v6818_v35 = vpop.f32.mrf.mxu0  ;;  %7913 = vrot.lane.b32.xlu0 %v6982_v24, %s11112_s25 }
 0x4d3   : > { %v10851_v58 = vpop.f32.mrf.mxu1 }
 0x4d4   : > { %v6992_v56 = vadd.f32 %v10851_v58, %v17970_v40  ;;  %7911 = vrot.lane.b32.xlu1 %v6977_v42, %s11112_s25  ;;  %v6821_v13 = vpop.f32.mrf.mxu0 }
 0x4d5   : > { %v6986_v47 = vpop.f32.mrf.mxu1 }
 0x4d6   : > { %v6987_v45 = vadd.f32 %v6986_v47, %v17966_v31  ;;  %v6823_v11 = vpop.f32.mrf.mxu0  ;;  %7917 = vrot.lane.b32.xlu0 %v6992_v56, %s11112_s25 }
 0x4d7   : > { %v10854_v26 = vpop.f32.mrf.mxu1 }
 0x4d8   : > { %v7002_v33 = vadd.f32 %v10854_v26, %v17978_v17  ;;  %7915 = vrot.lane.b32.xlu1 %v6987_v45, %s11112_s25  ;;  %v6826_v59 = vpop.f32.mrf.mxu0 }
 0x4d9   : > { %v6996_v21 = vpop.f32.mrf.mxu1 }
 0x4da   : > { %v6997_v57 = vadd.f32 %v6996_v21, %v17974_v46  ;;  %v6828_v6 = vpop.f32.mrf.mxu0  ;;  %7921 = vrot.lane.b32.xlu0 %v7002_v33, %s11112_s25 }
 0x4db   : > { %v10857_v40 = vpop.f32.mrf.mxu1 }
 0x4dc   : > { %v7012_v9 = vadd.f32 %v10857_v40, %v17986_v10  ;;  %7919 = vrot.lane.b32.xlu1 %v6997_v57, %s11112_s25  ;;  %v6831_v31 = vpop.f32.mrf.mxu0 }
 0x4dd   : > { %v7006_v20 = vpop.f32.mrf.mxu1 }
 0x4de   : > { %v7007_v37 = vadd.f32 %v7006_v20, %v17982_v27  ;;  %v6833_v23 = vpop.f32.mrf.mxu0  ;;  %7925 = vrot.lane.b32.xlu0 %v7012_v9, %s11112_s25 }
 0x4df   : > { %v10860_v17 = vpop.f32.mrf.mxu1 }
 0x4e0   : > { %v7022_v14 = vadd.f32 %v10860_v17, %v17994_v4  ;;  %7923 = vrot.lane.b32.xlu1 %v7007_v37, %s11112_s25  ;;  %v6836_v46 = vpop.f32.mrf.mxu0 }
 0x4e1   : > { %v7016_v24 = vpop.f32.mrf.mxu1 }
 0x4e2   : > { %v7017_v30 = vadd.f32 %v7016_v24, %v17990_v7  ;;  %v6838_v42 = vpop.f32.mrf.mxu0  ;;  %7929 = vrot.lane.b32.xlu0 %v7022_v14, %s11112_s25 }
 0x4e3   : > { %v10863_v10 = vpop.f32.mrf.mxu1 }
 0x4e4   : > { %v7032_v35 = vadd.f32 %v10863_v10, %v6806_v50  ;;  %7927 = vrot.lane.b32.xlu1 %v7017_v30, %s11112_s25  ;;  %v6841_v27 = vpop.f32.mrf.mxu0  ;;  %v7768_v30 = vpop.permute.xlu1 %7767 }
 0x4e5   : > { %v7026_v58 = vpop.f32.mrf.mxu1 }
 0x4e6   : > { %v7027_v56 = vadd.f32 %v7026_v58, %v18000_v18  ;;  %v6843_v47 = vpop.f32.mrf.mxu0  ;;  %7933 = vrot.lane.b32.xlu0 %v7032_v35, %s11112_s25 }
 0x4e7   : > { %v10866_v4 = vpop.f32.mrf.mxu1 }
 0x4e8   : > { %v7042_v45 = vadd.f32 %v10866_v4, %v6816_v19  ;;  %7931 = vrot.lane.b32.xlu1 %v7027_v56, %s11112_s25  ;;  %v6846_v11 = vpop.f32.mrf.mxu0  ;;  %v7772_v47 = vpop.permute.xlu1 %7771 }
 0x4e9   : > { %v7036_v7 = vpop.f32.mrf.mxu1 }
 0x4ea   : > { %v7037_v26 = vadd.f32 %v7036_v7, %v6811_v39  ;;  %v6848_v33 = vpop.f32.mrf.mxu0  ;;  %7937 = vrot.lane.b32.xlu0 %v7042_v45, %s11112_s25 }
 0x4eb   : > { %v10869_v50 = vpop.f32.mrf.mxu1 }
 0x4ec   : > { %v7052_v21 = vadd.f32 %v10869_v50, %v6826_v59  ;;  %7935 = vrot.lane.b32.xlu1 %v7037_v26, %s11112_s25  ;;  %v6851_v57 = vpop.f32.mrf.mxu0  ;;  %v7770_v59 = vpop.permute.xlu0 %7769 }
 0x4ed   : > { %v7046_v6 = vpop.f32.mrf.mxu1  ;;  %v7776_v33 = vpop.permute.xlu1 %7775 }
 0x4ee   : > { %v7047_v18 = vadd.f32 %v7046_v6, %v6821_v13  ;;  %v6853_v40 = vpop.f32.mrf.mxu0  ;;  %7941 = vrot.lane.b32.xlu0 %v7052_v21, %s11112_s25 }
 0x4ef   : > { %v10872_v9 = vpop.f32.mrf.mxu1 }
 0x4f0   : > { %v7062_v19 = vadd.f32 %v10872_v9, %v6836_v46  ;;  %7939 = vrot.lane.b32.xlu1 %v7047_v18, %s11112_s25  ;;  %v6856_v20 = vpop.f32.mrf.mxu0  ;;  %v7774_v35 = vpop.permute.xlu0 %7773 }
 0x4f1   : > { %v7056_v37 = vpop.f32.mrf.mxu1  ;;  %v7780_v6 = vpop.permute.xlu1 %7779 }
 0x4f2   : > { %v7057_v39 = vadd.f32 %v7056_v37, %v6831_v31  ;;  %v6858_v23 = vpop.f32.mrf.mxu0  ;;  %7945 = vrot.lane.b32.xlu0 %v7062_v19, %s11112_s25 }
 0x4f3   : > { %v10875_v17 = vpop.f32.mrf.mxu1 }
 0x4f4   : > { %v7072_v14 = vadd.f32 %v10875_v17, %v6846_v11  ;;  %7943 = vrot.lane.b32.xlu1 %v7057_v39, %s11112_s25  ;;  %v6861_v24 = vpop.f32.mrf.mxu0  ;;  %v7778_v7 = vpop.permute.xlu0 %7777 }
 0x4f5   : > { %v7066_v13 = vpop.f32.mrf.mxu1  ;;  %v7784_v40 = vpop.permute.xlu1 %7783 }
 0x4f6   : > { %v7067_v42 = vadd.f32 %v7066_v13, %v6841_v27  ;;  %v6863_v10 = vpop.f32.mrf.mxu0  ;;  %7949 = vrot.lane.b32.xlu0 %v7072_v14, %s11112_s25 }
 0x4f7   : > { %v10878_v46 = vpop.f32.mrf.mxu1 }
 0x4f8   : > { %v7082_v58 = vadd.f32 %v10878_v46, %v6856_v20  ;;  %7947 = vrot.lane.b32.xlu1 %v7067_v42, %s11112_s25  ;;  %v6866_v31 = vpop.f32.mrf.mxu0  ;;  %v7782_v21 = vpop.permute.xlu0 %7781 }
 0x4f9   : > { %v7076_v56 = vpop.f32.mrf.mxu1  ;;  %v18050_v9 = vpop.permute.xlu1 %7787 }
 0x4fa   : > { %v7077_v4 = vadd.f32 %v7076_v56, %v6851_v57  ;;  %v6868_v45 = vpop.f32.mrf.mxu0  ;;  %7953 = vrot.lane.b32.xlu0 %v7082_v58, %s11112_s25 }
 0x4fb   : > { %v10881_v11 = vpop.f32.mrf.mxu1 }
 0x4fc   : > { %v7092_v26 = vadd.f32 %v10881_v11, %v6866_v31  ;;  %7951 = vrot.lane.b32.xlu1 %v7077_v4, %s11112_s25  ;;  %v7786_v18 = vpop.permute.xlu0 %7785 }
 0x4fd   : > { %v7086_v27 = vpop.f32.mrf.mxu1  ;;  %v18054_v20 = vpop.permute.xlu1 %7791 }
 0x4fe   : > { %v7087_v50 = vadd.f32 %v7086_v27, %v6861_v24  ;;  %7957 = vrot.lane.b32.xlu0 %v7092_v26, %s11112_s25 }
 0x500   : > { %7955 = vrot.lane.b32.xlu1 %v7087_v50, %s11112_s25  ;;  %v18048_v57 = vpop.permute.xlu0 %7789  ;;  %v8158_v50 = vsel %vm8156_vm6, %v17537_v44, %v7770_v59  ;;  %v19596_v59 = vld [vmem:[#allocation73_spill] sm:$0xff] }
 0x501   : > { %v18058_v39 = vpop.permute.xlu1 %7795 }
 0x504   : > { %v18052_v19 = vpop.permute.xlu0 %7793 }
 0x505   : > { %v18062_v17 = vpop.permute.xlu1 %7799 }
 0x508   : > { %v18056_v37 = vpop.permute.xlu0 %7797 }
 0x509   : > { %v18066_v24 = vpop.permute.xlu1 %7803 }
 0x50c   : > { %v18060_v23 = vpop.permute.xlu0 %7801 }
 0x50d   : > { %v18070_v42 = vpop.permute.xlu1 %7807 }
 0x510   : > { %v18064_v14 = vpop.permute.xlu0 %7805 }
 0x511   : > { %v18074_v46 = vpop.permute.xlu1 %7811 }
 0x514   : > { %v18068_v13 = vpop.permute.xlu0 %7809 }
 0x515   : > { %v18078_v31 = vpop.permute.xlu1 %7815 }
 0x518   : > { %v18072_v10 = vpop.permute.xlu0 %7813 }
 0x51c   : > { %v18076_v58 = vpop.permute.xlu0 %7817  ;;  %v18082_v4 = vpop.permute.xlu1 %7819 }
 0x520   : > { %v18080_v56 = vpop.permute.xlu0 %7821 }
 0x524   : > { %v18086_v11 = vpop.permute.xlu1 %7823 }
 0x525   : > { %19593 = vst [vmem:[#allocation10_spill] sm:$0xff] %v18086_v11  ;;  %v8160_v11 = vsel %vm8156_vm6, %v17563_v54, %v7774_v35 }
 0x528   : > { %v18084_v45 = vpop.permute.xlu0 %7825 }
 0x529   : > { %19592 = vst [vmem:[#allocation68_spill] sm:$0xff] %v18084_v45  ;;  %v8159_v45 = vsel %vm8156_vm6, %v19596_v59, %v7772_v47  ;;  %v8164_v47 = vsel %vm8156_vm6, %v17622_v22, %v7782_v21  ;;  %v8165_v21 = vsel %vm8156_vm6, %v17636_v32, %v7784_v40  ;;  %v8169_v59 = vsel %vm8156_vm6, %v17694_v1, %v18054_v20 }
 0x52c   : > { %v18090_v27 = vpop.permute.xlu1 %7827 }
 0x52d   : > { %19595 = vst [vmem:[#allocation66_spill] sm:$0xff] %v18090_v27  ;;  %v8157_v27 = vsel %vm8156_vm6, %v17514_v63, %v7768_v30 }
 0x530   : > { %v18088_v26 = vpop.permute.xlu0 %7829 }
 0x531   : > { %19594 = vst [vmem:[#allocation85_spill] sm:$0xff] %v18088_v26 }
 0x534   : > { %v7898_v0 = vpop.permute.xlu0 %7897 }
 0x535   : > { %v8191_v49 = vsel %vm8189_vm5, %v8158_v50, %v7898_v0  ;;  %v8167_v50 = vsel %vm8156_vm6, %v17665_v3, %v18050_v9 }
 0x536   : > { %8223 = vst [vmem:[%s18097_s30 + $0x8] sm:$0xff] %v8191_v49  ;;  %v7896_v26 = vpop.permute.xlu1 %7895  ;;  %v8162_v49 = vsel %vm8156_vm6, %v17594_v61, %v7778_v7  ;;  %v8163_v7 = vsel %vm8156_vm6, %v17608_v34, %v7780_v6  ;;  %v8168_v6 = vsel %vm8156_vm6, %v17680_v55, %v18048_v57 }
 0x537   : > { %v8190_v28 = vsel %vm8189_vm5, %v8157_v27, %v7896_v26 }
 0x538   : > { %8222 = vst [vmem:[%s18097_s30] sm:$0xff] %v8190_v28  ;;  %v7902_v51 = vpop.permute.xlu0 %7901  ;;  %v8161_v28 = vsel %vm8156_vm6, %v17577_v8, %v7776_v33  ;;  %v8166_v33 = vsel %vm8156_vm6, %v17651_v5, %v7786_v18 }
 0x539   : > { %v8193_v44 = vsel %vm8189_vm5, %v8160_v11, %v7902_v51 }
 0x53a   : > { %8225 = vst [vmem:[%s18097_s30 + $0x18] sm:$0xff] %v8193_v44  ;;  %v7900_v0 = vpop.permute.xlu1 %7899  ;;  %v8170_v44 = vsel %vm8156_vm6, %v17704_v29, %v18052_v19 }
 0x53b   : > { %v8192_v63 = vsel %vm8189_vm5, %v8159_v45, %v7900_v0  ;;  %v8172_v0 = vsel %vm8156_vm6, %v17730_v62, %v18056_v37 }
 0x53c   : > { %8224 = vst [vmem:[%s18097_s30 + $0x10] sm:$0xff] %v8192_v63  ;;  %v7906_v30 = vpop.permute.xlu0 %7905  ;;  %v8171_v63 = vsel %vm8156_vm6, %v17744_v36, %v18058_v39 }
 0x53d   : > { %v8195_v54 = vsel %vm8189_vm5, %v8162_v49, %v7906_v30  ;;  %v8174_v49 = vsel %vm8156_vm6, %v17753_v52, %v18060_v23  ;;  %v8173_v30 = vsel %vm8156_vm6, %v17766_v48, %v18062_v17 }
 0x53e   : > { %8227 = vst [vmem:[%s18097_s30 + $0x28] sm:$0xff] %v8195_v54  ;;  %v7904_v51 = vpop.permute.xlu1 %7903  ;;  %v8176_v54 = vsel %vm8156_vm6, %v17787_v2, %v18064_v14 }
 0x53f   : > { %v8194_v35 = vsel %vm8189_vm5, %v8161_v28, %v7904_v51  ;;  %v8175_v28 = vsel %vm8156_vm6, %v17800_v25, %v18066_v24  ;;  %v8178_v51 = vsel %vm8156_vm6, %v17814_v41, %v18068_v13 }
 0x540   : > { %8226 = vst [vmem:[%s18097_s30 + $0x20] sm:$0xff] %v8194_v35  ;;  %v7910_v45 = vpop.permute.xlu0 %7909  ;;  %v8177_v35 = vsel %vm8156_vm6, %v17830_v12, %v18070_v42 }
 0x541   : > { %v8197_v61 = vsel %vm8189_vm5, %v8164_v47, %v7910_v45  ;;  %v8180_v47 = vsel %vm8156_vm6, %v17856_v38, %v18072_v10  ;;  %v8179_v45 = vsel %vm8156_vm6, %v17861_v15, %v18074_v46 }
 0x542   : > { %8229 = vst [vmem:[%s18097_s30 + $0x38] sm:$0xff] %v8197_v61  ;;  %v7908_v11 = vpop.permute.xlu1 %7907  ;;  %v8182_v61 = vsel %vm8156_vm6, %v17878_v43, %v18076_v58 }
 0x543   : > { %v8196_v8 = vsel %vm8189_vm5, %v8163_v7, %v7908_v11  ;;  %v8181_v7 = vsel %vm8156_vm6, %v17889_v53, %v18078_v31  ;;  %v8184_v11 = vsel %vm8156_vm6, %v17910_v60, %v18080_v56 }
 0x544   : > { %8228 = vst [vmem:[%s18097_s30 + $0x30] sm:$0xff] %v8196_v8  ;;  %v7914_v26 = vpop.permute.xlu0 %7913  ;;  %v8183_v8 = vsel %vm8156_vm6, %v17922_v16, %v18082_v4 }
 0x545   : > { %v8199_v22 = vsel %vm8189_vm5, %v8166_v33, %v7914_v26  ;;  %v19597_v33 = vld [vmem:[#allocation68_spill] sm:$0xff]  ;;  %v19598_v26 = vld [vmem:[#allocation115_spill] sm:$0xff] }
 0x546   : > { %8231 = vst [vmem:[%s18097_s30 + $0x48] sm:$0xff] %v8199_v22  ;;  %v7912_v27 = vpop.permute.xlu1 %7911  ;;  %v8186_v22 = vsel %vm8156_vm6, %v19598_v26, %v19597_v33 }
 0x547   : > { %v8198_v34 = vsel %vm8189_vm5, %v8165_v21, %v7912_v27  ;;  %v19599_v21 = vld [vmem:[#allocation10_spill] sm:$0xff]  ;;  %v19600_v27 = vld [vmem:[#allocation108_spill] sm:$0xff] }
 0x548   : > { %8230 = vst [vmem:[%s18097_s30 + $0x40] sm:$0xff] %v8198_v34  ;;  %v7918_v5 = vpop.permute.xlu0 %7917  ;;  %v8185_v34 = vsel %vm8156_vm6, %v19600_v27, %v19599_v21 }
 0x549   : > { %v8201_v18 = vsel %vm8189_vm5, %v8168_v6, %v7918_v5  ;;  %v19601_v6 = vld [vmem:[#allocation85_spill] sm:$0xff] }
 0x54a   : > { %8233 = vst [vmem:[%s18097_s30 + $0x58] sm:$0xff] %v8201_v18  ;;  %v7916_v32 = vpop.permute.xlu1 %7915  ;;  %v19602_v5 = vld [vmem:[#allocation185_spill] sm:$0xff] }
 0x54b   : > { %v8200_v40 = vsel %vm8189_vm5, %v8167_v50, %v7916_v32  ;;  %v8188_v18 = vsel %vm8156_vm6, %v19602_v5, %v19601_v6 }
 0x54c   : > { %8232 = vst [vmem:[%s18097_s30 + $0x50] sm:$0xff] %v8200_v40  ;;  %v7922_v55 = vpop.permute.xlu0 %7921  ;;  %v19603_v40 = vld [vmem:[#allocation66_spill] sm:$0xff] }
 0x54d   : > { %v8203_v57 = vsel %vm8189_vm5, %v8170_v44, %v7922_v55  ;;  %v19604_v44 = vld [vmem:[#allocation111_spill] sm:$0xff] }
 0x54e   : > { %8235 = vst [vmem:[%s18097_s30 + $0x68] sm:$0xff] %v8203_v57  ;;  %v7920_v3 = vpop.permute.xlu1 %7919  ;;  %v8187_v55 = vsel %vm8156_vm6, %v19604_v44, %v19603_v40 }
 0x54f   : > { %v8202_v9 = vsel %vm8189_vm5, %v8169_v59, %v7920_v3 }
 0x550   : > { %8234 = vst [vmem:[%s18097_s30 + $0x60] sm:$0xff] %v8202_v9  ;;  %v7926_v29 = vpop.permute.xlu0 %7925 }
 0x551   : > { %v8205_v19 = vsel %vm8189_vm5, %v8172_v0, %v7926_v29 }
 0x552   : > { %8237 = vst [vmem:[%s18097_s30 + $0x78] sm:$0xff] %v8205_v19  ;;  %v7924_v1 = vpop.permute.xlu1 %7923 }
 0x553   : > { %v8204_v20 = vsel %vm8189_vm5, %v8171_v63, %v7924_v1 }
 0x554   : > { %8236 = vst [vmem:[%s18097_s30 + $0x70] sm:$0xff] %v8204_v20  ;;  %v7930_v62 = vpop.permute.xlu0 %7929 }
 0x555   : > { %v8207_v37 = vsel %vm8189_vm5, %v8174_v49, %v7930_v62 }
 0x556   : > { %8239 = vst [vmem:[%s18097_s30 + $0x88] sm:$0xff] %v8207_v37  ;;  %v7928_v36 = vpop.permute.xlu1 %7927 }
 0x557   : > { %v8206_v39 = vsel %vm8189_vm5, %v8173_v30, %v7928_v36 }
 0x558   : > { %8238 = vst [vmem:[%s18097_s30 + $0x80] sm:$0xff] %v8206_v39  ;;  %v7934_v52 = vpop.permute.xlu0 %7933 }
 0x559   : > { %v8209_v23 = vsel %vm8189_vm5, %v8176_v54, %v7934_v52 }
 0x55a   : > { %8241 = vst [vmem:[%s18097_s30 + $0x98] sm:$0xff] %v8209_v23  ;;  %v7932_v48 = vpop.permute.xlu1 %7931 }
 0x55b   : > { %v8208_v17 = vsel %vm8189_vm5, %v8175_v28, %v7932_v48 }
 0x55c   : > { %8240 = vst [vmem:[%s18097_s30 + $0x90] sm:$0xff] %v8208_v17  ;;  %v7938_v2 = vpop.permute.xlu0 %7937 }
 0x55d   : > { %v8211_v14 = vsel %vm8189_vm5, %v8178_v51, %v7938_v2 }
 0x55e   : > { %8243 = vst [vmem:[%s18097_s30 + $0xa8] sm:$0xff] %v8211_v14  ;;  %v7936_v25 = vpop.permute.xlu1 %7935 }
 0x55f   : > { %v8210_v24 = vsel %vm8189_vm5, %v8177_v35, %v7936_v25 }
 0x560   : > { %8242 = vst [vmem:[%s18097_s30 + $0xa0] sm:$0xff] %v8210_v24  ;;  %v7942_v41 = vpop.permute.xlu0 %7941 }
 0x561   : > { %v8213_v13 = vsel %vm8189_vm5, %v8180_v47, %v7942_v41 }
 0x562   : > { %8245 = vst [vmem:[%s18097_s30 + $0xb8] sm:$0xff] %v8213_v13  ;;  %v7940_v12 = vpop.permute.xlu1 %7939 }
 0x563   : > { %v8212_v42 = vsel %vm8189_vm5, %v8179_v45, %v7940_v12 }
 0x564   : > { %8244 = vst [vmem:[%s18097_s30 + $0xb0] sm:$0xff] %v8212_v42  ;;  %v7946_v38 = vpop.permute.xlu0 %7945 }
 0x565   : > { %v8215_v10 = vsel %vm8189_vm5, %v8182_v61, %v7946_v38 }
 0x566   : > { %8247 = vst [vmem:[%s18097_s30 + $0xc8] sm:$0xff] %v8215_v10  ;;  %v7944_v15 = vpop.permute.xlu1 %7943 }
 0x567   : > { %v8214_v46 = vsel %vm8189_vm5, %v8181_v7, %v7944_v15 }
 0x568   : > { %8246 = vst [vmem:[%s18097_s30 + $0xc0] sm:$0xff] %v8214_v46  ;;  %v7950_v43 = vpop.permute.xlu0 %7949 }
 0x569   : > { %v8217_v58 = vsel %vm8189_vm5, %v8184_v11, %v7950_v43 }
 0x56a   : > { %8249 = vst [vmem:[%s18097_s30 + $0xd8] sm:$0xff] %v8217_v58  ;;  %v7948_v53 = vpop.permute.xlu1 %7947 }
 0x56b   : > { %v8216_v31 = vsel %vm8189_vm5, %v8183_v8, %v7948_v53 }
 0x56c   : > { %8248 = vst [vmem:[%s18097_s30 + $0xd0] sm:$0xff] %v8216_v31  ;;  %v7954_v60 = vpop.permute.xlu0 %7953 }
 0x56d   : > { %v8219_v56 = vsel %vm8189_vm5, %v8186_v22, %v7954_v60 }
 0x56e   : > { %8251 = vst [vmem:[%s18097_s30 + $0xe8] sm:$0xff] %v8219_v56  ;;  %v7952_v16 = vpop.permute.xlu1 %7951 }
 0x56f   : > { %v8218_v4 = vsel %vm8189_vm5, %v8185_v34, %v7952_v16 }
 0x570   : > { %8250 = vst [vmem:[%s18097_s30 + $0xe0] sm:$0xff] %v8218_v4  ;;  %v7958_v50 = vpop.permute.xlu0 %7957 }
 0x571   : > { %v8221_v32 = vsel %vm8189_vm5, %v8188_v18, %v7958_v50 }
 0x572   : > { %8253 = vst [vmem:[%s18097_s30 + $0xf8] sm:$0xff] %v8221_v32  ;;  %v7956_v57 = vpop.permute.xlu1 %7955 }
 0x573   : > { %v8220_v59 = vsel %vm8189_vm5, %v8187_v55, %v7956_v57 }
 0x574   : > { %8252 = vst [vmem:[%s18097_s30 + $0xf0] sm:$0xff] %v8220_v59 }
 0x575 PF: > { %s13_s12 = sadd.s32 1, %s11094_s12  }
 0x576   : > { %p10_p4 = scmp.ge.s32.totalorder %s13_s12, 4  }
 0x578   :  { %12 = sbr.rel (!%p10_p4) target bundleno = 1 (0x1), region = 62 }

</bundles_post_ra>
